<compile_context>
chip_gen: v7x
topology: tpu7x:2x2x1
jax: 0.10.0
libtpu: 0.0.40
codegen_flags: <defaults>
</compile_context>

<pallas_src>
import jax
import jax.numpy as jnp
from jax.experimental import pallas as pl
from jax.experimental.pallas import tpu as pltpu


# ----------------------------------------------------------------------------
# Fused decoder-step kernel
# ----------------------------------------------------------------------------
def _make_decoder_kernel(n_layers, batch, hid_dim):
    H = hid_dim

    def kernel(*refs):
        # inputs
        ids_ref, emb_ref, h_in_ref, c_in_ref = refs[:4]
        lstm_refs = refs[4:4 + 3 * n_layers]               # (w_ih, w_hh, b) per layer
        fc_w_ref, fc_b_ref = refs[4 + 3 * n_layers:6 + 3 * n_layers]
        # outputs
        pred_ref, h_out_ref, c_out_ref = refs[6 + 3 * n_layers:]

        # ---- embedding lookup: ids are scalars in SMEM, table rows in VMEM ----
        rows = [emb_ref[pl.ds(ids_ref[b], 1), :] for b in range(batch)]
        x = jnp.concatenate(rows, axis=0)                  # (B, E) f32
        # self.dropout(embedded): identity in eval mode.
        layer_in = x

        # ---- unrolled LSTM layers: two [B,D]@[D,4H] / [B,H]@[H,4H] MXU matmuls ----
        for l in range(n_layers):
            w_ih_ref = lstm_refs[3 * l]                    # (D_l, 4H) bf16
            w_hh_ref = lstm_refs[3 * l + 1]                # (H,   4H) bf16
            b_ref = lstm_refs[3 * l + 2]                   # (1,   4H) f32
            h_prev = h_in_ref[l]                           # (B, H)    f32
            c_prev = c_in_ref[l]

            gates = (
                jnp.dot(layer_in.astype(jnp.bfloat16), w_ih_ref[...],
                        preferred_element_type=jnp.float32)
                + jnp.dot(h_prev.astype(jnp.bfloat16), w_hh_ref[...],
                          preferred_element_type=jnp.float32)
                + b_ref[...])

            # PyTorch gate order: i, f, g, o
            i_g = jax.nn.sigmoid(gates[:, 0 * H:1 * H])
            f_g = jax.nn.sigmoid(gates[:, 1 * H:2 * H])
            g_g = jnp.tanh(gates[:, 2 * H:3 * H])
            o_g = jax.nn.sigmoid(gates[:, 3 * H:4 * H])

            c_new = f_g * c_prev + i_g * g_g
            h_new = o_g * jnp.tanh(c_new)

            h_out_ref[l] = h_new
            c_out_ref[l] = c_new
            # inter-layer LSTM dropout: identity in eval mode.
            layer_in = h_new

        # ---- output projection: [B, H] @ [H, V] + b ----
        pred_ref[...] = (
            jnp.dot(layer_in.astype(jnp.bfloat16), fc_w_ref[...],
                    preferred_element_type=jnp.float32) + fc_b_ref[...])

    return kernel


# ----------------------------------------------------------------------------
# Wrapper
# ----------------------------------------------------------------------------
@jax.jit
def decoder_forward(params, input_ids, hidden, cell):
    """Mirrors Decoder.forward (eval mode).

    input_ids: [B] int32
    hidden, cell: [n_layers, B, H] f32
    returns: prediction [B, V] f32, hidden, cell
    """
    n_layers, B, H = hidden.shape
    V = params["fc_w_t"].shape[-1]

    kernel = _make_decoder_kernel(n_layers, B, H)
    vmem = pl.BlockSpec(memory_space=pltpu.MemorySpace.VMEM)
    smem = pl.BlockSpec(memory_space=pltpu.MemorySpace.SMEM)

    lstm_inputs = []
    for l in range(n_layers):
        lstm_inputs += [params["w_ih"][l], params["w_hh"][l], params["b"][l]]

    return pl.pallas_call(
        kernel,
        out_shape=(
            jax.ShapeDtypeStruct((B, V), jnp.float32),
            jax.ShapeDtypeStruct((n_layers, B, H), jnp.float32),
            jax.ShapeDtypeStruct((n_layers, B, H), jnp.float32),
        ),
        in_specs=[smem, vmem, vmem, vmem] + [vmem] * (3 * n_layers + 2),
        out_specs=(vmem, vmem, vmem),
    )(input_ids, params["embedding"], hidden, cell,
      *lstm_inputs, params["fc_w_t"], params["fc_b"])


# ----------------------------------------------------------------------------
# Pure-JAX reference (mirrors the kernel numerics: bf16 weights, f32 accum)
# ----------------------------------------------------------------------------
def decoder_forward_ref(params, input_ids, hidden, cell):
    H = hidden.shape[-1]
    x = params["embedding"][input_ids]                     # (B, E) f32
    layer_in = x
    new_h, new_c = [], []
    for l in range(hidden.shape[0]):
        gates = (
            jnp.dot(layer_in.astype(jnp.bfloat16), params["w_ih"][l],
                    preferred_element_type=jnp.float32)
            + jnp.dot(hidden[l].astype(jnp.bfloat16), params["w_hh"][l],
                      preferred_element_type=jnp.float32)
            + params["b"][l])
        i_g = jax.nn.sigmoid(gates[:, 0 * H:1 * H])
        f_g = jax.nn.sigmoid(gates[:, 1 * H:2 * H])
        g_g = jnp.tanh(gates[:, 2 * H:3 * H])
        o_g = jax.nn.sigmoid(gates[:, 3 * H:4 * H])
        c_new = f_g * cell[l] + i_g * g_g
        h_new = o_g * jnp.tanh(c_new)
        new_h.append(h_new)
        new_c.append(c_new)
        layer_in = h_new
    pred = jnp.dot(layer_in.astype(jnp.bfloat16), params["fc_w_t"],
                   preferred_element_type=jnp.float32) + params["fc_b"]
    return pred, jnp.stack(new_h, 0), jnp.stack(new_c, 0)


# ----------------------------------------------------------------------------
# Deterministic parameter init (shapes follow the nn.Module __init__)
# ----------------------------------------------------------------------------
def init_params(key, output_dim, emb_dim, hid_dim, n_layers):
    keys = jax.random.split(key, 4 + n_layers)
    scale = 0.1
    params = {
        # embedding kept f32 so the in-kernel dynamic row gather uses the 32-bit path
        "embedding": scale * jax.random.normal(keys[0], (output_dim, emb_dim), jnp.float32),
        "fc_w_t": (scale * jax.random.normal(keys[1], (hid_dim, output_dim),
                                             jnp.float32)).astype(jnp.bfloat16),
        "fc_b": scale * jax.random.normal(keys[2], (1, output_dim), jnp.float32),
        "w_ih": [],
        "w_hh": [],
        "b": [],
    }
    for l in range(n_layers):
        in_dim = emb_dim if l == 0 else hid_dim
        k0, k1, k2, k3 = jax.random.split(keys[4 + l], 4)
        # PyTorch: weight_ih_l{k} [4H, in], weight_hh_l{k} [4H, H].
        # Store transposed so gates = x @ W_ih^T + h @ W_hh^T + (b_ih + b_hh).
        w_ih_t = scale * jax.random.normal(k0, (in_dim, 4 * hid_dim), jnp.float32)
        w_hh_t = scale * jax.random.normal(k1, (hid_dim, 4 * hid_dim), jnp.float32)
        params["w_ih"].append(w_ih_t.astype(jnp.bfloat16))
        params["w_hh"].append(w_hh_t.astype(jnp.bfloat16))
        b_ih = scale * jax.random.normal(k2, (4 * hid_dim,), jnp.float32)
        b_hh = scale * jax.random.normal(k3, (4 * hid_dim,), jnp.float32)
        params["b"].append((b_ih + b_hh).reshape(1, 4 * hid_dim))
    return params


if __name__ == "__main__":
    # Small, TPU-friendly sizes consistent with the Decoder module
    # (emb_dim=256, hid_dim=512, n_layers=2; vocab/batch shrunk for the test).
    OUTPUT_DIM = 512   # vocab (multiple of 128 -> lane-dense FC output)
    EMB_DIM = 256
    HID_DIM = 512
    N_LAYERS = 2
    BATCH = 8

    root = jax.random.PRNGKey(0)
    k_p, k_in, k_h, k_c = jax.random.split(root, 4)

    params = init_params(k_p, OUTPUT_DIM, EMB_DIM, HID_DIM, N_LAYERS)
    input_ids = jax.random.randint(k_in, (BATCH,), 1, OUTPUT_DIM, dtype=jnp.int32)
    hidden = jax.random.normal(k_h, (N_LAYERS, BATCH, HID_DIM), jnp.float32)
    cell = jax.random.normal(k_c, (N_LAYERS, BATCH, HID_DIM), jnp.float32)

    pred, h_new, c_new = decoder_forward(params, input_ids, hidden, cell)
    jax.block_until_ready((pred, h_new, c_new))

    pred_r, h_r, c_r = decoder_forward_ref(params, input_ids, hidden, cell)
    assert pred.shape == (BATCH, OUTPUT_DIM)
    assert h_new.shape == (N_LAYERS, BATCH, HID_DIM)
    assert c_new.shape == (N_LAYERS, BATCH, HID_DIM)
    assert jnp.allclose(pred, pred_r, atol=2e-3, rtol=2e-3)
    assert jnp.allclose(h_new, h_r, atol=2e-3, rtol=2e-3)
    assert jnp.allclose(c_new, c_r, atol=2e-3, rtol=2e-3)

    print("KERNEL_OK")
</pallas_src>

<mosaic_0001>
module attributes {stable_mosaic.version = 11 : i64} {
  func.func @kernel(%arg0: memref<8xi32, #tpu.memory_space<smem>>, %arg1: memref<512x256xf32, #tpu.memory_space<vmem>>, %arg2: memref<2x8x512xf32, #tpu.memory_space<vmem>>, %arg3: memref<2x8x512xf32, #tpu.memory_space<vmem>>, %arg4: memref<256x2048xbf16, #tpu.memory_space<vmem>>, %arg5: memref<512x2048xbf16, #tpu.memory_space<vmem>>, %arg6: memref<1x2048xf32, #tpu.memory_space<vmem>>, %arg7: memref<512x2048xbf16, #tpu.memory_space<vmem>>, %arg8: memref<512x2048xbf16, #tpu.memory_space<vmem>>, %arg9: memref<1x2048xf32, #tpu.memory_space<vmem>>, %arg10: memref<512x512xbf16, #tpu.memory_space<vmem>>, %arg11: memref<1x512xf32, #tpu.memory_space<vmem>>, %arg12: memref<8x512xf32, #tpu.memory_space<vmem>>, %arg13: memref<2x8x512xf32, #tpu.memory_space<vmem>>, %arg14: memref<2x8x512xf32, #tpu.memory_space<vmem>>) attributes {dimension_semantics = [], scalar_prefetch = 0 : i64, scratch_operands = 0 : i64, tpu.core_type = #tpu.core_type<tc>} {
    %c0 = arith.constant 0 : index
    %0 = memref.load %arg0[%c0] : memref<8xi32, #tpu.memory_space<smem>>
    %1 = arith.index_cast %0 : i32 to index
    %c0_0 = arith.constant 0 : index
    %2 = vector.load %arg1[%1, %c0_0] : memref<512x256xf32, #tpu.memory_space<vmem>>, vector<1x256xf32>
    %c1 = arith.constant 1 : index
    %3 = memref.load %arg0[%c1] : memref<8xi32, #tpu.memory_space<smem>>
    %4 = arith.index_cast %3 : i32 to index
    %c0_1 = arith.constant 0 : index
    %5 = vector.load %arg1[%4, %c0_1] : memref<512x256xf32, #tpu.memory_space<vmem>>, vector<1x256xf32>
    %c2 = arith.constant 2 : index
    %6 = memref.load %arg0[%c2] : memref<8xi32, #tpu.memory_space<smem>>
    %7 = arith.index_cast %6 : i32 to index
    %c0_2 = arith.constant 0 : index
    %8 = vector.load %arg1[%7, %c0_2] : memref<512x256xf32, #tpu.memory_space<vmem>>, vector<1x256xf32>
    %c3 = arith.constant 3 : index
    %9 = memref.load %arg0[%c3] : memref<8xi32, #tpu.memory_space<smem>>
    %10 = arith.index_cast %9 : i32 to index
    %c0_3 = arith.constant 0 : index
    %11 = vector.load %arg1[%10, %c0_3] : memref<512x256xf32, #tpu.memory_space<vmem>>, vector<1x256xf32>
    %c4 = arith.constant 4 : index
    %12 = memref.load %arg0[%c4] : memref<8xi32, #tpu.memory_space<smem>>
    %13 = arith.index_cast %12 : i32 to index
    %c0_4 = arith.constant 0 : index
    %14 = vector.load %arg1[%13, %c0_4] : memref<512x256xf32, #tpu.memory_space<vmem>>, vector<1x256xf32>
    %c5 = arith.constant 5 : index
    %15 = memref.load %arg0[%c5] : memref<8xi32, #tpu.memory_space<smem>>
    %16 = arith.index_cast %15 : i32 to index
    %c0_5 = arith.constant 0 : index
    %17 = vector.load %arg1[%16, %c0_5] : memref<512x256xf32, #tpu.memory_space<vmem>>, vector<1x256xf32>
    %c6 = arith.constant 6 : index
    %18 = memref.load %arg0[%c6] : memref<8xi32, #tpu.memory_space<smem>>
    %19 = arith.index_cast %18 : i32 to index
    %c0_6 = arith.constant 0 : index
    %20 = vector.load %arg1[%19, %c0_6] : memref<512x256xf32, #tpu.memory_space<vmem>>, vector<1x256xf32>
    %c7 = arith.constant 7 : index
    %21 = memref.load %arg0[%c7] : memref<8xi32, #tpu.memory_space<smem>>
    %22 = arith.index_cast %21 : i32 to index
    %c0_7 = arith.constant 0 : index
    %23 = vector.load %arg1[%22, %c0_7] : memref<512x256xf32, #tpu.memory_space<vmem>>, vector<1x256xf32>
    %24 = tpu.concatenate %2, %5, %8, %11, %14, %17, %20, %23 in 0 : vector<1x256xf32>, vector<1x256xf32>, vector<1x256xf32>, vector<1x256xf32>, vector<1x256xf32>, vector<1x256xf32>, vector<1x256xf32>, vector<1x256xf32> -> vector<8x256xf32>
    %c0_8 = arith.constant 0 : index
    %c0_9 = arith.constant 0 : index
    %c0_10 = arith.constant 0 : index
    %25 = vector.load %arg2[%c0_8, %c0_9, %c0_10] : memref<2x8x512xf32, #tpu.memory_space<vmem>>, vector<1x8x512xf32>
    %26 = vector.shape_cast %25 : vector<1x8x512xf32> to vector<8x512xf32>
    %c0_11 = arith.constant 0 : index
    %c0_12 = arith.constant 0 : index
    %c0_13 = arith.constant 0 : index
    %27 = vector.load %arg3[%c0_11, %c0_12, %c0_13] : memref<2x8x512xf32, #tpu.memory_space<vmem>>, vector<1x8x512xf32>
    %28 = vector.shape_cast %27 : vector<1x8x512xf32> to vector<8x512xf32>
    %29 = arith.truncf %24 : vector<8x256xf32> to vector<8x256xbf16>
    %c0_14 = arith.constant 0 : index
    %c0_15 = arith.constant 0 : index
    %30 = vector.load %arg4[%c0_14, %c0_15] : memref<256x2048xbf16, #tpu.memory_space<vmem>>, vector<256x2048xbf16>
    %cst = arith.constant dense<0.000000e+00> : vector<8x2048xf32>
    %31 = tpu.matmul %29, %30, %cst {dimension_numbers = #tpu.dot_dimension_numbers<[1], [0], [0], [1], [0, 0, 1, 1], [], []>} : vector<8x256xbf16>, vector<256x2048xbf16>, vector<8x2048xf32> -> vector<8x2048xf32>
    %32 = arith.truncf %26 : vector<8x512xf32> to vector<8x512xbf16>
    %c0_16 = arith.constant 0 : index
    %c0_17 = arith.constant 0 : index
    %33 = vector.load %arg5[%c0_16, %c0_17] : memref<512x2048xbf16, #tpu.memory_space<vmem>>, vector<512x2048xbf16>
    %cst_18 = arith.constant dense<0.000000e+00> : vector<8x2048xf32>
    %34 = tpu.matmul %32, %33, %cst_18 {dimension_numbers = #tpu.dot_dimension_numbers<[1], [0], [0], [1], [0, 0, 1, 1], [], []>} : vector<8x512xbf16>, vector<512x2048xbf16>, vector<8x2048xf32> -> vector<8x2048xf32>
    %35 = arith.addf %31, %34 : vector<8x2048xf32>
    %c0_19 = arith.constant 0 : index
    %c0_20 = arith.constant 0 : index
    %36 = vector.load %arg6[%c0_19, %c0_20] : memref<1x2048xf32, #tpu.memory_space<vmem>>, vector<1x2048xf32>
    %37 = vector.broadcast %36 : vector<1x2048xf32> to vector<8x2048xf32>
    %38 = arith.addf %35, %37 : vector<8x2048xf32>
    %39 = vector.extract_strided_slice %38 {offsets = [0, 0], sizes = [8, 512], strides = [1, 1]} : vector<8x2048xf32> to vector<8x512xf32>
    %40 = arith.negf %39 : vector<8x512xf32>
    %41 = math.exp %40 : vector<8x512xf32>
    %cst_21 = arith.constant 1.000000e+00 : f32
    %42 = vector.broadcast %cst_21 : f32 to vector<8x512xf32>
    %43 = arith.addf %42, %41 : vector<8x512xf32>
    %44 = arith.divf %42, %43 : vector<8x512xf32>
    %45 = vector.extract_strided_slice %38 {offsets = [0, 512], sizes = [8, 512], strides = [1, 1]} : vector<8x2048xf32> to vector<8x512xf32>
    %46 = arith.negf %45 : vector<8x512xf32>
    %47 = math.exp %46 : vector<8x512xf32>
    %cst_22 = arith.constant 1.000000e+00 : f32
    %48 = vector.broadcast %cst_22 : f32 to vector<8x512xf32>
    %49 = arith.addf %48, %47 : vector<8x512xf32>
    %50 = arith.divf %48, %49 : vector<8x512xf32>
    %51 = vector.extract_strided_slice %38 {offsets = [0, 1024], sizes = [8, 512], strides = [1, 1]} : vector<8x2048xf32> to vector<8x512xf32>
    %52 = math.tanh %51 : vector<8x512xf32>
    %53 = vector.extract_strided_slice %38 {offsets = [0, 1536], sizes = [8, 512], strides = [1, 1]} : vector<8x2048xf32> to vector<8x512xf32>
    %54 = arith.negf %53 : vector<8x512xf32>
    %55 = math.exp %54 : vector<8x512xf32>
    %cst_23 = arith.constant 1.000000e+00 : f32
    %56 = vector.broadcast %cst_23 : f32 to vector<8x512xf32>
    %57 = arith.addf %56, %55 : vector<8x512xf32>
    %58 = arith.divf %56, %57 : vector<8x512xf32>
    %59 = arith.mulf %50, %28 : vector<8x512xf32>
    %60 = arith.mulf %44, %52 : vector<8x512xf32>
    %61 = arith.addf %59, %60 : vector<8x512xf32>
    %62 = math.tanh %61 : vector<8x512xf32>
    %63 = arith.mulf %58, %62 : vector<8x512xf32>
    %c0_24 = arith.constant 0 : index
    %c0_25 = arith.constant 0 : index
    %c0_26 = arith.constant 0 : index
    %64 = vector.load %arg13[%c0_24, %c0_25, %c0_26] : memref<2x8x512xf32, #tpu.memory_space<vmem>>, vector<1x8x512xf32>
    %65 = vector.shape_cast %64 : vector<1x8x512xf32> to vector<8x512xf32>
    %66 = vector.shape_cast %63 : vector<8x512xf32> to vector<1x8x512xf32>
    tpu.vector_store %arg13[%c0_24, %c0_25, %c0_26], %66 {strides = array<i32>} : memref<2x8x512xf32, #tpu.memory_space<vmem>>, vector<1x8x512xf32>,
    %c0_27 = arith.constant 0 : index
    %c0_28 = arith.constant 0 : index
    %c0_29 = arith.constant 0 : index
    %67 = vector.load %arg14[%c0_27, %c0_28, %c0_29] : memref<2x8x512xf32, #tpu.memory_space<vmem>>, vector<1x8x512xf32>
    %68 = vector.shape_cast %67 : vector<1x8x512xf32> to vector<8x512xf32>
    %69 = vector.shape_cast %61 : vector<8x512xf32> to vector<1x8x512xf32>
    tpu.vector_store %arg14[%c0_27, %c0_28, %c0_29], %69 {strides = array<i32>} : memref<2x8x512xf32, #tpu.memory_space<vmem>>, vector<1x8x512xf32>,
    %c1_30 = arith.constant 1 : index
    %c0_31 = arith.constant 0 : index
    %c0_32 = arith.constant 0 : index
    %70 = vector.load %arg2[%c1_30, %c0_31, %c0_32] : memref<2x8x512xf32, #tpu.memory_space<vmem>>, vector<1x8x512xf32>
    %71 = vector.shape_cast %70 : vector<1x8x512xf32> to vector<8x512xf32>
    %c1_33 = arith.constant 1 : index
    %c0_34 = arith.constant 0 : index
    %c0_35 = arith.constant 0 : index
    %72 = vector.load %arg3[%c1_33, %c0_34, %c0_35] : memref<2x8x512xf32, #tpu.memory_space<vmem>>, vector<1x8x512xf32>
    %73 = vector.shape_cast %72 : vector<1x8x512xf32> to vector<8x512xf32>
    %74 = arith.truncf %63 : vector<8x512xf32> to vector<8x512xbf16>
    %c0_36 = arith.constant 0 : index
    %c0_37 = arith.constant 0 : index
    %75 = vector.load %arg7[%c0_36, %c0_37] : memref<512x2048xbf16, #tpu.memory_space<vmem>>, vector<512x2048xbf16>
    %cst_38 = arith.constant dense<0.000000e+00> : vector<8x2048xf32>
    %76 = tpu.matmul %74, %75, %cst_38 {dimension_numbers = #tpu.dot_dimension_numbers<[1], [0], [0], [1], [0, 0, 1, 1], [], []>} : vector<8x512xbf16>, vector<512x2048xbf16>, vector<8x2048xf32> -> vector<8x2048xf32>
    %77 = arith.truncf %71 : vector<8x512xf32> to vector<8x512xbf16>
    %c0_39 = arith.constant 0 : index
    %c0_40 = arith.constant 0 : index
    %78 = vector.load %arg8[%c0_39, %c0_40] : memref<512x2048xbf16, #tpu.memory_space<vmem>>, vector<512x2048xbf16>
    %cst_41 = arith.constant dense<0.000000e+00> : vector<8x2048xf32>
    %79 = tpu.matmul %77, %78, %cst_41 {dimension_numbers = #tpu.dot_dimension_numbers<[1], [0], [0], [1], [0, 0, 1, 1], [], []>} : vector<8x512xbf16>, vector<512x2048xbf16>, vector<8x2048xf32> -> vector<8x2048xf32>
    %80 = arith.addf %76, %79 : vector<8x2048xf32>
    %c0_42 = arith.constant 0 : index
    %c0_43 = arith.constant 0 : index
    %81 = vector.load %arg9[%c0_42, %c0_43] : memref<1x2048xf32, #tpu.memory_space<vmem>>, vector<1x2048xf32>
    %82 = vector.broadcast %81 : vector<1x2048xf32> to vector<8x2048xf32>
    %83 = arith.addf %80, %82 : vector<8x2048xf32>
    %84 = vector.extract_strided_slice %83 {offsets = [0, 0], sizes = [8, 512], strides = [1, 1]} : vector<8x2048xf32> to vector<8x512xf32>
    %85 = arith.negf %84 : vector<8x512xf32>
    %86 = math.exp %85 : vector<8x512xf32>
    %cst_44 = arith.constant 1.000000e+00 : f32
    %87 = vector.broadcast %cst_44 : f32 to vector<8x512xf32>
    %88 = arith.addf %87, %86 : vector<8x512xf32>
    %89 = arith.divf %87, %88 : vector<8x512xf32>
    %90 = vector.extract_strided_slice %83 {offsets = [0, 512], sizes = [8, 512], strides = [1, 1]} : vector<8x2048xf32> to vector<8x512xf32>
    %91 = arith.negf %90 : vector<8x512xf32>
    %92 = math.exp %91 : vector<8x512xf32>
    %cst_45 = arith.constant 1.000000e+00 : f32
    %93 = vector.broadcast %cst_45 : f32 to vector<8x512xf32>
    %94 = arith.addf %93, %92 : vector<8x512xf32>
    %95 = arith.divf %93, %94 : vector<8x512xf32>
    %96 = vector.extract_strided_slice %83 {offsets = [0, 1024], sizes = [8, 512], strides = [1, 1]} : vector<8x2048xf32> to vector<8x512xf32>
    %97 = math.tanh %96 : vector<8x512xf32>
    %98 = vector.extract_strided_slice %83 {offsets = [0, 1536], sizes = [8, 512], strides = [1, 1]} : vector<8x2048xf32> to vector<8x512xf32>
    %99 = arith.negf %98 : vector<8x512xf32>
    %100 = math.exp %99 : vector<8x512xf32>
    %cst_46 = arith.constant 1.000000e+00 : f32
    %101 = vector.broadcast %cst_46 : f32 to vector<8x512xf32>
    %102 = arith.addf %101, %100 : vector<8x512xf32>
    %103 = arith.divf %101, %102 : vector<8x512xf32>
    %104 = arith.mulf %95, %73 : vector<8x512xf32>
    %105 = arith.mulf %89, %97 : vector<8x512xf32>
    %106 = arith.addf %104, %105 : vector<8x512xf32>
    %107 = math.tanh %106 : vector<8x512xf32>
    %108 = arith.mulf %103, %107 : vector<8x512xf32>
    %c1_47 = arith.constant 1 : index
    %c0_48 = arith.constant 0 : index
    %c0_49 = arith.constant 0 : index
    %109 = vector.load %arg13[%c1_47, %c0_48, %c0_49] : memref<2x8x512xf32, #tpu.memory_space<vmem>>, vector<1x8x512xf32>
    %110 = vector.shape_cast %109 : vector<1x8x512xf32> to vector<8x512xf32>
    %111 = vector.shape_cast %108 : vector<8x512xf32> to vector<1x8x512xf32>
    tpu.vector_store %arg13[%c1_47, %c0_48, %c0_49], %111 {strides = array<i32>} : memref<2x8x512xf32, #tpu.memory_space<vmem>>, vector<1x8x512xf32>,
    %c1_50 = arith.constant 1 : index
    %c0_51 = arith.constant 0 : index
    %c0_52 = arith.constant 0 : index
    %112 = vector.load %arg14[%c1_50, %c0_51, %c0_52] : memref<2x8x512xf32, #tpu.memory_space<vmem>>, vector<1x8x512xf32>
    %113 = vector.shape_cast %112 : vector<1x8x512xf32> to vector<8x512xf32>
    %114 = vector.shape_cast %106 : vector<8x512xf32> to vector<1x8x512xf32>
    tpu.vector_store %arg14[%c1_50, %c0_51, %c0_52], %114 {strides = array<i32>} : memref<2x8x512xf32, #tpu.memory_space<vmem>>, vector<1x8x512xf32>,
    %115 = arith.truncf %108 : vector<8x512xf32> to vector<8x512xbf16>
    %c0_53 = arith.constant 0 : index
    %c0_54 = arith.constant 0 : index
    %116 = vector.load %arg10[%c0_53, %c0_54] : memref<512x512xbf16, #tpu.memory_space<vmem>>, vector<512x512xbf16>
    %cst_55 = arith.constant dense<0.000000e+00> : vector<8x512xf32>
    %117 = tpu.matmul %115, %116, %cst_55 {dimension_numbers = #tpu.dot_dimension_numbers<[1], [0], [0], [1], [0, 0, 1, 1], [], []>} : vector<8x512xbf16>, vector<512x512xbf16>, vector<8x512xf32> -> vector<8x512xf32>
    %c0_56 = arith.constant 0 : index
    %c0_57 = arith.constant 0 : index
    %118 = vector.load %arg11[%c0_56, %c0_57] : memref<1x512xf32, #tpu.memory_space<vmem>>, vector<1x512xf32>
    %119 = vector.broadcast %118 : vector<1x512xf32> to vector<8x512xf32>
    %120 = arith.addf %117, %119 : vector<8x512xf32>
    %c0_58 = arith.constant 0 : index
    %c0_59 = arith.constant 0 : index
    %121 = vector.load %arg12[%c0_58, %c0_59] : memref<8x512xf32, #tpu.memory_space<vmem>>, vector<8x512xf32>
    tpu.vector_store %arg12[%c0_58, %c0_59], %120 {strides = array<i32>} : memref<8x512xf32, #tpu.memory_space<vmem>>, vector<8x512xf32>,
    return
  }
}

</mosaic_0001>

<bundles_post_ra>
// kernel: decoder_forward.1
= control target key start
LH: loop header
LB: loop body
LE: loop exit
PB: predicated region body
PF: predicated region fallthrough
CT: control target
= control target key end

     0   :  { %20 = vsyncpa [#allocation5], 0  ;;  %s18433_s0 = inlined_call_operand.hbm [shape: s32[8], index: 0, kind: input, shape index: {}]   ;;  %s18434_s1 = inlined_call_operand.hbm [shape: f32[512,256], index: 1, kind: input, shape index: {}]   ;;  %s18435_s2 = inlined_call_operand.hbm [shape: f32[2,8,512], index: 2, kind: input, shape index: {}]   ;;  %s18436_s3 = inlined_call_operand.hbm [shape: f32[2,8,512], index: 3, kind: input, shape index: {}]   ;;  %s18437_s4 = inlined_call_operand.hbm [shape: bf16[256,2048], index: 4, kind: input, shape index: {}]   ;;  %s18438_s5 = inlined_call_operand.hbm [shape: bf16[512,2048], index: 5, kind: input, shape index: {}]   ;;  %s18439_s6 = inlined_call_operand.hbm [shape: f32[1,2048], index: 6, kind: input, shape index: {}]   ;;  %s18440_s7 = inlined_call_operand.hbm [shape: bf16[512,2048], index: 7, kind: input, shape index: {}]   ;;  %s18441_s8 = inlined_call_operand.hbm [shape: bf16[512,2048], index: 8, kind: input, shape index: {}]   ;;  %s18442_s9 = inlined_call_operand.hbm [shape: f32[1,2048], index: 9, kind: input, shape index: {}]   ;;  %s18443_s10 = inlined_call_operand.hbm [shape: bf16[512,512], index: 10, kind: input, shape index: {}]   ;;  %s18444_s11 = inlined_call_operand.hbm [shape: f32[1,512], index: 11, kind: input, shape index: {}]   ;;  %s18445_s12 = inlined_call_operand.hbm [shape: f32[8,512], index: 12, kind: output, shape index: {0}]   ;;  %s18446_s13 = inlined_call_operand.hbm [shape: f32[2,8,512], index: 13, kind: output, shape index: {1}]   ;;  %s18447_s14 = inlined_call_operand.hbm [shape: f32[2,8,512], index: 14, kind: output, shape index: {2}]  }
   0x1   :  { %21 = vsyncpa [#allocation3], 0 }
   0x2   :  { %22 = vsyncpa [#allocation8], 0 }
   0x3   :  { %23 = vsyncpa [#allocation11], 0 }
   0x4   :  { %24 = vsyncpa [#allocation14], 0 }
   0x5   :  { %25 = vsyncpa [#allocation17], 0 }
   0x6   :  { %26 = vsyncpa [#allocation20], 0 }
   0x7   :  { %27 = vsyncpa [#allocation4], 0 }
   0x8   :  { %28 = vsyncpa [#allocation24], 0  ;;  %s17585_s29 = smov [#allocation7]   ;;  %s17249_s17 = scalar_lea.hbm %s18435_s2, 1024 }
   0x9   :  { %s54_s30 = sshll.u32 %s17585_s29, 4  ;;  %p17250_p0 = scmp.ne.s32.totalorder %s18435_s2, %s17249_s17  ;;  %s55_s30 = int_to_ptr.vmem [resolvable:$true] %s54_s30 }
   0xa   :  { %p17253_p1 = scmp.lt.u32.totalorder %s17249_s17, %s18435_s2 }
   0xc   :  { %p17255_p2 = pnand %p17253_p1, %p17250_p0 }
   0xe   :  { %17258 = shalt.err (!%p17255_p2)
}
   0xf   :  { %s17259_s22 = scalar_lea.vmem %s55_s30, 1024  ;;  %p17264_p4 = scmp.lt.s32.totalorder %s55_s30, %s55_s30 }
  0x10   :  { %p17260_p3 = scmp.ne.s32.totalorder %s55_s30, %s17259_s22  ;;  %p17265_p5 = scmp.lt.s32.totalorder %s17259_s22, %s17259_s22 }
  0x12   :  { %p17266_p6 = por %p17265_p5, %p17264_p4 }
  0x14   :  { %p17267_p7 = pnand %p17266_p6, %p17260_p3 }
  0x16   :  { %17270 = shalt.err (!%p17267_p7)
}
  0x17   :  { %s18448_s23 = smov 512   ;;  %s17587_s24 = smov 32  }
  0x18   :  { %60 = dma.hbm_to_vmem [thread:$0]  %s18435_s2, 1024, %s55_s30, [#allocation8], %s18448_s23, %s18448_s23, %s17587_s24  }
  0x19   :  { %s17588_s27 = smov [#allocation10]   ;;  %s17271_s16 = scalar_lea.hbm %s18437_s4, 32768 }
  0x1a   :  { %s78_s28 = sshll.u32 %s17588_s27, 4  ;;  %p17272_p8 = scmp.ne.s32.totalorder %s18437_s4, %s17271_s16  ;;  %s79_s28 = int_to_ptr.vmem [resolvable:$true] %s78_s28 }
  0x1b   :  { %p17275_p9 = scmp.lt.u32.totalorder %s17271_s16, %s18437_s4 }
  0x1d   :  { %p17277_p10 = pnand %p17275_p9, %p17272_p8 }
  0x1f   :  { %17280 = shalt.err (!%p17277_p10)
}
  0x20   :  { %s17281_s21 = scalar_lea.vmem %s79_s28, 32768  ;;  %p17286_p12 = scmp.lt.s32.totalorder %s79_s28, %s79_s28 }
  0x21   :  { %p17282_p11 = scmp.ne.s32.totalorder %s79_s28, %s17281_s21  ;;  %p17287_p13 = scmp.lt.s32.totalorder %s17281_s21, %s17281_s21 }
  0x23   :  { %p17288_p0 = por %p17287_p13, %p17286_p12 }
  0x25   :  { %p17289_p1 = pnand %p17288_p0, %p17282_p11 }
  0x27   :  { %17292 = shalt.err (!%p17289_p1)
}
  0x28   :  { %s17589_s2 = smov 1024   ;;  %s17590_s30 = smov 64  }
  0x29   :  { %84 = dma.hbm_to_vmem [thread:$0]  %s18437_s4, 32768, %s79_s28, [#allocation11], %s17589_s2, %s17589_s2, %s17590_s30  }
  0x2a   :  { %s17591_s26 = smov [#allocation13]   ;;  %s17592_s29 = smov [#allocation16]  }
  0x2b   :  { %s103_s27 = sshll.u32 %s17591_s26, 4  ;;  %s124_s15 = sshll.u32 %s17592_s29, 4  ;;  %s104_s27 = int_to_ptr.vmem [resolvable:$true] %s103_s27  ;;  %s17711_s15 = int_to_ptr.vmem [resolvable:$true] %s124_s15 }
  0x2c   :  { %s17293_s18 = scalar_lea.hbm %s18439_s6, 256 }
  0x2d   :  { %p17294_p2 = scmp.ne.s32.totalorder %s18439_s6, %s17293_s18  ;;  %p17297_p3 = scmp.lt.u32.totalorder %s17293_s18, %s18439_s6 }
  0x2f   :  { %p17299_p4 = pnand %p17297_p3, %p17294_p2 }
  0x31   :  { %17302 = shalt.err (!%p17299_p4)
}
  0x32   :  { %s17303_s4 = scalar_lea.vmem %s104_s27, 256  ;;  %p17308_p6 = scmp.lt.s32.totalorder %s104_s27, %s104_s27 }
  0x33   :  { %p17304_p5 = scmp.ne.s32.totalorder %s104_s27, %s17303_s4  ;;  %p17309_p7 = scmp.lt.s32.totalorder %s17303_s4, %s17303_s4 }
  0x35   :  { %p17310_p8 = por %p17309_p7, %p17308_p6 }
  0x37   :  { %p17311_p9 = pnand %p17310_p8, %p17304_p5 }
  0x39   :  { %17314 = shalt.err (!%p17311_p9)
}
  0x3a   :  { %106 = dma.hbm_to_vmem [thread:$0]  %s18439_s6, 256, %s104_s27, [#allocation14]  }
  0x3b   :  { %s17315_s29 = scalar_lea.hbm %s18441_s8, 65536 }
  0x3c   :  { %p17316_p10 = scmp.ne.s32.totalorder %s18441_s8, %s17315_s29  ;;  %p17319_p11 = scmp.lt.u32.totalorder %s17315_s29, %s18441_s8 }
  0x3e   :  { %p17321_p12 = pnand %p17319_p11, %p17316_p10 }
  0x40   :  { %17324 = shalt.err (!%p17321_p12)
}
  0x41   :  { %s17325_s19 = scalar_lea.vmem %s17711_s15, 65536  ;;  %p17330_p0 = scmp.lt.s32.totalorder %s17711_s15, %s17711_s15 }
  0x42   :  { %p17326_p13 = scmp.ne.s32.totalorder %s17711_s15, %s17325_s19  ;;  %p17331_p1 = scmp.lt.s32.totalorder %s17325_s19, %s17325_s19 }
  0x44   :  { %p17332_p2 = por %p17331_p1, %p17330_p0 }
  0x46   :  { %p17333_p3 = pnand %p17332_p2, %p17326_p13 }
  0x48   :  { %17336 = shalt.err (!%p17333_p3)
}
  0x49   :  { %130 = dma.hbm_to_vmem [thread:$0]  %s18441_s8, 65536, %s17711_s15, [#allocation17], %s17589_s2, %s17589_s2, %s17590_s30  }
  0x4a   :  { %s17593_s20 = smov [#allocation19]   ;;  %s17594_s4 = smov [#allocation6]  }
  0x4b   :  { %s146_s21 = sshll.u32 %s17593_s20, 4  ;;  %s42_s28 = sshll.u32 %s17594_s4, 4  ;;  %s147_s21 = int_to_ptr.vmem [resolvable:$true] %s146_s21  ;;  %s43_s28 = int_to_ptr.vmem [resolvable:$true] %s42_s28 }
  0x4c   :  { %s17337_s26 = scalar_lea.hbm %s18443_s10, 16384 }
  0x4d   :  { %p17338_p4 = scmp.ne.s32.totalorder %s18443_s10, %s17337_s26  ;;  %p17341_p5 = scmp.lt.u32.totalorder %s17337_s26, %s18443_s10 }
  0x4f   :  { %p17343_p6 = pnand %p17341_p5, %p17338_p4 }
  0x51   :  { %17346 = shalt.err (!%p17343_p6)
}
  0x52   :  { %s17347_s8 = scalar_lea.vmem %s147_s21, 16384  ;;  %p17352_p8 = scmp.lt.s32.totalorder %s147_s21, %s147_s21 }
  0x53   :  { %p17348_p7 = scmp.ne.s32.totalorder %s147_s21, %s17347_s8  ;;  %p17353_p9 = scmp.lt.s32.totalorder %s17347_s8, %s17347_s8 }
  0x55   :  { %p17354_p10 = por %p17353_p9, %p17352_p8 }
  0x57   :  { %p17355_p11 = pnand %p17354_p10, %p17348_p7 }
  0x59   :  { %17358 = shalt.err (!%p17355_p11)
}
  0x5a   :  { %s17595_s15 = smov 256   ;;  %s17596_s18 = smov 16  }
  0x5b   :  { %152 = dma.hbm_to_vmem [thread:$0]  %s18443_s10, 16384, %s147_s21, [#allocation20], %s17595_s15, %s17595_s15, %s17596_s18  }
  0x5c   :  { %s17359_s4 = scalar_lea.hbm %s18433_s0, 16 }
  0x5d   :  { %p17360_p12 = scmp.ne.s32.totalorder %s18433_s0, %s17359_s4  ;;  %p17363_p13 = scmp.lt.u32.totalorder %s17359_s4, %s18433_s0 }
  0x5f   :  { %p17365_p0 = pnand %p17363_p13, %p17360_p12 }
  0x61   :  { %17368 = shalt.err (!%p17365_p0)
}
  0x62   :  { %s17597_s16 = smov [#allocation2]   ;;  %s17369_s8 = scalar_lea.hbm %s18434_s1, 16384 }
  0x63   :  { %36 = dma.hbm_to_smem %s18433_s0, 16, %s17597_s16, [#allocation5]  }
  0x64   :  { %p17370_p1 = scmp.ne.s32.totalorder %s18434_s1, %s17369_s8  ;;  %p17373_p2 = scmp.lt.u32.totalorder %s17369_s8, %s18434_s1 }
  0x66   :  { %p17375_p3 = pnand %p17373_p2, %p17370_p1 }
  0x68   :  { %17378 = shalt.err (!%p17375_p3)
}
  0x69   :  { %s17379_s4 = scalar_lea.vmem %s43_s28, 16384  ;;  %p17384_p5 = scmp.lt.s32.totalorder %s43_s28, %s43_s28 }
  0x6a   :  { %p17380_p4 = scmp.ne.s32.totalorder %s43_s28, %s17379_s4  ;;  %p17385_p6 = scmp.lt.s32.totalorder %s17379_s4, %s17379_s4 }
  0x6c   :  { %p17386_p7 = por %p17385_p6, %p17384_p5 }
  0x6e   :  { %p17387_p8 = pnand %p17386_p7, %p17380_p4 }
  0x70   :  { %17390 = shalt.err (!%p17387_p8)
}
  0x71   :  { %48 = dma.hbm_to_vmem [thread:$0]  %s18434_s1, 16384, %s43_s28, [#allocation3], %s17595_s15, %s17595_s15, %s17596_s18  }
  0x72   :  { %s17598_s25 = smov [#allocation9]   ;;  %s17599_s29 = smov [#allocation12]  }
  0x73   :  { %s66_s26 = sshll.u32 %s17598_s25, 4  ;;  %s90_s16 = sshll.u32 %s17599_s29, 4  ;;  %s67_s26 = int_to_ptr.vmem [resolvable:$true] %s66_s26  ;;  %s91_s16 = int_to_ptr.vmem [resolvable:$true] %s90_s16 }
  0x74   :  { %s17391_s10 = scalar_lea.hbm %s18436_s3, 1024 }
  0x75   :  { %p17392_p9 = scmp.ne.s32.totalorder %s18436_s3, %s17391_s10  ;;  %p17395_p10 = scmp.lt.u32.totalorder %s17391_s10, %s18436_s3 }
  0x77   :  { %p17397_p11 = pnand %p17395_p10, %p17392_p9 }
  0x79   :  { %17400 = shalt.err (!%p17397_p11)
}
  0x7a   :  { %s17401_s1 = scalar_lea.vmem %s67_s26, 1024  ;;  %p17406_p13 = scmp.lt.s32.totalorder %s67_s26, %s67_s26 }
  0x7b   :  { %p17402_p12 = scmp.ne.s32.totalorder %s67_s26, %s17401_s1  ;;  %p17407_p0 = scmp.lt.s32.totalorder %s17401_s1, %s17401_s1 }
  0x7d   :  { %p17408_p1 = por %p17407_p0, %p17406_p13 }
  0x7f   :  { %p17409_p2 = pnand %p17408_p1, %p17402_p12 }
  0x81   :  { %17412 = shalt.err (!%p17409_p2)
}
  0x82   :  { %s18450_s28 = smov 512   ;;  %s17413_s4 = scalar_lea.hbm %s18438_s5, 65536 }
  0x83   :  { %72 = dma.hbm_to_vmem [thread:$0]  %s18436_s3, 1024, %s67_s26, [#allocation8], %s18450_s28, %s18450_s28, %s17587_s24  }
  0x84   :  { %p17414_p3 = scmp.ne.s32.totalorder %s18438_s5, %s17413_s4  ;;  %p17417_p4 = scmp.lt.u32.totalorder %s17413_s4, %s18438_s5 }
  0x86   :  { %p17419_p5 = pnand %p17417_p4, %p17414_p3 }
  0x88   :  { %17422 = shalt.err (!%p17419_p5)
}
  0x89   :  { %s17423_s23 = scalar_lea.vmem %s91_s16, 65536  ;;  %p17428_p7 = scmp.lt.s32.totalorder %s91_s16, %s91_s16 }
  0x8a   :  { %p17424_p6 = scmp.ne.s32.totalorder %s91_s16, %s17423_s23  ;;  %p17429_p8 = scmp.lt.s32.totalorder %s17423_s23, %s17423_s23 }
  0x8c   :  { %p17430_p9 = por %p17429_p8, %p17428_p7 }
  0x8e   :  { %p17431_p10 = pnand %p17430_p9, %p17424_p6 }
  0x90   :  { %17434 = shalt.err (!%p17431_p10)
}
  0x91   :  { %96 = dma.hbm_to_vmem [thread:$0]  %s18438_s5, 65536, %s91_s16, [#allocation11], %s17589_s2, %s17589_s2, %s17590_s30  }
  0x92   :  { %s17600_s17 = smov [#allocation15]   ;;  %s17601_s21 = smov [#allocation18]  }
  0x93   :  { %s112_s10 = sshll.u32 %s17600_s17, 4  ;;  %s137_s8 = sshll.u32 %s17601_s21, 4  ;;  %s113_s10 = int_to_ptr.vmem [resolvable:$true] %s112_s10  ;;  %s138_s8 = int_to_ptr.vmem [resolvable:$true] %s137_s8 }
  0x94   :  { %s17435_s1 = scalar_lea.hbm %s18440_s7, 65536 }
  0x95   :  { %p17436_p11 = scmp.ne.s32.totalorder %s18440_s7, %s17435_s1  ;;  %p17439_p12 = scmp.lt.u32.totalorder %s17435_s1, %s18440_s7 }
  0x97   :  { %p17441_p13 = pnand %p17439_p12, %p17436_p11 }
  0x99   :  { %17444 = shalt.err (!%p17441_p13)
}
  0x9a   :  { %s17445_s5 = scalar_lea.vmem %s113_s10, 65536  ;;  %p17450_p1 = scmp.lt.s32.totalorder %s113_s10, %s113_s10 }
  0x9b   :  { %p17446_p0 = scmp.ne.s32.totalorder %s113_s10, %s17445_s5  ;;  %p17451_p2 = scmp.lt.s32.totalorder %s17445_s5, %s17445_s5 }
  0x9d   :  { %p17452_p3 = por %p17451_p2, %p17450_p1 }
  0x9f   :  { %p17453_p4 = pnand %p17452_p3, %p17446_p0 }
  0xa1   :  { %17456 = shalt.err (!%p17453_p4)
}
  0xa2   :  { %118 = dma.hbm_to_vmem [thread:$0]  %s18440_s7, 65536, %s113_s10, [#allocation14], %s17589_s2, %s17589_s2, %s17590_s30  }
  0xa3   :  { %s17457_s25 = scalar_lea.hbm %s18442_s9, 256 }
  0xa4   :  { %p17458_p5 = scmp.ne.s32.totalorder %s18442_s9, %s17457_s25  ;;  %p17461_p6 = scmp.lt.u32.totalorder %s17457_s25, %s18442_s9 }
  0xa6   :  { %p17463_p7 = pnand %p17461_p6, %p17458_p5 }
  0xa8   :  { %17466 = shalt.err (!%p17463_p7)
}
  0xa9   :  { %s17467_s17 = scalar_lea.vmem %s138_s8, 256  ;;  %p17472_p9 = scmp.lt.s32.totalorder %s138_s8, %s138_s8 }
  0xaa   :  { %p17468_p8 = scmp.ne.s32.totalorder %s138_s8, %s17467_s17  ;;  %p17473_p10 = scmp.lt.s32.totalorder %s17467_s17, %s17467_s17 }
  0xac   :  { %p17474_p11 = por %p17473_p10, %p17472_p9 }
  0xae   :  { %p17475_p12 = pnand %p17474_p11, %p17468_p8 }
  0xb0   :  { %17478 = shalt.err (!%p17475_p12)
}
  0xb1   :  { %140 = dma.hbm_to_vmem [thread:$0]  %s18442_s9, 256, %s138_s8, [#allocation17]  }
  0xb2   :  { %s17602_s30 = smov [#allocation21]   ;;  %s17479_s6 = scalar_lea.hbm %s18444_s11, 64 }
  0xb3   :  { %s159_s10 = sshll.u32 %s17602_s30, 4  ;;  %p17480_p13 = scmp.ne.s32.totalorder %s18444_s11, %s17479_s6  ;;  %s160_s10 = int_to_ptr.vmem [resolvable:$true] %s159_s10 }
  0xb4   :  { %p17483_p0 = scmp.lt.u32.totalorder %s17479_s6, %s18444_s11 }
  0xb6   :  { %p17485_p1 = pnand %p17483_p0, %p17480_p13 }
  0xb8   :  { %17488 = shalt.err (!%p17485_p1)
}
  0xb9   :  { %s17489_s20 = scalar_lea.vmem %s160_s10, 64  ;;  %p17494_p3 = scmp.lt.s32.totalorder %s160_s10, %s160_s10 }
  0xba   :  { %p17490_p2 = scmp.ne.s32.totalorder %s160_s10, %s17489_s20  ;;  %p17495_p4 = scmp.lt.s32.totalorder %s17489_s20, %s17489_s20 }
  0xbc   :  { %p17496_p5 = por %p17495_p4, %p17494_p3 }
  0xbe   :  { %p17497_p6 = pnand %p17496_p5, %p17490_p2 }
  0xc0   :  { %17500 = shalt.err (!%p17497_p6)
}
  0xc1   :  { %162 = dma.hbm_to_vmem [thread:$0]  %s18444_s11, 64, %s160_s10, [#allocation20]  }
  0xc2   :  { %17567 = dma.done.wait [#allocation5], 16  }
  0xc3   :  { %17568 = vsyncadd [#allocation5], 4294967280 }
  0xc4   :  { %17569 = dma.done.wait [#allocation3], 16384  }
  0xc5   :  { %17570 = vsyncadd [#allocation3], 4294950912 }
  0xc6   :  { %17571 = dma.done.wait [#allocation8], 2048  }
  0xc7   :  { %17572 = vsyncadd [#allocation8], 4294965248 }
  0xc8   :  { %17573 = dma.done.wait [#allocation11], 98304  }
  0xc9   :  { %17574 = vsyncadd [#allocation11], 4294868992 }
  0xca   :  { %17575 = dma.done.wait [#allocation14], 65792  }
  0xcb   :  { %17576 = vsyncadd [#allocation14], 4294901504 }
  0xcc   :  { %17577 = dma.done.wait [#allocation17], 65792  }
  0xcd   :  { %17578 = vsyncadd [#allocation17], 4294901504 }
  0xce   :  { %17579 = dma.done.wait [#allocation20], 16448  }
  0xcf   :  { %17580 = vsyncadd [#allocation20], 4294950848 }
  0xd0   :  { %199 = sfence }
  0xd1   :  { %v659_v0 = vld [vmem:[#allocation12] sm:$0xff]  ;;  %v390_v53 = vld [vmem:[#allocation7 + $0x8] sm:$0xff]  ;;  %v392_v54 = vld [vmem:[#allocation7 + $0x18] sm:$0xff]  ;;  %s17900_s11 = sld [smem:[#allocation2]]  ;;  %s17902_s5 = sld [smem:[#allocation2 + $0x1]]  ;;  %vm368_vm0 = vcmask 1040384  }
  0xd2   :  { %v667_v1 = vld [vmem:[#allocation12 + $0x40] sm:$0xff]  ;;  %v17850_v58 = vpack.c.bf16 %v390_v53, %v390_v53  ;;  %v17852_v59 = vpack.c.bf16 %v392_v54, %v392_v54  ;;  %s17904_s16 = sld [smem:[#allocation2 + $0x2]]  ;;  %s17907_s0 = sld [smem:[#allocation2 + $0x3]]  ;;  %vm371_vm1 = vcmask 1041408   ;;  %vm374_vm2 = vcmask 1042432  }
  0xd3   :  { %v915_v2 = vld [vmem:[#allocation12 + $0x800] sm:$0xff]  ;;  %v14941_v3 = vcombine.high %v659_v0, %v667_v1  ;;  %v14940_v5 = vcombine.low %v659_v0, %v667_v1  ;;  %s17916_s3 = sld [smem:[#allocation2 + $0x4]]  ;;  %s17920_s17 = sld [smem:[#allocation2 + $0x5]]  ;;  %vm377_vm3 = vcmask 1043456   ;;  %vm380_vm4 = vcmask 1044480  }
  0xd4   :  { %v923_v4 = vld [vmem:[#allocation12 + $0x840] sm:$0xff]  ;;  %3763 = vmatprep.mubr.bf16.mxu0 %v17850_v58  ;;  %3804 = vmatprep.mubr.bf16.mxu1 %v17852_v59  ;;  %s17927_s6 = sld [smem:[#allocation2 + $0x6]]  ;;  %s17936_s9 = sld [smem:[#allocation2 + $0x7]]  ;;  %vm383_vm5 = vcmask 1045504   ;;  %vm386_vm6 = vcmask 1046528  }
  0xd5   :  { %v675_v6 = vld [vmem:[#allocation12 + $0x80] sm:$0xff]  ;;  %v15197_v8 = vcombine.high %v915_v2, %v923_v4  ;;  %v15196_v9 = vcombine.low %v915_v2, %v923_v4  ;;  %3731 = vmatprep.subr.bf16.mxu0 %v14941_v3 }
  0xd6   :  { %v683_v7 = vld [vmem:[#allocation12 + $0xc0] sm:$0xff]  ;;  %3732 = vmatpush1.bf16.msra.mxu0 %v14940_v5 }
  0xd7   :  { %v14957_v10 = vcombine.high %v675_v6, %v683_v7  ;;  %v931_v11 = vld [vmem:[#allocation12 + $0x880] sm:$0xff]  ;;  %3772 = vmatprep.subr.bf16.mxu1 %v15197_v8  ;;  %v14956_v18 = vcombine.low %v675_v6, %v683_v7  ;;  %s201_s4 = sshra.s32 %s17900_s11, 3  ;;  %s204_s22 = sand.u32 7, %s17900_s11 }
  0xd8   :  { %v939_v12 = vld [vmem:[#allocation12 + $0x8c0] sm:$0xff]  ;;  %3773 = vmatpush1.bf16.msra.mxu1 %v15196_v9  ;;  %s16884_s25 = sshll.u32 %s201_s4, 4  ;;  %s211_s29 = sshra.s32 %s17902_s5, 3 }
  0xd9   :  { %v691_v13 = vld [vmem:[#allocation12 + $0x100] sm:$0xff]  ;;  %v15213_v14 = vcombine.high %v931_v11, %v939_v12  ;;  %3733 = vmatprep.subr.bf16.mxu0 %v14957_v10  ;;  %v15212_v19 = vcombine.low %v931_v11, %v939_v12  ;;  %s221_s23 = sshra.s32 %s17904_s16, 3  ;;  %s17918_s26 = sadd.s32 %s16884_s25, %s204_s22 }
  0xda   :  { %v699_v15 = vld [vmem:[#allocation12 + $0x140] sm:$0xff]  ;;  %3734 = vmatpush1.bf16.msra.mxu0 %v14956_v18  ;;  %s214_s7 = sand.u32 7, %s17902_s5  ;;  %s16885_s2 = sshll.u32 %s211_s29, 4 }
  0xdb   :  { %v947_v16 = vld [vmem:[#allocation12 + $0x900] sm:$0xff]  ;;  %v14973_v20 = vcombine.high %v691_v13, %v699_v15  ;;  %3774 = vmatprep.subr.bf16.mxu1 %v15213_v14  ;;  %v14972_v26 = vcombine.low %v691_v13, %v699_v15  ;;  %s224_s30 = sand.u32 7, %s17904_s16  ;;  %s16886_s10 = sshll.u32 %s221_s23, 4 }
  0xdc   :  { %v955_v17 = vld [vmem:[#allocation12 + $0x940] sm:$0xff]  ;;  %3775 = vmatpush1.bf16.msra.mxu1 %v15212_v19  ;;  %s231_s21 = sshra.s32 %s17907_s0, 3  ;;  %s17925_s19 = sadd.s32 %s16885_s2, %s214_s7 }
  0xdd   :  { %v15229_v21 = vcombine.high %v947_v16, %v955_v17  ;;  %v707_v22 = vld [vmem:[#allocation12 + $0x180] sm:$0xff]  ;;  %3735 = vmatprep.subr.bf16.mxu0 %v14973_v20  ;;  %v15228_v27 = vcombine.low %v947_v16, %v955_v17  ;;  %s17929_s1 = sadd.s32 %s16886_s10, %s224_s30  ;;  %s234_s15 = sand.u32 7, %s17907_s0 }
  0xde   :  { %v715_v23 = vld [vmem:[#allocation12 + $0x1c0] sm:$0xff]  ;;  %3736 = vmatpush1.bf16.msra.mxu0 %v14972_v26  ;;  %s16887_s18 = sshll.u32 %s231_s21, 4  ;;  %s241_s27 = sshra.s32 %s17916_s3, 3 }
  0xdf   :  { %v963_v24 = vld [vmem:[#allocation12 + $0x980] sm:$0xff]  ;;  %v14989_v28 = vcombine.high %v707_v22, %v715_v23  ;;  %3776 = vmatprep.subr.bf16.mxu1 %v15229_v21  ;;  %v14988_v34 = vcombine.low %v707_v22, %v715_v23  ;;  %s251_s20 = sshra.s32 %s17920_s17, 3  ;;  %s208_s8 = scalar_lea.vmem [#allocation6], %s17918_s26 }
  0xe0   :  { %v971_v25 = vld [vmem:[#allocation12 + $0x9c0] sm:$0xff]  ;;  %3777 = vmatpush1.bf16.msra.mxu1 %v15228_v27  ;;  %s17941_s11 = sadd.s32 %s16887_s18, %s234_s15  ;;  %s218_s5 = scalar_lea.vmem [#allocation6], %s17925_s19 }
  0xe1   :  { %v15245_v29 = vcombine.high %v963_v24, %v971_v25  ;;  %v723_v30 = vld [vmem:[#allocation12 + $0x200] sm:$0xff]  ;;  %3737 = vmatprep.subr.bf16.mxu0 %v14989_v28  ;;  %v15244_v35 = vcombine.low %v963_v24, %v971_v25  ;;  %s244_s16 = sand.u32 7, %s17916_s3  ;;  %s16888_s4 = sshll.u32 %s241_s27, 4 }
  0xe2   :  { %v731_v31 = vld [vmem:[#allocation12 + $0x240] sm:$0xff]  ;;  %3738 = vmatpush1.bf16.msra.mxu0 %v14988_v34  ;;  %s254_s0 = sand.u32 7, %s17920_s17  ;;  %s16889_s22 = sshll.u32 %s251_s20, 4 }
  0xe3   :  { %v979_v32 = vld [vmem:[#allocation12 + $0xa00] sm:$0xff]  ;;  %v15005_v36 = vcombine.high %v723_v30, %v731_v31  ;;  %3778 = vmatprep.subr.bf16.mxu1 %v15245_v29  ;;  %v15004_v42 = vcombine.low %v723_v30, %v731_v31  ;;  %s261_s25 = sshra.s32 %s17927_s6, 3  ;;  %s228_s29 = scalar_lea.vmem [#allocation6], %s17929_s1 }
  0xe4   :  { %v987_v33 = vld [vmem:[#allocation12 + $0xa40] sm:$0xff]  ;;  %3779 = vmatpush1.bf16.msra.mxu1 %v15244_v35  ;;  %s17955_s23 = sadd.s32 %s16888_s4, %s244_s16  ;;  %s17961_s3 = sadd.s32 %s16889_s22, %s254_s0 }
  0xe5   :  { %v15261_v37 = vcombine.high %v979_v32, %v987_v33  ;;  %v739_v38 = vld [vmem:[#allocation12 + $0x280] sm:$0xff]  ;;  %3739 = vmatprep.subr.bf16.mxu0 %v15005_v36  ;;  %v15260_v43 = vcombine.low %v979_v32, %v987_v33  ;;  %s264_s26 = sand.u32 7, %s17927_s6  ;;  %s16890_s17 = sshll.u32 %s261_s25, 4 }
  0xe6   :  { %v747_v39 = vld [vmem:[#allocation12 + $0x2c0] sm:$0xff]  ;;  %3740 = vmatpush1.bf16.msra.mxu0 %v15004_v42  ;;  %s238_s7 = scalar_lea.vmem [#allocation6], %s17941_s11  ;;  %s271_s2 = sshra.s32 %s17936_s9, 3 }
  0xe7   :  { %v995_v40 = vld [vmem:[#allocation12 + $0xa80] sm:$0xff]  ;;  %v15021_v44 = vcombine.high %v739_v38, %v747_v39  ;;  %3780 = vmatprep.subr.bf16.mxu1 %v15261_v37  ;;  %v15020_v50 = vcombine.low %v739_v38, %v747_v39  ;;  %s17971_s30 = sadd.s32 %s16890_s17, %s264_s26  ;;  %s248_s10 = scalar_lea.vmem [#allocation6], %s17955_s23 }
  0xe8   :  { %v1003_v41 = vld [vmem:[#allocation12 + $0xac0] sm:$0xff]  ;;  %3781 = vmatpush1.bf16.msra.mxu1 %v15260_v43  ;;  %s274_s21 = sand.u32 7, %s17936_s9  ;;  %s16891_s19 = sshll.u32 %s271_s2, 4 }
  0xe9   :  { %v15277_v45 = vcombine.high %v995_v40, %v1003_v41  ;;  %v755_v46 = vld [vmem:[#allocation12 + $0x300] sm:$0xff]  ;;  %3741 = vmatprep.subr.bf16.mxu0 %v15021_v44  ;;  %v15276_v51 = vcombine.low %v995_v40, %v1003_v41  ;;  %s258_s6 = scalar_lea.vmem [#allocation6], %s17961_s3  ;;  %s277_s1 = sadd.s32 %s16891_s19, %s274_s21 }
  0xea   :  { %v763_v47 = vld [vmem:[#allocation12 + $0x340] sm:$0xff]  ;;  %3742 = vmatpush1.bf16.msra.mxu0 %v15020_v50  ;;  %s268_s15 = scalar_lea.vmem [#allocation6], %s17971_s30  ;;  %s278_s18 = scalar_lea.vmem [#allocation6], %s277_s1 }
  0xeb   :  { %v1011_v48 = vld [vmem:[#allocation12 + $0xb00] sm:$0xff]  ;;  %v15037_v52 = vcombine.high %v755_v46, %v763_v47  ;;  %3782 = vmatprep.subr.bf16.mxu1 %v15277_v45  ;;  %v15036_v62 = vcombine.low %v755_v46, %v763_v47  ;;  %s17603_s27 = smov [#allocation23]  }
  0xec   :  { %v1019_v49 = vld [vmem:[#allocation12 + $0xb40] sm:$0xff]  ;;  %3783 = vmatpush1.bf16.msra.mxu1 %v15276_v51  ;;  %s14856_s20 = sshll.u32 %s17603_s27, 4  ;;  %s14857_s20 = int_to_ptr.vmem [resolvable:$true] %s14856_s20 }
  0xed   :  { %v15293_v55 = vcombine.high %v1011_v48, %v1019_v49  ;;  %v771_v56 = vld [vmem:[#allocation12 + $0x380] sm:$0xff]  ;;  %3743 = vmatprep.subr.bf16.mxu0 %v15037_v52  ;;  %v15292_v63 = vcombine.low %v1011_v48, %v1019_v49  ;;  %s17501_s9 = scalar_lea.vmem %s14857_s20, 1024  ;;  %p17506_p8 = scmp.lt.s32.totalorder %s14857_s20, %s14857_s20 }
  0xee   :  { %v779_v57 = vld [vmem:[#allocation12 + $0x3c0] sm:$0xff]  ;;  %3744 = vmatpush1.bf16.msra.mxu0 %v15036_v62  ;;  %p17502_p7 = scmp.ne.s32.totalorder %s14857_s20, %s17501_s9  ;;  %p17507_p9 = scmp.lt.s32.totalorder %s17501_s9, %s17501_s9 }
  0xef   :  { %v1027_v60 = vld [vmem:[#allocation12 + $0xb80] sm:$0xff]  ;;  %v15053_v0 = vcombine.high %v771_v56, %v779_v57  ;;  %3784 = vmatprep.subr.bf16.mxu1 %v15293_v55  ;;  %v15052_v6 = vcombine.low %v771_v56, %v779_v57 }
  0xf0   :  { %v1035_v61 = vld [vmem:[#allocation12 + $0xbc0] sm:$0xff]  ;;  %3785 = vmatpush1.bf16.msra.mxu1 %v15292_v63  ;;  %p17508_p10 = por %p17507_p9, %p17506_p8 }
  0xf1   :  { %v15309_v1 = vcombine.high %v1027_v60, %v1035_v61  ;;  %v787_v2 = vld [vmem:[#allocation12 + $0x400] sm:$0xff]  ;;  %3745 = vmatprep.subr.bf16.mxu0 %v15053_v0  ;;  %v15308_v7 = vcombine.low %v1027_v60, %v1035_v61 }
  0xf2   :  { %v795_v3 = vld [vmem:[#allocation12 + $0x440] sm:$0xff]  ;;  %3746 = vmatpush1.bf16.msra.mxu0 %v15052_v6  ;;  %v916_v6 = vld [vmem:[#allocation12 + $0x808] sm:$0xff]  ;;  %p17509_p11 = pnand %p17508_p10, %p17502_p7 }
  0xf3   :  { %v1043_v4 = vld [vmem:[#allocation12 + $0xc00] sm:$0xff]  ;;  %v15069_v8 = vcombine.high %v787_v2, %v795_v3  ;;  %3786 = vmatprep.subr.bf16.mxu1 %v15309_v1  ;;  %v15068_v14 = vcombine.low %v787_v2, %v795_v3 }
  0xf4   :  { %v1051_v5 = vld [vmem:[#allocation12 + $0xc40] sm:$0xff]  ;;  %3787 = vmatpush1.bf16.msra.mxu1 %v15308_v7  ;;  %v924_v7 = vld [vmem:[#allocation12 + $0x848] sm:$0xff] }
  0xf5   :  { %v15325_v9 = vcombine.high %v1043_v4, %v1051_v5  ;;  %v803_v10 = vld [vmem:[#allocation12 + $0x480] sm:$0xff]  ;;  %3747 = vmatprep.subr.bf16.mxu0 %v15069_v8  ;;  %v15324_v15 = vcombine.low %v1043_v4, %v1051_v5  ;;  %v660_v4 = vld [vmem:[#allocation12 + $0x8] sm:$0xff] }
  0xf6   :  { %v811_v11 = vld [vmem:[#allocation12 + $0x4c0] sm:$0xff]  ;;  %3748 = vmatpush1.bf16.msra.mxu0 %v15068_v14  ;;  %v668_v5 = vld [vmem:[#allocation12 + $0x48] sm:$0xff] }
  0xf7   :  { %v1059_v12 = vld [vmem:[#allocation12 + $0xc80] sm:$0xff]  ;;  %v15085_v16 = vcombine.high %v803_v10, %v811_v11  ;;  %3788 = vmatprep.subr.bf16.mxu1 %v15325_v9  ;;  %v15084_v22 = vcombine.low %v803_v10, %v811_v11  ;;  %v391_v11 = vld [vmem:[#allocation7 + $0x10] sm:$0xff]  ;;  %v676_v14 = vld [vmem:[#allocation12 + $0x88] sm:$0xff] }
  0xf8   :  { %v1067_v13 = vld [vmem:[#allocation12 + $0xcc0] sm:$0xff]  ;;  %3789 = vmatpush1.bf16.msra.mxu1 %v15324_v15  ;;  %v684_v15 = vld [vmem:[#allocation12 + $0xc8] sm:$0xff] }
  0xf9   :  { %v15341_v17 = vcombine.high %v1059_v12, %v1067_v13  ;;  %v819_v18 = vld [vmem:[#allocation12 + $0x500] sm:$0xff]  ;;  %3749 = vmatprep.subr.bf16.mxu0 %v15085_v16  ;;  %v15340_v23 = vcombine.low %v1059_v12, %v1067_v13  ;;  %v14943_v12 = vcombine.high %v660_v4, %v668_v5  ;;  %v15199_v13 = vcombine.high %v916_v6, %v924_v7 }
  0xfa   :  { %v827_v19 = vld [vmem:[#allocation12 + $0x540] sm:$0xff]  ;;  %3750 = vmatpush1.bf16.msra.mxu0 %v15084_v22  ;;  %v14959_v22 = vcombine.high %v676_v14, %v684_v15 }
  0xfb   :  { %v1075_v20 = vld [vmem:[#allocation12 + $0xd00] sm:$0xff]  ;;  %v15101_v24 = vcombine.high %v819_v18, %v827_v19  ;;  %3790 = vmatprep.subr.bf16.mxu1 %v15341_v17  ;;  %v15100_v30 = vcombine.low %v819_v18, %v827_v19  ;;  %v932_v17 = vld [vmem:[#allocation12 + $0x888] sm:$0xff]  ;;  %v17858_v19 = vpack.c.bf16 %v391_v11, %v391_v11 }
  0xfc   :  { %v1083_v21 = vld [vmem:[#allocation12 + $0xd40] sm:$0xff]  ;;  %3791 = vmatpush1.bf16.msra.mxu1 %v15340_v23  ;;  %v940_v18 = vld [vmem:[#allocation12 + $0x8c8] sm:$0xff] }
  0xfd   :  { %v15357_v25 = vcombine.high %v1075_v20, %v1083_v21  ;;  %v835_v26 = vld [vmem:[#allocation12 + $0x580] sm:$0xff]  ;;  %3751 = vmatprep.subr.bf16.mxu0 %v15101_v24  ;;  %v15356_v31 = vcombine.low %v1075_v20, %v1083_v21  ;;  %v14942_v20 = vcombine.low %v660_v4, %v668_v5  ;;  %v15198_v21 = vcombine.low %v916_v6, %v924_v7  ;;  %v692_v23 = vld [vmem:[#allocation12 + $0x108] sm:$0xff] }
  0xfe   :  { %v843_v27 = vld [vmem:[#allocation12 + $0x5c0] sm:$0xff]  ;;  %3752 = vmatpush1.bf16.msra.mxu0 %v15100_v30  ;;  %v700_v24 = vld [vmem:[#allocation12 + $0x148] sm:$0xff] }
  0xff   :  { %v1091_v28 = vld [vmem:[#allocation12 + $0xd80] sm:$0xff]  ;;  %v15117_v32 = vcombine.high %v835_v26, %v843_v27  ;;  %3792 = vmatprep.subr.bf16.mxu1 %v15357_v25  ;;  %v15116_v38 = vcombine.low %v835_v26, %v843_v27  ;;  %v15215_v25 = vcombine.high %v932_v17, %v940_v18  ;;  %v948_v26 = vld [vmem:[#allocation12 + $0x908] sm:$0xff]  ;;  %v14975_v30 = vcombine.high %v692_v23, %v700_v24 }
 0x100   :  { %v1099_v29 = vld [vmem:[#allocation12 + $0xdc0] sm:$0xff]  ;;  %3793 = vmatpush1.bf16.msra.mxu1 %v15356_v31  ;;  %v956_v27 = vld [vmem:[#allocation12 + $0x948] sm:$0xff] }
 0x101   :  { %v15373_v33 = vcombine.high %v1091_v28, %v1099_v29  ;;  %v851_v34 = vld [vmem:[#allocation12 + $0x600] sm:$0xff]  ;;  %3753 = vmatprep.subr.bf16.mxu0 %v15117_v32  ;;  %v15372_v39 = vcombine.low %v1091_v28, %v1099_v29  ;;  %v14958_v28 = vcombine.low %v676_v14, %v684_v15  ;;  %v15214_v29 = vcombine.low %v932_v17, %v940_v18  ;;  %v708_v31 = vld [vmem:[#allocation12 + $0x188] sm:$0xff] }
 0x102   :  { %v859_v35 = vld [vmem:[#allocation12 + $0x640] sm:$0xff]  ;;  %3754 = vmatpush1.bf16.msra.mxu0 %v15116_v38  ;;  %v716_v32 = vld [vmem:[#allocation12 + $0x1c8] sm:$0xff] }
 0x103   :  { %v1107_v36 = vld [vmem:[#allocation12 + $0xe00] sm:$0xff]  ;;  %v15133_v40 = vcombine.high %v851_v34, %v859_v35  ;;  %3794 = vmatprep.subr.bf16.mxu1 %v15373_v33  ;;  %v15132_v46 = vcombine.low %v851_v34, %v859_v35  ;;  %v964_v33 = vld [vmem:[#allocation12 + $0x988] sm:$0xff]  ;;  %v15231_v34 = vcombine.high %v948_v26, %v956_v27  ;;  %v14991_v38 = vcombine.high %v708_v31, %v716_v32 }
 0x104   :  { %v1115_v37 = vld [vmem:[#allocation12 + $0xe40] sm:$0xff]  ;;  %3795 = vmatpush1.bf16.msra.mxu1 %v15372_v39  ;;  %v972_v35 = vld [vmem:[#allocation12 + $0x9c8] sm:$0xff] }
 0x105   :  { %v15389_v41 = vcombine.high %v1107_v36, %v1115_v37  ;;  %v867_v42 = vld [vmem:[#allocation12 + $0x680] sm:$0xff]  ;;  %3755 = vmatprep.subr.bf16.mxu0 %v15133_v40  ;;  %v15388_v47 = vcombine.low %v1107_v36, %v1115_v37  ;;  %v14974_v36 = vcombine.low %v692_v23, %v700_v24  ;;  %v15230_v37 = vcombine.low %v948_v26, %v956_v27  ;;  %v724_v39 = vld [vmem:[#allocation12 + $0x208] sm:$0xff] }
 0x106   :  { %v875_v43 = vld [vmem:[#allocation12 + $0x6c0] sm:$0xff]  ;;  %3756 = vmatpush1.bf16.msra.mxu0 %v15132_v46  ;;  %v732_v40 = vld [vmem:[#allocation12 + $0x248] sm:$0xff] }
 0x107   :  { %v1123_v44 = vld [vmem:[#allocation12 + $0xe80] sm:$0xff]  ;;  %v15149_v48 = vcombine.high %v867_v42, %v875_v43  ;;  %3796 = vmatprep.subr.bf16.mxu1 %v15389_v41  ;;  %v15148_v54 = vcombine.low %v867_v42, %v875_v43  ;;  %v980_v41 = vld [vmem:[#allocation12 + $0xa08] sm:$0xff]  ;;  %v15247_v42 = vcombine.high %v964_v33, %v972_v35  ;;  %v15007_v46 = vcombine.high %v724_v39, %v732_v40 }
 0x108   :  { %v1131_v45 = vld [vmem:[#allocation12 + $0xec0] sm:$0xff]  ;;  %3797 = vmatpush1.bf16.msra.mxu1 %v15388_v47  ;;  %v988_v43 = vld [vmem:[#allocation12 + $0xa48] sm:$0xff] }
 0x109   :  { %v15405_v49 = vcombine.high %v1123_v44, %v1131_v45  ;;  %v883_v50 = vld [vmem:[#allocation12 + $0x700] sm:$0xff]  ;;  %3757 = vmatprep.subr.bf16.mxu0 %v15149_v48  ;;  %v15404_v55 = vcombine.low %v1123_v44, %v1131_v45  ;;  %v14990_v44 = vcombine.low %v708_v31, %v716_v32  ;;  %v15246_v45 = vcombine.low %v964_v33, %v972_v35  ;;  %v740_v47 = vld [vmem:[#allocation12 + $0x288] sm:$0xff] }
 0x10a   :  { %v891_v51 = vld [vmem:[#allocation12 + $0x740] sm:$0xff]  ;;  %3758 = vmatpush1.bf16.msra.mxu0 %v15148_v54  ;;  %v748_v48 = vld [vmem:[#allocation12 + $0x2c8] sm:$0xff] }
 0x10b   :  { %v1139_v52 = vld [vmem:[#allocation12 + $0xf00] sm:$0xff]  ;;  %v15165_v56 = vcombine.high %v883_v50, %v891_v51  ;;  %3798 = vmatprep.subr.bf16.mxu1 %v15405_v49  ;;  %v15164_v0 = vcombine.low %v883_v50, %v891_v51  ;;  %v996_v49 = vld [vmem:[#allocation12 + $0xa88] sm:$0xff]  ;;  %v15263_v50 = vcombine.high %v980_v41, %v988_v43  ;;  %v15023_v54 = vcombine.high %v740_v47, %v748_v48 }
 0x10c   :  { %v1147_v53 = vld [vmem:[#allocation12 + $0xf40] sm:$0xff]  ;;  %3799 = vmatpush1.bf16.msra.mxu1 %v15404_v55  ;;  %v1004_v51 = vld [vmem:[#allocation12 + $0xac8] sm:$0xff] }
 0x10d   :  { %v15421_v57 = vcombine.high %v1139_v52, %v1147_v53  ;;  %v899_v60 = vld [vmem:[#allocation12 + $0x780] sm:$0xff]  ;;  %3759 = vmatprep.subr.bf16.mxu0 %v15165_v56  ;;  %v15420_v1 = vcombine.low %v1139_v52, %v1147_v53  ;;  %v15006_v52 = vcombine.low %v724_v39, %v732_v40  ;;  %v15262_v53 = vcombine.low %v980_v41, %v988_v43  ;;  %v756_v55 = vld [vmem:[#allocation12 + $0x308] sm:$0xff] }
 0x10e   :  { %v907_v61 = vld [vmem:[#allocation12 + $0x7c0] sm:$0xff]  ;;  %3760 = vmatpush1.bf16.msra.mxu0 %v15164_v0  ;;  %v764_v56 = vld [vmem:[#allocation12 + $0x348] sm:$0xff] }
 0x10f   :  { %v1155_v62 = vld [vmem:[#allocation12 + $0xf80] sm:$0xff]  ;;  %v15181_v2 = vcombine.high %v899_v60, %v907_v61  ;;  %3800 = vmatprep.subr.bf16.mxu1 %v15421_v57  ;;  %v15180_v8 = vcombine.low %v899_v60, %v907_v61  ;;  %v1012_v57 = vld [vmem:[#allocation12 + $0xb08] sm:$0xff]  ;;  %v15279_v60 = vcombine.high %v996_v49, %v1004_v51  ;;  %v15039_v0 = vcombine.high %v756_v55, %v764_v56 }
 0x110   :  { %v1163_v63 = vld [vmem:[#allocation12 + $0xfc0] sm:$0xff]  ;;  %3801 = vmatpush1.bf16.msra.mxu1 %v15420_v1  ;;  %v1020_v61 = vld [vmem:[#allocation12 + $0xb48] sm:$0xff]  ;;  %v15038_v6 = vcombine.low %v756_v55, %v764_v56 }
 0x111   :  { %v15437_v3 = vcombine.high %v1155_v62, %v1163_v63  ;;  %v389_v9 = vld [vmem:[#allocation7] sm:$0xff]  ;;  %3761 = vmatprep.subr.bf16.mxu0 %v15181_v2  ;;  %v15436_v10 = vcombine.low %v1155_v62, %v1163_v63  ;;  %v15022_v62 = vcombine.low %v740_v47, %v748_v48  ;;  %v15278_v63 = vcombine.low %v996_v49, %v1004_v51  ;;  %v772_v1 = vld [vmem:[#allocation12 + $0x388] sm:$0xff] }
 0x112   :  { %v17856_v16 = vpack.c.bf16 %v389_v9, %v389_v9  ;;  %3762 = vmatpush1.bf16.msra.mxu0 %v15180_v8  ;;  %v780_v2 = vld [vmem:[#allocation12 + $0x3c8] sm:$0xff]  ;;  %v15295_v4 = vcombine.high %v1012_v57, %v1020_v61  ;;  %v15294_v7 = vcombine.low %v1012_v57, %v1020_v61 }
 0x113   :  { %3802 = vmatprep.subr.bf16.mxu1 %v15437_v3  ;;  %3813 = vmatprep.subr.bf16.mxu0 %v14943_v12  ;;  %v1028_v3 = vld [vmem:[#allocation12 + $0xb88] sm:$0xff]  ;;  %v15055_v8 = vcombine.high %v772_v1, %v780_v2  ;;  %v15054_v14 = vcombine.low %v772_v1, %v780_v2 }
 0x114   :  { %3803 = vmatpush1.bf16.msra.mxu1 %v15436_v10  ;;  %v1036_v5 = vld [vmem:[#allocation12 + $0xbc8] sm:$0xff] }
 0x115   :  { %3854 = vmatprep.subr.bf16.mxu1 %v15199_v13  ;;  %3764 = vmatmul.mubr.bf16.vlgmr.msra.gmra.mrb[0].mxu0 %v17856_v16  ;;  %v788_v9 = vld [vmem:[#allocation12 + $0x408] sm:$0xff]  ;;  %v15311_v12 = vcombine.high %v1028_v3, %v1036_v5  ;;  %v15310_v15 = vcombine.low %v1028_v3, %v1036_v5 }
 0x116   :  { %3814 = vmatpush1.bf16.msra.mxu0 %v14942_v20  ;;  %3845 = vmatprep.mubr.bf16.mxu0 %v17850_v58  ;;  %v796_v10 = vld [vmem:[#allocation12 + $0x448] sm:$0xff] }
 0x117   :  { %3805 = vmatmul.mubr.bf16.vlgmr.msra.gmra.mrb[0].mxu1 %v17858_v19  ;;  %3815 = vmatprep.subr.bf16.mxu0 %v14959_v22  ;;  %v1044_v11 = vld [vmem:[#allocation12 + $0xc08] sm:$0xff]  ;;  %v15071_v17 = vcombine.high %v788_v9, %v796_v10  ;;  %v15070_v24 = vcombine.low %v788_v9, %v796_v10 }
 0x118   :  { %3855 = vmatpush1.bf16.msra.mxu1 %v15198_v21  ;;  %3886 = vmatprep.mubr.bf16.mxu1 %v17852_v59  ;;  %v1052_v13 = vld [vmem:[#allocation12 + $0xc48] sm:$0xff] }
 0x119   :  { %3856 = vmatprep.subr.bf16.mxu1 %v15215_v25  ;;  %v804_v18 = vld [vmem:[#allocation12 + $0x488] sm:$0xff]  ;;  %v15327_v22 = vcombine.high %v1044_v11, %v1052_v13  ;;  %v15326_v25 = vcombine.low %v1044_v11, %v1052_v13  ;;  %v661_v13 = vld [vmem:[#allocation12 + $0x10] sm:$0xff] }
 0x11a   :  { %3816 = vmatpush1.bf16.msra.mxu0 %v14958_v28  ;;  %v812_v20 = vld [vmem:[#allocation12 + $0x4c8] sm:$0xff] }
 0x11b   :  { %3817 = vmatprep.subr.bf16.mxu0 %v14975_v30  ;;  %v1060_v21 = vld [vmem:[#allocation12 + $0xc88] sm:$0xff]  ;;  %v15087_v26 = vcombine.high %v804_v18, %v812_v20  ;;  %v15086_v32 = vcombine.low %v804_v18, %v812_v20  ;;  %v925_v18 = vld [vmem:[#allocation12 + $0x850] sm:$0xff] }
 0x11c   :  { %3857 = vmatpush1.bf16.msra.mxu1 %v15214_v29  ;;  %v1068_v23 = vld [vmem:[#allocation12 + $0xcc8] sm:$0xff] }
 0x11d   :  { %3858 = vmatprep.subr.bf16.mxu1 %v15231_v34  ;;  %v820_v27 = vld [vmem:[#allocation12 + $0x508] sm:$0xff]  ;;  %v15343_v30 = vcombine.high %v1060_v21, %v1068_v23  ;;  %v15342_v33 = vcombine.low %v1060_v21, %v1068_v23  ;;  %v677_v23 = vld [vmem:[#allocation12 + $0x90] sm:$0xff] }
 0x11e   :  { %3818 = vmatpush1.bf16.msra.mxu0 %v14974_v36  ;;  %v828_v28 = vld [vmem:[#allocation12 + $0x548] sm:$0xff] }
 0x11f   :  { %3819 = vmatprep.subr.bf16.mxu0 %v14991_v38  ;;  %v1076_v29 = vld [vmem:[#allocation12 + $0xd08] sm:$0xff]  ;;  %v15103_v34 = vcombine.high %v820_v27, %v828_v28  ;;  %v15102_v40 = vcombine.low %v820_v27, %v828_v28  ;;  %v941_v27 = vld [vmem:[#allocation12 + $0x8d0] sm:$0xff] }
 0x120   :  { %3859 = vmatpush1.bf16.msra.mxu1 %v15230_v37  ;;  %v1084_v31 = vld [vmem:[#allocation12 + $0xd48] sm:$0xff] }
 0x121   :  { %3860 = vmatprep.subr.bf16.mxu1 %v15247_v42  ;;  %v836_v35 = vld [vmem:[#allocation12 + $0x588] sm:$0xff]  ;;  %v15359_v38 = vcombine.high %v1076_v29, %v1084_v31  ;;  %v15358_v41 = vcombine.low %v1076_v29, %v1084_v31 }
 0x122   :  { %3820 = vmatpush1.bf16.msra.mxu0 %v14990_v44  ;;  %v844_v36 = vld [vmem:[#allocation12 + $0x5c8] sm:$0xff] }
 0x123   :  { %3821 = vmatprep.subr.bf16.mxu0 %v15007_v46  ;;  %v1092_v37 = vld [vmem:[#allocation12 + $0xd88] sm:$0xff]  ;;  %v15119_v42 = vcombine.high %v836_v35, %v844_v36  ;;  %v15118_v48 = vcombine.low %v836_v35, %v844_v36  ;;  %v957_v35 = vld [vmem:[#allocation12 + $0x950] sm:$0xff] }
 0x124   :  { %3861 = vmatpush1.bf16.msra.mxu1 %v15246_v45  ;;  %v1100_v39 = vld [vmem:[#allocation12 + $0xdc8] sm:$0xff] }
 0x125   :  { %3862 = vmatprep.subr.bf16.mxu1 %v15263_v50  ;;  %v852_v43 = vld [vmem:[#allocation12 + $0x608] sm:$0xff]  ;;  %v15375_v46 = vcombine.high %v1092_v37, %v1100_v39  ;;  %v15374_v49 = vcombine.low %v1092_v37, %v1100_v39 }
 0x126   :  { %3822 = vmatpush1.bf16.msra.mxu0 %v15006_v52  ;;  %v860_v44 = vld [vmem:[#allocation12 + $0x648] sm:$0xff] }
 0x127   :  { %3823 = vmatprep.subr.bf16.mxu0 %v15023_v54  ;;  %v1108_v45 = vld [vmem:[#allocation12 + $0xe08] sm:$0xff]  ;;  %v15135_v50 = vcombine.high %v852_v43, %v860_v44  ;;  %v15134_v56 = vcombine.low %v852_v43, %v860_v44  ;;  %v973_v43 = vld [vmem:[#allocation12 + $0x9d0] sm:$0xff] }
 0x128   :  { %3863 = vmatpush1.bf16.msra.mxu1 %v15262_v53  ;;  %v1116_v47 = vld [vmem:[#allocation12 + $0xe48] sm:$0xff] }
 0x129   :  { %3864 = vmatprep.subr.bf16.mxu1 %v15279_v60  ;;  %v868_v51 = vld [vmem:[#allocation12 + $0x688] sm:$0xff]  ;;  %v15391_v54 = vcombine.high %v1108_v45, %v1116_v47  ;;  %v15390_v57 = vcombine.low %v1108_v45, %v1116_v47 }
 0x12a   :  { %3824 = vmatpush1.bf16.msra.mxu0 %v15022_v62  ;;  %v876_v52 = vld [vmem:[#allocation12 + $0x6c8] sm:$0xff] }
 0x12b   :  { %3825 = vmatprep.subr.bf16.mxu0 %v15039_v0  ;;  %v1124_v53 = vld [vmem:[#allocation12 + $0xe88] sm:$0xff]  ;;  %v15151_v60 = vcombine.high %v868_v51, %v876_v52  ;;  %v15150_v2 = vcombine.low %v868_v51, %v876_v52  ;;  %v989_v51 = vld [vmem:[#allocation12 + $0xa50] sm:$0xff] }
 0x12c   :  { %3865 = vmatpush1.bf16.msra.mxu1 %v15278_v63  ;;  %v1132_v55 = vld [vmem:[#allocation12 + $0xec8] sm:$0xff] }
 0x12d   :  { %3866 = vmatprep.subr.bf16.mxu1 %v15295_v4  ;;  %v884_v61 = vld [vmem:[#allocation12 + $0x708] sm:$0xff]  ;;  %v15407_v0 = vcombine.high %v1124_v53, %v1132_v55  ;;  %v15406_v3 = vcombine.low %v1124_v53, %v1132_v55 }
 0x12e   :  { %3826 = vmatpush1.bf16.msra.mxu0 %v15038_v6  ;;  %v892_v62 = vld [vmem:[#allocation12 + $0x748] sm:$0xff] }
 0x12f   :  { %3827 = vmatprep.subr.bf16.mxu0 %v15055_v8  ;;  %v1140_v63 = vld [vmem:[#allocation12 + $0xf08] sm:$0xff]  ;;  %v15167_v4 = vcombine.high %v884_v61, %v892_v62  ;;  %v15166_v10 = vcombine.low %v884_v61, %v892_v62  ;;  %v1005_v61 = vld [vmem:[#allocation12 + $0xad0] sm:$0xff] }
 0x130   :  { %3867 = vmatpush1.bf16.msra.mxu1 %v15294_v7  ;;  %v1148_v1 = vld [vmem:[#allocation12 + $0xf48] sm:$0xff] }
 0x131   :  { %3868 = vmatprep.subr.bf16.mxu1 %v15311_v12  ;;  %v900_v5 = vld [vmem:[#allocation12 + $0x788] sm:$0xff]  ;;  %v15423_v8 = vcombine.high %v1140_v63, %v1148_v1  ;;  %v15422_v11 = vcombine.low %v1140_v63, %v1148_v1 }
 0x132   :  { %3828 = vmatpush1.bf16.msra.mxu0 %v15054_v14  ;;  %v908_v6 = vld [vmem:[#allocation12 + $0x7c8] sm:$0xff]  ;;  %v669_v14 = vld [vmem:[#allocation12 + $0x50] sm:$0xff] }
 0x133   :  { %3829 = vmatprep.subr.bf16.mxu0 %v15071_v17  ;;  %v1156_v7 = vld [vmem:[#allocation12 + $0xf88] sm:$0xff]  ;;  %v15183_v12 = vcombine.high %v900_v5, %v908_v6  ;;  %v15182_v20 = vcombine.low %v900_v5, %v908_v6  ;;  %v14944_v28 = vcombine.low %v661_v13, %v669_v14  ;;  %v1021_v5 = vld [vmem:[#allocation12 + $0xb50] sm:$0xff] }
 0x134   :  { %3869 = vmatpush1.bf16.msra.mxu1 %v15310_v15  ;;  %v1164_v9 = vld [vmem:[#allocation12 + $0xfc8] sm:$0xff]  ;;  %v917_v15 = vld [vmem:[#allocation12 + $0x810] sm:$0xff] }
 0x135   :  { %3870 = vmatprep.subr.bf16.mxu1 %v15327_v22  ;;  %v15439_v17 = vcombine.high %v1156_v7, %v1164_v9  ;;  %v15438_v21 = vcombine.low %v1156_v7, %v1164_v9  ;;  %v14945_v22 = vcombine.high %v661_v13, %v669_v14  ;;  %v15200_v29 = vcombine.low %v917_v15, %v925_v18  ;;  %v1037_v13 = vld [vmem:[#allocation12 + $0xbd0] sm:$0xff] }
 0x136   :  { %3830 = vmatpush1.bf16.msra.mxu0 %v15070_v24  ;;  %v685_v24 = vld [vmem:[#allocation12 + $0xd0] sm:$0xff] }
 0x137   :  { %3831 = vmatprep.subr.bf16.mxu0 %v15087_v26  ;;  %v15201_v26 = vcombine.high %v917_v15, %v925_v18  ;;  %v14960_v36 = vcombine.low %v677_v23, %v685_v24 }
 0x138   :  { %3871 = vmatpush1.bf16.msra.mxu1 %v15326_v25  ;;  %v933_v25 = vld [vmem:[#allocation12 + $0x890] sm:$0xff] }
 0x139   :  { %3872 = vmatprep.subr.bf16.mxu1 %v15343_v30  ;;  %v14961_v30 = vcombine.high %v677_v23, %v685_v24  ;;  %v15217_v31 = vcombine.high %v933_v25, %v941_v27  ;;  %v15216_v37 = vcombine.low %v933_v25, %v941_v27  ;;  %v1053_v23 = vld [vmem:[#allocation12 + $0xc50] sm:$0xff] }
 0x13a   :  { %3832 = vmatpush1.bf16.msra.mxu0 %v15086_v32  ;;  %v693_v32 = vld [vmem:[#allocation12 + $0x110] sm:$0xff] }
 0x13b   :  { %3833 = vmatprep.subr.bf16.mxu0 %v15103_v34  ;;  %v949_v34 = vld [vmem:[#allocation12 + $0x910] sm:$0xff] }
 0x13c   :  { %3873 = vmatpush1.bf16.msra.mxu1 %v15342_v33  ;;  %v701_v33 = vld [vmem:[#allocation12 + $0x150] sm:$0xff]  ;;  %v15233_v39 = vcombine.high %v949_v34, %v957_v35  ;;  %v15232_v45 = vcombine.low %v949_v34, %v957_v35 }
 0x13d   :  { %3874 = vmatprep.subr.bf16.mxu1 %v15359_v38  ;;  %v14977_v38 = vcombine.high %v693_v32, %v701_v33  ;;  %v14976_v44 = vcombine.low %v693_v32, %v701_v33 }
 0x13e   :  { %3834 = vmatpush1.bf16.msra.mxu0 %v15102_v40  ;;  %v709_v40 = vld [vmem:[#allocation12 + $0x190] sm:$0xff] }
 0x13f   :  { %3835 = vmatprep.subr.bf16.mxu0 %v15119_v42  ;;  %v965_v42 = vld [vmem:[#allocation12 + $0x990] sm:$0xff] }
 0x140   :  { %3875 = vmatpush1.bf16.msra.mxu1 %v15358_v41  ;;  %v717_v41 = vld [vmem:[#allocation12 + $0x1d0] sm:$0xff]  ;;  %v15249_v47 = vcombine.high %v965_v42, %v973_v43  ;;  %v15248_v53 = vcombine.low %v965_v42, %v973_v43 }
 0x141   :  { %3876 = vmatprep.subr.bf16.mxu1 %v15375_v46  ;;  %v14993_v46 = vcombine.high %v709_v40, %v717_v41  ;;  %v14992_v52 = vcombine.low %v709_v40, %v717_v41 }
 0x142   :  { %3836 = vmatpush1.bf16.msra.mxu0 %v15118_v48  ;;  %v725_v48 = vld [vmem:[#allocation12 + $0x210] sm:$0xff] }
 0x143   :  { %3837 = vmatprep.subr.bf16.mxu0 %v15135_v50  ;;  %v981_v50 = vld [vmem:[#allocation12 + $0xa10] sm:$0xff] }
 0x144   :  { %3877 = vmatpush1.bf16.msra.mxu1 %v15374_v49  ;;  %v733_v49 = vld [vmem:[#allocation12 + $0x250] sm:$0xff]  ;;  %v15265_v55 = vcombine.high %v981_v50, %v989_v51  ;;  %v15264_v63 = vcombine.low %v981_v50, %v989_v51 }
 0x145   :  { %3878 = vmatprep.subr.bf16.mxu1 %v15391_v54  ;;  %v15009_v54 = vcombine.high %v725_v48, %v733_v49  ;;  %v15008_v62 = vcombine.low %v725_v48, %v733_v49 }
 0x146   :  { %3838 = vmatpush1.bf16.msra.mxu0 %v15134_v56  ;;  %v741_v56 = vld [vmem:[#allocation12 + $0x290] sm:$0xff] }
 0x147   :  { %3839 = vmatprep.subr.bf16.mxu0 %v15151_v60  ;;  %v997_v60 = vld [vmem:[#allocation12 + $0xa90] sm:$0xff] }
 0x148   :  { %3879 = vmatpush1.bf16.msra.mxu1 %v15390_v57  ;;  %v749_v57 = vld [vmem:[#allocation12 + $0x2d0] sm:$0xff]  ;;  %v15281_v1 = vcombine.high %v997_v60, %v1005_v61  ;;  %v15280_v7 = vcombine.low %v997_v60, %v1005_v61 }
 0x149   :  { %3880 = vmatprep.subr.bf16.mxu1 %v15407_v0  ;;  %v15025_v0 = vcombine.high %v741_v56, %v749_v57  ;;  %v15024_v6 = vcombine.low %v741_v56, %v749_v57 }
 0x14a   :  { %3840 = vmatpush1.bf16.msra.mxu0 %v15150_v2  ;;  %v757_v2 = vld [vmem:[#allocation12 + $0x310] sm:$0xff] }
 0x14b   :  { %3841 = vmatprep.subr.bf16.mxu0 %v15167_v4  ;;  %v1013_v4 = vld [vmem:[#allocation12 + $0xb10] sm:$0xff] }
 0x14c   :  { %3881 = vmatpush1.bf16.msra.mxu1 %v15406_v3  ;;  %v765_v3 = vld [vmem:[#allocation12 + $0x350] sm:$0xff]  ;;  %v15297_v9 = vcombine.high %v1013_v4, %v1021_v5  ;;  %v15296_v15 = vcombine.low %v1013_v4, %v1021_v5 }
 0x14d   :  { %3882 = vmatprep.subr.bf16.mxu1 %v15423_v8  ;;  %v15041_v8 = vcombine.high %v757_v2, %v765_v3  ;;  %v15040_v14 = vcombine.low %v757_v2, %v765_v3 }
 0x14e   :  { %3842 = vmatpush1.bf16.msra.mxu0 %v15166_v10  ;;  %v773_v10 = vld [vmem:[#allocation12 + $0x390] sm:$0xff] }
 0x14f   :  { %3843 = vmatprep.subr.bf16.mxu0 %v15183_v12  ;;  %v1029_v12 = vld [vmem:[#allocation12 + $0xb90] sm:$0xff] }
 0x150   :  { %3883 = vmatpush1.bf16.msra.mxu1 %v15422_v11  ;;  %v781_v11 = vld [vmem:[#allocation12 + $0x3d0] sm:$0xff]  ;;  %v15313_v18 = vcombine.high %v1029_v12, %v1037_v13  ;;  %v15312_v25 = vcombine.low %v1029_v12, %v1037_v13 }
 0x151   :  { %3884 = vmatprep.subr.bf16.mxu1 %v15439_v17  ;;  %v15057_v17 = vcombine.high %v773_v10, %v781_v11  ;;  %v15056_v24 = vcombine.low %v773_v10, %v781_v11 }
 0x152   :  { %3844 = vmatpush1.bf16.msra.mxu0 %v15182_v20  ;;  %v789_v20 = vld [vmem:[#allocation12 + $0x410] sm:$0xff] }
 0x153   :  { %3895 = vmatprep.subr.bf16.mxu0 %v14945_v22  ;;  %v1045_v22 = vld [vmem:[#allocation12 + $0xc10] sm:$0xff] }
 0x154   :  { %3885 = vmatpush1.bf16.msra.mxu1 %v15438_v21  ;;  %v797_v21 = vld [vmem:[#allocation12 + $0x450] sm:$0xff]  ;;  %v15329_v27 = vcombine.high %v1045_v22, %v1053_v23  ;;  %v15328_v33 = vcombine.low %v1045_v22, %v1053_v23 }
 0x155   :  { %3936 = vmatprep.subr.bf16.mxu1 %v15201_v26  ;;  %3846 = vmatmul.mubr.bf16.vlgmr.msra.gmra.mrb[4].mxu0 %v17856_v16  ;;  %v15073_v26 = vcombine.high %v789_v20, %v797_v21  ;;  %v15072_v32 = vcombine.low %v789_v20, %v797_v21 }
 0x156   :  { %3896 = vmatpush1.bf16.msra.mxu0 %v14944_v28  ;;  %3927 = vmatprep.mubr.bf16.mxu0 %v17850_v58  ;;  %v805_v28 = vld [vmem:[#allocation12 + $0x490] sm:$0xff] }
 0x157   :  { %3887 = vmatmul.mubr.bf16.vlgmr.msra.gmra.mrb[4].mxu1 %v17858_v19  ;;  %3897 = vmatprep.subr.bf16.mxu0 %v14961_v30  ;;  %v1061_v30 = vld [vmem:[#allocation12 + $0xc90] sm:$0xff] }
 0x158   :  { %3937 = vmatpush1.bf16.msra.mxu1 %v15200_v29  ;;  %3968 = vmatprep.mubr.bf16.mxu1 %v17852_v59  ;;  %v813_v29 = vld [vmem:[#allocation12 + $0x4d0] sm:$0xff] }
 0x159   :  { %3938 = vmatprep.subr.bf16.mxu1 %v15217_v31  ;;  %v1069_v31 = vld [vmem:[#allocation12 + $0xcd0] sm:$0xff]  ;;  %v15089_v34 = vcombine.high %v805_v28, %v813_v29  ;;  %v15088_v40 = vcombine.low %v805_v28, %v813_v29 }
 0x15a   :  { %3898 = vmatpush1.bf16.msra.mxu0 %v14960_v36  ;;  %v15345_v35 = vcombine.high %v1061_v30, %v1069_v31  ;;  %v821_v36 = vld [vmem:[#allocation12 + $0x510] sm:$0xff]  ;;  %v15344_v41 = vcombine.low %v1061_v30, %v1069_v31 }
 0x15b   :  { %3899 = vmatprep.subr.bf16.mxu0 %v14977_v38  ;;  %v1077_v38 = vld [vmem:[#allocation12 + $0xd10] sm:$0xff] }
 0x15c   :  { %3939 = vmatpush1.bf16.msra.mxu1 %v15216_v37  ;;  %v829_v37 = vld [vmem:[#allocation12 + $0x550] sm:$0xff] }
 0x15d   :  { %3940 = vmatprep.subr.bf16.mxu1 %v15233_v39  ;;  %v1085_v39 = vld [vmem:[#allocation12 + $0xd50] sm:$0xff]  ;;  %v15105_v42 = vcombine.high %v821_v36, %v829_v37  ;;  %v15104_v48 = vcombine.low %v821_v36, %v829_v37 }
 0x15e   :  { %3900 = vmatpush1.bf16.msra.mxu0 %v14976_v44  ;;  %v15361_v43 = vcombine.high %v1077_v38, %v1085_v39  ;;  %v837_v44 = vld [vmem:[#allocation12 + $0x590] sm:$0xff]  ;;  %v15360_v49 = vcombine.low %v1077_v38, %v1085_v39 }
 0x15f   :  { %3901 = vmatprep.subr.bf16.mxu0 %v14993_v46  ;;  %v1093_v46 = vld [vmem:[#allocation12 + $0xd90] sm:$0xff] }
 0x160   :  { %3941 = vmatpush1.bf16.msra.mxu1 %v15232_v45  ;;  %v845_v45 = vld [vmem:[#allocation12 + $0x5d0] sm:$0xff] }
 0x161   :  { %3942 = vmatprep.subr.bf16.mxu1 %v15249_v47  ;;  %v1101_v47 = vld [vmem:[#allocation12 + $0xdd0] sm:$0xff]  ;;  %v15121_v50 = vcombine.high %v837_v44, %v845_v45  ;;  %v15120_v56 = vcombine.low %v837_v44, %v845_v45 }
 0x162   :  { %3902 = vmatpush1.bf16.msra.mxu0 %v14992_v52  ;;  %v15377_v51 = vcombine.high %v1093_v46, %v1101_v47  ;;  %v853_v52 = vld [vmem:[#allocation12 + $0x610] sm:$0xff]  ;;  %v15376_v57 = vcombine.low %v1093_v46, %v1101_v47 }
 0x163   :  { %3903 = vmatprep.subr.bf16.mxu0 %v15009_v54  ;;  %v1109_v54 = vld [vmem:[#allocation12 + $0xe10] sm:$0xff] }
 0x164   :  { %3943 = vmatpush1.bf16.msra.mxu1 %v15248_v53  ;;  %v861_v53 = vld [vmem:[#allocation12 + $0x650] sm:$0xff] }
 0x165   :  { %3944 = vmatprep.subr.bf16.mxu1 %v15265_v55  ;;  %v1117_v55 = vld [vmem:[#allocation12 + $0xe50] sm:$0xff]  ;;  %v15137_v60 = vcombine.high %v853_v52, %v861_v53  ;;  %v15136_v2 = vcombine.low %v853_v52, %v861_v53 }
 0x166   :  { %3904 = vmatpush1.bf16.msra.mxu0 %v15008_v62  ;;  %v15393_v61 = vcombine.high %v1109_v54, %v1117_v55  ;;  %v869_v62 = vld [vmem:[#allocation12 + $0x690] sm:$0xff]  ;;  %v15392_v3 = vcombine.low %v1109_v54, %v1117_v55 }
 0x167   :  { %3905 = vmatprep.subr.bf16.mxu0 %v15025_v0  ;;  %v1125_v0 = vld [vmem:[#allocation12 + $0xe90] sm:$0xff] }
 0x168   :  { %3945 = vmatpush1.bf16.msra.mxu1 %v15264_v63  ;;  %v877_v63 = vld [vmem:[#allocation12 + $0x6d0] sm:$0xff] }
 0x169   :  { %3946 = vmatprep.subr.bf16.mxu1 %v15281_v1  ;;  %v1133_v1 = vld [vmem:[#allocation12 + $0xed0] sm:$0xff]  ;;  %v15153_v4 = vcombine.high %v869_v62, %v877_v63  ;;  %v15152_v10 = vcombine.low %v869_v62, %v877_v63 }
 0x16a   :  { %3906 = vmatpush1.bf16.msra.mxu0 %v15024_v6  ;;  %v15409_v5 = vcombine.high %v1125_v0, %v1133_v1  ;;  %v885_v6 = vld [vmem:[#allocation12 + $0x710] sm:$0xff]  ;;  %v15408_v11 = vcombine.low %v1125_v0, %v1133_v1 }
 0x16b   :  { %3907 = vmatprep.subr.bf16.mxu0 %v15041_v8  ;;  %v1141_v8 = vld [vmem:[#allocation12 + $0xf10] sm:$0xff] }
 0x16c   :  { %3947 = vmatpush1.bf16.msra.mxu1 %v15280_v7  ;;  %v893_v7 = vld [vmem:[#allocation12 + $0x750] sm:$0xff] }
 0x16d   :  { %3948 = vmatprep.subr.bf16.mxu1 %v15297_v9  ;;  %v1149_v9 = vld [vmem:[#allocation12 + $0xf50] sm:$0xff]  ;;  %v15169_v12 = vcombine.high %v885_v6, %v893_v7  ;;  %v15168_v20 = vcombine.low %v885_v6, %v893_v7 }
 0x16e   :  { %3908 = vmatpush1.bf16.msra.mxu0 %v15040_v14  ;;  %v15425_v13 = vcombine.high %v1141_v8, %v1149_v9  ;;  %v901_v14 = vld [vmem:[#allocation12 + $0x790] sm:$0xff]  ;;  %v15424_v21 = vcombine.low %v1141_v8, %v1149_v9 }
 0x16f   :  { %3909 = vmatprep.subr.bf16.mxu0 %v15057_v17  ;;  %v1157_v17 = vld [vmem:[#allocation12 + $0xf90] sm:$0xff] }
 0x170   :  { %3949 = vmatpush1.bf16.msra.mxu1 %v15296_v15  ;;  %v909_v15 = vld [vmem:[#allocation12 + $0x7d0] sm:$0xff] }
 0x171   :  { %3950 = vmatprep.subr.bf16.mxu1 %v15313_v18  ;;  %v1165_v18 = vld [vmem:[#allocation12 + $0xfd0] sm:$0xff]  ;;  %v15185_v22 = vcombine.high %v901_v14, %v909_v15  ;;  %v15184_v28 = vcombine.low %v901_v14, %v909_v15 }
 0x172   :  { %3910 = vmatpush1.bf16.msra.mxu0 %v15056_v24  ;;  %v15441_v23 = vcombine.high %v1157_v17, %v1165_v18  ;;  %v662_v24 = vld [vmem:[#allocation12 + $0x18] sm:$0xff]  ;;  %v15440_v29 = vcombine.low %v1157_v17, %v1165_v18 }
 0x173   :  { %3911 = vmatprep.subr.bf16.mxu0 %v15073_v26  ;;  %v918_v26 = vld [vmem:[#allocation12 + $0x818] sm:$0xff] }
 0x174   :  { %3951 = vmatpush1.bf16.msra.mxu1 %v15312_v25  ;;  %v670_v25 = vld [vmem:[#allocation12 + $0x58] sm:$0xff] }
 0x175   :  { %3952 = vmatprep.subr.bf16.mxu1 %v15329_v27  ;;  %v926_v27 = vld [vmem:[#allocation12 + $0x858] sm:$0xff]  ;;  %v14947_v30 = vcombine.high %v662_v24, %v670_v25  ;;  %v14946_v36 = vcombine.low %v662_v24, %v670_v25 }
 0x176   :  { %3912 = vmatpush1.bf16.msra.mxu0 %v15072_v32  ;;  %v15203_v31 = vcombine.high %v918_v26, %v926_v27  ;;  %v678_v32 = vld [vmem:[#allocation12 + $0x98] sm:$0xff]  ;;  %v15202_v37 = vcombine.low %v918_v26, %v926_v27 }
 0x177   :  { %3913 = vmatprep.subr.bf16.mxu0 %v15089_v34  ;;  %v934_v34 = vld [vmem:[#allocation12 + $0x898] sm:$0xff] }
 0x178   :  { %3953 = vmatpush1.bf16.msra.mxu1 %v15328_v33  ;;  %v686_v33 = vld [vmem:[#allocation12 + $0xd8] sm:$0xff] }
 0x179   :  { %3954 = vmatprep.subr.bf16.mxu1 %v15345_v35  ;;  %v942_v35 = vld [vmem:[#allocation12 + $0x8d8] sm:$0xff]  ;;  %v14963_v38 = vcombine.high %v678_v32, %v686_v33  ;;  %v14962_v44 = vcombine.low %v678_v32, %v686_v33 }
 0x17a   :  { %3914 = vmatpush1.bf16.msra.mxu0 %v15088_v40  ;;  %v15219_v39 = vcombine.high %v934_v34, %v942_v35  ;;  %v694_v40 = vld [vmem:[#allocation12 + $0x118] sm:$0xff]  ;;  %v15218_v45 = vcombine.low %v934_v34, %v942_v35 }
 0x17b   :  { %3915 = vmatprep.subr.bf16.mxu0 %v15105_v42  ;;  %v950_v42 = vld [vmem:[#allocation12 + $0x918] sm:$0xff] }
 0x17c   :  { %3955 = vmatpush1.bf16.msra.mxu1 %v15344_v41  ;;  %v702_v41 = vld [vmem:[#allocation12 + $0x158] sm:$0xff] }
 0x17d   :  { %3956 = vmatprep.subr.bf16.mxu1 %v15361_v43  ;;  %v958_v43 = vld [vmem:[#allocation12 + $0x958] sm:$0xff]  ;;  %v14979_v46 = vcombine.high %v694_v40, %v702_v41  ;;  %v14978_v52 = vcombine.low %v694_v40, %v702_v41 }
 0x17e   :  { %3916 = vmatpush1.bf16.msra.mxu0 %v15104_v48  ;;  %v15235_v47 = vcombine.high %v950_v42, %v958_v43  ;;  %v710_v48 = vld [vmem:[#allocation12 + $0x198] sm:$0xff]  ;;  %v15234_v53 = vcombine.low %v950_v42, %v958_v43 }
 0x17f   :  { %3917 = vmatprep.subr.bf16.mxu0 %v15121_v50  ;;  %v966_v50 = vld [vmem:[#allocation12 + $0x998] sm:$0xff] }
 0x180   :  { %3957 = vmatpush1.bf16.msra.mxu1 %v15360_v49  ;;  %v718_v49 = vld [vmem:[#allocation12 + $0x1d8] sm:$0xff] }
 0x181   :  { %3958 = vmatprep.subr.bf16.mxu1 %v15377_v51  ;;  %v974_v51 = vld [vmem:[#allocation12 + $0x9d8] sm:$0xff]  ;;  %v14995_v54 = vcombine.high %v710_v48, %v718_v49  ;;  %v14994_v62 = vcombine.low %v710_v48, %v718_v49 }
 0x182   :  { %3918 = vmatpush1.bf16.msra.mxu0 %v15120_v56  ;;  %v15251_v55 = vcombine.high %v966_v50, %v974_v51  ;;  %v726_v56 = vld [vmem:[#allocation12 + $0x218] sm:$0xff]  ;;  %v15250_v63 = vcombine.low %v966_v50, %v974_v51 }
 0x183   :  { %3919 = vmatprep.subr.bf16.mxu0 %v15137_v60  ;;  %v982_v60 = vld [vmem:[#allocation12 + $0xa18] sm:$0xff] }
 0x184   :  { %3959 = vmatpush1.bf16.msra.mxu1 %v15376_v57  ;;  %v734_v57 = vld [vmem:[#allocation12 + $0x258] sm:$0xff] }
 0x185   :  { %3960 = vmatprep.subr.bf16.mxu1 %v15393_v61  ;;  %v990_v61 = vld [vmem:[#allocation12 + $0xa58] sm:$0xff]  ;;  %v15011_v0 = vcombine.high %v726_v56, %v734_v57  ;;  %v15010_v6 = vcombine.low %v726_v56, %v734_v57 }
 0x186   :  { %3920 = vmatpush1.bf16.msra.mxu0 %v15136_v2  ;;  %v15267_v1 = vcombine.high %v982_v60, %v990_v61  ;;  %v742_v2 = vld [vmem:[#allocation12 + $0x298] sm:$0xff]  ;;  %v15266_v7 = vcombine.low %v982_v60, %v990_v61 }
 0x187   :  { %3921 = vmatprep.subr.bf16.mxu0 %v15153_v4  ;;  %v998_v4 = vld [vmem:[#allocation12 + $0xa98] sm:$0xff] }
 0x188   :  { %3961 = vmatpush1.bf16.msra.mxu1 %v15392_v3  ;;  %v750_v3 = vld [vmem:[#allocation12 + $0x2d8] sm:$0xff] }
 0x189   :  { %3962 = vmatprep.subr.bf16.mxu1 %v15409_v5  ;;  %v1006_v5 = vld [vmem:[#allocation12 + $0xad8] sm:$0xff]  ;;  %v15027_v8 = vcombine.high %v742_v2, %v750_v3  ;;  %v15026_v14 = vcombine.low %v742_v2, %v750_v3 }
 0x18a   :  { %3922 = vmatpush1.bf16.msra.mxu0 %v15152_v10  ;;  %v15283_v9 = vcombine.high %v998_v4, %v1006_v5  ;;  %v758_v10 = vld [vmem:[#allocation12 + $0x318] sm:$0xff]  ;;  %v15282_v15 = vcombine.low %v998_v4, %v1006_v5 }
 0x18b   :  { %3923 = vmatprep.subr.bf16.mxu0 %v15169_v12  ;;  %v1014_v12 = vld [vmem:[#allocation12 + $0xb18] sm:$0xff] }
 0x18c   :  { %3963 = vmatpush1.bf16.msra.mxu1 %v15408_v11  ;;  %v766_v11 = vld [vmem:[#allocation12 + $0x358] sm:$0xff] }
 0x18d   :  { %3964 = vmatprep.subr.bf16.mxu1 %v15425_v13  ;;  %v1022_v13 = vld [vmem:[#allocation12 + $0xb58] sm:$0xff]  ;;  %v15043_v17 = vcombine.high %v758_v10, %v766_v11  ;;  %v15042_v24 = vcombine.low %v758_v10, %v766_v11 }
 0x18e   :  { %3924 = vmatpush1.bf16.msra.mxu0 %v15168_v20  ;;  %v15299_v18 = vcombine.high %v1014_v12, %v1022_v13  ;;  %v774_v20 = vld [vmem:[#allocation12 + $0x398] sm:$0xff]  ;;  %v15298_v25 = vcombine.low %v1014_v12, %v1022_v13 }
 0x18f   :  { %3925 = vmatprep.subr.bf16.mxu0 %v15185_v22  ;;  %v1030_v22 = vld [vmem:[#allocation12 + $0xb98] sm:$0xff] }
 0x190   :  { %3965 = vmatpush1.bf16.msra.mxu1 %v15424_v21  ;;  %v782_v21 = vld [vmem:[#allocation12 + $0x3d8] sm:$0xff] }
 0x191   :  { %3966 = vmatprep.subr.bf16.mxu1 %v15441_v23  ;;  %v1038_v23 = vld [vmem:[#allocation12 + $0xbd8] sm:$0xff]  ;;  %v15059_v26 = vcombine.high %v774_v20, %v782_v21  ;;  %v15058_v32 = vcombine.low %v774_v20, %v782_v21 }
 0x192   :  { %3926 = vmatpush1.bf16.msra.mxu0 %v15184_v28  ;;  %v15315_v27 = vcombine.high %v1030_v22, %v1038_v23  ;;  %v790_v28 = vld [vmem:[#allocation12 + $0x418] sm:$0xff]  ;;  %v15314_v33 = vcombine.low %v1030_v22, %v1038_v23 }
 0x193   :  { %3977 = vmatprep.subr.bf16.mxu0 %v14947_v30  ;;  %v1046_v30 = vld [vmem:[#allocation12 + $0xc18] sm:$0xff] }
 0x194   :  { %3967 = vmatpush1.bf16.msra.mxu1 %v15440_v29  ;;  %v798_v29 = vld [vmem:[#allocation12 + $0x458] sm:$0xff] }
 0x195   :  { %4018 = vmatprep.subr.bf16.mxu1 %v15203_v31  ;;  %3928 = vmatmul.mubr.bf16.vlgmr.msra.gmra.mrb[8].mxu0 %v17856_v16  ;;  %v1054_v31 = vld [vmem:[#allocation12 + $0xc58] sm:$0xff]  ;;  %v15075_v34 = vcombine.high %v790_v28, %v798_v29  ;;  %v15074_v40 = vcombine.low %v790_v28, %v798_v29 }
 0x196   :  { %3978 = vmatpush1.bf16.msra.mxu0 %v14946_v36  ;;  %4009 = vmatprep.mubr.bf16.mxu0 %v17850_v58  ;;  %v15331_v35 = vcombine.high %v1046_v30, %v1054_v31  ;;  %v806_v36 = vld [vmem:[#allocation12 + $0x498] sm:$0xff]  ;;  %v15330_v41 = vcombine.low %v1046_v30, %v1054_v31 }
 0x197   :  { %3969 = vmatmul.mubr.bf16.vlgmr.msra.gmra.mrb[8].mxu1 %v17858_v19  ;;  %3979 = vmatprep.subr.bf16.mxu0 %v14963_v38  ;;  %v1062_v38 = vld [vmem:[#allocation12 + $0xc98] sm:$0xff] }
 0x198   :  { %4019 = vmatpush1.bf16.msra.mxu1 %v15202_v37  ;;  %4050 = vmatprep.mubr.bf16.mxu1 %v17852_v59  ;;  %v814_v37 = vld [vmem:[#allocation12 + $0x4d8] sm:$0xff] }
 0x199   :  { %4020 = vmatprep.subr.bf16.mxu1 %v15219_v39  ;;  %v1070_v39 = vld [vmem:[#allocation12 + $0xcd8] sm:$0xff]  ;;  %v15091_v42 = vcombine.high %v806_v36, %v814_v37  ;;  %v15090_v48 = vcombine.low %v806_v36, %v814_v37 }
 0x19a   :  { %3980 = vmatpush1.bf16.msra.mxu0 %v14962_v44  ;;  %v15347_v43 = vcombine.high %v1062_v38, %v1070_v39  ;;  %v822_v44 = vld [vmem:[#allocation12 + $0x518] sm:$0xff]  ;;  %v15346_v49 = vcombine.low %v1062_v38, %v1070_v39 }
 0x19b   :  { %3981 = vmatprep.subr.bf16.mxu0 %v14979_v46  ;;  %v1078_v46 = vld [vmem:[#allocation12 + $0xd18] sm:$0xff] }
 0x19c   :  { %4021 = vmatpush1.bf16.msra.mxu1 %v15218_v45  ;;  %v830_v45 = vld [vmem:[#allocation12 + $0x558] sm:$0xff] }
 0x19d   :  { %4022 = vmatprep.subr.bf16.mxu1 %v15235_v47  ;;  %v1086_v47 = vld [vmem:[#allocation12 + $0xd58] sm:$0xff]  ;;  %v15107_v50 = vcombine.high %v822_v44, %v830_v45  ;;  %v15106_v56 = vcombine.low %v822_v44, %v830_v45 }
 0x19e   :  { %3982 = vmatpush1.bf16.msra.mxu0 %v14978_v52  ;;  %v15363_v51 = vcombine.high %v1078_v46, %v1086_v47  ;;  %v838_v52 = vld [vmem:[#allocation12 + $0x598] sm:$0xff]  ;;  %v15362_v57 = vcombine.low %v1078_v46, %v1086_v47 }
 0x19f   :  { %3983 = vmatprep.subr.bf16.mxu0 %v14995_v54  ;;  %v1094_v54 = vld [vmem:[#allocation12 + $0xd98] sm:$0xff] }
 0x1a0   :  { %4023 = vmatpush1.bf16.msra.mxu1 %v15234_v53  ;;  %v846_v53 = vld [vmem:[#allocation12 + $0x5d8] sm:$0xff] }
 0x1a1   :  { %4024 = vmatprep.subr.bf16.mxu1 %v15251_v55  ;;  %v1102_v55 = vld [vmem:[#allocation12 + $0xdd8] sm:$0xff]  ;;  %v15123_v60 = vcombine.high %v838_v52, %v846_v53  ;;  %v15122_v2 = vcombine.low %v838_v52, %v846_v53 }
 0x1a2   :  { %3984 = vmatpush1.bf16.msra.mxu0 %v14994_v62  ;;  %v15379_v61 = vcombine.high %v1094_v54, %v1102_v55  ;;  %v854_v62 = vld [vmem:[#allocation12 + $0x618] sm:$0xff]  ;;  %v15378_v3 = vcombine.low %v1094_v54, %v1102_v55 }
 0x1a3   :  { %3985 = vmatprep.subr.bf16.mxu0 %v15011_v0  ;;  %v1110_v0 = vld [vmem:[#allocation12 + $0xe18] sm:$0xff] }
 0x1a4   :  { %4025 = vmatpush1.bf16.msra.mxu1 %v15250_v63  ;;  %v862_v63 = vld [vmem:[#allocation12 + $0x658] sm:$0xff] }
 0x1a5   :  { %4026 = vmatprep.subr.bf16.mxu1 %v15267_v1  ;;  %v1118_v1 = vld [vmem:[#allocation12 + $0xe58] sm:$0xff]  ;;  %v15139_v4 = vcombine.high %v854_v62, %v862_v63  ;;  %v15138_v10 = vcombine.low %v854_v62, %v862_v63 }
 0x1a6   :  { %3986 = vmatpush1.bf16.msra.mxu0 %v15010_v6  ;;  %v15395_v5 = vcombine.high %v1110_v0, %v1118_v1  ;;  %v870_v6 = vld [vmem:[#allocation12 + $0x698] sm:$0xff]  ;;  %v15394_v11 = vcombine.low %v1110_v0, %v1118_v1 }
 0x1a7   :  { %3987 = vmatprep.subr.bf16.mxu0 %v15027_v8  ;;  %v1126_v8 = vld [vmem:[#allocation12 + $0xe98] sm:$0xff] }
 0x1a8   :  { %4027 = vmatpush1.bf16.msra.mxu1 %v15266_v7  ;;  %v878_v7 = vld [vmem:[#allocation12 + $0x6d8] sm:$0xff] }
 0x1a9   :  { %4028 = vmatprep.subr.bf16.mxu1 %v15283_v9  ;;  %v1134_v9 = vld [vmem:[#allocation12 + $0xed8] sm:$0xff]  ;;  %v15155_v12 = vcombine.high %v870_v6, %v878_v7  ;;  %v15154_v20 = vcombine.low %v870_v6, %v878_v7 }
 0x1aa   :  { %3988 = vmatpush1.bf16.msra.mxu0 %v15026_v14  ;;  %v15411_v13 = vcombine.high %v1126_v8, %v1134_v9  ;;  %v886_v14 = vld [vmem:[#allocation12 + $0x718] sm:$0xff]  ;;  %v15410_v21 = vcombine.low %v1126_v8, %v1134_v9 }
 0x1ab   :  { %3989 = vmatprep.subr.bf16.mxu0 %v15043_v17  ;;  %v1142_v17 = vld [vmem:[#allocation12 + $0xf18] sm:$0xff] }
 0x1ac   :  { %4029 = vmatpush1.bf16.msra.mxu1 %v15282_v15  ;;  %v894_v15 = vld [vmem:[#allocation12 + $0x758] sm:$0xff] }
 0x1ad   :  { %4030 = vmatprep.subr.bf16.mxu1 %v15299_v18  ;;  %v1150_v18 = vld [vmem:[#allocation12 + $0xf58] sm:$0xff]  ;;  %v15171_v22 = vcombine.high %v886_v14, %v894_v15  ;;  %v15170_v28 = vcombine.low %v886_v14, %v894_v15 }
 0x1ae   :  { %3990 = vmatpush1.bf16.msra.mxu0 %v15042_v24  ;;  %v15427_v23 = vcombine.high %v1142_v17, %v1150_v18  ;;  %v902_v24 = vld [vmem:[#allocation12 + $0x798] sm:$0xff]  ;;  %v15426_v29 = vcombine.low %v1142_v17, %v1150_v18 }
 0x1af   :  { %3991 = vmatprep.subr.bf16.mxu0 %v15059_v26  ;;  %v1158_v26 = vld [vmem:[#allocation12 + $0xf98] sm:$0xff] }
 0x1b0   :  { %4031 = vmatpush1.bf16.msra.mxu1 %v15298_v25  ;;  %v910_v25 = vld [vmem:[#allocation12 + $0x7d8] sm:$0xff] }
 0x1b1   :  { %4032 = vmatprep.subr.bf16.mxu1 %v15315_v27  ;;  %v1166_v27 = vld [vmem:[#allocation12 + $0xfd8] sm:$0xff]  ;;  %v15187_v30 = vcombine.high %v902_v24, %v910_v25  ;;  %v15186_v36 = vcombine.low %v902_v24, %v910_v25 }
 0x1b2   :  { %3992 = vmatpush1.bf16.msra.mxu0 %v15058_v32  ;;  %v15443_v31 = vcombine.high %v1158_v26, %v1166_v27  ;;  %v663_v32 = vld [vmem:[#allocation12 + $0x20] sm:$0xff]  ;;  %v15442_v37 = vcombine.low %v1158_v26, %v1166_v27 }
 0x1b3   :  { %3993 = vmatprep.subr.bf16.mxu0 %v15075_v34  ;;  %v919_v34 = vld [vmem:[#allocation12 + $0x820] sm:$0xff] }
 0x1b4   :  { %4033 = vmatpush1.bf16.msra.mxu1 %v15314_v33  ;;  %v671_v33 = vld [vmem:[#allocation12 + $0x60] sm:$0xff] }
 0x1b5   :  { %4034 = vmatprep.subr.bf16.mxu1 %v15331_v35  ;;  %v927_v35 = vld [vmem:[#allocation12 + $0x860] sm:$0xff]  ;;  %v14949_v38 = vcombine.high %v663_v32, %v671_v33  ;;  %v14948_v44 = vcombine.low %v663_v32, %v671_v33 }
 0x1b6   :  { %3994 = vmatpush1.bf16.msra.mxu0 %v15074_v40  ;;  %v15205_v39 = vcombine.high %v919_v34, %v927_v35  ;;  %v679_v40 = vld [vmem:[#allocation12 + $0xa0] sm:$0xff]  ;;  %v15204_v45 = vcombine.low %v919_v34, %v927_v35 }
 0x1b7   :  { %3995 = vmatprep.subr.bf16.mxu0 %v15091_v42  ;;  %v935_v42 = vld [vmem:[#allocation12 + $0x8a0] sm:$0xff] }
 0x1b8   :  { %4035 = vmatpush1.bf16.msra.mxu1 %v15330_v41  ;;  %v687_v41 = vld [vmem:[#allocation12 + $0xe0] sm:$0xff] }
 0x1b9   :  { %4036 = vmatprep.subr.bf16.mxu1 %v15347_v43  ;;  %v943_v43 = vld [vmem:[#allocation12 + $0x8e0] sm:$0xff]  ;;  %v14965_v46 = vcombine.high %v679_v40, %v687_v41  ;;  %v14964_v52 = vcombine.low %v679_v40, %v687_v41 }
 0x1ba   :  { %3996 = vmatpush1.bf16.msra.mxu0 %v15090_v48  ;;  %v15221_v47 = vcombine.high %v935_v42, %v943_v43  ;;  %v695_v48 = vld [vmem:[#allocation12 + $0x120] sm:$0xff]  ;;  %v15220_v53 = vcombine.low %v935_v42, %v943_v43 }
 0x1bb   :  { %3997 = vmatprep.subr.bf16.mxu0 %v15107_v50  ;;  %v951_v50 = vld [vmem:[#allocation12 + $0x920] sm:$0xff] }
 0x1bc   :  { %4037 = vmatpush1.bf16.msra.mxu1 %v15346_v49  ;;  %v703_v49 = vld [vmem:[#allocation12 + $0x160] sm:$0xff] }
 0x1bd   :  { %4038 = vmatprep.subr.bf16.mxu1 %v15363_v51  ;;  %v959_v51 = vld [vmem:[#allocation12 + $0x960] sm:$0xff]  ;;  %v14981_v54 = vcombine.high %v695_v48, %v703_v49  ;;  %v14980_v62 = vcombine.low %v695_v48, %v703_v49 }
 0x1be   :  { %3998 = vmatpush1.bf16.msra.mxu0 %v15106_v56  ;;  %v15237_v55 = vcombine.high %v951_v50, %v959_v51  ;;  %v711_v56 = vld [vmem:[#allocation12 + $0x1a0] sm:$0xff]  ;;  %v15236_v63 = vcombine.low %v951_v50, %v959_v51 }
 0x1bf   :  { %3999 = vmatprep.subr.bf16.mxu0 %v15123_v60  ;;  %v967_v60 = vld [vmem:[#allocation12 + $0x9a0] sm:$0xff] }
 0x1c0   :  { %4039 = vmatpush1.bf16.msra.mxu1 %v15362_v57  ;;  %v719_v57 = vld [vmem:[#allocation12 + $0x1e0] sm:$0xff] }
 0x1c1   :  { %4040 = vmatprep.subr.bf16.mxu1 %v15379_v61  ;;  %v975_v61 = vld [vmem:[#allocation12 + $0x9e0] sm:$0xff]  ;;  %v14997_v0 = vcombine.high %v711_v56, %v719_v57  ;;  %v14996_v6 = vcombine.low %v711_v56, %v719_v57 }
 0x1c2   :  { %4000 = vmatpush1.bf16.msra.mxu0 %v15122_v2  ;;  %v15253_v1 = vcombine.high %v967_v60, %v975_v61  ;;  %v727_v2 = vld [vmem:[#allocation12 + $0x220] sm:$0xff]  ;;  %v15252_v7 = vcombine.low %v967_v60, %v975_v61 }
 0x1c3   :  { %4001 = vmatprep.subr.bf16.mxu0 %v15139_v4  ;;  %v983_v4 = vld [vmem:[#allocation12 + $0xa20] sm:$0xff] }
 0x1c4   :  { %4041 = vmatpush1.bf16.msra.mxu1 %v15378_v3  ;;  %v735_v3 = vld [vmem:[#allocation12 + $0x260] sm:$0xff] }
 0x1c5   :  { %4042 = vmatprep.subr.bf16.mxu1 %v15395_v5  ;;  %v991_v5 = vld [vmem:[#allocation12 + $0xa60] sm:$0xff]  ;;  %v15013_v8 = vcombine.high %v727_v2, %v735_v3  ;;  %v15012_v14 = vcombine.low %v727_v2, %v735_v3 }
 0x1c6   :  { %4002 = vmatpush1.bf16.msra.mxu0 %v15138_v10  ;;  %v15269_v9 = vcombine.high %v983_v4, %v991_v5  ;;  %v743_v10 = vld [vmem:[#allocation12 + $0x2a0] sm:$0xff]  ;;  %v15268_v15 = vcombine.low %v983_v4, %v991_v5 }
 0x1c7   :  { %4003 = vmatprep.subr.bf16.mxu0 %v15155_v12  ;;  %v999_v12 = vld [vmem:[#allocation12 + $0xaa0] sm:$0xff] }
 0x1c8   :  { %4043 = vmatpush1.bf16.msra.mxu1 %v15394_v11  ;;  %v751_v11 = vld [vmem:[#allocation12 + $0x2e0] sm:$0xff] }
 0x1c9   :  { %4044 = vmatprep.subr.bf16.mxu1 %v15411_v13  ;;  %v1007_v13 = vld [vmem:[#allocation12 + $0xae0] sm:$0xff]  ;;  %v15029_v17 = vcombine.high %v743_v10, %v751_v11  ;;  %v15028_v24 = vcombine.low %v743_v10, %v751_v11 }
 0x1ca   :  { %4004 = vmatpush1.bf16.msra.mxu0 %v15154_v20  ;;  %v15285_v18 = vcombine.high %v999_v12, %v1007_v13  ;;  %v759_v20 = vld [vmem:[#allocation12 + $0x320] sm:$0xff]  ;;  %v15284_v25 = vcombine.low %v999_v12, %v1007_v13 }
 0x1cb   :  { %4005 = vmatprep.subr.bf16.mxu0 %v15171_v22  ;;  %v1015_v22 = vld [vmem:[#allocation12 + $0xb20] sm:$0xff] }
 0x1cc   :  { %4045 = vmatpush1.bf16.msra.mxu1 %v15410_v21  ;;  %v767_v21 = vld [vmem:[#allocation12 + $0x360] sm:$0xff] }
 0x1cd   :  { %4046 = vmatprep.subr.bf16.mxu1 %v15427_v23  ;;  %v1023_v23 = vld [vmem:[#allocation12 + $0xb60] sm:$0xff]  ;;  %v15045_v26 = vcombine.high %v759_v20, %v767_v21 }
 0x1ce   :  { %4006 = vmatpush1.bf16.msra.mxu0 %v15170_v28  ;;  %v15301_v28 = vcombine.high %v1015_v22, %v1023_v23  ;;  %v1031_v33 = vld [vmem:[#allocation12 + $0xba0] sm:$0xff]  ;;  %v15300_v42 = vcombine.low %v1015_v22, %v1023_v23 }
 0x1cf   :  { %4007 = vmatprep.subr.bf16.mxu0 %v15187_v30  ;;  %v783_v30 = vld [vmem:[#allocation12 + $0x3e0] sm:$0xff] }
 0x1d0   :  { %4047 = vmatpush1.bf16.msra.mxu1 %v15426_v29  ;;  %v775_v29 = vld [vmem:[#allocation12 + $0x3a0] sm:$0xff] }
 0x1d1   :  { %4048 = vmatprep.subr.bf16.mxu1 %v15443_v31  ;;  %v1039_v34 = vld [vmem:[#allocation12 + $0xbe0] sm:$0xff]  ;;  %v15061_v43 = vcombine.high %v775_v29, %v783_v30  ;;  %v15060_v50 = vcombine.low %v775_v29, %v783_v30 }
 0x1d2   :  { %4008 = vmatpush1.bf16.msra.mxu0 %v15186_v36  ;;  %v1047_v48 = vld [vmem:[#allocation12 + $0xc20] sm:$0xff]  ;;  %v15316_v51 = vcombine.low %v1031_v33, %v1039_v34 }
 0x1d3   :  { %4059 = vmatprep.subr.bf16.mxu0 %v14949_v38  ;;  %v15044_v38 = vcombine.low %v759_v20, %v767_v21  ;;  %v1055_v49 = vld [vmem:[#allocation12 + $0xc60] sm:$0xff] }
 0x1d4   :  { %4049 = vmatpush1.bf16.msra.mxu1 %v15442_v37  ;;  %v1063_v56 = vld [vmem:[#allocation12 + $0xca0] sm:$0xff]  ;;  %v15332_v61 = vcombine.low %v1047_v48, %v1055_v49 }
 0x1d5   :  { %4100 = vmatprep.subr.bf16.mxu1 %v15205_v39  ;;  %4010 = vmatmul.mubr.bf16.vlgmr.msra.gmra.mrb[12].mxu0 %v17856_v16  ;;  %v1071_v57 = vld [vmem:[#allocation12 + $0xce0] sm:$0xff] }
 0x1d6   :  { %4060 = vmatpush1.bf16.msra.mxu0 %v14948_v44  ;;  %4091 = vmatprep.mubr.bf16.mxu0 %v17850_v58  ;;  %v1079_v2 = vld [vmem:[#allocation12 + $0xd20] sm:$0xff]  ;;  %v15348_v5 = vcombine.low %v1063_v56, %v1071_v57 }
 0x1d7   :  { %4051 = vmatmul.mubr.bf16.vlgmr.msra.gmra.mrb[12].mxu1 %v17858_v19  ;;  %4061 = vmatprep.subr.bf16.mxu0 %v14965_v46  ;;  %v791_v46 = vld [vmem:[#allocation12 + $0x420] sm:$0xff] }
 0x1d8   :  { %4101 = vmatpush1.bf16.msra.mxu1 %v15204_v45  ;;  %4132 = vmatprep.mubr.bf16.mxu1 %v17852_v59  ;;  %v15317_v45 = vcombine.high %v1031_v33, %v1039_v34  ;;  %v1087_v3 = vld [vmem:[#allocation12 + $0xd60] sm:$0xff] }
 0x1d9   :  { %4102 = vmatprep.subr.bf16.mxu1 %v15221_v47  ;;  %v799_v47 = vld [vmem:[#allocation12 + $0x460] sm:$0xff]  ;;  %v15364_v13 = vcombine.low %v1079_v2, %v1087_v3 }
 0x1da   :  { %4062 = vmatpush1.bf16.msra.mxu0 %v14964_v52  ;;  %v15077_v52 = vcombine.high %v791_v46, %v799_v47  ;;  %v15076_v60 = vcombine.low %v791_v46, %v799_v47  ;;  %v1095_v10 = vld [vmem:[#allocation12 + $0xda0] sm:$0xff] }
 0x1db   :  { %4063 = vmatprep.subr.bf16.mxu0 %v14981_v54  ;;  %v807_v54 = vld [vmem:[#allocation12 + $0x4a0] sm:$0xff] }
 0x1dc   :  { %4103 = vmatpush1.bf16.msra.mxu1 %v15220_v53  ;;  %v15333_v53 = vcombine.high %v1047_v48, %v1055_v49  ;;  %v1103_v11 = vld [vmem:[#allocation12 + $0xde0] sm:$0xff] }
 0x1dd   :  { %4104 = vmatprep.subr.bf16.mxu1 %v15237_v55  ;;  %v815_v55 = vld [vmem:[#allocation12 + $0x4e0] sm:$0xff]  ;;  %v15380_v23 = vcombine.low %v1095_v10, %v1103_v11 }
 0x1de   :  { %4064 = vmatpush1.bf16.msra.mxu0 %v14980_v62  ;;  %v15093_v62 = vcombine.high %v807_v54, %v815_v55  ;;  %v15092_v4 = vcombine.low %v807_v54, %v815_v55  ;;  %v1111_v20 = vld [vmem:[#allocation12 + $0xe20] sm:$0xff]  ;;  %v920_v54 = vld [vmem:[#allocation12 + $0x828] sm:$0xff] }
 0x1df   :  { %4065 = vmatprep.subr.bf16.mxu0 %v14997_v0  ;;  %v823_v0 = vld [vmem:[#allocation12 + $0x520] sm:$0xff]  ;;  %v928_v55 = vld [vmem:[#allocation12 + $0x868] sm:$0xff] }
 0x1e0   :  { %4105 = vmatpush1.bf16.msra.mxu1 %v15236_v63  ;;  %v15349_v63 = vcombine.high %v1063_v56, %v1071_v57  ;;  %v1119_v21 = vld [vmem:[#allocation12 + $0xe60] sm:$0xff] }
 0x1e1   :  { %4106 = vmatprep.subr.bf16.mxu1 %v15253_v1  ;;  %v831_v1 = vld [vmem:[#allocation12 + $0x560] sm:$0xff] }
 0x1e2   :  { %4066 = vmatpush1.bf16.msra.mxu0 %v14996_v6  ;;  %v15109_v6 = vcombine.high %v823_v0, %v831_v1  ;;  %v15108_v12 = vcombine.low %v823_v0, %v831_v1  ;;  %v1135_v29 = vld [vmem:[#allocation12 + $0xee0] sm:$0xff]  ;;  %v936_v0 = vld [vmem:[#allocation12 + $0x8a8] sm:$0xff] }
 0x1e3   :  { %4067 = vmatprep.subr.bf16.mxu0 %v15013_v8  ;;  %v839_v8 = vld [vmem:[#allocation12 + $0x5a0] sm:$0xff]  ;;  %v944_v1 = vld [vmem:[#allocation12 + $0x8e8] sm:$0xff] }
 0x1e4   :  { %4107 = vmatpush1.bf16.msra.mxu1 %v15252_v7  ;;  %v15365_v7 = vcombine.high %v1079_v2, %v1087_v3  ;;  %v887_v34 = vld [vmem:[#allocation12 + $0x720] sm:$0xff]  ;;  %v15206_v3 = vcombine.low %v920_v54, %v928_v55 }
 0x1e5   :  { %4108 = vmatprep.subr.bf16.mxu1 %v15269_v9  ;;  %v847_v9 = vld [vmem:[#allocation12 + $0x5e0] sm:$0xff] }
 0x1e6   :  { %4068 = vmatpush1.bf16.msra.mxu0 %v15012_v14  ;;  %v15125_v14 = vcombine.high %v839_v8, %v847_v9  ;;  %v15124_v22 = vcombine.low %v839_v8, %v847_v9  ;;  %v1159_v46 = vld [vmem:[#allocation12 + $0xfa0] sm:$0xff]  ;;  %v952_v8 = vld [vmem:[#allocation12 + $0x928] sm:$0xff] }
 0x1e7   :  { %4069 = vmatprep.subr.bf16.mxu0 %v15029_v17  ;;  %v855_v17 = vld [vmem:[#allocation12 + $0x620] sm:$0xff]  ;;  %v960_v9 = vld [vmem:[#allocation12 + $0x968] sm:$0xff] }
 0x1e8   :  { %4109 = vmatpush1.bf16.msra.mxu1 %v15268_v15  ;;  %v3765_v27 = vpop.f32.mrb[0].mxu0  ;;  %v15381_v15 = vcombine.high %v1095_v10, %v1103_v11  ;;  %v1167_v47 = vld [vmem:[#allocation12 + $0xfe0] sm:$0xff]  ;;  %v15222_v11 = vcombine.low %v936_v0, %v944_v1 }
 0x1e9   :  { %4110 = vmatprep.subr.bf16.mxu1 %v15285_v18  ;;  %v3767_v32 = vpop.f32.mrb[1].mxu0  ;;  %v863_v18 = vld [vmem:[#allocation12 + $0x660] sm:$0xff]  ;;  %v15444_v57 = vcombine.low %v1159_v46, %v1167_v47 }
 0x1ea   :  { %v3806_v31 = vpop.f32.mrb[0].mxu1  ;;  %v3769_v37 = vpop.f32.mrb[2].mxu0  ;;  %4070 = vmatpush1.bf16.msra.mxu0 %v15028_v24  ;;  %v15141_v24 = vcombine.high %v855_v17, %v863_v18  ;;  %v15140_v30 = vcombine.low %v855_v17, %v863_v18  ;;  %v968_v17 = vld [vmem:[#allocation12 + $0x9a8] sm:$0xff] }
 0x1eb   :  { %v17876_v35 = vadd.f32 %v3806_v31, %v3765_v27  ;;  %v3808_v36 = vpop.f32.mrb[1].mxu1  ;;  %v3770_v41 = vpop.f32.mrb[3].mxu0  ;;  %4071 = vmatprep.subr.bf16.mxu0 %v15045_v26  ;;  %v871_v26 = vld [vmem:[#allocation12 + $0x6a0] sm:$0xff]  ;;  %v15396_v31 = vcombine.low %v1111_v20, %v1119_v21  ;;  %v976_v18 = vld [vmem:[#allocation12 + $0x9e8] sm:$0xff] }
 0x1ec   :  { %v17878_v39 = vadd.f32 %v3808_v36, %v3767_v32  ;;  %v3810_v40 = vpop.f32.mrb[2].mxu1  ;;  %4111 = vmatpush1.bf16.msra.mxu1 %v15284_v25  ;;  %v15397_v25 = vcombine.high %v1111_v20, %v1119_v21  ;;  %v879_v27 = vld [vmem:[#allocation12 + $0x6e0] sm:$0xff]  ;;  %v15238_v21 = vcombine.low %v952_v8, %v960_v9 }
 0x1ed   :  { %v3811_v44 = vpop.f32.mrb[3].mxu1  ;;  %4112 = vmatprep.subr.bf16.mxu1 %v15301_v28  ;;  %v1127_v28 = vld [vmem:[#allocation12 + $0xea0] sm:$0xff]  ;;  %v15157_v32 = vcombine.high %v871_v26, %v879_v27  ;;  %v15156_v40 = vcombine.low %v871_v26, %v879_v27  ;;  %v984_v26 = vld [vmem:[#allocation12 + $0xa28] sm:$0xff] }
 0x1ee   :  { %4072 = vmatpush1.bf16.msra.mxu0 %v15044_v38  ;;  %v15413_v33 = vcombine.high %v1127_v28, %v1135_v29  ;;  %v895_v36 = vld [vmem:[#allocation12 + $0x760] sm:$0xff]  ;;  %v15412_v41 = vcombine.low %v1127_v28, %v1135_v29  ;;  %v992_v27 = vld [vmem:[#allocation12 + $0xa68] sm:$0xff]  ;;  %v15254_v29 = vcombine.low %v968_v17, %v976_v18 }
 0x1ef   :  { %4073 = vmatprep.subr.bf16.mxu0 %v15061_v43  ;;  %v1143_v37 = vld [vmem:[#allocation12 + $0xf20] sm:$0xff]  ;;  %v15172_v48 = vcombine.low %v887_v34, %v895_v36 }
 0x1f0   :  { %4113 = vmatpush1.bf16.msra.mxu1 %v15300_v42  ;;  %v1151_v38 = vld [vmem:[#allocation12 + $0xf60] sm:$0xff]  ;;  %v15173_v42 = vcombine.high %v887_v34, %v895_v36  ;;  %v1000_v34 = vld [vmem:[#allocation12 + $0xaa8] sm:$0xff] }
 0x1f1   :  { %4114 = vmatprep.subr.bf16.mxu1 %v15317_v45  ;;  %v15429_v43 = vcombine.high %v1143_v37, %v1151_v38  ;;  %v903_v44 = vld [vmem:[#allocation12 + $0x7a0] sm:$0xff]  ;;  %v15428_v49 = vcombine.low %v1143_v37, %v1151_v38  ;;  %v1008_v36 = vld [vmem:[#allocation12 + $0xae8] sm:$0xff]  ;;  %v15270_v38 = vcombine.low %v984_v26, %v992_v27 }
 0x1f2   :  { %4074 = vmatpush1.bf16.msra.mxu0 %v15060_v50  ;;  %v911_v45 = vld [vmem:[#allocation12 + $0x7e0] sm:$0xff] }
 0x1f3   :  { %4075 = vmatprep.subr.bf16.mxu0 %v15077_v52  ;;  %v15189_v50 = vcombine.high %v903_v44, %v911_v45  ;;  %v664_v52 = vld [vmem:[#allocation12 + $0x28] sm:$0xff]  ;;  %v15188_v56 = vcombine.low %v903_v44, %v911_v45 }
 0x1f4   :  { %4115 = vmatpush1.bf16.msra.mxu1 %v15316_v51  ;;  %v15445_v51 = vcombine.high %v1159_v46, %v1167_v47  ;;  %v1016_v44 = vld [vmem:[#allocation12 + $0xb28] sm:$0xff]  ;;  %v15286_v47 = vcombine.low %v1000_v34, %v1008_v36 }
 0x1f5   :  { %4116 = vmatprep.subr.bf16.mxu1 %v15333_v53  ;;  %v672_v53 = vld [vmem:[#allocation12 + $0x68] sm:$0xff] }
 0x1f6   :  { %4076 = vmatpush1.bf16.msra.mxu0 %v15076_v60  ;;  %v14951_v60 = vcombine.high %v664_v52, %v672_v53  ;;  %v14950_v2 = vcombine.low %v664_v52, %v672_v53  ;;  %v1024_v45 = vld [vmem:[#allocation12 + $0xb68] sm:$0xff] }
 0x1f7   :  { %4077 = vmatprep.subr.bf16.mxu0 %v15093_v62  ;;  %v680_v62 = vld [vmem:[#allocation12 + $0xa8] sm:$0xff] }
 0x1f8   :  { %4117 = vmatpush1.bf16.msra.mxu1 %v15332_v61  ;;  %v15207_v61 = vcombine.high %v920_v54, %v928_v55  ;;  %v784_v52 = vld [vmem:[#allocation12 + $0x3e8] sm:$0xff] }
 0x1f9   :  { %4118 = vmatprep.subr.bf16.mxu1 %v15349_v63  ;;  %v688_v63 = vld [vmem:[#allocation12 + $0xe8] sm:$0xff] }
 0x1fa   :  { %4078 = vmatpush1.bf16.msra.mxu0 %v15092_v4  ;;  %v14967_v4 = vcombine.high %v680_v62, %v688_v63  ;;  %v14966_v10 = vcombine.low %v680_v62, %v688_v63  ;;  %v1032_v55 = vld [vmem:[#allocation12 + $0xba8] sm:$0xff] }
 0x1fb   :  { %4079 = vmatprep.subr.bf16.mxu0 %v15109_v6  ;;  %v696_v6 = vld [vmem:[#allocation12 + $0x128] sm:$0xff] }
 0x1fc   :  { %4119 = vmatpush1.bf16.msra.mxu1 %v15348_v5  ;;  %v15223_v5 = vcombine.high %v936_v0, %v944_v1 }
 0x1fd   :  { %4120 = vmatprep.subr.bf16.mxu1 %v15365_v7  ;;  %v704_v7 = vld [vmem:[#allocation12 + $0x168] sm:$0xff] }
 0x1fe   :  { %4080 = vmatpush1.bf16.msra.mxu0 %v15108_v12  ;;  %v14983_v12 = vcombine.high %v696_v6, %v704_v7  ;;  %v14982_v20 = vcombine.low %v696_v6, %v704_v7  ;;  %v792_v6 = vld [vmem:[#allocation12 + $0x428] sm:$0xff] }
 0x1ff   :  { %4081 = vmatprep.subr.bf16.mxu0 %v15125_v14  ;;  %v712_v14 = vld [vmem:[#allocation12 + $0x1a8] sm:$0xff] }
 0x200   :  { %4121 = vmatpush1.bf16.msra.mxu1 %v15364_v13  ;;  %v15239_v13 = vcombine.high %v952_v8, %v960_v9  ;;  %v800_v7 = vld [vmem:[#allocation12 + $0x468] sm:$0xff] }
 0x201   :  { %4122 = vmatprep.subr.bf16.mxu1 %v15381_v15  ;;  %v720_v15 = vld [vmem:[#allocation12 + $0x1e8] sm:$0xff] }
 0x202   :  { %4082 = vmatpush1.bf16.msra.mxu0 %v15124_v22  ;;  %v14999_v22 = vcombine.high %v712_v14, %v720_v15  ;;  %v14998_v28 = vcombine.low %v712_v14, %v720_v15  ;;  %v1048_v8 = vld [vmem:[#allocation12 + $0xc28] sm:$0xff] }
 0x203   :  { %4083 = vmatprep.subr.bf16.mxu0 %v15141_v24  ;;  %v728_v24 = vld [vmem:[#allocation12 + $0x228] sm:$0xff] }
 0x204   :  { %4123 = vmatpush1.bf16.msra.mxu1 %v15380_v23  ;;  %v15255_v23 = vcombine.high %v968_v17, %v976_v18  ;;  %v1056_v9 = vld [vmem:[#allocation12 + $0xc68] sm:$0xff] }
 0x205   :  { %4124 = vmatprep.subr.bf16.mxu1 %v15397_v25  ;;  %v736_v25 = vld [vmem:[#allocation12 + $0x268] sm:$0xff] }
 0x206   :  { %4084 = vmatpush1.bf16.msra.mxu0 %v15140_v30  ;;  %v15015_v30 = vcombine.high %v728_v24, %v736_v25  ;;  %v15014_v37 = vcombine.low %v728_v24, %v736_v25  ;;  %v808_v14 = vld [vmem:[#allocation12 + $0x4a8] sm:$0xff] }
 0x207   :  { %4085 = vmatprep.subr.bf16.mxu0 %v15157_v32  ;;  %v744_v32 = vld [vmem:[#allocation12 + $0x2a8] sm:$0xff] }
 0x208   :  { %4125 = vmatpush1.bf16.msra.mxu1 %v15396_v31  ;;  %v15271_v31 = vcombine.high %v984_v26, %v992_v27  ;;  %v816_v15 = vld [vmem:[#allocation12 + $0x4e8] sm:$0xff] }
 0x209   :  { %4126 = vmatprep.subr.bf16.mxu1 %v15413_v33  ;;  %v752_v33 = vld [vmem:[#allocation12 + $0x2e8] sm:$0xff] }
 0x20a   :  { %4086 = vmatpush1.bf16.msra.mxu0 %v15156_v40  ;;  %v15031_v40 = vcombine.high %v744_v32, %v752_v33  ;;  %v15030_v46 = vcombine.low %v744_v32, %v752_v33  ;;  %v1064_v17 = vld [vmem:[#allocation12 + $0xca8] sm:$0xff] }
 0x20b   :  { %4087 = vmatprep.subr.bf16.mxu0 %v15173_v42  ;;  %v760_v42 = vld [vmem:[#allocation12 + $0x328] sm:$0xff] }
 0x20c   :  { %4127 = vmatpush1.bf16.msra.mxu1 %v15412_v41  ;;  %v15287_v41 = vcombine.high %v1000_v34, %v1008_v36  ;;  %v1072_v18 = vld [vmem:[#allocation12 + $0xce8] sm:$0xff] }
 0x20d   :  { %4128 = vmatprep.subr.bf16.mxu1 %v15429_v43  ;;  %v768_v43 = vld [vmem:[#allocation12 + $0x368] sm:$0xff] }
 0x20e   :  { %4088 = vmatpush1.bf16.msra.mxu0 %v15172_v48  ;;  %v15047_v48 = vcombine.high %v760_v42, %v768_v43  ;;  %v15046_v62 = vcombine.low %v760_v42, %v768_v43  ;;  %v824_v24 = vld [vmem:[#allocation12 + $0x528] sm:$0xff] }
 0x20f   :  { %4089 = vmatprep.subr.bf16.mxu0 %v15189_v50  ;;  %v15303_v50 = vcombine.high %v1016_v44, %v1024_v45  ;;  %v832_v25 = vld [vmem:[#allocation12 + $0x568] sm:$0xff] }
 0x210   :  { %4129 = vmatpush1.bf16.msra.mxu1 %v15428_v49  ;;  %v1080_v26 = vld [vmem:[#allocation12 + $0xd28] sm:$0xff] }
 0x211   :  { %4130 = vmatprep.subr.bf16.mxu1 %v15445_v51  ;;  %v776_v51 = vld [vmem:[#allocation12 + $0x3a8] sm:$0xff] }
 0x212   :  { %4090 = vmatpush1.bf16.msra.mxu0 %v15188_v56  ;;  %v1040_v56 = vld [vmem:[#allocation12 + $0xbe8] sm:$0xff] }
 0x213   :  { %4141 = vmatprep.subr.bf16.mxu0 %v14951_v60  ;;  %v1088_v27 = vld [vmem:[#allocation12 + $0xd68] sm:$0xff] }
 0x214   :  { %4131 = vmatpush1.bf16.msra.mxu1 %v15444_v57  ;;  %v840_v32 = vld [vmem:[#allocation12 + $0x5a8] sm:$0xff] }
 0x215   :  { %4182 = vmatprep.subr.bf16.mxu1 %v15207_v61  ;;  %4092 = vmatmul.mubr.bf16.vlgmr.msra.gmra.mrb[16].mxu0 %v17856_v16  ;;  %v848_v33 = vld [vmem:[#allocation12 + $0x5e8] sm:$0xff] }
 0x216   :  { %4142 = vmatpush1.bf16.msra.mxu0 %v14950_v2  ;;  %4173 = vmatprep.mubr.bf16.mxu0 %v17850_v58  ;;  %v15302_v2 = vcombine.low %v1016_v44, %v1024_v45  ;;  %v1096_v34 = vld [vmem:[#allocation12 + $0xda8] sm:$0xff] }
 0x217   :  { %4133 = vmatmul.mubr.bf16.vlgmr.msra.gmra.mrb[16].mxu1 %v17858_v19  ;;  %4143 = vmatprep.subr.bf16.mxu0 %v14967_v4  ;;  %v1104_v36 = vld [vmem:[#allocation12 + $0xde8] sm:$0xff] }
 0x218   :  { %4183 = vmatpush1.bf16.msra.mxu1 %v15206_v3  ;;  %4214 = vmatprep.mubr.bf16.mxu1 %v17852_v59  ;;  %v15063_v3 = vcombine.high %v776_v51, %v784_v52  ;;  %v856_v42 = vld [vmem:[#allocation12 + $0x628] sm:$0xff] }
 0x219   :  { %4184 = vmatprep.subr.bf16.mxu1 %v15223_v5  ;;  %v15319_v5 = vcombine.high %v1032_v55, %v1040_v56  ;;  %v864_v43 = vld [vmem:[#allocation12 + $0x668] sm:$0xff] }
 0x21a   :  { %4144 = vmatpush1.bf16.msra.mxu0 %v14966_v10  ;;  %v15062_v10 = vcombine.low %v776_v51, %v784_v52  ;;  %v1112_v44 = vld [vmem:[#allocation12 + $0xe28] sm:$0xff] }
 0x21b   :  { %4145 = vmatprep.subr.bf16.mxu0 %v14983_v12  ;;  %v15079_v12 = vcombine.high %v792_v6, %v800_v7  ;;  %v1120_v45 = vld [vmem:[#allocation12 + $0xe68] sm:$0xff] }
 0x21c   :  { %4185 = vmatpush1.bf16.msra.mxu1 %v15222_v11  ;;  %v15318_v11 = vcombine.low %v1032_v55, %v1040_v56  ;;  %v880_v51 = vld [vmem:[#allocation12 + $0x6e8] sm:$0xff]  ;;  %v15398_v55 = vcombine.low %v1112_v44, %v1120_v45 }
 0x21d   :  { %4186 = vmatprep.subr.bf16.mxu1 %v15239_v13  ;;  %v15335_v13 = vcombine.high %v1048_v8, %v1056_v9  ;;  %v1128_v52 = vld [vmem:[#allocation12 + $0xea8] sm:$0xff] }
 0x21e   :  { %4146 = vmatpush1.bf16.msra.mxu0 %v14982_v20  ;;  %v15078_v20 = vcombine.low %v792_v6, %v800_v7  ;;  %v904_v6 = vld [vmem:[#allocation12 + $0x7a8] sm:$0xff] }
 0x21f   :  { %4147 = vmatprep.subr.bf16.mxu0 %v14999_v22  ;;  %v15095_v22 = vcombine.high %v808_v14, %v816_v15  ;;  %v912_v7 = vld [vmem:[#allocation12 + $0x7e8] sm:$0xff] }
 0x220   :  { %4187 = vmatpush1.bf16.msra.mxu1 %v15238_v21  ;;  %v15334_v21 = vcombine.low %v1048_v8, %v1056_v9  ;;  %v1160_v8 = vld [vmem:[#allocation12 + $0xfa8] sm:$0xff] }
 0x221   :  { %4188 = vmatprep.subr.bf16.mxu1 %v15255_v23  ;;  %v15351_v23 = vcombine.high %v1064_v17, %v1072_v18  ;;  %v1168_v9 = vld [vmem:[#allocation12 + $0xfe8] sm:$0xff] }
 0x222   :  { %4148 = vmatpush1.bf16.msra.mxu0 %v14998_v28  ;;  %v15094_v28 = vcombine.low %v808_v14, %v816_v15  ;;  %v665_v14 = vld [vmem:[#allocation12 + $0x30] sm:$0xff] }
 0x223   :  { %4149 = vmatprep.subr.bf16.mxu0 %v15015_v30  ;;  %v15111_v30 = vcombine.high %v824_v24, %v832_v25  ;;  %v673_v15 = vld [vmem:[#allocation12 + $0x70] sm:$0xff] }
 0x224   :  { %4189 = vmatpush1.bf16.msra.mxu1 %v15254_v29  ;;  %v15350_v29 = vcombine.low %v1064_v17, %v1072_v18  ;;  %v921_v17 = vld [vmem:[#allocation12 + $0x830] sm:$0xff] }
 0x225   :  { %4190 = vmatprep.subr.bf16.mxu1 %v15271_v31  ;;  %v15367_v31 = vcombine.high %v1080_v26, %v1088_v27  ;;  %v929_v18 = vld [vmem:[#allocation12 + $0x870] sm:$0xff] }
 0x226   :  { %4150 = vmatpush1.bf16.msra.mxu0 %v15014_v37  ;;  %v15110_v37 = vcombine.low %v824_v24, %v832_v25  ;;  %v681_v24 = vld [vmem:[#allocation12 + $0xb0] sm:$0xff] }
 0x227   :  { %4151 = vmatprep.subr.bf16.mxu0 %v15031_v40  ;;  %v15127_v40 = vcombine.high %v840_v32, %v848_v33  ;;  %v689_v25 = vld [vmem:[#allocation12 + $0xf0] sm:$0xff] }
 0x228   :  { %4191 = vmatpush1.bf16.msra.mxu1 %v15270_v38  ;;  %v3847_v49 = vpop.f32.mrb[4].mxu0  ;;  %v15366_v38 = vcombine.low %v1080_v26, %v1088_v27  ;;  %v937_v26 = vld [vmem:[#allocation12 + $0x8b0] sm:$0xff] }
 0x229   :  { %4192 = vmatprep.subr.bf16.mxu1 %v15287_v41  ;;  %v3849_v54 = vpop.f32.mrb[5].mxu0  ;;  %v15383_v41 = vcombine.high %v1096_v34, %v1104_v36  ;;  %v945_v27 = vld [vmem:[#allocation12 + $0x8f0] sm:$0xff] }
 0x22a   :  { %v3888_v53 = vpop.f32.mrb[4].mxu1  ;;  %v3851_v61 = vpop.f32.mrb[6].mxu0  ;;  %4152 = vmatpush1.bf16.msra.mxu0 %v15030_v46  ;;  %v15126_v46 = vcombine.low %v840_v32, %v848_v33  ;;  %v697_v32 = vld [vmem:[#allocation12 + $0x130] sm:$0xff] }
 0x22b   :  { %v17884_v57 = vadd.f32 %v3888_v53, %v3847_v49  ;;  %v3890_v60 = vpop.f32.mrb[5].mxu1  ;;  %v3852_v1 = vpop.f32.mrb[7].mxu0  ;;  %4153 = vmatprep.subr.bf16.mxu0 %v15047_v48  ;;  %v15143_v48 = vcombine.high %v856_v42, %v864_v43  ;;  %v15399_v49 = vcombine.high %v1112_v44, %v1120_v45  ;;  %v1136_v53 = vld [vmem:[#allocation12 + $0xee8] sm:$0xff]  ;;  %v705_v33 = vld [vmem:[#allocation12 + $0x170] sm:$0xff] }
 0x22c   :  { %v17886_v63 = vadd.f32 %v3890_v60, %v3849_v54  ;;  %v3892_v0 = vpop.f32.mrb[6].mxu1  ;;  %4193 = vmatpush1.bf16.msra.mxu1 %v15286_v47  ;;  %v15382_v47 = vcombine.low %v1096_v34, %v1104_v36  ;;  %v15142_v54 = vcombine.low %v856_v42, %v864_v43  ;;  %v15415_v60 = vcombine.high %v1128_v52, %v1136_v53  ;;  %v888_v61 = vld [vmem:[#allocation12 + $0x728] sm:$0xff]  ;;  %v953_v34 = vld [vmem:[#allocation12 + $0x930] sm:$0xff] }
 0x22d   :  { %v3893_v4 = vpop.f32.mrb[7].mxu1  ;;  %4194 = vmatprep.subr.bf16.mxu1 %v15303_v50  ;;  %v872_v50 = vld [vmem:[#allocation12 + $0x6a8] sm:$0xff]  ;;  %v961_v36 = vld [vmem:[#allocation12 + $0x970] sm:$0xff] }
 0x22e   :  { %4154 = vmatpush1.bf16.msra.mxu0 %v15046_v62  ;;  %v15159_v56 = vcombine.high %v872_v50, %v880_v51  ;;  %v896_v62 = vld [vmem:[#allocation12 + $0x768] sm:$0xff]  ;;  %v713_v42 = vld [vmem:[#allocation12 + $0x1b0] sm:$0xff] }
 0x22f   :  { %4155 = vmatprep.subr.bf16.mxu0 %v15063_v3  ;;  %v1144_v0 = vld [vmem:[#allocation12 + $0xf28] sm:$0xff]  ;;  %v15414_v3 = vcombine.low %v1128_v52, %v1136_v53  ;;  %v15175_v4 = vcombine.high %v888_v61, %v896_v62  ;;  %v721_v43 = vld [vmem:[#allocation12 + $0x1f0] sm:$0xff] }
 0x230   :  { %4195 = vmatpush1.bf16.msra.mxu1 %v15302_v2  ;;  %v1152_v1 = vld [vmem:[#allocation12 + $0xf68] sm:$0xff]  ;;  %v15158_v2 = vcombine.low %v872_v50, %v880_v51  ;;  %v969_v44 = vld [vmem:[#allocation12 + $0x9b0] sm:$0xff] }
 0x231   :  { %4196 = vmatprep.subr.bf16.mxu1 %v15319_v5  ;;  %v15431_v5 = vcombine.high %v1144_v0, %v1152_v1  ;;  %v977_v45 = vld [vmem:[#allocation12 + $0x9f0] sm:$0xff] }
 0x232   :  { %4156 = vmatpush1.bf16.msra.mxu0 %v15062_v10  ;;  %v15174_v10 = vcombine.low %v888_v61, %v896_v62  ;;  %v729_v50 = vld [vmem:[#allocation12 + $0x230] sm:$0xff] }
 0x233   :  { %4157 = vmatprep.subr.bf16.mxu0 %v15079_v12  ;;  %v15191_v12 = vcombine.high %v904_v6, %v912_v7  ;;  %v737_v51 = vld [vmem:[#allocation12 + $0x270] sm:$0xff] }
 0x234   :  { %4197 = vmatpush1.bf16.msra.mxu1 %v15318_v11  ;;  %v15430_v11 = vcombine.low %v1144_v0, %v1152_v1  ;;  %v985_v52 = vld [vmem:[#allocation12 + $0xa30] sm:$0xff] }
 0x235   :  { %4198 = vmatprep.subr.bf16.mxu1 %v15335_v13  ;;  %v15447_v13 = vcombine.high %v1160_v8, %v1168_v9  ;;  %v993_v53 = vld [vmem:[#allocation12 + $0xa70] sm:$0xff] }
 0x236   :  { %4158 = vmatpush1.bf16.msra.mxu0 %v15078_v20  ;;  %v15190_v20 = vcombine.low %v904_v6, %v912_v7  ;;  %v745_v61 = vld [vmem:[#allocation12 + $0x2b0] sm:$0xff] }
 0x237   :  { %4159 = vmatprep.subr.bf16.mxu0 %v15095_v22  ;;  %v14953_v22 = vcombine.high %v665_v14, %v673_v15  ;;  %v753_v62 = vld [vmem:[#allocation12 + $0x2f0] sm:$0xff] }
 0x238   :  { %4199 = vmatpush1.bf16.msra.mxu1 %v15334_v21  ;;  %v15446_v21 = vcombine.low %v1160_v8, %v1168_v9  ;;  %v1001_v0 = vld [vmem:[#allocation12 + $0xab0] sm:$0xff] }
 0x239   :  { %4200 = vmatprep.subr.bf16.mxu1 %v15351_v23  ;;  %v15209_v23 = vcombine.high %v921_v17, %v929_v18  ;;  %v1009_v1 = vld [vmem:[#allocation12 + $0xaf0] sm:$0xff] }
 0x23a   :  { %4160 = vmatpush1.bf16.msra.mxu0 %v15094_v28  ;;  %v14952_v28 = vcombine.low %v665_v14, %v673_v15  ;;  %v761_v6 = vld [vmem:[#allocation12 + $0x330] sm:$0xff] }
 0x23b   :  { %4161 = vmatprep.subr.bf16.mxu0 %v15111_v30  ;;  %v14969_v30 = vcombine.high %v681_v24, %v689_v25  ;;  %v769_v7 = vld [vmem:[#allocation12 + $0x370] sm:$0xff] }
 0x23c   :  { %4201 = vmatpush1.bf16.msra.mxu1 %v15350_v29  ;;  %v15208_v29 = vcombine.low %v921_v17, %v929_v18  ;;  %v1017_v8 = vld [vmem:[#allocation12 + $0xb30] sm:$0xff] }
 0x23d   :  { %4202 = vmatprep.subr.bf16.mxu1 %v15367_v31  ;;  %v15225_v31 = vcombine.high %v937_v26, %v945_v27  ;;  %v1025_v9 = vld [vmem:[#allocation12 + $0xb70] sm:$0xff] }
 0x23e   :  { %4162 = vmatpush1.bf16.msra.mxu0 %v15110_v37  ;;  %v14968_v37 = vcombine.low %v681_v24, %v689_v25  ;;  %v15305_v14 = vcombine.high %v1017_v8, %v1025_v9  ;;  %v777_v15 = vld [vmem:[#allocation12 + $0x3b0] sm:$0xff] }
 0x23f   :  { %4163 = vmatprep.subr.bf16.mxu0 %v15127_v40  ;;  %v14985_v40 = vcombine.high %v697_v32, %v705_v33  ;;  %v785_v17 = vld [vmem:[#allocation12 + $0x3f0] sm:$0xff] }
 0x240   :  { %4203 = vmatpush1.bf16.msra.mxu1 %v15366_v38  ;;  %v15224_v38 = vcombine.low %v937_v26, %v945_v27  ;;  %v15048_v26 = vcombine.low %v761_v6, %v769_v7 }
 0x241   :  { %4204 = vmatprep.subr.bf16.mxu1 %v15383_v41  ;;  %v15241_v41 = vcombine.high %v953_v34, %v961_v36 }
 0x242   :  { %4164 = vmatpush1.bf16.msra.mxu0 %v15126_v46  ;;  %v14984_v46 = vcombine.low %v697_v32, %v705_v33 }
 0x243   :  { %4165 = vmatprep.subr.bf16.mxu0 %v15143_v48  ;;  %v15001_v48 = vcombine.high %v713_v42, %v721_v43 }
 0x244   :  { %4205 = vmatpush1.bf16.msra.mxu1 %v15382_v47  ;;  %v15240_v47 = vcombine.low %v953_v34, %v961_v36  ;;  %v793_v34 = vld [vmem:[#allocation12 + $0x430] sm:$0xff] }
 0x245   :  { %4206 = vmatprep.subr.bf16.mxu1 %v15399_v49  ;;  %v15257_v49 = vcombine.high %v969_v44, %v977_v45  ;;  %v801_v36 = vld [vmem:[#allocation12 + $0x470] sm:$0xff] }
 0x246   :  { %4166 = vmatpush1.bf16.msra.mxu0 %v15142_v54  ;;  %v15000_v54 = vcombine.low %v713_v42, %v721_v43  ;;  %v15081_v42 = vcombine.high %v793_v34, %v801_v36 }
 0x247   :  { %4167 = vmatprep.subr.bf16.mxu0 %v15159_v56  ;;  %v15017_v56 = vcombine.high %v729_v50, %v737_v51 }
 0x248   :  { %4207 = vmatpush1.bf16.msra.mxu1 %v15398_v55  ;;  %v15256_v55 = vcombine.low %v969_v44, %v977_v45  ;;  %v809_v44 = vld [vmem:[#allocation12 + $0x4b0] sm:$0xff] }
 0x249   :  { %4208 = vmatprep.subr.bf16.mxu1 %v15415_v60  ;;  %v15273_v60 = vcombine.high %v985_v52, %v993_v53  ;;  %v817_v45 = vld [vmem:[#allocation12 + $0x4f0] sm:$0xff] }
 0x24a   :  { %4168 = vmatpush1.bf16.msra.mxu0 %v15158_v2  ;;  %v15016_v2 = vcombine.low %v729_v50, %v737_v51  ;;  %v15097_v50 = vcombine.high %v809_v44, %v817_v45 }
 0x24b   :  { %4169 = vmatprep.subr.bf16.mxu0 %v15175_v4  ;;  %v15033_v4 = vcombine.high %v745_v61, %v753_v62 }
 0x24c   :  { %4209 = vmatpush1.bf16.msra.mxu1 %v15414_v3  ;;  %v15272_v3 = vcombine.low %v985_v52, %v993_v53  ;;  %v825_v52 = vld [vmem:[#allocation12 + $0x530] sm:$0xff] }
 0x24d   :  { %4210 = vmatprep.subr.bf16.mxu1 %v15431_v5  ;;  %v15289_v5 = vcombine.high %v1001_v0, %v1009_v1  ;;  %v833_v53 = vld [vmem:[#allocation12 + $0x570] sm:$0xff] }
 0x24e   :  { %4170 = vmatpush1.bf16.msra.mxu0 %v15174_v10  ;;  %v15032_v10 = vcombine.low %v745_v61, %v753_v62  ;;  %v15113_v61 = vcombine.high %v825_v52, %v833_v53 }
 0x24f   :  { %4171 = vmatprep.subr.bf16.mxu0 %v15191_v12  ;;  %v15049_v12 = vcombine.high %v761_v6, %v769_v7 }
 0x250   :  { %4211 = vmatpush1.bf16.msra.mxu1 %v15430_v11  ;;  %v15288_v11 = vcombine.low %v1001_v0, %v1009_v1  ;;  %v841_v0 = vld [vmem:[#allocation12 + $0x5b0] sm:$0xff] }
 0x251   :  { %4212 = vmatprep.subr.bf16.mxu1 %v15447_v13  ;;  %v849_v1 = vld [vmem:[#allocation12 + $0x5f0] sm:$0xff] }
 0x252   :  { %4172 = vmatpush1.bf16.msra.mxu0 %v15190_v20  ;;  %v15129_v6 = vcombine.high %v841_v0, %v849_v1 }
 0x253   :  { %4223 = vmatprep.subr.bf16.mxu0 %v14953_v22  ;;  %v1041_v22 = vld [vmem:[#allocation12 + $0xbf0] sm:$0xff] }
 0x254   :  { %4213 = vmatpush1.bf16.msra.mxu1 %v15446_v21  ;;  %v1033_v21 = vld [vmem:[#allocation12 + $0xbb0] sm:$0xff] }
 0x255   :  { %4264 = vmatprep.subr.bf16.mxu1 %v15209_v23  ;;  %4174 = vmatmul.mubr.bf16.vlgmr.msra.gmra.mrb[20].mxu0 %v17856_v16  ;;  %v15321_v33 = vcombine.high %v1033_v21, %v1041_v22 }
 0x256   :  { %4224 = vmatpush1.bf16.msra.mxu0 %v14952_v28  ;;  %4255 = vmatprep.mubr.bf16.mxu0 %v17850_v58 }
 0x257   :  { %4215 = vmatmul.mubr.bf16.vlgmr.msra.gmra.mrb[20].mxu1 %v17858_v19  ;;  %4225 = vmatprep.subr.bf16.mxu0 %v14969_v30  ;;  %v15304_v30 = vcombine.low %v1017_v8, %v1025_v9  ;;  %v857_v8 = vld [vmem:[#allocation12 + $0x630] sm:$0xff] }
 0x258   :  { %4265 = vmatpush1.bf16.msra.mxu1 %v15208_v29  ;;  %4296 = vmatprep.mubr.bf16.mxu1 %v17852_v59  ;;  %v865_v9 = vld [vmem:[#allocation12 + $0x670] sm:$0xff] }
 0x259   :  { %4266 = vmatprep.subr.bf16.mxu1 %v15225_v31  ;;  %v15065_v31 = vcombine.high %v777_v15, %v785_v17 }
 0x25a   :  { %4226 = vmatpush1.bf16.msra.mxu0 %v14968_v37  ;;  %v1049_v37 = vld [vmem:[#allocation12 + $0xc30] sm:$0xff] }
 0x25b   :  { %4227 = vmatprep.subr.bf16.mxu0 %v14985_v40  ;;  %v15064_v40 = vcombine.low %v777_v15, %v785_v17  ;;  %v873_v17 = vld [vmem:[#allocation12 + $0x6b0] sm:$0xff] }
 0x25c   :  { %4267 = vmatpush1.bf16.msra.mxu1 %v15224_v38  ;;  %v1057_v38 = vld [vmem:[#allocation12 + $0xc70] sm:$0xff] }
 0x25d   :  { %4268 = vmatprep.subr.bf16.mxu1 %v15241_v41  ;;  %v15320_v41 = vcombine.low %v1033_v21, %v1041_v22  ;;  %v15337_v43 = vcombine.high %v1049_v37, %v1057_v38  ;;  %v1137_v21 = vld [vmem:[#allocation12 + $0xef0] sm:$0xff]  ;;  %v15144_v22 = vcombine.low %v857_v8, %v865_v9 }
 0x25e   :  { %4228 = vmatpush1.bf16.msra.mxu0 %v14984_v46  ;;  %v1065_v46 = vld [vmem:[#allocation12 + $0xcb0] sm:$0xff] }
 0x25f   :  { %4229 = vmatprep.subr.bf16.mxu0 %v15001_v48  ;;  %v15080_v48 = vcombine.low %v793_v34, %v801_v36 }
 0x260   :  { %4269 = vmatpush1.bf16.msra.mxu1 %v15240_v47  ;;  %v1073_v47 = vld [vmem:[#allocation12 + $0xcf0] sm:$0xff] }
 0x261   :  { %4270 = vmatprep.subr.bf16.mxu1 %v15257_v49  ;;  %v15336_v49 = vcombine.low %v1049_v37, %v1057_v38  ;;  %v15353_v51 = vcombine.high %v1065_v46, %v1073_v47  ;;  %v905_v37 = vld [vmem:[#allocation12 + $0x7b0] sm:$0xff] }
 0x262   :  { %4230 = vmatpush1.bf16.msra.mxu0 %v15000_v54  ;;  %v1081_v54 = vld [vmem:[#allocation12 + $0xd30] sm:$0xff] }
 0x263   :  { %4231 = vmatprep.subr.bf16.mxu0 %v15017_v56  ;;  %v15096_v56 = vcombine.low %v809_v44, %v817_v45  ;;  %v913_v38 = vld [vmem:[#allocation12 + $0x7f0] sm:$0xff] }
 0x264   :  { %4271 = vmatpush1.bf16.msra.mxu1 %v15256_v55  ;;  %v1089_v55 = vld [vmem:[#allocation12 + $0xd70] sm:$0xff]  ;;  %v15193_v44 = vcombine.high %v905_v37, %v913_v38 }
 0x265   :  { %4272 = vmatprep.subr.bf16.mxu1 %v15273_v60  ;;  %v15352_v60 = vcombine.low %v1065_v46, %v1073_v47  ;;  %v15369_v62 = vcombine.high %v1081_v54, %v1089_v55  ;;  %v666_v46 = vld [vmem:[#allocation12 + $0x38] sm:$0xff] }
 0x266   :  { %4232 = vmatpush1.bf16.msra.mxu0 %v15016_v2  ;;  %v1097_v2 = vld [vmem:[#allocation12 + $0xdb0] sm:$0xff]  ;;  %v674_v47 = vld [vmem:[#allocation12 + $0x78] sm:$0xff] }
 0x267   :  { %4233 = vmatprep.subr.bf16.mxu0 %v15033_v4  ;;  %v15112_v4 = vcombine.low %v825_v52, %v833_v53  ;;  %v14955_v52 = vcombine.high %v666_v46, %v674_v47 }
 0x268   :  { %4273 = vmatpush1.bf16.msra.mxu1 %v15272_v3  ;;  %v3929_v13 = vpop.f32.mrb[8].mxu0  ;;  %v1105_v3 = vld [vmem:[#allocation12 + $0xdf0] sm:$0xff] }
 0x269   :  { %4274 = vmatprep.subr.bf16.mxu1 %v15289_v5  ;;  %v3931_v20 = vpop.f32.mrb[9].mxu0  ;;  %v15368_v5 = vcombine.low %v1081_v54, %v1089_v55  ;;  %v15385_v7 = vcombine.high %v1097_v2, %v1105_v3  ;;  %v682_v54 = vld [vmem:[#allocation12 + $0xb8] sm:$0xff] }
 0x26a   :  { %v3970_v18 = vpop.f32.mrb[8].mxu1  ;;  %v3933_v25 = vpop.f32.mrb[10].mxu0  ;;  %4234 = vmatpush1.bf16.msra.mxu0 %v15032_v10  ;;  %v1113_v10 = vld [vmem:[#allocation12 + $0xe30] sm:$0xff]  ;;  %v690_v55 = vld [vmem:[#allocation12 + $0xf8] sm:$0xff] }
 0x26b   :  { %v17892_v23 = vadd.f32 %v3970_v18, %v3929_v13  ;;  %v3972_v24 = vpop.f32.mrb[9].mxu1  ;;  %v3934_v29 = vpop.f32.mrb[11].mxu0  ;;  %4235 = vmatprep.subr.bf16.mxu0 %v15049_v12  ;;  %v15128_v12 = vcombine.low %v841_v0, %v849_v1  ;;  %v15384_v13 = vcombine.low %v1097_v2, %v1105_v3  ;;  %v881_v18 = vld [vmem:[#allocation12 + $0x6f0] sm:$0xff]  ;;  %v14971_v0 = vcombine.high %v682_v54, %v690_v55  ;;  %v698_v2 = vld [vmem:[#allocation12 + $0x138] sm:$0xff] }
 0x26c   :  { %v17894_v27 = vadd.f32 %v3972_v24, %v3931_v20  ;;  %v3974_v28 = vpop.f32.mrb[10].mxu1  ;;  %4275 = vmatpush1.bf16.msra.mxu1 %v15288_v11  ;;  %v1121_v11 = vld [vmem:[#allocation12 + $0xe70] sm:$0xff]  ;;  %v15161_v25 = vcombine.high %v873_v17, %v881_v18  ;;  %v706_v3 = vld [vmem:[#allocation12 + $0x178] sm:$0xff] }
 0x26d   :  { %v3975_v32 = vpop.f32.mrb[11].mxu1  ;;  %4276 = vmatprep.subr.bf16.mxu1 %v15305_v14  ;;  %v15145_v14 = vcombine.high %v857_v8, %v865_v9  ;;  %v15401_v15 = vcombine.high %v1113_v10, %v1121_v11  ;;  %v1129_v20 = vld [vmem:[#allocation12 + $0xeb0] sm:$0xff]  ;;  %v15400_v24 = vcombine.low %v1113_v10, %v1121_v11  ;;  %v14987_v8 = vcombine.high %v698_v2, %v706_v3  ;;  %v714_v10 = vld [vmem:[#allocation12 + $0x1b8] sm:$0xff] }
 0x26e   :  { %4236 = vmatpush1.bf16.msra.mxu0 %v15048_v26  ;;  %v15417_v26 = vcombine.high %v1129_v20, %v1137_v21  ;;  %v889_v28 = vld [vmem:[#allocation12 + $0x730] sm:$0xff]  ;;  %v15160_v32 = vcombine.low %v873_v17, %v881_v18  ;;  %v722_v11 = vld [vmem:[#allocation12 + $0x1f8] sm:$0xff] }
 0x26f   :  { %4237 = vmatprep.subr.bf16.mxu0 %v15065_v31  ;;  %v897_v29 = vld [vmem:[#allocation12 + $0x770] sm:$0xff]  ;;  %v15003_v17 = vcombine.high %v714_v10, %v722_v11 }
 0x270   :  { %4277 = vmatpush1.bf16.msra.mxu1 %v15304_v30  ;;  %v1145_v30 = vld [vmem:[#allocation12 + $0xf30] sm:$0xff]  ;;  %v15177_v34 = vcombine.high %v889_v28, %v897_v29 }
 0x271   :  { %4278 = vmatprep.subr.bf16.mxu1 %v15321_v33  ;;  %v1153_v31 = vld [vmem:[#allocation12 + $0xf70] sm:$0xff]  ;;  %v15416_v33 = vcombine.low %v1129_v20, %v1137_v21  ;;  %v730_v20 = vld [vmem:[#allocation12 + $0x238] sm:$0xff] }
 0x272   :  { %4238 = vmatpush1.bf16.msra.mxu0 %v15064_v40  ;;  %v15433_v36 = vcombine.high %v1145_v30, %v1153_v31  ;;  %v1161_v40 = vld [vmem:[#allocation12 + $0xfb0] sm:$0xff]  ;;  %v738_v21 = vld [vmem:[#allocation12 + $0x278] sm:$0xff] }
 0x273   :  { %4239 = vmatprep.subr.bf16.mxu0 %v15081_v42  ;;  %v15176_v42 = vcombine.low %v889_v28, %v897_v29  ;;  %v746_v28 = vld [vmem:[#allocation12 + $0x2b8] sm:$0xff] }
 0x274   :  { %4279 = vmatpush1.bf16.msra.mxu1 %v15320_v41  ;;  %v1169_v41 = vld [vmem:[#allocation12 + $0xff0] sm:$0xff]  ;;  %v754_v29 = vld [vmem:[#allocation12 + $0x2f8] sm:$0xff] }
 0x275   :  { %4280 = vmatprep.subr.bf16.mxu1 %v15337_v43  ;;  %v15432_v43 = vcombine.low %v1145_v30, %v1153_v31  ;;  %v15449_v45 = vcombine.high %v1161_v40, %v1169_v41  ;;  %v1002_v30 = vld [vmem:[#allocation12 + $0xab8] sm:$0xff] }
 0x276   :  { %4240 = vmatpush1.bf16.msra.mxu0 %v15080_v48  ;;  %v922_v48 = vld [vmem:[#allocation12 + $0x838] sm:$0xff] }
 0x277   :  { %4241 = vmatprep.subr.bf16.mxu0 %v15097_v50  ;;  %v15192_v50 = vcombine.low %v905_v37, %v913_v38  ;;  %v1010_v31 = vld [vmem:[#allocation12 + $0xaf8] sm:$0xff] }
 0x278   :  { %4281 = vmatpush1.bf16.msra.mxu1 %v15336_v49  ;;  %v930_v49 = vld [vmem:[#allocation12 + $0x878] sm:$0xff] }
 0x279   :  { %4282 = vmatprep.subr.bf16.mxu1 %v15353_v51  ;;  %v15448_v51 = vcombine.low %v1161_v40, %v1169_v41  ;;  %v15211_v53 = vcombine.high %v922_v48, %v930_v49  ;;  %v762_v37 = vld [vmem:[#allocation12 + $0x338] sm:$0xff] }
 0x27a   :  { %4242 = vmatpush1.bf16.msra.mxu0 %v15096_v56  ;;  %v938_v56 = vld [vmem:[#allocation12 + $0x8b8] sm:$0xff] }
 0x27b   :  { %4243 = vmatprep.subr.bf16.mxu0 %v15113_v61  ;;  %v14954_v61 = vcombine.low %v666_v46, %v674_v47  ;;  %v770_v38 = vld [vmem:[#allocation12 + $0x378] sm:$0xff] }
 0x27c   :  { %4283 = vmatpush1.bf16.msra.mxu1 %v15352_v60  ;;  %v946_v60 = vld [vmem:[#allocation12 + $0x8f8] sm:$0xff] }
 0x27d   :  { %4284 = vmatprep.subr.bf16.mxu1 %v15369_v62  ;;  %v15210_v62 = vcombine.low %v922_v48, %v930_v49  ;;  %v15227_v1 = vcombine.high %v938_v56, %v946_v60  ;;  %v1018_v40 = vld [vmem:[#allocation12 + $0xb38] sm:$0xff] }
 0x27e   :  { %4244 = vmatpush1.bf16.msra.mxu0 %v15112_v4  ;;  %v954_v4 = vld [vmem:[#allocation12 + $0x938] sm:$0xff] }
 0x27f   :  { %4245 = vmatprep.subr.bf16.mxu0 %v15129_v6  ;;  %v14970_v6 = vcombine.low %v682_v54, %v690_v55  ;;  %v1026_v41 = vld [vmem:[#allocation12 + $0xb78] sm:$0xff] }
 0x280   :  { %4285 = vmatpush1.bf16.msra.mxu1 %v15368_v5  ;;  %v962_v5 = vld [vmem:[#allocation12 + $0x978] sm:$0xff]  ;;  %v15307_v46 = vcombine.high %v1018_v40, %v1026_v41 }
 0x281   :  { %4286 = vmatprep.subr.bf16.mxu1 %v15385_v7  ;;  %v15226_v7 = vcombine.low %v938_v56, %v946_v60  ;;  %v15243_v9 = vcombine.high %v954_v4, %v962_v5  ;;  %v778_v47 = vld [vmem:[#allocation12 + $0x3b8] sm:$0xff]  ;;  %v15050_v56 = vcombine.low %v762_v37, %v770_v38 }
 0x282   :  { %4246 = vmatpush1.bf16.msra.mxu0 %v15128_v12  ;;  %v970_v12 = vld [vmem:[#allocation12 + $0x9b8] sm:$0xff] }
 0x283   :  { %4247 = vmatprep.subr.bf16.mxu0 %v15145_v14  ;;  %v14986_v14 = vcombine.low %v698_v2, %v706_v3  ;;  %v786_v48 = vld [vmem:[#allocation12 + $0x3f8] sm:$0xff] }
 0x284   :  { %4287 = vmatpush1.bf16.msra.mxu1 %v15384_v13  ;;  %v978_v13 = vld [vmem:[#allocation12 + $0x9f8] sm:$0xff] }
 0x285   :  { %4288 = vmatprep.subr.bf16.mxu1 %v15401_v15  ;;  %v15242_v15 = vcombine.low %v954_v4, %v962_v5  ;;  %v15259_v18 = vcombine.high %v970_v12, %v978_v13  ;;  %v794_v4 = vld [vmem:[#allocation12 + $0x438] sm:$0xff] }
 0x286   :  { %4248 = vmatpush1.bf16.msra.mxu0 %v15144_v22  ;;  %v986_v22 = vld [vmem:[#allocation12 + $0xa38] sm:$0xff] }
 0x287   :  { %4249 = vmatprep.subr.bf16.mxu0 %v15161_v25  ;;  %v15002_v25 = vcombine.low %v714_v10, %v722_v11  ;;  %v802_v5 = vld [vmem:[#allocation12 + $0x478] sm:$0xff]  ;;  %v281_v11 = vlaneseq }
 0x288   :  { %4289 = vmatpush1.bf16.msra.mxu1 %v15400_v24  ;;  %v994_v24 = vld [vmem:[#allocation12 + $0xa78] sm:$0xff]  ;;  %v15083_v10 = vcombine.high %v794_v4, %v802_v5 }
 0x289   :  { %4290 = vmatprep.subr.bf16.mxu1 %v15417_v26  ;;  %v15019_v26 = vcombine.high %v730_v20, %v738_v21 }
 0x28a   :  { %4250 = vmatpush1.bf16.msra.mxu0 %v15160_v32  ;;  %v15018_v32 = vcombine.low %v730_v20, %v738_v21 }
 0x28b   :  { %4251 = vmatprep.subr.bf16.mxu0 %v15177_v34  ;;  %v15035_v34 = vcombine.high %v746_v28, %v754_v29 }
 0x28c   :  { %4291 = vmatpush1.bf16.msra.mxu1 %v15416_v33  ;;  %v15274_v33 = vcombine.low %v986_v22, %v994_v24 }
 0x28d   :  { %4292 = vmatprep.subr.bf16.mxu1 %v15433_v36  ;;  %v15291_v36 = vcombine.high %v1002_v30, %v1010_v31 }
 0x28e   :  { %4252 = vmatpush1.bf16.msra.mxu0 %v15176_v42  ;;  %v15034_v42 = vcombine.low %v746_v28, %v754_v29 }
 0x28f   :  { %4253 = vmatprep.subr.bf16.mxu0 %v15193_v44  ;;  %v15051_v44 = vcombine.high %v762_v37, %v770_v38  ;;  %v17947_v37 = vld [vmem:[%s218_s5] ss:$8 sm:$0x3]  ;;  %v1098_v38 = vld [vmem:[#allocation12 + $0xdb8] sm:$0xff] }
 0x290   :  { %4293 = vmatpush1.bf16.msra.mxu1 %v15432_v43  ;;  %v15290_v43 = vcombine.low %v1002_v30, %v1010_v31  ;;  %v842_v31 = vld [vmem:[#allocation12 + $0x5b8] sm:$0xff] }
 0x291   :  { %4294 = vmatprep.subr.bf16.mxu1 %v15449_v45 }
 0x292   :  { %4254 = vmatpush1.bf16.msra.mxu0 %v15192_v50 }
 0x293   :  { %4305 = vmatprep.subr.bf16.mxu0 %v14955_v52  ;;  %v1042_v52 = vld [vmem:[#allocation12 + $0xbf8] sm:$0xff] }
 0x294   :  { %4295 = vmatpush1.bf16.msra.mxu1 %v15448_v51  ;;  %v1034_v51 = vld [vmem:[#allocation12 + $0xbb8] sm:$0xff] }
 0x295   :  { %4346 = vmatprep.subr.bf16.mxu1 %v15211_v53  ;;  %4256 = vmatmul.mubr.bf16.vlgmr.msra.gmra.mrb[24].mxu0 %v17856_v16  ;;  %v15323_v3 = vcombine.high %v1034_v51, %v1042_v52 }
 0x296   :  { %4306 = vmatpush1.bf16.msra.mxu0 %v14954_v61  ;;  %4337 = vmatprep.mubr.bf16.mxu0 %v17850_v58  ;;  %v15258_v58 = vcombine.low %v970_v12, %v978_v13  ;;  %v810_v13 = vld [vmem:[#allocation12 + $0x4b8] sm:$0xff] }
 0x297   :  { %4297 = vmatmul.mubr.bf16.vlgmr.msra.gmra.mrb[24].mxu1 %v17858_v19  ;;  %4307 = vmatprep.subr.bf16.mxu0 %v14971_v0  ;;  %v15306_v0 = vcombine.low %v1018_v40, %v1026_v41  ;;  %v1106_v40 = vld [vmem:[#allocation12 + $0xdf8] sm:$0xff] }
 0x298   :  { %4347 = vmatpush1.bf16.msra.mxu1 %v15210_v62  ;;  %4378 = vmatprep.mubr.bf16.mxu1 %v17852_v59  ;;  %v15275_v59 = vcombine.high %v986_v22, %v994_v24  ;;  %v17931_v22 = vshrl.u32 %v281_v11, 7 }
 0x299   :  { %4348 = vmatprep.subr.bf16.mxu1 %v15227_v1  ;;  %v15067_v1 = vcombine.high %v778_v47, %v786_v48 }
 0x29a   :  { %4308 = vmatpush1.bf16.msra.mxu0 %v14970_v6  ;;  %v1050_v6 = vld [vmem:[#allocation12 + $0xc38] sm:$0xff] }
 0x29b   :  { %4309 = vmatprep.subr.bf16.mxu0 %v14987_v8  ;;  %v15066_v8 = vcombine.low %v778_v47, %v786_v48  ;;  %v15387_v47 = vcombine.high %v1098_v38, %v1106_v40  ;;  %v858_v48 = vld [vmem:[#allocation12 + $0x638] sm:$0xff] }
 0x29c   :  { %4349 = vmatpush1.bf16.msra.mxu1 %v15226_v7  ;;  %v1058_v7 = vld [vmem:[#allocation12 + $0xc78] sm:$0xff] }
 0x29d   :  { %4350 = vmatprep.subr.bf16.mxu1 %v15243_v9  ;;  %v15322_v9 = vcombine.low %v1034_v51, %v1042_v52  ;;  %v15339_v12 = vcombine.high %v1050_v6, %v1058_v7  ;;  %v15338_v20 = vcombine.low %v1050_v6, %v1058_v7  ;;  %v1122_v51 = vld [vmem:[#allocation12 + $0xe78] sm:$0xff] }
 0x29e   :  { %4310 = vmatpush1.bf16.msra.mxu0 %v14986_v14  ;;  %v818_v14 = vld [vmem:[#allocation12 + $0x4f8] sm:$0xff] }
 0x29f   :  { %4311 = vmatprep.subr.bf16.mxu0 %v15003_v17  ;;  %v1074_v17 = vld [vmem:[#allocation12 + $0xcf8] sm:$0xff]  ;;  %v15099_v21 = vcombine.high %v810_v13, %v818_v14  ;;  %v15098_v28 = vcombine.low %v810_v13, %v818_v14  ;;  %v17981_v14 = vld [vmem:[%s258_s6] ss:$8 sm:$0x3] }
 0x2a0   :  { %4351 = vmatpush1.bf16.msra.mxu1 %v15242_v15  ;;  %v1066_v15 = vld [vmem:[#allocation12 + $0xcb8] sm:$0xff] }
 0x2a1   :  { %4352 = vmatprep.subr.bf16.mxu1 %v15259_v18  ;;  %v15082_v18 = vcombine.low %v794_v4, %v802_v5  ;;  %v15355_v24 = vcombine.high %v1066_v15, %v1074_v17  ;;  %v15354_v29 = vcombine.low %v1066_v15, %v1074_v17  ;;  %v1138_v4 = vld [vmem:[#allocation12 + $0xef8] sm:$0xff]  ;;  %v17974_v5 = vld [vmem:[%s248_s10] ss:$8 sm:$0x3] }
 0x2a2   :  { %4312 = vmatpush1.bf16.msra.mxu0 %v15002_v25  ;;  %v826_v25 = vld [vmem:[#allocation12 + $0x538] sm:$0xff] }
 0x2a3   :  { %4313 = vmatprep.subr.bf16.mxu0 %v15019_v26  ;;  %v1082_v26 = vld [vmem:[#allocation12 + $0xd38] sm:$0xff] }
 0x2a4   :  { %4353 = vmatpush1.bf16.msra.mxu1 %v15258_v58  ;;  %v834_v58 = vld [vmem:[#allocation12 + $0x578] sm:$0xff] }
 0x2a5   :  { %4354 = vmatprep.subr.bf16.mxu1 %v15275_v59  ;;  %v1090_v59 = vld [vmem:[#allocation12 + $0xd78] sm:$0xff]  ;;  %v15115_v30 = vcombine.high %v826_v25, %v834_v58  ;;  %v15114_v41 = vcombine.low %v826_v25, %v834_v58  ;;  %v17987_v58 = vld [vmem:[%s268_s15] ss:$8 sm:$0x3] }
 0x2a6   :  { %4314 = vmatpush1.bf16.msra.mxu0 %v15018_v32  ;;  %v17939_v32 = vld [vmem:[%s208_s8] ss:$8 sm:$0x3]  ;;  %v898_v13 = vld [vmem:[#allocation12 + $0x778] sm:$0xff] }
 0x2a7   :  { %4315 = vmatprep.subr.bf16.mxu0 %v15035_v34  ;;  %v15371_v34 = vcombine.high %v1082_v26, %v1090_v59  ;;  %v1146_v17 = vld [vmem:[#allocation12 + $0xf38] sm:$0xff] }
 0x2a8   :  { %4355 = vmatpush1.bf16.msra.mxu1 %v15274_v33  ;;  %v4011_v45 = vpop.f32.mrb[12].mxu0  ;;  %v17944_v33 = vsub.s32 1, %v17931_v22 }
 0x2a9   :  { %4356 = vmatprep.subr.bf16.mxu1 %v15291_v36  ;;  %v4013_v50 = vpop.f32.mrb[13].mxu0  ;;  %v850_v36 = vld [vmem:[#allocation12 + $0x5f8] sm:$0xff] }
 0x2aa   :  { %v4052_v49 = vpop.f32.mrb[12].mxu1  ;;  %v4015_v55 = vpop.f32.mrb[14].mxu0  ;;  %4316 = vmatpush1.bf16.msra.mxu0 %v15034_v42  ;;  %v15370_v42 = vcombine.low %v1082_v26, %v1090_v59  ;;  %v15130_v52 = vcombine.low %v842_v31, %v850_v36  ;;  %v332_v15 = vrot.slane %v17974_v5, %v17944_v33  ;;  %v343_v26 = vrot.slane %v17981_v14, %v17944_v33 }
 0x2ab   :  { %v17909_v53 = vadd.f32 %v4052_v49, %v4011_v45  ;;  %v4054_v54 = vpop.f32.mrb[13].mxu1  ;;  %v4016_v62 = vpop.f32.mrb[15].mxu0  ;;  %4317 = vmatprep.subr.bf16.mxu0 %v15051_v44  ;;  %v17953_v44 = vld [vmem:[%s228_s29] ss:$8 sm:$0x3]  ;;  %v288_v45 = vrot.slane %v17939_v32, %v17944_v33  ;;  %v866_v49 = vld [vmem:[#allocation12 + $0x678] sm:$0xff] }
 0x2ac   :  { %v17911_v60 = vadd.f32 %v4054_v54, %v4013_v50  ;;  %v4056_v61 = vpop.f32.mrb[14].mxu1  ;;  %4357 = vmatpush1.bf16.msra.mxu1 %v15290_v43  ;;  %v15131_v43 = vcombine.high %v842_v31, %v850_v36  ;;  %v1114_v50 = vld [vmem:[#allocation12 + $0xe38] sm:$0xff]  ;;  %v17965_v54 = vld [vmem:[%s238_s7] ss:$8 sm:$0x3]  ;;  %v310_v55 = vrot.slane %v17953_v44, %v17944_v33  ;;  %v15146_v7 = vcombine.low %v858_v48, %v866_v49 }
 0x2ad   :  { %v4057_v2 = vpop.f32.mrb[15].mxu1  ;;  %4358 = vmatprep.subr.bf16.mxu1 %v15307_v46  ;;  %v299_v46 = vrot.slane %v17947_v37, %v17944_v33  ;;  %v15147_v61 = vcombine.high %v858_v48, %v866_v49  ;;  %v321_v6 = vrot.slane %v17965_v54, %v17944_v33  ;;  %v1162_v31 = vld [vmem:[#allocation12 + $0xfb8] sm:$0xff]  ;;  %v400_v48 = vld [vmem:[#allocation10 + $0x8] sm:$0xff] }
 0x2ae   :  { %4318 = vmatpush1.bf16.msra.mxu0 %v15050_v56  ;;  %v15386_v56 = vcombine.low %v1098_v38, %v1106_v40  ;;  %v882_v2 = vld [vmem:[#allocation12 + $0x6f8] sm:$0xff]  ;;  %v17992_v38 = vld [vmem:[%s278_s18] ss:$8 sm:$0x3]  ;;  %v354_v40 = vrot.slane %v17987_v58, %v17944_v33 }
 0x2af   :  { %4319 = vmatprep.subr.bf16.mxu0 %v15067_v1  ;;  %v370_v62 = vsel %vm368_vm0, %v288_v45, %v299_v46  ;;  %v874_v1 = vld [vmem:[#allocation12 + $0x6b8] sm:$0xff]  ;;  %v399_v46 = vld [vmem:[#allocation10] sm:$0xff]  ;;  %v408_v49 = vld [vmem:[#allocation10 + $0x48] sm:$0xff] }
 0x2b0   :  { %4359 = vmatpush1.bf16.msra.mxu1 %v15306_v0  ;;  %v15403_v0 = vcombine.high %v1114_v50, %v1122_v51 }
 0x2b1   :  { %4360 = vmatprep.subr.bf16.mxu1 %v15323_v3  ;;  %v1130_v3 = vld [vmem:[#allocation12 + $0xeb8] sm:$0xff] }
 0x2b2   :  { %4320 = vmatpush1.bf16.msra.mxu0 %v15066_v8  ;;  %v373_v8 = vsel %vm371_vm1, %v370_v62, %v310_v55  ;;  %v15419_v11 = vcombine.high %v1130_v3, %v1138_v4  ;;  %v415_v62 = vld [vmem:[#allocation10 + $0x80] sm:$0xff] }
 0x2b3   :  { %4321 = vmatprep.subr.bf16.mxu0 %v15083_v10  ;;  %v15163_v10 = vcombine.high %v874_v1, %v882_v2 }
 0x2b4   :  { %4361 = vmatpush1.bf16.msra.mxu1 %v15322_v9  ;;  %v15402_v9 = vcombine.low %v1114_v50, %v1122_v51  ;;  %v365_v50 = vrot.slane %v17992_v38, %v17944_v33 }
 0x2b5   :  { %4362 = vmatprep.subr.bf16.mxu1 %v15339_v12  ;;  %v890_v12 = vld [vmem:[#allocation12 + $0x738] sm:$0xff] }
 0x2b6   :  { %4322 = vmatpush1.bf16.msra.mxu0 %v15082_v18  ;;  %v1154_v18 = vld [vmem:[#allocation12 + $0xf78] sm:$0xff]  ;;  %v15179_v25 = vcombine.high %v890_v12, %v898_v13  ;;  %v15178_v36 = vcombine.low %v890_v12, %v898_v13  ;;  %v432_v12 = vld [vmem:[#allocation10 + $0x108] sm:$0xff] }
 0x2b7   :  { %4323 = vmatprep.subr.bf16.mxu0 %v15099_v21  ;;  %v15162_v21 = vcombine.low %v874_v1, %v882_v2  ;;  %v15435_v59 = vcombine.high %v1146_v17, %v1154_v18  ;;  %v416_v1 = vld [vmem:[#allocation10 + $0x88] sm:$0xff] }
 0x2b8   :  { %4363 = vmatpush1.bf16.msra.mxu1 %v15338_v20  ;;  %v376_v20 = vsel %vm374_vm2, %v373_v8, %v321_v6  ;;  %v424_v2 = vld [vmem:[#allocation10 + $0xc8] sm:$0xff]  ;;  %v15454_v6 = vcombine.low %v400_v48, %v408_v49 }
 0x2b9   :  { %4364 = vmatprep.subr.bf16.mxu1 %v15355_v24  ;;  %v15418_v24 = vcombine.low %v1130_v3, %v1138_v4  ;;  %v15471_v8 = vcombine.high %v416_v1, %v424_v2  ;;  %v440_v13 = vld [vmem:[#allocation10 + $0x148] sm:$0xff] }
 0x2ba   :  { %4324 = vmatpush1.bf16.msra.mxu0 %v15098_v28  ;;  %v906_v28 = vld [vmem:[#allocation12 + $0x7b8] sm:$0xff] }
 0x2bb   :  { %4325 = vmatprep.subr.bf16.mxu0 %v15115_v30  ;;  %v379_v30 = vsel %vm377_vm3, %v376_v20, %v332_v15  ;;  %v15487_v20 = vcombine.high %v432_v12, %v440_v13 }
 0x2bc   :  { %4365 = vmatpush1.bf16.msra.mxu1 %v15354_v29  ;;  %v914_v29 = vld [vmem:[#allocation12 + $0x7f8] sm:$0xff] }
 0x2bd   :  { %4366 = vmatprep.subr.bf16.mxu1 %v15371_v34  ;;  %v1170_v34 = vld [vmem:[#allocation12 + $0xff8] sm:$0xff]  ;;  %v15194_v51 = vcombine.low %v906_v28, %v914_v29 }
 0x2be   :  { %4326 = vmatpush1.bf16.msra.mxu0 %v15114_v41  ;;  %v15434_v41 = vcombine.low %v1146_v17, %v1154_v18  ;;  %v15451_v45 = vcombine.high %v1162_v31, %v1170_v34  ;;  %v15450_v55 = vcombine.low %v1162_v31, %v1170_v34  ;;  %v15470_v17 = vcombine.low %v416_v1, %v424_v2  ;;  %v464_v31 = vld [vmem:[#allocation10 + $0x208] sm:$0xff] }
 0x2bf   :  { %4327 = vmatprep.subr.bf16.mxu0 %v15131_v43  ;;  %v382_v43 = vsel %vm380_vm4, %v379_v30, %v343_v26  ;;  %v456_v26 = vld [vmem:[#allocation10 + $0x1c8] sm:$0xff]  ;;  %v471_v30 = vld [vmem:[#allocation10 + $0x240] sm:$0xff] }
 0x2c0   :  { %4367 = vmatpush1.bf16.msra.mxu1 %v15370_v42  ;;  %v15195_v42 = vcombine.high %v906_v28, %v914_v29  ;;  %v463_v29 = vld [vmem:[#allocation10 + $0x200] sm:$0xff]  ;;  %v472_v34 = vld [vmem:[#allocation10 + $0x248] sm:$0xff] }
 0x2c1   :  { %4368 = vmatprep.subr.bf16.mxu1 %v15387_v47  ;;  %v407_v47 = vld [vmem:[#allocation10 + $0x40] sm:$0xff] }
 0x2c2   :  { %4328 = vmatpush1.bf16.msra.mxu0 %v15130_v52  ;;  %v385_v52 = vsel %vm383_vm5, %v382_v43, %v354_v40  ;;  %v15452_v4 = vcombine.low %v399_v46, %v407_v47  ;;  %v479_v43 = vld [vmem:[#allocation10 + $0x280] sm:$0xff] }
 0x2c3   :  { %4329 = vmatprep.subr.bf16.mxu0 %v15147_v61  ;;  %v15455_v61 = vcombine.high %v400_v48, %v408_v49  ;;  %v388_v3 = vsel %vm386_vm6, %v385_v52, %v365_v50  ;;  %v15516_v48 = vcombine.low %v463_v29, %v471_v30  ;;  %v15518_v49 = vcombine.low %v464_v31, %v472_v34  ;;  %v495_v52 = vld [vmem:[#allocation10 + $0x300] sm:$0xff] }
 0x2c4   :  { %4369 = vmatpush1.bf16.msra.mxu1 %v15386_v56  ;;  %v15453_v56 = vcombine.high %v399_v46, %v407_v47  ;;  %v480_v46 = vld [vmem:[#allocation10 + $0x288] sm:$0xff] }
 0x2c5   :  { %4370 = vmatprep.subr.bf16.mxu1 %v15403_v0  ;;  %v423_v0 = vld [vmem:[#allocation10 + $0xc0] sm:$0xff]  ;;  %v488_v47 = vld [vmem:[#allocation10 + $0x2c8] sm:$0xff] }
 0x2c6   :  { %4330 = vmatpush1.bf16.msra.mxu0 %v15146_v7  ;;  %v15469_v7 = vcombine.high %v415_v62, %v423_v0  ;;  %v15468_v15 = vcombine.low %v415_v62, %v423_v0  ;;  %v15534_v0 = vcombine.low %v480_v46, %v488_v47 }
 0x2c7   :  { %4331 = vmatprep.subr.bf16.mxu0 %v15163_v10  ;;  %v439_v10 = vld [vmem:[#allocation10 + $0x140] sm:$0xff] }
 0x2c8   :  { %4371 = vmatpush1.bf16.msra.mxu1 %v15402_v9  ;;  %v431_v9 = vld [vmem:[#allocation10 + $0x100] sm:$0xff] }
 0x2c9   :  { %4372 = vmatprep.subr.bf16.mxu1 %v15419_v11  ;;  %v18001_v11 = vpack.c.bf16 %v388_v3, %v388_v3  ;;  %v15485_v18 = vcombine.high %v431_v9, %v439_v10 }
 0x2ca   :  { %4332 = vmatpush1.bf16.msra.mxu0 %v15162_v21  ;;  %v447_v21 = vld [vmem:[#allocation10 + $0x180] sm:$0xff] }
 0x2cb   :  { %4333 = vmatprep.subr.bf16.mxu0 %v15179_v25  ;;  %v448_v25 = vld [vmem:[#allocation10 + $0x188] sm:$0xff] }
 0x2cc   :  { %4373 = vmatpush1.bf16.msra.mxu1 %v15418_v24  ;;  %v455_v24 = vld [vmem:[#allocation10 + $0x1c0] sm:$0xff]  ;;  %v15503_v28 = vcombine.high %v448_v25, %v456_v26  ;;  %v15502_v40 = vcombine.low %v448_v25, %v456_v26 }
 0x2cd   :  { %4374 = vmatprep.subr.bf16.mxu1 %v15435_v59  ;;  %v15501_v59 = vcombine.high %v447_v21, %v455_v24 }
 0x2ce   :  { %4334 = vmatpush1.bf16.msra.mxu0 %v15178_v36  ;;  %v15500_v36 = vcombine.low %v447_v21, %v455_v24 }
 0x2cf   :  { %4335 = vmatprep.subr.bf16.mxu0 %v15195_v42  ;;  %v15519_v42 = vcombine.high %v464_v31, %v472_v34 }
 0x2d0   :  { %4375 = vmatpush1.bf16.msra.mxu1 %v15434_v41  ;;  %v15517_v41 = vcombine.high %v463_v29, %v471_v30  ;;  %v536_v29 = vld [vmem:[#allocation10 + $0x448] sm:$0xff] }
 0x2d1   :  { %4376 = vmatprep.subr.bf16.mxu1 %v15451_v45  ;;  %v487_v45 = vld [vmem:[#allocation10 + $0x2c0] sm:$0xff] }
 0x2d2   :  { %4336 = vmatpush1.bf16.msra.mxu0 %v15194_v51  ;;  %v15533_v50 = vcombine.high %v479_v43, %v487_v45  ;;  %v15535_v51 = vcombine.high %v480_v46, %v488_v47  ;;  %v15532_v62 = vcombine.low %v479_v43, %v487_v45  ;;  %v552_v43 = vld [vmem:[#allocation10 + $0x4c8] sm:$0xff] }
 0x2d3   :  { %5667 = vmatprep.subr.bf16.mxu0 %v15453_v56  ;;  %v496_v56 = vld [vmem:[#allocation10 + $0x308] sm:$0xff] }
 0x2d4   :  { %4377 = vmatpush1.bf16.msra.mxu1 %v15450_v55  ;;  %v503_v55 = vld [vmem:[#allocation10 + $0x340] sm:$0xff] }
 0x2d5   :  { %5708 = vmatprep.subr.bf16.mxu1 %v15455_v61  ;;  %4338 = vmatmul.mubr.bf16.vlgmr.msra.gmra.mrb[28].mxu0 %v17856_v16  ;;  %v15484_v16 = vcombine.low %v431_v9, %v439_v10  ;;  %v504_v61 = vld [vmem:[#allocation10 + $0x348] sm:$0xff]  ;;  %v15549_v1 = vcombine.high %v495_v52, %v503_v55 }
 0x2d6   :  { %5668 = vmatpush1.bf16.msra.mxu0 %v15452_v4  ;;  %5699 = vmatprep.mubr.bf16.mxu0 %v18001_v11  ;;  %v15551_v3 = vcombine.high %v496_v56, %v504_v61  ;;  %v511_v4 = vld [vmem:[#allocation10 + $0x380] sm:$0xff]  ;;  %v512_v9 = vld [vmem:[#allocation10 + $0x388] sm:$0xff]  ;;  %v15550_v24 = vcombine.low %v496_v56, %v504_v61 }
 0x2d7   :  { %4379 = vmatmul.mubr.bf16.vlgmr.msra.gmra.mrb[28].mxu1 %v17858_v19  ;;  %5669 = vmatprep.subr.bf16.mxu0 %v15469_v7  ;;  %v15486_v19 = vcombine.low %v432_v12, %v440_v13  ;;  %v520_v10 = vld [vmem:[#allocation10 + $0x3c8] sm:$0xff] }
 0x2d8   :  { %5709 = vmatpush1.bf16.msra.mxu1 %v15454_v6  ;;  %5740 = vmatprep.mubr.bf16.mxu1 %v18001_v11  ;;  %v519_v6 = vld [vmem:[#allocation10 + $0x3c0] sm:$0xff]  ;;  %v15566_v31 = vcombine.low %v512_v9, %v520_v10 }
 0x2d9   :  { %5710 = vmatprep.subr.bf16.mxu1 %v15471_v8  ;;  %v15565_v25 = vcombine.high %v511_v4, %v519_v6  ;;  %v15564_v30 = vcombine.low %v511_v4, %v519_v6  ;;  %v576_v6 = vld [vmem:[#allocation10 + $0x588] sm:$0xff] }
 0x2da   :  { %5670 = vmatpush1.bf16.msra.mxu0 %v15468_v15 }
 0x2db   :  { %5671 = vmatprep.subr.bf16.mxu0 %v15485_v18 }
 0x2dc   :  { %5711 = vmatpush1.bf16.msra.mxu1 %v15470_v17  ;;  %v15548_v17 = vcombine.low %v495_v52, %v503_v55  ;;  %v560_v52 = vld [vmem:[#allocation10 + $0x508] sm:$0xff] }
 0x2dd   :  { %5712 = vmatprep.subr.bf16.mxu1 %v15487_v20  ;;  %v568_v55 = vld [vmem:[#allocation10 + $0x548] sm:$0xff] }
 0x2de   :  { %5672 = vmatpush1.bf16.msra.mxu0 %v15484_v16  ;;  %v15567_v16 = vcombine.high %v512_v9, %v520_v10  ;;  %v15614_v9 = vcombine.low %v560_v52, %v568_v55 }
 0x2df   :  { %5673 = vmatprep.subr.bf16.mxu0 %v15501_v59  ;;  %v535_v59 = vld [vmem:[#allocation10 + $0x440] sm:$0xff] }
 0x2e0   :  { %5713 = vmatpush1.bf16.msra.mxu1 %v15486_v19  ;;  %v527_v19 = vld [vmem:[#allocation10 + $0x400] sm:$0xff] }
 0x2e1   :  { %5714 = vmatprep.subr.bf16.mxu1 %v15503_v28  ;;  %v528_v28 = vld [vmem:[#allocation10 + $0x408] sm:$0xff]  ;;  %v15581_v34 = vcombine.high %v527_v19, %v535_v59  ;;  %v15580_v45 = vcombine.low %v527_v19, %v535_v59  ;;  %v607_v59 = vld [vmem:[#allocation10 + $0x680] sm:$0xff] }
 0x2e2   :  { %5674 = vmatpush1.bf16.msra.mxu0 %v15500_v36  ;;  %v15583_v36 = vcombine.high %v528_v28, %v536_v29  ;;  %v15582_v46 = vcombine.low %v528_v28, %v536_v29  ;;  %v615_v28 = vld [vmem:[#allocation10 + $0x6c0] sm:$0xff]  ;;  %v608_v29 = vld [vmem:[#allocation10 + $0x688] sm:$0xff] }
 0x2e3   :  { %5675 = vmatprep.subr.bf16.mxu0 %v15517_v41  ;;  %v551_v41 = vld [vmem:[#allocation10 + $0x4c0] sm:$0xff] }
 0x2e4   :  { %5715 = vmatpush1.bf16.msra.mxu1 %v15502_v40  ;;  %v543_v40 = vld [vmem:[#allocation10 + $0x480] sm:$0xff] }
 0x2e5   :  { %5716 = vmatprep.subr.bf16.mxu1 %v15519_v42  ;;  %v544_v42 = vld [vmem:[#allocation10 + $0x488] sm:$0xff]  ;;  %v15597_v47 = vcombine.high %v543_v40, %v551_v41  ;;  %v15596_v56 = vcombine.low %v543_v40, %v551_v41  ;;  %v15661_v40 = vcombine.high %v607_v59, %v615_v28 }
 0x2e6   :  { %5676 = vmatpush1.bf16.msra.mxu0 %v15516_v48  ;;  %v15599_v48 = vcombine.high %v544_v42, %v552_v43  ;;  %v15598_v61 = vcombine.low %v544_v42, %v552_v43  ;;  %v623_v42 = vld [vmem:[#allocation10 + $0x700] sm:$0xff] }
 0x2e7   :  { %5677 = vmatprep.subr.bf16.mxu0 %v15533_v50  ;;  %v567_v50 = vld [vmem:[#allocation10 + $0x540] sm:$0xff] }
 0x2e8   :  { %5717 = vmatpush1.bf16.msra.mxu1 %v15518_v49  ;;  %v4093_v2 = vpop.f32.mrb[16].mxu0  ;;  %v559_v49 = vld [vmem:[#allocation10 + $0x500] sm:$0xff] }
 0x2e9   :  { %5718 = vmatprep.subr.bf16.mxu1 %v15535_v51  ;;  %v4095_v8 = vpop.f32.mrb[17].mxu0  ;;  %v18012_v51 = vsub.s32 0, %v17931_v22  ;;  %v631_v43 = vld [vmem:[#allocation10 + $0x740] sm:$0xff] }
 0x2ea   :  { %v4134_v7 = vpop.f32.mrb[16].mxu1  ;;  %v4097_v15 = vpop.f32.mrb[18].mxu0  ;;  %5678 = vmatpush1.bf16.msra.mxu0 %v15532_v62  ;;  %v15613_v62 = vcombine.high %v559_v49, %v567_v50 }
 0x2eb   :  { %v18007_v12 = vadd.f32 %v4134_v7, %v4093_v2  ;;  %v4136_v13 = vpop.f32.mrb[17].mxu1  ;;  %v4098_v21 = vpop.f32.mrb[19].mxu0  ;;  %5679 = vmatprep.subr.bf16.mxu0 %v15549_v1  ;;  %v575_v1 = vld [vmem:[#allocation10 + $0x580] sm:$0xff]  ;;  %v295_v4 = vrot.slane %v17947_v37, %v18012_v51  ;;  %v584_v7 = vld [vmem:[#allocation10 + $0x5c8] sm:$0xff] }
 0x2ec   :  { %v18009_v18 = vadd.f32 %v4136_v13, %v4095_v8  ;;  %v4138_v20 = vpop.f32.mrb[18].mxu1  ;;  %5719 = vmatpush1.bf16.msra.mxu1 %v15534_v0  ;;  %v15615_v0 = vcombine.high %v560_v52, %v568_v55  ;;  %v583_v2 = vld [vmem:[#allocation10 + $0x5c0] sm:$0xff]  ;;  %v15612_v8 = vcombine.low %v559_v49, %v567_v50  ;;  %v306_v13 = vrot.slane %v17953_v44, %v18012_v51  ;;  %v592_v21 = vld [vmem:[#allocation10 + $0x608] sm:$0xff] }
 0x2ed   :  { %v4139_v26 = vpop.f32.mrb[19].mxu1  ;;  %5720 = vmatprep.subr.bf16.mxu1 %v15551_v3  ;;  %v284_v3 = vrot.slane %v17939_v32, %v18012_v51  ;;  %v15629_v10 = vcombine.high %v575_v1, %v583_v2  ;;  %v15631_v15 = vcombine.high %v576_v6, %v584_v7  ;;  %v599_v20 = vld [vmem:[#allocation10 + $0x640] sm:$0xff]  ;;  %v15628_v37 = vcombine.low %v575_v1, %v583_v2 }
 0x2ee   :  { %5680 = vmatpush1.bf16.msra.mxu0 %v15548_v17  ;;  %v591_v17 = vld [vmem:[#allocation10 + $0x600] sm:$0xff]  ;;  %v15630_v26 = vcombine.low %v576_v6, %v584_v7  ;;  %v15677_v50 = vcombine.high %v623_v42, %v631_v43  ;;  %v350_v52 = vrot.slane %v17987_v58, %v18012_v51  ;;  %v15676_v1 = vcombine.low %v623_v42, %v631_v43  ;;  %v401_v7 = vld [vmem:[#allocation10 + $0x10] sm:$0xff]  ;;  %v450_v42 = vld [vmem:[#allocation10 + $0x198] sm:$0xff] }
 0x2ef   :  { %5681 = vmatprep.subr.bf16.mxu0 %v15565_v25  ;;  %v369_v32 = vsel %vm368_vm0, %v284_v3, %v295_v4  ;;  %v317_v25 = vrot.slane %v17965_v54, %v18012_v51  ;;  %v361_v2 = vrot.slane %v17992_v38, %v18012_v51  ;;  %v458_v43 = vld [vmem:[#allocation10 + $0x1d8] sm:$0xff] }
 0x2f0   :  { %5721 = vmatpush1.bf16.msra.mxu1 %v15550_v24  ;;  %v600_v24 = vld [vmem:[#allocation10 + $0x648] sm:$0xff]  ;;  %v372_v19 = vsel %vm371_vm1, %v369_v32, %v306_v13  ;;  %v417_v32 = vld [vmem:[#allocation10 + $0x90] sm:$0xff] }
 0x2f1   :  { %5722 = vmatprep.subr.bf16.mxu1 %v15567_v16  ;;  %v15645_v16 = vcombine.high %v591_v17, %v599_v20  ;;  %v15647_v44 = vcombine.high %v592_v21, %v600_v24  ;;  %v15646_v54 = vcombine.low %v592_v21, %v600_v24  ;;  %v425_v21 = vld [vmem:[#allocation10 + $0xd0] sm:$0xff] }
 0x2f2   :  { %5682 = vmatpush1.bf16.msra.mxu0 %v15564_v30  ;;  %v616_v30 = vld [vmem:[#allocation10 + $0x6c8] sm:$0xff] }
 0x2f3   :  { %5683 = vmatprep.subr.bf16.mxu0 %v15581_v34  ;;  %v15644_v34 = vcombine.low %v591_v17, %v599_v20  ;;  %v15663_v41 = vcombine.high %v608_v29, %v616_v30  ;;  %v15662_v49 = vcombine.low %v608_v29, %v616_v30  ;;  %v434_v29 = vld [vmem:[#allocation10 + $0x118] sm:$0xff] }
 0x2f4   :  { %5723 = vmatpush1.bf16.msra.mxu1 %v15566_v31  ;;  %v328_v31 = vrot.slane %v17974_v5, %v18012_v51  ;;  %v15660_v5 = vcombine.low %v607_v59, %v615_v28  ;;  %v433_v59 = vld [vmem:[#allocation10 + $0x110] sm:$0xff]  ;;  %v442_v30 = vld [vmem:[#allocation10 + $0x158] sm:$0xff] }
 0x2f5   :  { %5724 = vmatprep.subr.bf16.mxu1 %v15583_v36  ;;  %v375_v36 = vsel %vm374_vm2, %v372_v19, %v317_v25  ;;  %v426_v25 = vld [vmem:[#allocation10 + $0xd8] sm:$0xff]  ;;  %v15473_v19 = vcombine.high %v417_v32, %v425_v21  ;;  %v441_v28 = vld [vmem:[#allocation10 + $0x150] sm:$0xff] }
 0x2f6   :  { %5684 = vmatpush1.bf16.msra.mxu0 %v15580_v45  ;;  %v339_v45 = vrot.slane %v17981_v14, %v18012_v51  ;;  %v640_v14 = vld [vmem:[#allocation10 + $0x788] sm:$0xff] }
 0x2f7   :  { %5685 = vmatprep.subr.bf16.mxu0 %v15597_v47  ;;  %v632_v47 = vld [vmem:[#allocation10 + $0x748] sm:$0xff] }
 0x2f8   :  { %5725 = vmatpush1.bf16.msra.mxu1 %v15582_v46  ;;  %v624_v46 = vld [vmem:[#allocation10 + $0x708] sm:$0xff] }
 0x2f9   :  { %5726 = vmatprep.subr.bf16.mxu1 %v15599_v48  ;;  %v378_v48 = vsel %vm377_vm3, %v375_v36, %v328_v31  ;;  %v15679_v55 = vcombine.high %v624_v46, %v632_v47  ;;  %v15678_v3 = vcombine.low %v624_v46, %v632_v47  ;;  %v15472_v31 = vcombine.low %v417_v32, %v425_v21  ;;  %v513_v32 = vld [vmem:[#allocation10 + $0x390] sm:$0xff] }
 0x2fa   :  { %5686 = vmatpush1.bf16.msra.mxu0 %v15596_v56  ;;  %v639_v56 = vld [vmem:[#allocation10 + $0x780] sm:$0xff]  ;;  %v15489_v36 = vcombine.high %v433_v59, %v441_v28  ;;  %v15490_v46 = vcombine.low %v434_v29, %v442_v30  ;;  %v521_v21 = vld [vmem:[#allocation10 + $0x3d0] sm:$0xff] }
 0x2fb   :  { %5687 = vmatprep.subr.bf16.mxu0 %v15613_v62  ;;  %v381_v62 = vsel %vm380_vm4, %v378_v48, %v339_v45  ;;  %v15488_v45 = vcombine.low %v433_v59, %v441_v28  ;;  %v15507_v48 = vcombine.high %v450_v42, %v458_v43 }
 0x2fc   :  { %5727 = vmatpush1.bf16.msra.mxu1 %v15598_v61  ;;  %v647_v61 = vld [vmem:[#allocation10 + $0x7c0] sm:$0xff]  ;;  %v384_v6 = vsel %vm383_vm5, %v381_v62, %v350_v52  ;;  %v474_v52 = vld [vmem:[#allocation10 + $0x258] sm:$0xff] }
 0x2fd   :  { %5728 = vmatprep.subr.bf16.mxu1 %v15615_v0  ;;  %v648_v0 = vld [vmem:[#allocation10 + $0x7c8] sm:$0xff]  ;;  %v15693_v4 = vcombine.high %v639_v56, %v647_v61  ;;  %v15692_v13 = vcombine.low %v639_v56, %v647_v61  ;;  %v15506_v56 = vcombine.low %v450_v42, %v458_v43  ;;  %v537_v42 = vld [vmem:[#allocation10 + $0x450] sm:$0xff]  ;;  %v530_v43 = vld [vmem:[#allocation10 + $0x418] sm:$0xff] }
 0x2fe   :  { %5688 = vmatpush1.bf16.msra.mxu0 %v15612_v8  ;;  %v15695_v58 = vcombine.high %v640_v14, %v648_v0  ;;  %v409_v8 = vld [vmem:[#allocation10 + $0x50] sm:$0xff]  ;;  %v15694_v17 = vcombine.low %v640_v14, %v648_v0 }
 0x2ff   :  { %5689 = vmatprep.subr.bf16.mxu0 %v15629_v10  ;;  %v410_v10 = vld [vmem:[#allocation10 + $0x58] sm:$0xff]  ;;  %v15457_v38 = vcombine.high %v401_v7, %v409_v8  ;;  %v481_v14 = vld [vmem:[#allocation10 + $0x290] sm:$0xff] }
 0x300   :  { %5729 = vmatpush1.bf16.msra.mxu1 %v15614_v9  ;;  %v402_v9 = vld [vmem:[#allocation10 + $0x18] sm:$0xff]  ;;  %v489_v0 = vld [vmem:[#allocation10 + $0x2d0] sm:$0xff] }
 0x301   :  { %5730 = vmatprep.subr.bf16.mxu1 %v15631_v15  ;;  %v387_v15 = vsel %vm386_vm6, %v384_v6, %v361_v2  ;;  %v15459_v20 = vcombine.high %v402_v9, %v410_v10  ;;  %v490_v2 = vld [vmem:[#allocation10 + $0x2d8] sm:$0xff]  ;;  %v15537_v6 = vcombine.high %v481_v14, %v489_v0 }
 0x302   :  { %5690 = vmatpush1.bf16.msra.mxu0 %v15628_v37  ;;  %v18037_v24 = vpack.c.bf16 %v387_v15, %v387_v15  ;;  %v418_v37 = vld [vmem:[#allocation10 + $0x98] sm:$0xff] }
 0x303   :  { %5691 = vmatprep.subr.bf16.mxu0 %v15645_v16  ;;  %v15458_v16 = vcombine.low %v402_v9, %v410_v10  ;;  %v498_v9 = vld [vmem:[#allocation10 + $0x318] sm:$0xff] }
 0x304   :  { %5731 = vmatpush1.bf16.msra.mxu1 %v15630_v26  ;;  %v15456_v26 = vcombine.low %v401_v7, %v409_v8  ;;  %v497_v7 = vld [vmem:[#allocation10 + $0x310] sm:$0xff]  ;;  %v506_v10 = vld [vmem:[#allocation10 + $0x358] sm:$0xff] }
 0x305   :  { %5732 = vmatprep.subr.bf16.mxu1 %v15647_v44  ;;  %v15475_v44 = vcombine.high %v418_v37, %v426_v25  ;;  %v505_v8 = vld [vmem:[#allocation10 + $0x350] sm:$0xff] }
 0x306   :  { %5692 = vmatpush1.bf16.msra.mxu0 %v15644_v34  ;;  %v15474_v34 = vcombine.low %v418_v37, %v426_v25  ;;  %v15552_v28 = vcombine.low %v497_v7, %v505_v8 }
 0x307   :  { %5693 = vmatprep.subr.bf16.mxu0 %v15661_v40  ;;  %v449_v40 = vld [vmem:[#allocation10 + $0x190] sm:$0xff] }
 0x308   :  { %5733 = vmatpush1.bf16.msra.mxu1 %v15646_v54  ;;  %v15491_v54 = vcombine.high %v434_v29, %v442_v30 }
 0x309   :  { %5734 = vmatprep.subr.bf16.mxu1 %v15663_v41  ;;  %v457_v41 = vld [vmem:[#allocation10 + $0x1d0] sm:$0xff] }
 0x30a   :  { %5694 = vmatpush1.bf16.msra.mxu0 %v15660_v5  ;;  %v15505_v47 = vcombine.high %v449_v40, %v457_v41  ;;  %v465_v5 = vld [vmem:[#allocation10 + $0x210] sm:$0xff] }
 0x30b   :  { %5695 = vmatprep.subr.bf16.mxu0 %v15677_v50  ;;  %v466_v50 = vld [vmem:[#allocation10 + $0x218] sm:$0xff] }
 0x30c   :  { %5735 = vmatpush1.bf16.msra.mxu1 %v15662_v49  ;;  %v473_v49 = vld [vmem:[#allocation10 + $0x250] sm:$0xff]  ;;  %v15523_v62 = vcombine.high %v466_v50, %v474_v52 }
 0x30d   :  { %5736 = vmatprep.subr.bf16.mxu1 %v15679_v55  ;;  %v15504_v55 = vcombine.low %v449_v40, %v457_v41  ;;  %v15521_v61 = vcombine.high %v465_v5, %v473_v49  ;;  %v529_v41 = vld [vmem:[#allocation10 + $0x410] sm:$0xff] }
 0x30e   :  { %5696 = vmatpush1.bf16.msra.mxu0 %v15676_v1  ;;  %v482_v1 = vld [vmem:[#allocation10 + $0x298] sm:$0xff] }
 0x30f   :  { %5697 = vmatprep.subr.bf16.mxu0 %v15693_v4  ;;  %v15522_v4 = vcombine.low %v466_v50, %v474_v52  ;;  %v15538_v15 = vcombine.low %v482_v1, %v490_v2  ;;  %v553_v50 = vld [vmem:[#allocation10 + $0x4d0] sm:$0xff]  ;;  %v546_v52 = vld [vmem:[#allocation10 + $0x498] sm:$0xff] }
 0x310   :  { %5737 = vmatpush1.bf16.msra.mxu1 %v15678_v3  ;;  %v15520_v3 = vcombine.low %v465_v5, %v473_v49  ;;  %v545_v49 = vld [vmem:[#allocation10 + $0x490] sm:$0xff] }
 0x311   :  { %5738 = vmatprep.subr.bf16.mxu1 %v15695_v58  ;;  %v15539_v58 = vcombine.high %v482_v1, %v490_v2  ;;  %v569_v1 = vld [vmem:[#allocation10 + $0x550] sm:$0xff]  ;;  %v562_v2 = vld [vmem:[#allocation10 + $0x518] sm:$0xff] }
 0x312   :  { %5698 = vmatpush1.bf16.msra.mxu0 %v15692_v13  ;;  %v15536_v13 = vcombine.low %v481_v14, %v489_v0  ;;  %v561_v0 = vld [vmem:[#allocation10 + $0x510] sm:$0xff] }
 0x313   :  { %5749 = vmatprep.subr.bf16.mxu0 %v15457_v38 }
 0x314   :  { %5739 = vmatpush1.bf16.msra.mxu1 %v15694_v17  ;;  %v15553_v17 = vcombine.high %v497_v7, %v505_v8  ;;  %v577_v8 = vld [vmem:[#allocation10 + $0x590] sm:$0xff] }
 0x315   :  { %5790 = vmatprep.subr.bf16.mxu1 %v15459_v20  ;;  %5700 = vmatmul.mubr.bf16.vlgmr.msra.gmra.mrb[32].mxu0 %v18037_v24  ;;  %v15555_v20 = vcombine.high %v498_v9, %v506_v10 }
 0x316   :  { %5750 = vmatpush1.bf16.msra.mxu0 %v15456_v26  ;;  %5781 = vmatprep.mubr.bf16.mxu0 %v18001_v11  ;;  %v514_v26 = vld [vmem:[#allocation10 + $0x398] sm:$0xff] }
 0x317   :  { %5741 = vmatmul.mubr.bf16.vlgmr.msra.gmra.mrb[32].mxu1 %v18037_v24  ;;  %5751 = vmatprep.subr.bf16.mxu0 %v15473_v19 }
 0x318   :  { %5791 = vmatpush1.bf16.msra.mxu1 %v15458_v16  ;;  %5822 = vmatprep.mubr.bf16.mxu1 %v18001_v11  ;;  %v522_v16 = vld [vmem:[#allocation10 + $0x3d8] sm:$0xff] }
 0x319   :  { %5792 = vmatprep.subr.bf16.mxu1 %v15475_v44  ;;  %v15571_v40 = vcombine.high %v514_v26, %v522_v16 }
 0x31a   :  { %5752 = vmatpush1.bf16.msra.mxu0 %v15472_v31 }
 0x31b   :  { %5753 = vmatprep.subr.bf16.mxu0 %v15489_v36  ;;  %v15569_v36 = vcombine.high %v513_v32, %v521_v21 }
 0x31c   :  { %5793 = vmatpush1.bf16.msra.mxu1 %v15474_v34  ;;  %v15554_v34 = vcombine.low %v498_v9, %v506_v10  ;;  %v585_v9 = vld [vmem:[#allocation10 + $0x5d0] sm:$0xff]  ;;  %v578_v10 = vld [vmem:[#allocation10 + $0x598] sm:$0xff] }
 0x31d   :  { %5794 = vmatprep.subr.bf16.mxu1 %v15491_v54 }
 0x31e   :  { %5754 = vmatpush1.bf16.msra.mxu0 %v15488_v45  ;;  %v538_v45 = vld [vmem:[#allocation10 + $0x458] sm:$0xff] }
 0x31f   :  { %5755 = vmatprep.subr.bf16.mxu0 %v15505_v47  ;;  %v15570_v47 = vcombine.low %v514_v26, %v522_v16  ;;  %v15587_v5 = vcombine.high %v530_v43, %v538_v45  ;;  %v15632_v26 = vcombine.low %v577_v8, %v585_v9 }
 0x320   :  { %5795 = vmatpush1.bf16.msra.mxu1 %v15490_v46  ;;  %v15568_v46 = vcombine.low %v513_v32, %v521_v21  ;;  %v593_v32 = vld [vmem:[#allocation10 + $0x610] sm:$0xff] }
 0x321   :  { %5796 = vmatprep.subr.bf16.mxu1 %v15507_v48  ;;  %v15585_v48 = vcombine.high %v529_v41, %v537_v42  ;;  %v601_v21 = vld [vmem:[#allocation10 + $0x650] sm:$0xff] }
 0x322   :  { %5756 = vmatpush1.bf16.msra.mxu0 %v15504_v55  ;;  %v554_v55 = vld [vmem:[#allocation10 + $0x4d8] sm:$0xff] }
 0x323   :  { %5757 = vmatprep.subr.bf16.mxu0 %v15521_v61  ;;  %v15586_v61 = vcombine.low %v530_v43, %v538_v45  ;;  %v15603_v14 = vcombine.high %v546_v52, %v554_v55  ;;  %v633_v43 = vld [vmem:[#allocation10 + $0x750] sm:$0xff]  ;;  %v626_v45 = vld [vmem:[#allocation10 + $0x718] sm:$0xff] }
 0x324   :  { %5797 = vmatpush1.bf16.msra.mxu1 %v15506_v56  ;;  %v15584_v56 = vcombine.low %v529_v41, %v537_v42  ;;  %v625_v42 = vld [vmem:[#allocation10 + $0x710] sm:$0xff] }
 0x325   :  { %5798 = vmatprep.subr.bf16.mxu1 %v15523_v62  ;;  %v15601_v62 = vcombine.high %v545_v49, %v553_v50 }
 0x326   :  { %5758 = vmatpush1.bf16.msra.mxu0 %v15520_v3  ;;  %v570_v3 = vld [vmem:[#allocation10 + $0x558] sm:$0xff] }
 0x327   :  { %5759 = vmatprep.subr.bf16.mxu0 %v15537_v6  ;;  %v15602_v6 = vcombine.low %v546_v52, %v554_v55  ;;  %v15619_v7 = vcombine.high %v562_v2, %v570_v3  ;;  %v649_v52 = vld [vmem:[#allocation10 + $0x7d0] sm:$0xff]  ;;  %v642_v55 = vld [vmem:[#allocation10 + $0x798] sm:$0xff] }
 0x328   :  { %5799 = vmatpush1.bf16.msra.mxu1 %v15522_v4  ;;  %v4175_v38 = vpop.f32.mrb[20].mxu0  ;;  %v15600_v4 = vcombine.low %v545_v49, %v553_v50  ;;  %v641_v50 = vld [vmem:[#allocation10 + $0x790] sm:$0xff] }
 0x329   :  { %5800 = vmatprep.subr.bf16.mxu1 %v15539_v58  ;;  %v4177_v25 = vpop.f32.mrb[21].mxu0  ;;  %v15617_v58 = vcombine.high %v561_v0, %v569_v1 }
 0x32a   :  { %v4216_v37 = vpop.f32.mrb[20].mxu1  ;;  %v4179_v59 = vpop.f32.mrb[22].mxu0  ;;  %5760 = vmatpush1.bf16.msra.mxu0 %v15536_v13  ;;  %v586_v13 = vld [vmem:[#allocation10 + $0x5d8] sm:$0xff] }
 0x32b   :  { %v18043_v19 = vadd.f32 %v4216_v37, %v4175_v38  ;;  %v4218_v44 = vpop.f32.mrb[21].mxu1  ;;  %v4180_v31 = vpop.f32.mrb[23].mxu0  ;;  %5761 = vmatprep.subr.bf16.mxu0 %v15553_v17  ;;  %v15618_v17 = vcombine.low %v562_v2, %v570_v3  ;;  %v15633_v38 = vcombine.high %v577_v8, %v585_v9  ;;  %v594_v37 = vld [vmem:[#allocation10 + $0x618] sm:$0xff]  ;;  %v15634_v16 = vcombine.low %v578_v10, %v586_v13  ;;  %v411_v2 = vld [vmem:[#allocation10 + $0x60] sm:$0xff]  ;;  %v404_v3 = vld [vmem:[#allocation10 + $0x28] sm:$0xff] }
 0x32c   :  { %v18045_v29 = vadd.f32 %v4218_v44, %v4177_v25  ;;  %v4220_v30 = vpop.f32.mrb[22].mxu1  ;;  %5801 = vmatpush1.bf16.msra.mxu1 %v15538_v15  ;;  %v15616_v15 = vcombine.low %v561_v0, %v569_v1  ;;  %v602_v25 = vld [vmem:[#allocation10 + $0x658] sm:$0xff]  ;;  %v15649_v44 = vcombine.high %v593_v32, %v601_v21  ;;  %v403_v1 = vld [vmem:[#allocation10 + $0x20] sm:$0xff] }
 0x32d   :  { %v4221_v54 = vpop.f32.mrb[23].mxu1  ;;  %5802 = vmatprep.subr.bf16.mxu1 %v15555_v20  ;;  %v15635_v20 = vcombine.high %v578_v10, %v586_v13  ;;  %v15651_v59 = vcombine.high %v594_v37, %v602_v25  ;;  %v617_v30 = vld [vmem:[#allocation10 + $0x6d0] sm:$0xff]  ;;  %v610_v31 = vld [vmem:[#allocation10 + $0x698] sm:$0xff]  ;;  %v419_v9 = vld [vmem:[#allocation10 + $0xa0] sm:$0xff] }
 0x32e   :  { %5762 = vmatpush1.bf16.msra.mxu0 %v15552_v28  ;;  %v609_v28 = vld [vmem:[#allocation10 + $0x690] sm:$0xff]  ;;  %v15650_v54 = vcombine.low %v594_v37, %v602_v25  ;;  %v427_v10 = vld [vmem:[#allocation10 + $0xe0] sm:$0xff]  ;;  %v420_v13 = vld [vmem:[#allocation10 + $0xa8] sm:$0xff] }
 0x32f   :  { %5763 = vmatprep.subr.bf16.mxu0 %v15569_v36  ;;  %v15648_v36 = vcombine.low %v593_v32, %v601_v21  ;;  %v435_v21 = vld [vmem:[#allocation10 + $0x120] sm:$0xff]  ;;  %v436_v25 = vld [vmem:[#allocation10 + $0x128] sm:$0xff] }
 0x330   :  { %5803 = vmatpush1.bf16.msra.mxu1 %v15554_v34  ;;  %v618_v34 = vld [vmem:[#allocation10 + $0x6d8] sm:$0xff]  ;;  %v443_v37 = vld [vmem:[#allocation10 + $0x160] sm:$0xff] }
 0x331   :  { %5804 = vmatprep.subr.bf16.mxu1 %v15571_v40  ;;  %v15665_v40 = vcombine.high %v609_v28, %v617_v30  ;;  %v15667_v41 = vcombine.high %v610_v31, %v618_v34 }
 0x332   :  { %5764 = vmatpush1.bf16.msra.mxu0 %v15568_v46  ;;  %v634_v46 = vld [vmem:[#allocation10 + $0x758] sm:$0xff] }
 0x333   :  { %5765 = vmatprep.subr.bf16.mxu0 %v15585_v48  ;;  %v15666_v48 = vcombine.low %v610_v31, %v618_v34  ;;  %v15683_v49 = vcombine.high %v626_v45, %v634_v46  ;;  %v459_v31 = vld [vmem:[#allocation10 + $0x1e0] sm:$0xff]  ;;  %v452_v34 = vld [vmem:[#allocation10 + $0x1a8] sm:$0xff] }
 0x334   :  { %5805 = vmatpush1.bf16.msra.mxu1 %v15570_v47  ;;  %v15664_v47 = vcombine.low %v609_v28, %v617_v30  ;;  %v451_v30 = vld [vmem:[#allocation10 + $0x1a0] sm:$0xff] }
 0x335   :  { %5806 = vmatprep.subr.bf16.mxu1 %v15587_v5  ;;  %v15681_v5 = vcombine.high %v625_v42, %v633_v43 }
 0x336   :  { %5766 = vmatpush1.bf16.msra.mxu0 %v15584_v56  ;;  %v650_v56 = vld [vmem:[#allocation10 + $0x7d8] sm:$0xff] }
 0x337   :  { %5767 = vmatprep.subr.bf16.mxu0 %v15601_v62  ;;  %v15682_v62 = vcombine.low %v626_v45, %v634_v46  ;;  %v15699_v0 = vcombine.high %v642_v55, %v650_v56  ;;  %v475_v45 = vld [vmem:[#allocation10 + $0x260] sm:$0xff]  ;;  %v468_v46 = vld [vmem:[#allocation10 + $0x228] sm:$0xff] }
 0x338   :  { %5807 = vmatpush1.bf16.msra.mxu1 %v15586_v61  ;;  %v15680_v61 = vcombine.low %v625_v42, %v633_v43  ;;  %v467_v43 = vld [vmem:[#allocation10 + $0x220] sm:$0xff] }
 0x339   :  { %5808 = vmatprep.subr.bf16.mxu1 %v15603_v14  ;;  %v15697_v14 = vcombine.high %v641_v50, %v649_v52 }
 0x33a   :  { %5768 = vmatpush1.bf16.msra.mxu0 %v15600_v4  ;;  %v412_v4 = vld [vmem:[#allocation10 + $0x68] sm:$0xff] }
 0x33b   :  { %5769 = vmatprep.subr.bf16.mxu0 %v15617_v58  ;;  %v15698_v58 = vcombine.low %v642_v55, %v650_v56  ;;  %v15463_v8 = vcombine.high %v404_v3, %v412_v4  ;;  %v491_v55 = vld [vmem:[#allocation10 + $0x2e0] sm:$0xff]  ;;  %v484_v56 = vld [vmem:[#allocation10 + $0x2a8] sm:$0xff] }
 0x33c   :  { %5809 = vmatpush1.bf16.msra.mxu1 %v15602_v6  ;;  %v15696_v6 = vcombine.low %v641_v50, %v649_v52  ;;  %v483_v52 = vld [vmem:[#allocation10 + $0x2a0] sm:$0xff] }
 0x33d   :  { %5810 = vmatprep.subr.bf16.mxu1 %v15619_v7  ;;  %v15461_v7 = vcombine.high %v403_v1, %v411_v2 }
 0x33e   :  { %5770 = vmatpush1.bf16.msra.mxu0 %v15616_v15  ;;  %v428_v15 = vld [vmem:[#allocation10 + $0xe8] sm:$0xff] }
 0x33f   :  { %5771 = vmatprep.subr.bf16.mxu0 %v15633_v38  ;;  %v15462_v38 = vcombine.low %v404_v3, %v412_v4  ;;  %v15479_v32 = vcombine.high %v420_v13, %v428_v15  ;;  %v507_v3 = vld [vmem:[#allocation10 + $0x360] sm:$0xff]  ;;  %v500_v4 = vld [vmem:[#allocation10 + $0x328] sm:$0xff] }
 0x340   :  { %5811 = vmatpush1.bf16.msra.mxu1 %v15618_v17  ;;  %v15460_v17 = vcombine.low %v403_v1, %v411_v2  ;;  %v499_v2 = vld [vmem:[#allocation10 + $0x320] sm:$0xff] }
 0x341   :  { %5812 = vmatprep.subr.bf16.mxu1 %v15635_v20  ;;  %v15477_v20 = vcombine.high %v419_v9, %v427_v10 }
 0x342   :  { %5772 = vmatpush1.bf16.msra.mxu0 %v15632_v26  ;;  %v444_v26 = vld [vmem:[#allocation10 + $0x168] sm:$0xff] }
 0x343   :  { %5773 = vmatprep.subr.bf16.mxu0 %v15649_v44  ;;  %v15478_v44 = vcombine.low %v420_v13, %v428_v15  ;;  %v15495_v28 = vcombine.high %v436_v25, %v444_v26  ;;  %v515_v13 = vld [vmem:[#allocation10 + $0x3a0] sm:$0xff] }
 0x344   :  { %5813 = vmatpush1.bf16.msra.mxu1 %v15634_v16  ;;  %v15476_v16 = vcombine.low %v419_v9, %v427_v10  ;;  %v523_v15 = vld [vmem:[#allocation10 + $0x3e0] sm:$0xff] }
 0x345   :  { %5814 = vmatprep.subr.bf16.mxu1 %v15651_v59  ;;  %v15493_v59 = vcombine.high %v435_v21, %v443_v37 }
 0x346   :  { %5774 = vmatpush1.bf16.msra.mxu0 %v15648_v36  ;;  %v460_v36 = vld [vmem:[#allocation10 + $0x1e8] sm:$0xff] }
 0x347   :  { %5775 = vmatprep.subr.bf16.mxu0 %v15665_v40  ;;  %v15494_v40 = vcombine.low %v436_v25, %v444_v26  ;;  %v15511_v42 = vcombine.high %v452_v34, %v460_v36  ;;  %v15556_v26 = vcombine.low %v499_v2, %v507_v3 }
 0x348   :  { %5815 = vmatpush1.bf16.msra.mxu1 %v15650_v54  ;;  %v15492_v54 = vcombine.low %v435_v21, %v443_v37 }
 0x349   :  { %5816 = vmatprep.subr.bf16.mxu1 %v15667_v41  ;;  %v15509_v41 = vcombine.high %v451_v30, %v459_v31 }
 0x34a   :  { %5776 = vmatpush1.bf16.msra.mxu0 %v15664_v47  ;;  %v476_v47 = vld [vmem:[#allocation10 + $0x268] sm:$0xff] }
 0x34b   :  { %5777 = vmatprep.subr.bf16.mxu0 %v15681_v5  ;;  %v15510_v5 = vcombine.low %v452_v34, %v460_v36  ;;  %v15527_v50 = vcombine.high %v468_v46, %v476_v47  ;;  %v531_v36 = vld [vmem:[#allocation10 + $0x420] sm:$0xff] }
 0x34c   :  { %5817 = vmatpush1.bf16.msra.mxu1 %v15666_v48  ;;  %v15508_v48 = vcombine.low %v451_v30, %v459_v31  ;;  %v15573_v30 = vcombine.high %v515_v13, %v523_v15 }
 0x34d   :  { %5818 = vmatprep.subr.bf16.mxu1 %v15683_v49  ;;  %v15525_v49 = vcombine.high %v467_v43, %v475_v45 }
 0x34e   :  { %5778 = vmatpush1.bf16.msra.mxu0 %v15680_v61  ;;  %v492_v61 = vld [vmem:[#allocation10 + $0x2e8] sm:$0xff] }
 0x34f   :  { %5779 = vmatprep.subr.bf16.mxu0 %v15697_v14  ;;  %v15526_v14 = vcombine.low %v468_v46, %v476_v47  ;;  %v15543_v1 = vcombine.high %v484_v56, %v492_v61  ;;  %v547_v47 = vld [vmem:[#allocation10 + $0x4a0] sm:$0xff] }
 0x350   :  { %5819 = vmatpush1.bf16.msra.mxu1 %v15682_v62  ;;  %v15524_v62 = vcombine.low %v467_v43, %v475_v45 }
 0x351   :  { %5820 = vmatprep.subr.bf16.mxu1 %v15699_v0  ;;  %v15541_v0 = vcombine.high %v483_v52, %v491_v55 }
 0x352   :  { %5780 = vmatpush1.bf16.msra.mxu0 %v15696_v6  ;;  %v508_v6 = vld [vmem:[#allocation10 + $0x368] sm:$0xff] }
 0x353   :  { %5831 = vmatprep.subr.bf16.mxu0 %v15461_v7  ;;  %v15542_v7 = vcombine.low %v484_v56, %v492_v61  ;;  %v15559_v10 = vcombine.high %v500_v4, %v508_v6  ;;  %v563_v61 = vld [vmem:[#allocation10 + $0x520] sm:$0xff] }
 0x354   :  { %5821 = vmatpush1.bf16.msra.mxu1 %v15698_v58  ;;  %v15540_v58 = vcombine.low %v483_v52, %v491_v55 }
 0x355   :  { %5872 = vmatprep.subr.bf16.mxu1 %v15463_v8  ;;  %5782 = vmatmul.mubr.bf16.vlgmr.msra.gmra.mrb[36].mxu0 %v18037_v24  ;;  %v15557_v8 = vcombine.high %v499_v2, %v507_v3 }
 0x356   :  { %5832 = vmatpush1.bf16.msra.mxu0 %v15460_v17  ;;  %5863 = vmatprep.mubr.bf16.mxu0 %v18001_v11 }
 0x357   :  { %5823 = vmatmul.mubr.bf16.vlgmr.msra.gmra.mrb[36].mxu1 %v18037_v24  ;;  %5833 = vmatprep.subr.bf16.mxu0 %v15477_v20  ;;  %v516_v20 = vld [vmem:[#allocation10 + $0x3a8] sm:$0xff] }
 0x358   :  { %5873 = vmatpush1.bf16.msra.mxu1 %v15462_v38  ;;  %5904 = vmatprep.mubr.bf16.mxu1 %v18001_v11 }
 0x359   :  { %5874 = vmatprep.subr.bf16.mxu1 %v15479_v32  ;;  %v524_v32 = vld [vmem:[#allocation10 + $0x3e8] sm:$0xff] }
 0x35a   :  { %5834 = vmatpush1.bf16.msra.mxu0 %v15476_v16  ;;  %v15575_v34 = vcombine.high %v516_v20, %v524_v32  ;;  %v15574_v43 = vcombine.low %v516_v20, %v524_v32  ;;  %v596_v20 = vld [vmem:[#allocation10 + $0x628] sm:$0xff] }
 0x35b   :  { %5835 = vmatprep.subr.bf16.mxu0 %v15493_v59  ;;  %v604_v32 = vld [vmem:[#allocation10 + $0x668] sm:$0xff] }
 0x35c   :  { %5875 = vmatpush1.bf16.msra.mxu1 %v15478_v44 }
 0x35d   :  { %5876 = vmatprep.subr.bf16.mxu1 %v15495_v28  ;;  %v15558_v28 = vcombine.low %v500_v4, %v508_v6  ;;  %v579_v6 = vld [vmem:[#allocation10 + $0x5a0] sm:$0xff] }
 0x35e   :  { %5836 = vmatpush1.bf16.msra.mxu0 %v15492_v54  ;;  %v539_v54 = vld [vmem:[#allocation10 + $0x460] sm:$0xff] }
 0x35f   :  { %5837 = vmatprep.subr.bf16.mxu0 %v15509_v41  ;;  %v540_v41 = vld [vmem:[#allocation10 + $0x468] sm:$0xff]  ;;  %v15589_v45 = vcombine.high %v531_v36, %v539_v54 }
 0x360   :  { %5877 = vmatpush1.bf16.msra.mxu1 %v15494_v40  ;;  %v532_v40 = vld [vmem:[#allocation10 + $0x428] sm:$0xff] }
 0x361   :  { %5878 = vmatprep.subr.bf16.mxu1 %v15511_v42  ;;  %v15572_v42 = vcombine.low %v515_v13, %v523_v15  ;;  %v15591_v46 = vcombine.high %v532_v40, %v540_v41  ;;  %v15590_v52 = vcombine.low %v532_v40, %v540_v41  ;;  %v627_v41 = vld [vmem:[#allocation10 + $0x720] sm:$0xff] }
 0x362   :  { %5838 = vmatpush1.bf16.msra.mxu0 %v15508_v48  ;;  %v555_v48 = vld [vmem:[#allocation10 + $0x4e0] sm:$0xff] }
 0x363   :  { %5839 = vmatprep.subr.bf16.mxu0 %v15525_v49  ;;  %v556_v49 = vld [vmem:[#allocation10 + $0x4e8] sm:$0xff]  ;;  %v15605_v55 = vcombine.high %v547_v47, %v555_v48 }
 0x364   :  { %5879 = vmatpush1.bf16.msra.mxu1 %v15510_v5  ;;  %v548_v5 = vld [vmem:[#allocation10 + $0x4a8] sm:$0xff] }
 0x365   :  { %5880 = vmatprep.subr.bf16.mxu1 %v15527_v50  ;;  %v15588_v50 = vcombine.low %v531_v36, %v539_v54  ;;  %v15607_v56 = vcombine.high %v548_v5, %v556_v49  ;;  %v15606_v2 = vcombine.low %v548_v5, %v556_v49  ;;  %v15654_v36 = vcombine.low %v596_v20, %v604_v32  ;;  %v643_v49 = vld [vmem:[#allocation10 + $0x7a0] sm:$0xff] }
 0x366   :  { %5840 = vmatpush1.bf16.msra.mxu0 %v15524_v62  ;;  %v571_v62 = vld [vmem:[#allocation10 + $0x560] sm:$0xff] }
 0x367   :  { %5841 = vmatprep.subr.bf16.mxu0 %v15541_v0  ;;  %v572_v0 = vld [vmem:[#allocation10 + $0x568] sm:$0xff]  ;;  %v15621_v3 = vcombine.high %v563_v61, %v571_v62 }
 0x368   :  { %5881 = vmatpush1.bf16.msra.mxu1 %v15526_v14  ;;  %v4257_v9 = vpop.f32.mrb[24].mxu0  ;;  %v564_v14 = vld [vmem:[#allocation10 + $0x528] sm:$0xff] }
 0x369   :  { %5882 = vmatprep.subr.bf16.mxu1 %v15543_v1  ;;  %v4259_v38 = vpop.f32.mrb[25].mxu0  ;;  %v15604_v1 = vcombine.low %v547_v47, %v555_v48  ;;  %v15623_v4 = vcombine.high %v564_v14, %v572_v0 }
 0x36a   :  { %v4298_v17 = vpop.f32.mrb[24].mxu1  ;;  %v4261_v25 = vpop.f32.mrb[26].mxu0  ;;  %5842 = vmatpush1.bf16.msra.mxu0 %v15540_v58  ;;  %v587_v58 = vld [vmem:[#allocation10 + $0x5e0] sm:$0xff] }
 0x36b   :  { %v18051_v21 = vadd.f32 %v4298_v17, %v4257_v9  ;;  %v4300_v37 = vpop.f32.mrb[25].mxu1  ;;  %v4262_v59 = vpop.f32.mrb[27].mxu0  ;;  %5843 = vmatprep.subr.bf16.mxu0 %v15557_v8  ;;  %v588_v8 = vld [vmem:[#allocation10 + $0x5e8] sm:$0xff]  ;;  %v15620_v9 = vcombine.low %v563_v61, %v571_v62  ;;  %v15637_v13 = vcombine.high %v579_v6, %v587_v58  ;;  %v595_v17 = vld [vmem:[#allocation10 + $0x620] sm:$0xff] }
 0x36c   :  { %v18053_v16 = vadd.f32 %v4300_v37, %v4259_v38  ;;  %v4302_v44 = vpop.f32.mrb[26].mxu1  ;;  %5883 = vmatpush1.bf16.msra.mxu1 %v15542_v7  ;;  %v580_v7 = vld [vmem:[#allocation10 + $0x5a8] sm:$0xff]  ;;  %v603_v38 = vld [vmem:[#allocation10 + $0x660] sm:$0xff]  ;;  %v15636_v37 = vcombine.low %v579_v6, %v587_v58 }
 0x36d   :  { %v4303_v31 = vpop.f32.mrb[27].mxu1  ;;  %5884 = vmatprep.subr.bf16.mxu1 %v15559_v10  ;;  %v15622_v10 = vcombine.low %v564_v14, %v572_v0  ;;  %v15639_v15 = vcombine.high %v580_v7, %v588_v8  ;;  %v15638_v25 = vcombine.low %v580_v7, %v588_v8  ;;  %v15655_v44 = vcombine.high %v596_v20, %v604_v32  ;;  %v611_v59 = vld [vmem:[#allocation10 + $0x6a0] sm:$0xff]  ;;  %v405_v0 = vld [vmem:[#allocation10 + $0x30] sm:$0xff] }
 0x36e   :  { %5844 = vmatpush1.bf16.msra.mxu0 %v15556_v26  ;;  %v15653_v26 = vcombine.high %v595_v17, %v603_v38  ;;  %v620_v31 = vld [vmem:[#allocation10 + $0x6e8] sm:$0xff]  ;;  %v421_v8 = vld [vmem:[#allocation10 + $0xb0] sm:$0xff] }
 0x36f   :  { %5845 = vmatprep.subr.bf16.mxu0 %v15573_v30  ;;  %v612_v30 = vld [vmem:[#allocation10 + $0x6a8] sm:$0xff]  ;;  %v437_v32 = vld [vmem:[#allocation10 + $0x130] sm:$0xff] }
 0x370   :  { %5885 = vmatpush1.bf16.msra.mxu1 %v15558_v28  ;;  %v619_v28 = vld [vmem:[#allocation10 + $0x6e0] sm:$0xff]  ;;  %v15671_v40 = vcombine.high %v612_v30, %v620_v31  ;;  %v15670_v47 = vcombine.low %v612_v30, %v620_v31  ;;  %v453_v31 = vld [vmem:[#allocation10 + $0x1b0] sm:$0xff] }
 0x371   :  { %5886 = vmatprep.subr.bf16.mxu1 %v15575_v34  ;;  %v15652_v34 = vcombine.low %v595_v17, %v603_v38  ;;  %v15669_v54 = vcombine.high %v611_v59, %v619_v28 }
 0x372   :  { %5846 = vmatpush1.bf16.msra.mxu0 %v15572_v42  ;;  %v635_v42 = vld [vmem:[#allocation10 + $0x760] sm:$0xff] }
 0x373   :  { %5847 = vmatprep.subr.bf16.mxu0 %v15589_v45  ;;  %v636_v45 = vld [vmem:[#allocation10 + $0x768] sm:$0xff]  ;;  %v15685_v48 = vcombine.high %v627_v41, %v635_v42 }
 0x374   :  { %5887 = vmatpush1.bf16.msra.mxu1 %v15574_v43  ;;  %v628_v43 = vld [vmem:[#allocation10 + $0x728] sm:$0xff] }
 0x375   :  { %5888 = vmatprep.subr.bf16.mxu1 %v15591_v46  ;;  %v15668_v46 = vcombine.low %v611_v59, %v619_v28  ;;  %v15687_v5 = vcombine.high %v628_v43, %v636_v45  ;;  %v15686_v61 = vcombine.low %v628_v43, %v636_v45  ;;  %v469_v45 = vld [vmem:[#allocation10 + $0x230] sm:$0xff] }
 0x376   :  { %5848 = vmatpush1.bf16.msra.mxu0 %v15588_v50  ;;  %v651_v50 = vld [vmem:[#allocation10 + $0x7e0] sm:$0xff] }
 0x377   :  { %5849 = vmatprep.subr.bf16.mxu0 %v15605_v55  ;;  %v652_v55 = vld [vmem:[#allocation10 + $0x7e8] sm:$0xff]  ;;  %v15701_v62 = vcombine.high %v643_v49, %v651_v50 }
 0x378   :  { %5889 = vmatpush1.bf16.msra.mxu1 %v15590_v52  ;;  %v644_v52 = vld [vmem:[#allocation10 + $0x7a8] sm:$0xff] }
 0x379   :  { %5890 = vmatprep.subr.bf16.mxu1 %v15607_v56  ;;  %v15684_v56 = vcombine.low %v627_v41, %v635_v42  ;;  %v15703_v14 = vcombine.high %v644_v52, %v652_v55  ;;  %v15702_v6 = vcombine.low %v644_v52, %v652_v55  ;;  %v485_v52 = vld [vmem:[#allocation10 + $0x2b0] sm:$0xff] }
 0x37a   :  { %5850 = vmatpush1.bf16.msra.mxu0 %v15604_v1  ;;  %v413_v1 = vld [vmem:[#allocation10 + $0x70] sm:$0xff] }
 0x37b   :  { %5851 = vmatprep.subr.bf16.mxu0 %v15621_v3  ;;  %v414_v3 = vld [vmem:[#allocation10 + $0x78] sm:$0xff]  ;;  %v15465_v58 = vcombine.high %v405_v0, %v413_v1  ;;  %v493_v55 = vld [vmem:[#allocation10 + $0x2f0] sm:$0xff] }
 0x37c   :  { %5891 = vmatpush1.bf16.msra.mxu1 %v15606_v2  ;;  %v406_v2 = vld [vmem:[#allocation10 + $0x38] sm:$0xff] }
 0x37d   :  { %5892 = vmatprep.subr.bf16.mxu1 %v15623_v4  ;;  %v15700_v4 = vcombine.low %v643_v49, %v651_v50  ;;  %v15467_v7 = vcombine.high %v406_v2, %v414_v3  ;;  %v15466_v17 = vcombine.low %v406_v2, %v414_v3  ;;  %v501_v2 = vld [vmem:[#allocation10 + $0x330] sm:$0xff] }
 0x37e   :  { %5852 = vmatpush1.bf16.msra.mxu0 %v15620_v9  ;;  %v429_v9 = vld [vmem:[#allocation10 + $0xf0] sm:$0xff] }
 0x37f   :  { %5853 = vmatprep.subr.bf16.mxu0 %v15637_v13  ;;  %v430_v13 = vld [vmem:[#allocation10 + $0xf8] sm:$0xff]  ;;  %v15481_v38 = vcombine.high %v421_v8, %v429_v9  ;;  %v509_v3 = vld [vmem:[#allocation10 + $0x370] sm:$0xff] }
 0x380   :  { %5893 = vmatpush1.bf16.msra.mxu1 %v15622_v10  ;;  %v422_v10 = vld [vmem:[#allocation10 + $0xb8] sm:$0xff] }
 0x381   :  { %5894 = vmatprep.subr.bf16.mxu1 %v15639_v15  ;;  %v15464_v15 = vcombine.low %v405_v0, %v413_v1  ;;  %v15483_v20 = vcombine.high %v422_v10, %v430_v13  ;;  %v15482_v59 = vcombine.low %v422_v10, %v430_v13  ;;  %v15545_v0 = vcombine.high %v485_v52, %v493_v55  ;;  %v517_v13 = vld [vmem:[#allocation10 + $0x3b0] sm:$0xff] }
 0x382   :  { %5854 = vmatpush1.bf16.msra.mxu0 %v15636_v37  ;;  %v445_v37 = vld [vmem:[#allocation10 + $0x170] sm:$0xff] }
 0x383   :  { %5855 = vmatprep.subr.bf16.mxu0 %v15653_v26  ;;  %v446_v26 = vld [vmem:[#allocation10 + $0x178] sm:$0xff]  ;;  %v15497_v28 = vcombine.high %v437_v32, %v445_v37 }
 0x384   :  { %5895 = vmatpush1.bf16.msra.mxu1 %v15638_v25  ;;  %v438_v25 = vld [vmem:[#allocation10 + $0x138] sm:$0xff] }
 0x385   :  { %5896 = vmatprep.subr.bf16.mxu1 %v15655_v44  ;;  %v15480_v44 = vcombine.low %v421_v8, %v429_v9  ;;  %v15499_v30 = vcombine.high %v438_v25, %v446_v26  ;;  %v15498_v41 = vcombine.low %v438_v25, %v446_v26  ;;  %v15561_v8 = vcombine.high %v501_v2, %v509_v3 }
 0x386   :  { %5856 = vmatpush1.bf16.msra.mxu0 %v15652_v34  ;;  %v461_v34 = vld [vmem:[#allocation10 + $0x1f0] sm:$0xff] }
 0x387   :  { %5857 = vmatprep.subr.bf16.mxu0 %v15669_v54  ;;  %v462_v54 = vld [vmem:[#allocation10 + $0x1f8] sm:$0xff]  ;;  %v15513_v42 = vcombine.high %v453_v31, %v461_v34 }
 0x388   :  { %5897 = vmatpush1.bf16.msra.mxu1 %v15654_v36  ;;  %v454_v36 = vld [vmem:[#allocation10 + $0x1b8] sm:$0xff] }
 0x389   :  { %5898 = vmatprep.subr.bf16.mxu1 %v15671_v40  ;;  %v15496_v40 = vcombine.low %v437_v32, %v445_v37  ;;  %v15515_v43 = vcombine.high %v454_v36, %v462_v54  ;;  %v15514_v49 = vcombine.low %v454_v36, %v462_v54  ;;  %v526_v32 = vld [vmem:[#allocation10 + $0x3f8] sm:$0xff] }
 0x38a   :  { %5858 = vmatpush1.bf16.msra.mxu0 %v15668_v46  ;;  %v477_v46 = vld [vmem:[#allocation10 + $0x270] sm:$0xff] }
 0x38b   :  { %5859 = vmatprep.subr.bf16.mxu0 %v15685_v48  ;;  %v478_v48 = vld [vmem:[#allocation10 + $0x278] sm:$0xff]  ;;  %v15529_v50 = vcombine.high %v469_v45, %v477_v46 }
 0x38c   :  { %5899 = vmatpush1.bf16.msra.mxu1 %v15670_v47  ;;  %v470_v47 = vld [vmem:[#allocation10 + $0x238] sm:$0xff] }
 0x38d   :  { %5900 = vmatprep.subr.bf16.mxu1 %v15687_v5  ;;  %v15512_v5 = vcombine.low %v453_v31, %v461_v34 }
 0x38e   :  { %5860 = vmatpush1.bf16.msra.mxu0 %v15684_v56  ;;  %v486_v56 = vld [vmem:[#allocation10 + $0x2b8] sm:$0xff] }
 0x38f   :  { %5861 = vmatprep.subr.bf16.mxu0 %v15701_v62  ;;  %v15528_v62 = vcombine.low %v469_v45, %v477_v46 }
 0x390   :  { %5901 = vmatpush1.bf16.msra.mxu1 %v15686_v61  ;;  %v494_v61 = vld [vmem:[#allocation10 + $0x2f8] sm:$0xff] }
 0x391   :  { %5902 = vmatprep.subr.bf16.mxu1 %v15703_v14  ;;  %v15530_v14 = vcombine.low %v470_v47, %v478_v48  ;;  %v15547_v1 = vcombine.high %v486_v56, %v494_v61 }
 0x392   :  { %5862 = vmatpush1.bf16.msra.mxu0 %v15700_v4  ;;  %v502_v4 = vld [vmem:[#allocation10 + $0x338] sm:$0xff] }
 0x393   :  { %5913 = vmatprep.subr.bf16.mxu0 %v15465_v58  ;;  %v15544_v58 = vcombine.low %v485_v52, %v493_v55 }
 0x394   :  { %5903 = vmatpush1.bf16.msra.mxu1 %v15702_v6  ;;  %v510_v6 = vld [vmem:[#allocation10 + $0x378] sm:$0xff] }
 0x395   :  { %5954 = vmatprep.subr.bf16.mxu1 %v15467_v7  ;;  %5864 = vmatmul.mubr.bf16.vlgmr.msra.gmra.mrb[40].mxu0 %v18037_v24  ;;  %v15546_v7 = vcombine.low %v486_v56, %v494_v61  ;;  %v15563_v10 = vcombine.high %v502_v4, %v510_v6  ;;  %v15562_v31 = vcombine.low %v502_v4, %v510_v6 }
 0x396   :  { %5914 = vmatpush1.bf16.msra.mxu0 %v15464_v15  ;;  %5945 = vmatprep.mubr.bf16.mxu0 %v18001_v11  ;;  %v525_v15 = vld [vmem:[#allocation10 + $0x3f0] sm:$0xff] }
 0x397   :  { %5905 = vmatmul.mubr.bf16.vlgmr.msra.gmra.mrb[40].mxu1 %v18037_v24  ;;  %5915 = vmatprep.subr.bf16.mxu0 %v15481_v38  ;;  %v15577_v34 = vcombine.high %v517_v13, %v525_v15  ;;  %v15576_v45 = vcombine.low %v517_v13, %v525_v15 }
 0x398   :  { %5955 = vmatpush1.bf16.msra.mxu1 %v15466_v17  ;;  %5986 = vmatprep.mubr.bf16.mxu1 %v18001_v11  ;;  %v15531_v11 = vcombine.high %v470_v47, %v478_v48 }
 0x399   :  { %5956 = vmatprep.subr.bf16.mxu1 %v15483_v20  ;;  %v518_v20 = vld [vmem:[#allocation10 + $0x3b8] sm:$0xff] }
 0x39a   :  { %5916 = vmatpush1.bf16.msra.mxu0 %v15480_v44  ;;  %v15560_v44 = vcombine.low %v501_v2, %v509_v3  ;;  %v15579_v54 = vcombine.high %v518_v20, %v526_v32  ;;  %v15578_v46 = vcombine.low %v518_v20, %v526_v32  ;;  %v605_v20 = vld [vmem:[#allocation10 + $0x670] sm:$0xff]  ;;  %v598_v32 = vld [vmem:[#allocation10 + $0x638] sm:$0xff] }
 0x39b   :  { %5917 = vmatprep.subr.bf16.mxu0 %v15497_v28 }
 0x39c   :  { %5957 = vmatpush1.bf16.msra.mxu1 %v15482_v59 }
 0x39d   :  { %5958 = vmatprep.subr.bf16.mxu1 %v15499_v30 }
 0x39e   :  { %5918 = vmatpush1.bf16.msra.mxu0 %v15496_v40  ;;  %v533_v40 = vld [vmem:[#allocation10 + $0x430] sm:$0xff] }
 0x39f   :  { %5919 = vmatprep.subr.bf16.mxu0 %v15513_v42  ;;  %v534_v42 = vld [vmem:[#allocation10 + $0x438] sm:$0xff] }
 0x3a0   :  { %5959 = vmatpush1.bf16.msra.mxu1 %v15498_v41  ;;  %v541_v41 = vld [vmem:[#allocation10 + $0x470] sm:$0xff] }
 0x3a1   :  { %5960 = vmatprep.subr.bf16.mxu1 %v15515_v43  ;;  %v542_v43 = vld [vmem:[#allocation10 + $0x478] sm:$0xff]  ;;  %v15593_v47 = vcombine.high %v533_v40, %v541_v41  ;;  %v15592_v52 = vcombine.low %v533_v40, %v541_v41 }
 0x3a2   :  { %5920 = vmatpush1.bf16.msra.mxu0 %v15512_v5  ;;  %v15595_v48 = vcombine.high %v534_v42, %v542_v43  ;;  %v549_v5 = vld [vmem:[#allocation10 + $0x4b0] sm:$0xff]  ;;  %v15594_v55 = vcombine.low %v534_v42, %v542_v43 }
 0x3a3   :  { %5921 = vmatprep.subr.bf16.mxu0 %v15529_v50  ;;  %v550_v50 = vld [vmem:[#allocation10 + $0x4b8] sm:$0xff] }
 0x3a4   :  { %5961 = vmatpush1.bf16.msra.mxu1 %v15514_v49  ;;  %v557_v49 = vld [vmem:[#allocation10 + $0x4f0] sm:$0xff] }
 0x3a5   :  { %5962 = vmatprep.subr.bf16.mxu1 %v15531_v11  ;;  %v558_v11 = vld [vmem:[#allocation10 + $0x4f8] sm:$0xff]  ;;  %v15609_v56 = vcombine.high %v549_v5, %v557_v49  ;;  %v15608_v2 = vcombine.low %v549_v5, %v557_v49 }
 0x3a6   :  { %5922 = vmatpush1.bf16.msra.mxu0 %v15528_v62  ;;  %v15611_v61 = vcombine.high %v550_v50, %v558_v11  ;;  %v565_v62 = vld [vmem:[#allocation10 + $0x530] sm:$0xff]  ;;  %v15610_v3 = vcombine.low %v550_v50, %v558_v11 }
 0x3a7   :  { %5923 = vmatprep.subr.bf16.mxu0 %v15545_v0  ;;  %v566_v0 = vld [vmem:[#allocation10 + $0x538] sm:$0xff] }
 0x3a8   :  { %5963 = vmatpush1.bf16.msra.mxu1 %v15530_v14  ;;  %v4339_v9 = vpop.f32.mrb[28].mxu0  ;;  %v573_v14 = vld [vmem:[#allocation10 + $0x570] sm:$0xff] }
 0x3a9   :  { %5964 = vmatprep.subr.bf16.mxu1 %v15547_v1  ;;  %v4341_v38 = vpop.f32.mrb[29].mxu0  ;;  %v574_v1 = vld [vmem:[#allocation10 + $0x578] sm:$0xff]  ;;  %v15625_v4 = vcombine.high %v565_v62, %v573_v14 }
 0x3aa   :  { %v4380_v17 = vpop.f32.mrb[28].mxu1  ;;  %v4343_v26 = vpop.f32.mrb[30].mxu0  ;;  %5924 = vmatpush1.bf16.msra.mxu0 %v15544_v58  ;;  %v15627_v6 = vcombine.high %v566_v0, %v574_v1  ;;  %v581_v58 = vld [vmem:[#allocation10 + $0x5b0] sm:$0xff]  ;;  %v15626_v13 = vcombine.low %v566_v0, %v574_v1 }
 0x3ab   :  { %v18059_v37 = vadd.f32 %v4380_v17, %v4339_v9  ;;  %v4382_v25 = vpop.f32.mrb[29].mxu1  ;;  %v4344_v30 = vpop.f32.mrb[31].mxu0  ;;  %5925 = vmatprep.subr.bf16.mxu0 %v15561_v8  ;;  %v582_v8 = vld [vmem:[#allocation10 + $0x5b8] sm:$0xff] }
 0x3ac   :  { %v18061_v59 = vadd.f32 %v4382_v25, %v4341_v38  ;;  %v4384_v28 = vpop.f32.mrb[30].mxu1  ;;  %5965 = vmatpush1.bf16.msra.mxu1 %v15546_v7  ;;  %v589_v7 = vld [vmem:[#allocation10 + $0x5f0] sm:$0xff]  ;;  %v590_v9 = vld [vmem:[#allocation10 + $0x5f8] sm:$0xff] }
 0x3ad   :  { %v4385_v36 = vpop.f32.mrb[31].mxu1  ;;  %5966 = vmatprep.subr.bf16.mxu1 %v15563_v10  ;;  %v15624_v10 = vcombine.low %v565_v62, %v573_v14  ;;  %v15641_v15 = vcombine.high %v581_v58, %v589_v7  ;;  %v15643_v17 = vcombine.high %v582_v8, %v590_v9  ;;  %v597_v38 = vld [vmem:[#allocation10 + $0x630] sm:$0xff]  ;;  %v606_v25 = vld [vmem:[#allocation10 + $0x678] sm:$0xff]  ;;  %v15640_v26 = vcombine.low %v581_v58, %v589_v7 }
 0x3ae   :  { %5926 = vmatpush1.bf16.msra.mxu0 %v15560_v44  ;;  %v15642_v44 = vcombine.low %v582_v8, %v590_v9  ;;  %v15657_v28 = vcombine.high %v597_v38, %v605_v20  ;;  %v15659_v30 = vcombine.high %v598_v32, %v606_v25  ;;  %v614_v36 = vld [vmem:[#allocation10 + $0x6b8] sm:$0xff]  ;;  %v15656_v40 = vcombine.low %v597_v38, %v605_v20  ;;  %v6201_v38 = vld [vmem:[#allocation7 + $0x28] sm:$0xff] }
 0x3af   :  { %5927 = vmatprep.subr.bf16.mxu0 %v15577_v34  ;;  %v621_v34 = vld [vmem:[#allocation10 + $0x6f0] sm:$0xff]  ;;  %v15658_v41 = vcombine.low %v598_v32, %v606_v25  ;;  %v6203_v32 = vld [vmem:[#allocation7 + $0x38] sm:$0xff] }
 0x3b0   :  { %5967 = vmatpush1.bf16.msra.mxu1 %v15562_v31  ;;  %v613_v31 = vld [vmem:[#allocation10 + $0x6b0] sm:$0xff] }
 0x3b1   :  { %5968 = vmatprep.subr.bf16.mxu1 %v15579_v54  ;;  %v622_v54 = vld [vmem:[#allocation10 + $0x6f8] sm:$0xff]  ;;  %v15673_v42 = vcombine.high %v613_v31, %v621_v34  ;;  %v15672_v5 = vcombine.low %v613_v31, %v621_v34  ;;  %v18063_v31 = vpack.c.bf16 %v6201_v38, %v6201_v38  ;;  %v7017_v34 = vld [vmem:[#allocation16 + $0x900] sm:$0xff] }
 0x3b2   :  { %5928 = vmatpush1.bf16.msra.mxu0 %v15576_v45  ;;  %v15675_v43 = vcombine.high %v614_v36, %v622_v54  ;;  %v629_v45 = vld [vmem:[#allocation10 + $0x730] sm:$0xff]  ;;  %v15674_v49 = vcombine.low %v614_v36, %v622_v54  ;;  %v18066_v54 = vpack.c.bf16 %v6203_v32, %v6203_v32 }
 0x3b3   :  { %5929 = vmatprep.subr.bf16.mxu0 %v15593_v47  ;;  %v630_v47 = vld [vmem:[#allocation10 + $0x738] sm:$0xff]  ;;  %v7025_v36 = vld [vmem:[#allocation16 + $0x940] sm:$0xff] }
 0x3b4   :  { %5969 = vmatpush1.bf16.msra.mxu1 %v15578_v46  ;;  %v637_v46 = vld [vmem:[#allocation10 + $0x770] sm:$0xff] }
 0x3b5   :  { %5970 = vmatprep.subr.bf16.mxu1 %v15595_v48  ;;  %v638_v48 = vld [vmem:[#allocation10 + $0x778] sm:$0xff]  ;;  %v15689_v50 = vcombine.high %v629_v45, %v637_v46  ;;  %v15688_v62 = vcombine.low %v629_v45, %v637_v46  ;;  %v6777_v45 = vld [vmem:[#allocation16 + $0x180] sm:$0xff] }
 0x3b6   :  { %5930 = vmatpush1.bf16.msra.mxu0 %v15592_v52  ;;  %v15691_v11 = vcombine.high %v630_v47, %v638_v48  ;;  %v645_v52 = vld [vmem:[#allocation10 + $0x7b0] sm:$0xff]  ;;  %v15690_v14 = vcombine.low %v630_v47, %v638_v48 }
 0x3b7   :  { %5931 = vmatprep.subr.bf16.mxu0 %v15609_v56  ;;  %v646_v56 = vld [vmem:[#allocation10 + $0x7b8] sm:$0xff]  ;;  %v6785_v46 = vld [vmem:[#allocation16 + $0x1c0] sm:$0xff] }
 0x3b8   :  { %5971 = vmatpush1.bf16.msra.mxu1 %v15594_v55  ;;  %v653_v55 = vld [vmem:[#allocation10 + $0x7f0] sm:$0xff] }
 0x3b9   :  { %5972 = vmatprep.subr.bf16.mxu1 %v15611_v61  ;;  %v654_v61 = vld [vmem:[#allocation10 + $0x7f8] sm:$0xff]  ;;  %v15705_v0 = vcombine.high %v645_v52, %v653_v55  ;;  %v15704_v58 = vcombine.low %v645_v52, %v653_v55  ;;  %v7033_v47 = vld [vmem:[#allocation16 + $0x980] sm:$0xff] }
 0x3ba   :  { %5932 = vmatpush1.bf16.msra.mxu0 %v15608_v2  ;;  %v15707_v1 = vcombine.high %v646_v56, %v654_v61  ;;  %v6729_v2 = vld [vmem:[#allocation16] sm:$0xff]  ;;  %v15706_v7 = vcombine.low %v646_v56, %v654_v61  ;;  %v15768_v61 = vcombine.low %v6777_v45, %v6785_v46 }
 0x3bb   :  { %5933 = vmatprep.subr.bf16.mxu0 %v15625_v4  ;;  %v6985_v4 = vld [vmem:[#allocation16 + $0x800] sm:$0xff] }
 0x3bc   :  { %5973 = vmatpush1.bf16.msra.mxu1 %v15610_v3  ;;  %v6737_v3 = vld [vmem:[#allocation16 + $0x40] sm:$0xff] }
 0x3bd   :  { %5974 = vmatprep.subr.bf16.mxu1 %v15627_v6  ;;  %v6993_v6 = vld [vmem:[#allocation16 + $0x840] sm:$0xff]  ;;  %v15721_v8 = vcombine.high %v6729_v2, %v6737_v3  ;;  %v15720_v20 = vcombine.low %v6729_v2, %v6737_v3 }
 0x3be   :  { %5934 = vmatpush1.bf16.msra.mxu0 %v15624_v10  ;;  %v15977_v9 = vcombine.high %v6985_v4, %v6993_v6  ;;  %v6745_v10 = vld [vmem:[#allocation16 + $0x80] sm:$0xff]  ;;  %v15976_v25 = vcombine.low %v6985_v4, %v6993_v6 }
 0x3bf   :  { %5935 = vmatprep.subr.bf16.mxu0 %v15641_v15  ;;  %v7001_v15 = vld [vmem:[#allocation16 + $0x880] sm:$0xff] }
 0x3c0   :  { %5975 = vmatpush1.bf16.msra.mxu1 %v15626_v13  ;;  %v6753_v13 = vld [vmem:[#allocation16 + $0xc0] sm:$0xff] }
 0x3c1   :  { %5976 = vmatprep.subr.bf16.mxu1 %v15643_v17  ;;  %v7009_v17 = vld [vmem:[#allocation16 + $0x8c0] sm:$0xff] }
 0x3c2   :  { %5936 = vmatpush1.bf16.msra.mxu0 %v15640_v26  ;;  %v15737_v26 = vcombine.high %v6745_v10, %v6753_v13  ;;  %v7041_v48 = vld [vmem:[#allocation16 + $0x9c0] sm:$0xff] }
 0x3c3   :  { %5937 = vmatprep.subr.bf16.mxu0 %v15657_v28  ;;  %v6761_v28 = vld [vmem:[#allocation16 + $0x100] sm:$0xff] }
 0x3c4   :  { %5977 = vmatpush1.bf16.msra.mxu1 %v15642_v44  ;;  %v15993_v44 = vcombine.high %v7001_v15, %v7009_v17  ;;  %v6801_v52 = vld [vmem:[#allocation16 + $0x240] sm:$0xff] }
 0x3c5   :  { %5978 = vmatprep.subr.bf16.mxu1 %v15659_v30  ;;  %v6769_v30 = vld [vmem:[#allocation16 + $0x140] sm:$0xff] }
 0x3c6   :  { %5938 = vmatpush1.bf16.msra.mxu0 %v15656_v40  ;;  %v15736_v40 = vcombine.low %v6745_v10, %v6753_v13  ;;  %v7049_v55 = vld [vmem:[#allocation16 + $0xa00] sm:$0xff] }
 0x3c7   :  { %5939 = vmatprep.subr.bf16.mxu0 %v15673_v42  ;;  %v15753_v42 = vcombine.high %v6761_v28, %v6769_v30  ;;  %v7057_v56 = vld [vmem:[#allocation16 + $0xa40] sm:$0xff] }
 0x3c8   :  { %5979 = vmatpush1.bf16.msra.mxu1 %v15658_v41  ;;  %v15992_v41 = vcombine.low %v7001_v15, %v7009_v17  ;;  %v6817_v2 = vld [vmem:[#allocation16 + $0x2c0] sm:$0xff] }
 0x3c9   :  { %5980 = vmatprep.subr.bf16.mxu1 %v15675_v43  ;;  %v16009_v43 = vcombine.high %v7017_v34, %v7025_v36  ;;  %v7065_v3 = vld [vmem:[#allocation16 + $0xa80] sm:$0xff] }
 0x3ca   :  { %5940 = vmatpush1.bf16.msra.mxu0 %v15672_v5  ;;  %v15752_v5 = vcombine.low %v6761_v28, %v6769_v30  ;;  %v7073_v4 = vld [vmem:[#allocation16 + $0xac0] sm:$0xff] }
 0x3cb   :  { %5941 = vmatprep.subr.bf16.mxu0 %v15689_v50  ;;  %v16025_v50 = vcombine.high %v7033_v47, %v7041_v48  ;;  %v6833_v10 = vld [vmem:[#allocation16 + $0x340] sm:$0xff]  ;;  %v16056_v38 = vcombine.low %v7065_v3, %v7073_v4 }
 0x3cc   :  { %5981 = vmatpush1.bf16.msra.mxu1 %v15674_v49  ;;  %v15769_v49 = vcombine.high %v6777_v45, %v6785_v46  ;;  %v7081_v13 = vld [vmem:[#allocation16 + $0xb00] sm:$0xff] }
 0x3cd   :  { %5982 = vmatprep.subr.bf16.mxu1 %v15691_v11  ;;  %v6793_v11 = vld [vmem:[#allocation16 + $0x200] sm:$0xff] }
 0x3ce   :  { %5942 = vmatpush1.bf16.msra.mxu0 %v15688_v62  ;;  %v16024_v62 = vcombine.low %v7033_v47, %v7041_v48  ;;  %v15784_v6 = vcombine.low %v6793_v11, %v6801_v52  ;;  %v7089_v15 = vld [vmem:[#allocation16 + $0xb40] sm:$0xff] }
 0x3cf   :  { %5943 = vmatprep.subr.bf16.mxu0 %v15705_v0  ;;  %v16041_v0 = vcombine.high %v7049_v55, %v7057_v56 }
 0x3d0   :  { %5983 = vmatpush1.bf16.msra.mxu1 %v15690_v14  ;;  %v15785_v14 = vcombine.high %v6793_v11, %v6801_v52  ;;  %v6865_v11 = vld [vmem:[#allocation16 + $0x440] sm:$0xff] }
 0x3d1   :  { %5984 = vmatprep.subr.bf16.mxu1 %v15707_v1  ;;  %v6809_v1 = vld [vmem:[#allocation16 + $0x280] sm:$0xff] }
 0x3d2   :  { %5944 = vmatpush1.bf16.msra.mxu0 %v15704_v58  ;;  %v16040_v58 = vcombine.low %v7049_v55, %v7057_v56  ;;  %v15800_v17 = vcombine.low %v6809_v1, %v6817_v2  ;;  %v7121_v52 = vld [vmem:[#allocation16 + $0xc40] sm:$0xff] }
 0x3d3   :  { %9801 = vmatprep.subr.bf16.mxu0 %v15721_v8  ;;  %v16057_v8 = vcombine.high %v7065_v3, %v7073_v4 }
 0x3d4   :  { %5985 = vmatpush1.bf16.msra.mxu1 %v15706_v7  ;;  %v15801_v7 = vcombine.high %v6809_v1, %v6817_v2  ;;  %v7137_v1 = vld [vmem:[#allocation16 + $0xcc0] sm:$0xff] }
 0x3d5   :  { %9842 = vmatprep.subr.bf16.mxu1 %v15977_v9  ;;  %5946 = vmatmul.mubr.bf16.vlgmr.msra.gmra.mrb[44].mxu0 %v18037_v24  ;;  %v6825_v9 = vld [vmem:[#allocation16 + $0x300] sm:$0xff] }
 0x3d6   :  { %9802 = vmatpush1.bf16.msra.mxu0 %v15720_v20  ;;  %9833 = vmatprep.mubr.bf16.mxu0 %v18063_v31  ;;  %v15817_v20 = vcombine.high %v6825_v9, %v6833_v10  ;;  %v15816_v46 = vcombine.low %v6825_v9, %v6833_v10  ;;  %v7153_v9 = vld [vmem:[#allocation16 + $0xd40] sm:$0xff] }
 0x3d7   :  { %5987 = vmatmul.mubr.bf16.vlgmr.msra.gmra.mrb[44].mxu1 %v18037_v24  ;;  %9803 = vmatprep.subr.bf16.mxu0 %v15737_v26  ;;  %v16008_v24 = vcombine.low %v7017_v34, %v7025_v36  ;;  %v6841_v26 = vld [vmem:[#allocation16 + $0x380] sm:$0xff] }
 0x3d8   :  { %9843 = vmatpush1.bf16.msra.mxu1 %v15976_v25  ;;  %9874 = vmatprep.mubr.bf16.mxu1 %v18066_v54  ;;  %v16073_v25 = vcombine.high %v7081_v13, %v7089_v15  ;;  %v7097_v36 = vld [vmem:[#allocation16 + $0xb80] sm:$0xff] }
 0x3d9   :  { %9844 = vmatprep.subr.bf16.mxu1 %v15993_v44  ;;  %v6849_v44 = vld [vmem:[#allocation16 + $0x3c0] sm:$0xff] }
 0x3da   :  { %9804 = vmatpush1.bf16.msra.mxu0 %v15736_v40  ;;  %v7105_v40 = vld [vmem:[#allocation16 + $0xbc0] sm:$0xff]  ;;  %v15832_v55 = vcombine.low %v6841_v26, %v6849_v44 }
 0x3db   :  { %9805 = vmatprep.subr.bf16.mxu0 %v15753_v42  ;;  %v16088_v56 = vcombine.low %v7097_v36, %v7105_v40 }
 0x3dc   :  { %9845 = vmatpush1.bf16.msra.mxu1 %v15992_v41 }
 0x3dd   :  { %9846 = vmatprep.subr.bf16.mxu1 %v16009_v43 }
 0x3de   :  { %9806 = vmatpush1.bf16.msra.mxu0 %v15752_v5  ;;  %v16072_v5 = vcombine.low %v7081_v13, %v7089_v15 }
 0x3df   :  { %9807 = vmatprep.subr.bf16.mxu0 %v15769_v49 }
 0x3e0   :  { %9847 = vmatpush1.bf16.msra.mxu1 %v16008_v24  ;;  %v15833_v24 = vcombine.high %v6841_v26, %v6849_v44 }
 0x3e1   :  { %9848 = vmatprep.subr.bf16.mxu1 %v16025_v50  ;;  %v6857_v50 = vld [vmem:[#allocation16 + $0x400] sm:$0xff] }
 0x3e2   :  { %9808 = vmatpush1.bf16.msra.mxu0 %v15768_v61  ;;  %v15848_v2 = vcombine.low %v6857_v50, %v6865_v11 }
 0x3e3   :  { %9809 = vmatprep.subr.bf16.mxu0 %v15785_v14  ;;  %v6881_v14 = vld [vmem:[#allocation16 + $0x4c0] sm:$0xff] }
 0x3e4   :  { %9849 = vmatpush1.bf16.msra.mxu1 %v16024_v62  ;;  %v6873_v62 = vld [vmem:[#allocation16 + $0x480] sm:$0xff] }
 0x3e5   :  { %9850 = vmatprep.subr.bf16.mxu1 %v16041_v0  ;;  %v7129_v0 = vld [vmem:[#allocation16 + $0xc80] sm:$0xff]  ;;  %v15865_v4 = vcombine.high %v6873_v62, %v6881_v14  ;;  %v15864_v10 = vcombine.low %v6873_v62, %v6881_v14 }
 0x3e6   :  { %9810 = vmatpush1.bf16.msra.mxu0 %v15784_v6  ;;  %v16121_v6 = vcombine.high %v7129_v0, %v7137_v1  ;;  %v16120_v13 = vcombine.low %v7129_v0, %v7137_v1  ;;  %v7217_v62 = vld [vmem:[#allocation16 + $0xf40] sm:$0xff] }
 0x3e7   :  { %9811 = vmatprep.subr.bf16.mxu0 %v15801_v7  ;;  %v6897_v7 = vld [vmem:[#allocation16 + $0x540] sm:$0xff] }
 0x3e8   :  { %9851 = vmatpush1.bf16.msra.mxu1 %v16040_v58  ;;  %v5701_v32 = vpop.f32.mrb[32].mxu0  ;;  %v6889_v58 = vld [vmem:[#allocation16 + $0x500] sm:$0xff] }
 0x3e9   :  { %9852 = vmatprep.subr.bf16.mxu1 %v16057_v8  ;;  %v18072_v28 = vadd.f32 %v5701_v32, %v17876_v35  ;;  %v5703_v34 = vpop.f32.mrb[33].mxu0  ;;  %v7145_v8 = vld [vmem:[#allocation16 + $0xd00] sm:$0xff]  ;;  %v15881_v15 = vcombine.high %v6889_v58, %v6897_v7  ;;  %v15880_v26 = vcombine.low %v6889_v58, %v6897_v7 }
 0x3ea   :  { %v5742_v30 = vpop.f32.mrb[32].mxu1  ;;  %v18078_v42 = vadd.f32 %v5703_v34, %v17878_v39  ;;  %v5705_v45 = vpop.f32.mrb[34].mxu0  ;;  %9812 = vmatpush1.bf16.msra.mxu0 %v15800_v17  ;;  %v7113_v39 = vld [vmem:[#allocation16 + $0xc00] sm:$0xff]  ;;  %v16137_v17 = vcombine.high %v7145_v8, %v7153_v9  ;;  %v16136_v44 = vcombine.low %v7145_v8, %v7153_v9 }
 0x3eb   :  { %v18075_v41 = vadd.f32 %v5742_v30, %v17884_v57  ;;  %v5744_v43 = vpop.f32.mrb[33].mxu1  ;;  %v5706_v35 = vpop.f32.mrb[35].mxu0  ;;  %9813 = vmatprep.subr.bf16.mxu0 %v15817_v20  ;;  %v16089_v57 = vcombine.high %v7097_v36, %v7105_v40  ;;  %v16105_v61 = vcombine.high %v7113_v39, %v7121_v52  ;;  %v16104_v3 = vcombine.low %v7113_v39, %v7121_v52  ;;  %v6913_v20 = vld [vmem:[#allocation16 + $0x5c0] sm:$0xff] }
 0x3ec   :  { %v18081_v47 = vadd.f32 %v5744_v43, %v17886_v63  ;;  %v5746_v48 = vpop.f32.mrb[34].mxu1  ;;  %9853 = vmatpush1.bf16.msra.mxu1 %v16056_v38  ;;  %v15849_v63 = vcombine.high %v6857_v50, %v6865_v11  ;;  %v6905_v38 = vld [vmem:[#allocation16 + $0x580] sm:$0xff] }
 0x3ed   :  { %v5747_v49 = vpop.f32.mrb[35].mxu1  ;;  %9854 = vmatprep.subr.bf16.mxu1 %v16073_v25  ;;  %v7161_v32 = vld [vmem:[#allocation16 + $0xd80] sm:$0xff]  ;;  %v15897_v30 = vcombine.high %v6905_v38, %v6913_v20 }
 0x3ee   :  { %9814 = vmatpush1.bf16.msra.mxu0 %v15816_v46  ;;  %v7169_v25 = vld [vmem:[#allocation16 + $0xdc0] sm:$0xff]  ;;  %v15896_v46 = vcombine.low %v6905_v38, %v6913_v20  ;;  %v6994_v38 = vld [vmem:[#allocation16 + $0x848] sm:$0xff] }
 0x3ef   :  { %9815 = vmatprep.subr.bf16.mxu0 %v15833_v24  ;;  %v16153_v34 = vcombine.high %v7161_v32, %v7169_v25  ;;  %v6921_v36 = vld [vmem:[#allocation16 + $0x600] sm:$0xff]  ;;  %v16152_v48 = vcombine.low %v7161_v32, %v7169_v25  ;;  %v6200_v32 = vld [vmem:[#allocation7 + $0x20] sm:$0xff] }
 0x3f0   :  { %9855 = vmatpush1.bf16.msra.mxu1 %v16072_v5  ;;  %v6929_v40 = vld [vmem:[#allocation16 + $0x640] sm:$0xff] }
 0x3f1   :  { %9856 = vmatprep.subr.bf16.mxu1 %v16089_v57  ;;  %v7177_v43 = vld [vmem:[#allocation16 + $0xe00] sm:$0xff]  ;;  %v15913_v35 = vcombine.high %v6921_v36, %v6929_v40  ;;  %v15912_v11 = vcombine.low %v6921_v36, %v6929_v40  ;;  %v6754_v36 = vld [vmem:[#allocation16 + $0xc8] sm:$0xff]  ;;  %v18083_v40 = vpack.c.bf16 %v6200_v32, %v6200_v32 }
 0x3f2   :  { %9816 = vmatpush1.bf16.msra.mxu0 %v15832_v55  ;;  %v7185_v45 = vld [vmem:[#allocation16 + $0xe40] sm:$0xff] }
 0x3f3   :  { %9817 = vmatprep.subr.bf16.mxu0 %v15849_v63  ;;  %v16169_v5 = vcombine.high %v7177_v43, %v7185_v45  ;;  %v6937_v24 = vld [vmem:[#allocation16 + $0x680] sm:$0xff]  ;;  %v16168_v39 = vcombine.low %v7177_v43, %v7185_v45  ;;  %v7002_v43 = vld [vmem:[#allocation16 + $0x888] sm:$0xff] }
 0x3f4   :  { %9857 = vmatpush1.bf16.msra.mxu1 %v16088_v56  ;;  %v6945_v49 = vld [vmem:[#allocation16 + $0x6c0] sm:$0xff]  ;;  %v7010_v45 = vld [vmem:[#allocation16 + $0x8c8] sm:$0xff] }
 0x3f5   :  { %9858 = vmatprep.subr.bf16.mxu1 %v16105_v61  ;;  %v7193_v57 = vld [vmem:[#allocation16 + $0xe80] sm:$0xff]  ;;  %v15929_v52 = vcombine.high %v6937_v24, %v6945_v49  ;;  %v15928_v14 = vcombine.low %v6937_v24, %v6945_v49  ;;  %v15995_v24 = vcombine.high %v7002_v43, %v7010_v45  ;;  %v6762_v49 = vld [vmem:[#allocation16 + $0x108] sm:$0xff] }
 0x3f6   :  { %9818 = vmatpush1.bf16.msra.mxu0 %v15848_v2  ;;  %v7201_v50 = vld [vmem:[#allocation16 + $0xec0] sm:$0xff] }
 0x3f7   :  { %9819 = vmatprep.subr.bf16.mxu0 %v15865_v4  ;;  %v16185_v55 = vcombine.high %v7193_v57, %v7201_v50  ;;  %v6953_v56 = vld [vmem:[#allocation16 + $0x700] sm:$0xff]  ;;  %v16184_v0 = vcombine.low %v7193_v57, %v7201_v50  ;;  %v6770_v57 = vld [vmem:[#allocation16 + $0x148] sm:$0xff] }
 0x3f8   :  { %9859 = vmatpush1.bf16.msra.mxu1 %v16104_v3  ;;  %v6961_v63 = vld [vmem:[#allocation16 + $0x740] sm:$0xff]  ;;  %v7018_v50 = vld [vmem:[#allocation16 + $0x908] sm:$0xff] }
 0x3f9   :  { %9860 = vmatprep.subr.bf16.mxu1 %v16121_v6  ;;  %v7209_v61 = vld [vmem:[#allocation16 + $0xf00] sm:$0xff]  ;;  %v15945_v1 = vcombine.high %v6953_v56, %v6961_v63  ;;  %v15944_v7 = vcombine.low %v6953_v56, %v6961_v63  ;;  %v6778_v63 = vld [vmem:[#allocation16 + $0x188] sm:$0xff] }
 0x3fa   :  { %9820 = vmatpush1.bf16.msra.mxu0 %v15864_v10  ;;  %v16201_v2 = vcombine.high %v7209_v61, %v7217_v62  ;;  %v6969_v3 = vld [vmem:[#allocation16 + $0x780] sm:$0xff]  ;;  %v16200_v8 = vcombine.low %v7209_v61, %v7217_v62  ;;  %v6786_v61 = vld [vmem:[#allocation16 + $0x1c8] sm:$0xff] }
 0x3fb   :  { %9821 = vmatprep.subr.bf16.mxu0 %v15881_v15  ;;  %v6977_v4 = vld [vmem:[#allocation16 + $0x7c0] sm:$0xff]  ;;  %v6738_v15 = vld [vmem:[#allocation16 + $0x48] sm:$0xff] }
 0x3fc   :  { %9861 = vmatpush1.bf16.msra.mxu1 %v16120_v13  ;;  %v7225_v6 = vld [vmem:[#allocation16 + $0xf80] sm:$0xff]  ;;  %v15961_v9 = vcombine.high %v6969_v3, %v6977_v4  ;;  %v6730_v13 = vld [vmem:[#allocation16 + $0x8] sm:$0xff]  ;;  %v15960_v20 = vcombine.low %v6969_v3, %v6977_v4 }
 0x3fd   :  { %9862 = vmatprep.subr.bf16.mxu1 %v16137_v17  ;;  %v7233_v58 = vld [vmem:[#allocation16 + $0xfc0] sm:$0xff]  ;;  %v6986_v17 = vld [vmem:[#allocation16 + $0x808] sm:$0xff] }
 0x3fe   :  { %9822 = vmatpush1.bf16.msra.mxu0 %v15880_v26  ;;  %v16217_v10 = vcombine.high %v7225_v6, %v7233_v58  ;;  %v16216_v25 = vcombine.low %v7225_v6, %v7233_v58  ;;  %v6202_v26 = vld [vmem:[#allocation7 + $0x30] sm:$0xff]  ;;  %v7034_v62 = vld [vmem:[#allocation16 + $0x988] sm:$0xff] }
 0x3ff   :  { %9823 = vmatprep.subr.bf16.mxu0 %v15897_v30  ;;  %v15979_v30 = vcombine.high %v6986_v17, %v6994_v38  ;;  %v6794_v4 = vld [vmem:[#allocation16 + $0x208] sm:$0xff] }
 0x400   :  { %9863 = vmatpush1.bf16.msra.mxu1 %v16136_v44  ;;  %v15723_v44 = vcombine.high %v6730_v13, %v6738_v15  ;;  %v6802_v6 = vld [vmem:[#allocation16 + $0x248] sm:$0xff] }
 0x401   :  { %9864 = vmatprep.subr.bf16.mxu1 %v16153_v34  ;;  %v6746_v34 = vld [vmem:[#allocation16 + $0x88] sm:$0xff]  ;;  %v15786_v32 = vcombine.low %v6794_v4, %v6802_v6 }
 0x402   :  { %9824 = vmatpush1.bf16.msra.mxu0 %v15896_v46  ;;  %v18085_v46 = vpack.c.bf16 %v6202_v26, %v6202_v26  ;;  %v7050_v58 = vld [vmem:[#allocation16 + $0xa08] sm:$0xff] }
 0x403   :  { %9825 = vmatprep.subr.bf16.mxu0 %v15913_v35  ;;  %v15978_v35 = vcombine.low %v6986_v17, %v6994_v38  ;;  %v6818_v17 = vld [vmem:[#allocation16 + $0x2c8] sm:$0xff] }
 0x404   :  { %9865 = vmatpush1.bf16.msra.mxu1 %v16152_v48  ;;  %v15722_v48 = vcombine.low %v6730_v13, %v6738_v15  ;;  %v6810_v15 = vld [vmem:[#allocation16 + $0x288] sm:$0xff] }
 0x405   :  { %9866 = vmatprep.subr.bf16.mxu1 %v16169_v5  ;;  %v15739_v5 = vcombine.high %v6746_v34, %v6754_v36  ;;  %v7066_v38 = vld [vmem:[#allocation16 + $0xa88] sm:$0xff]  ;;  %v15803_v26 = vcombine.high %v6810_v15, %v6818_v17 }
 0x406   :  { %9826 = vmatpush1.bf16.msra.mxu0 %v15912_v11  ;;  %v7026_v11 = vld [vmem:[#allocation16 + $0x948] sm:$0xff] }
 0x407   :  { %9827 = vmatprep.subr.bf16.mxu0 %v15929_v52  ;;  %v15994_v52 = vcombine.low %v7002_v43, %v7010_v45  ;;  %v16011_v56 = vcombine.high %v7018_v50, %v7026_v11  ;;  %v7090_v43 = vld [vmem:[#allocation16 + $0xb48] sm:$0xff]  ;;  %v15802_v45 = vcombine.low %v6810_v15, %v6818_v17 }
 0x408   :  { %9867 = vmatpush1.bf16.msra.mxu1 %v16168_v39  ;;  %v15738_v39 = vcombine.low %v6746_v34, %v6754_v36  ;;  %v6834_v34 = vld [vmem:[#allocation16 + $0x348] sm:$0xff] }
 0x409   :  { %9868 = vmatprep.subr.bf16.mxu1 %v16185_v55  ;;  %v15755_v55 = vcombine.high %v6762_v49, %v6770_v57  ;;  %v7082_v36 = vld [vmem:[#allocation16 + $0xb08] sm:$0xff] }
 0x40a   :  { %9828 = vmatpush1.bf16.msra.mxu0 %v15928_v14  ;;  %v7042_v14 = vld [vmem:[#allocation16 + $0x9c8] sm:$0xff] }
 0x40b   :  { %9829 = vmatprep.subr.bf16.mxu0 %v15945_v1  ;;  %v16010_v1 = vcombine.low %v7018_v50, %v7026_v11  ;;  %v16027_v3 = vcombine.high %v7034_v62, %v7042_v14  ;;  %v6882_v15 = vld [vmem:[#allocation16 + $0x4c8] sm:$0xff] }
 0x40c   :  { %9869 = vmatpush1.bf16.msra.mxu1 %v16184_v0  ;;  %v15754_v0 = vcombine.low %v6762_v49, %v6770_v57  ;;  %v6842_v49 = vld [vmem:[#allocation16 + $0x388] sm:$0xff] }
 0x40d   :  { %9870 = vmatprep.subr.bf16.mxu1 %v16201_v2  ;;  %v15771_v2 = vcombine.high %v6778_v63, %v6786_v61  ;;  %v6850_v57 = vld [vmem:[#allocation16 + $0x3c8] sm:$0xff] }
 0x40e   :  { %9830 = vmatpush1.bf16.msra.mxu0 %v15944_v7  ;;  %v7058_v7 = vld [vmem:[#allocation16 + $0xa48] sm:$0xff] }
 0x40f   :  { %9831 = vmatprep.subr.bf16.mxu0 %v15961_v9  ;;  %v16026_v9 = vcombine.low %v7034_v62, %v7042_v14  ;;  %v16043_v13 = vcombine.high %v7050_v58, %v7058_v7  ;;  %v7130_v17 = vld [vmem:[#allocation16 + $0xc88] sm:$0xff] }
 0x410   :  { %9871 = vmatpush1.bf16.msra.mxu1 %v16200_v8  ;;  %v15770_v8 = vcombine.low %v6778_v63, %v6786_v61 }
 0x411   :  { %9872 = vmatprep.subr.bf16.mxu1 %v16217_v10  ;;  %v15787_v10 = vcombine.high %v6794_v4, %v6802_v6  ;;  %v6858_v6 = vld [vmem:[#allocation16 + $0x408] sm:$0xff] }
 0x412   :  { %9832 = vmatpush1.bf16.msra.mxu0 %v15960_v20  ;;  %v7074_v20 = vld [vmem:[#allocation16 + $0xac8] sm:$0xff] }
 0x413   :  { %9883 = vmatprep.subr.bf16.mxu0 %v15723_v44  ;;  %v16059_v44 = vcombine.high %v7066_v38, %v7074_v20 }
 0x414   :  { %9873 = vmatpush1.bf16.msra.mxu1 %v16216_v25  ;;  %v16042_v25 = vcombine.low %v7050_v58, %v7058_v7  ;;  %v6866_v58 = vld [vmem:[#allocation16 + $0x448] sm:$0xff] }
 0x415   :  { %9924 = vmatprep.subr.bf16.mxu1 %v15979_v30  ;;  %9834 = vmatmul.mubr.bf16.vlgmr.msra.gmra.mrb[48].mxu0 %v18083_v40  ;;  %v6826_v30 = vld [vmem:[#allocation16 + $0x308] sm:$0xff] }
 0x416   :  { %9884 = vmatpush1.bf16.msra.mxu0 %v15722_v48  ;;  %9915 = vmatprep.mubr.bf16.mxu0 %v18063_v31  ;;  %v16058_v48 = vcombine.low %v7066_v38, %v7074_v20  ;;  %v15818_v14 = vcombine.low %v6826_v30, %v6834_v34  ;;  %v7122_v7 = vld [vmem:[#allocation16 + $0xc48] sm:$0xff]  ;;  %v15850_v20 = vcombine.low %v6858_v6, %v6866_v58 }
 0x417   :  { %9875 = vmatmul.mubr.bf16.vlgmr.msra.gmra.mrb[48].mxu1 %v18085_v46  ;;  %9885 = vmatprep.subr.bf16.mxu0 %v15739_v5  ;;  %v7138_v38 = vld [vmem:[#allocation16 + $0xcc8] sm:$0xff] }
 0x418   :  { %9925 = vmatpush1.bf16.msra.mxu1 %v15978_v35  ;;  %9956 = vmatprep.mubr.bf16.mxu1 %v18066_v54  ;;  %v15819_v35 = vcombine.high %v6826_v30, %v6834_v34  ;;  %v6898_v30 = vld [vmem:[#allocation16 + $0x548] sm:$0xff] }
 0x419   :  { %9926 = vmatprep.subr.bf16.mxu1 %v15995_v24  ;;  %v16075_v24 = vcombine.high %v7082_v36, %v7090_v43  ;;  %v7146_v34 = vld [vmem:[#allocation16 + $0xd08] sm:$0xff] }
 0x41a   :  { %9886 = vmatpush1.bf16.msra.mxu0 %v15738_v39 }
 0x41b   :  { %9887 = vmatprep.subr.bf16.mxu0 %v15755_v55  ;;  %v7106_v55 = vld [vmem:[#allocation16 + $0xbc8] sm:$0xff] }
 0x41c   :  { %9927 = vmatpush1.bf16.msra.mxu1 %v15994_v52  ;;  %v7098_v52 = vld [vmem:[#allocation16 + $0xb88] sm:$0xff] }
 0x41d   :  { %9928 = vmatprep.subr.bf16.mxu1 %v16011_v56 }
 0x41e   :  { %9888 = vmatpush1.bf16.msra.mxu0 %v15754_v0 }
 0x41f   :  { %9889 = vmatprep.subr.bf16.mxu0 %v15771_v2  ;;  %v16074_v2 = vcombine.low %v7082_v36, %v7090_v43  ;;  %v7154_v36 = vld [vmem:[#allocation16 + $0xd48] sm:$0xff] }
 0x420   :  { %9929 = vmatpush1.bf16.msra.mxu1 %v16010_v1 }
 0x421   :  { %9930 = vmatprep.subr.bf16.mxu1 %v16027_v3  ;;  %v15835_v3 = vcombine.high %v6842_v49, %v6850_v57 }
 0x422   :  { %9890 = vmatpush1.bf16.msra.mxu0 %v15770_v8  ;;  %v15834_v8 = vcombine.low %v6842_v49, %v6850_v57  ;;  %v7162_v49 = vld [vmem:[#allocation16 + $0xd88] sm:$0xff] }
 0x423   :  { %9891 = vmatprep.subr.bf16.mxu0 %v15787_v10  ;;  %v7170_v57 = vld [vmem:[#allocation16 + $0xdc8] sm:$0xff] }
 0x424   :  { %9931 = vmatpush1.bf16.msra.mxu1 %v16026_v9  ;;  %v16090_v9 = vcombine.low %v7098_v52, %v7106_v55 }
 0x425   :  { %9932 = vmatprep.subr.bf16.mxu1 %v16043_v13  ;;  %v6874_v13 = vld [vmem:[#allocation16 + $0x488] sm:$0xff] }
 0x426   :  { %9892 = vmatpush1.bf16.msra.mxu0 %v15786_v32  ;;  %v15866_v43 = vcombine.low %v6874_v13, %v6882_v15 }
 0x427   :  { %9893 = vmatprep.subr.bf16.mxu0 %v15803_v26  ;;  %v16123_v26 = vcombine.high %v7130_v17, %v7138_v38 }
 0x428   :  { %9933 = vmatpush1.bf16.msra.mxu1 %v16042_v25  ;;  %v5783_v5 = vpop.f32.mrb[36].mxu0  ;;  %v15867_v25 = vcombine.high %v6874_v13, %v6882_v15  ;;  %v6962_v13 = vld [vmem:[#allocation16 + $0x748] sm:$0xff]  ;;  %v18103_v15 = vld [vmem:[#allocation13] sm:$0xff] }
 0x429   :  { %9934 = vmatprep.subr.bf16.mxu1 %v16059_v44  ;;  %v18092_v50 = vadd.f32 %v5783_v5, %v17892_v23  ;;  %v5785_v39 = vpop.f32.mrb[37].mxu0  ;;  %v6890_v44 = vld [vmem:[#allocation16 + $0x508] sm:$0xff] }
 0x42a   :  { %v5824_v11 = vpop.f32.mrb[36].mxu1  ;;  %v18098_v63 = vadd.f32 %v5785_v39, %v17894_v27  ;;  %v5787_v62 = vpop.f32.mrb[38].mxu0  ;;  %9894 = vmatpush1.bf16.msra.mxu0 %v15802_v45  ;;  %v7114_v27 = vld [vmem:[#allocation16 + $0xc08] sm:$0xff]  ;;  %v16122_v45 = vcombine.low %v7130_v17, %v7138_v38  ;;  %v16138_v39 = vcombine.low %v7146_v34, %v7154_v36  ;;  %v18106_v17 = vsub.s32 2, %v17931_v22 }
 0x42b   :  { %v18095_v56 = vadd.f32 %v5824_v11, %v17909_v53  ;;  %v5826_v61 = vpop.f32.mrb[37].mxu1  ;;  %v5788_v23 = vpop.f32.mrb[39].mxu0  ;;  %9895 = vmatprep.subr.bf16.mxu0 %v15819_v35  ;;  %v16091_v53 = vcombine.high %v7098_v52, %v7106_v55  ;;  %v16107_v10 = vcombine.high %v7114_v27, %v7122_v7  ;;  %v16106_v32 = vcombine.low %v7114_v27, %v7122_v7  ;;  %v6906_v5 = vld [vmem:[#allocation16 + $0x588] sm:$0xff] }
 0x42c   :  { %v18101_v0 = vadd.f32 %v5826_v61, %v17911_v60  ;;  %v5828_v1 = vpop.f32.mrb[38].mxu1  ;;  %9935 = vmatpush1.bf16.msra.mxu1 %v16058_v48  ;;  %v15851_v60 = vcombine.high %v6858_v6, %v6866_v58  ;;  %v15883_v48 = vcombine.high %v6890_v44, %v6898_v30  ;;  %v16139_v35 = vcombine.high %v7146_v34, %v7154_v36  ;;  %v6922_v61 = vld [vmem:[#allocation16 + $0x608] sm:$0xff] }
 0x42d   :  { %v5829_v4 = vpop.f32.mrb[39].mxu1  ;;  %9936 = vmatprep.subr.bf16.mxu1 %v16075_v24  ;;  %v6914_v24 = vld [vmem:[#allocation16 + $0x5c8] sm:$0xff]  ;;  %v15882_v11 = vcombine.low %v6890_v44, %v6898_v30  ;;  %v16155_v55 = vcombine.high %v7162_v49, %v7170_v57  ;;  %v6002_v30 = vrot.slane %v18103_v15, %v18012_v51  ;;  %v18114_v34 = vsub.s32 4, %v17931_v22 }
 0x42e   :  { %9896 = vmatpush1.bf16.msra.mxu0 %v15818_v14  ;;  %v15899_v52 = vcombine.high %v6906_v5, %v6914_v24  ;;  %v6930_v62 = vld [vmem:[#allocation16 + $0x648] sm:$0xff]  ;;  %v15898_v23 = vcombine.low %v6906_v5, %v6914_v24 }
 0x42f   :  { %9897 = vmatprep.subr.bf16.mxu0 %v15835_v3  ;;  %v7178_v14 = vld [vmem:[#allocation16 + $0xe08] sm:$0xff]  ;;  %v15915_v3 = vcombine.high %v6922_v61, %v6930_v62  ;;  %v15914_v7 = vcombine.low %v6922_v61, %v6930_v62  ;;  %v6079_v62 = vadd.f32 %v6002_v30, %v18072_v28 }
 0x430   :  { %9937 = vmatpush1.bf16.msra.mxu1 %v16074_v2  ;;  %v7186_v1 = vld [vmem:[#allocation16 + $0xe48] sm:$0xff]  ;;  %v16154_v2 = vcombine.low %v7162_v49, %v7170_v57  ;;  %v6006_v49 = vrot.slane %v18103_v15, %v17944_v33  ;;  %v18124_v57 = vsub.s32 5, %v17931_v22 }
 0x431   :  { %9938 = vmatprep.subr.bf16.mxu1 %v16091_v53  ;;  %v16171_v4 = vcombine.high %v7178_v14, %v7186_v1  ;;  %v6938_v53 = vld [vmem:[#allocation16 + $0x688] sm:$0xff] }
 0x432   :  { %9898 = vmatpush1.bf16.msra.mxu0 %v15834_v8  ;;  %v6946_v6 = vld [vmem:[#allocation16 + $0x6c8] sm:$0xff]  ;;  %v16170_v8 = vcombine.low %v7178_v14, %v7186_v1  ;;  %v6018_v14 = vrot.slane %v18103_v15, %v18114_v34 }
 0x433   :  { %9899 = vmatprep.subr.bf16.mxu0 %v15851_v60  ;;  %v7194_v58 = vld [vmem:[#allocation16 + $0xe88] sm:$0xff] }
 0x434   :  { %9939 = vmatpush1.bf16.msra.mxu1 %v16090_v9  ;;  %v7202_v27 = vld [vmem:[#allocation16 + $0xec8] sm:$0xff]  ;;  %v15931_v9 = vcombine.high %v6938_v53, %v6946_v6 }
 0x435   :  { %9940 = vmatprep.subr.bf16.mxu1 %v16107_v10  ;;  %v16187_v60 = vcombine.high %v7194_v58, %v7202_v27  ;;  %v6954_v10 = vld [vmem:[#allocation16 + $0x708] sm:$0xff] }
 0x436   :  { %9900 = vmatpush1.bf16.msra.mxu0 %v15850_v20  ;;  %v7210_v38 = vld [vmem:[#allocation16 + $0xf08] sm:$0xff]  ;;  %v15947_v44 = vcombine.high %v6954_v10, %v6962_v13 }
 0x437   :  { %9901 = vmatprep.subr.bf16.mxu0 %v15867_v25  ;;  %v7218_v20 = vld [vmem:[#allocation16 + $0xf48] sm:$0xff]  ;;  %v18109_v25 = vsub.s32 3, %v17931_v22 }
 0x438   :  { %9941 = vmatpush1.bf16.msra.mxu1 %v16106_v32  ;;  %v15930_v32 = vcombine.low %v6938_v53, %v6946_v6  ;;  %v16203_v36 = vcombine.high %v7210_v38, %v7218_v20  ;;  %v7226_v5 = vld [vmem:[#allocation16 + $0xf88] sm:$0xff]  ;;  %v6995_v53 = vld [vmem:[#allocation16 + $0x850] sm:$0xff]  ;;  %v6080_v6 = vadd.f32 %v6006_v49, %v18078_v42 }
 0x439   :  { %9942 = vmatprep.subr.bf16.mxu1 %v16123_v26  ;;  %v16186_v26 = vcombine.low %v7194_v58, %v7202_v27  ;;  %v7234_v24 = vld [vmem:[#allocation16 + $0xfc8] sm:$0xff]  ;;  %v6022_v58 = vrot.slane %v18103_v15, %v18124_v57  ;;  %v6747_v42 = vld [vmem:[#allocation16 + $0x90] sm:$0xff] }
 0x43a   :  { %9902 = vmatpush1.bf16.msra.mxu0 %v15866_v43  ;;  %v6970_v43 = vld [vmem:[#allocation16 + $0x788] sm:$0xff]  ;;  %v16219_v1 = vcombine.high %v7226_v5, %v7234_v24  ;;  %v7027_v49 = vld [vmem:[#allocation16 + $0x950] sm:$0xff] }
 0x43b   :  { %9903 = vmatprep.subr.bf16.mxu0 %v15883_v48  ;;  %v6010_v48 = vrot.slane %v18103_v15, %v18106_v17 }
 0x43c   :  { %9943 = vmatpush1.bf16.msra.mxu1 %v16122_v45  ;;  %v6978_v45 = vld [vmem:[#allocation16 + $0x7c8] sm:$0xff] }
 0x43d   :  { %9944 = vmatprep.subr.bf16.mxu1 %v16139_v35  ;;  %v18119_v35 = vsub.s32 6, %v17931_v22  ;;  %v15963_v61 = vcombine.high %v6970_v43, %v6978_v45  ;;  %v15962_v27 = vcombine.low %v6970_v43, %v6978_v45 }
 0x43e   :  { %9904 = vmatpush1.bf16.msra.mxu0 %v15882_v11  ;;  %v18127_v11 = vsub.s32 7, %v17931_v22  ;;  %v6081_v22 = vadd.f32 %v6010_v48, %v18075_v41  ;;  %v16218_v41 = vcombine.low %v7226_v5, %v7234_v24  ;;  %v6763_v5 = vld [vmem:[#allocation16 + $0x110] sm:$0xff] }
 0x43f   :  { %9905 = vmatprep.subr.bf16.mxu0 %v15899_v52  ;;  %v6014_v52 = vrot.slane %v18103_v15, %v18109_v25 }
 0x440   :  { %9945 = vmatpush1.bf16.msra.mxu1 %v16138_v39  ;;  %v15946_v39 = vcombine.low %v6954_v10, %v6962_v13  ;;  %v6030_v28 = vrot.slane %v18103_v15, %v18127_v11  ;;  %v6755_v13 = vld [vmem:[#allocation16 + $0xd0] sm:$0xff] }
 0x441   :  { %9946 = vmatprep.subr.bf16.mxu1 %v16155_v55  ;;  %v16202_v55 = vcombine.low %v7210_v38, %v7218_v20  ;;  %v15710_v38 = vmul.f32 -1.442695, %v6081_v22  ;;  %v15741_v43 = vcombine.high %v6747_v42, %v6755_v13 }
 0x442   :  { %9906 = vmatpush1.bf16.msra.mxu0 %v15898_v23  ;;  %v6731_v23 = vld [vmem:[#allocation16 + $0x10] sm:$0xff] }
 0x443   :  { %9907 = vmatprep.subr.bf16.mxu0 %v15915_v3  ;;  %v6026_v3 = vrot.slane %v18103_v15, %v18119_v35  ;;  %v7011_v15 = vld [vmem:[#allocation16 + $0x8d0] sm:$0xff] }
 0x444   :  { %9947 = vmatpush1.bf16.msra.mxu1 %v16154_v2  ;;  %v6739_v2 = vld [vmem:[#allocation16 + $0x50] sm:$0xff] }
 0x445   :  { %9948 = vmatprep.subr.bf16.mxu1 %v16171_v4  ;;  %v6987_v4 = vld [vmem:[#allocation16 + $0x810] sm:$0xff]  ;;  %v6085_v20 = vadd.f32 %v6026_v3, %v18095_v56 }
 0x446   :  { %9908 = vmatpush1.bf16.msra.mxu0 %v15914_v7  ;;  %v6082_v7 = vadd.f32 %v6014_v52, %v18081_v47  ;;  %v15981_v10 = vcombine.high %v6987_v4, %v6995_v53  ;;  %v15724_v47 = vcombine.low %v6731_v23, %v6739_v2  ;;  %v6771_v56 = vld [vmem:[#allocation16 + $0x150] sm:$0xff] }
 0x447   :  { %9909 = vmatprep.subr.bf16.mxu0 %v15931_v9  ;;  %v15708_v9 = vmul.f32 -1.442695, %v6079_v62  ;;  %v15714_v24 = vmul.f32 -1.442695, %v6085_v20  ;;  %v15756_v22 = vcombine.low %v6763_v5, %v6771_v56 }
 0x448   :  { %9949 = vmatpush1.bf16.msra.mxu1 %v16170_v8  ;;  %v15725_v8 = vcombine.high %v6731_v23, %v6739_v2  ;;  %v15711_v30 = vmul.f32 -1.442695, %v6082_v7  ;;  %v7035_v23 = vld [vmem:[#allocation16 + $0x990] sm:$0xff] }
 0x449   :  { %9950 = vmatprep.subr.bf16.mxu1 %v16187_v60  ;;  %v6083_v60 = vadd.f32 %v6018_v14, %v18092_v50  ;;  %v15980_v50 = vcombine.low %v6987_v4, %v6995_v53  ;;  %17117 = vpow2.f32 %v15708_v9  ;;  %v6779_v14 = vld [vmem:[#allocation16 + $0x190] sm:$0xff] }
 0x44a   :  { %9910 = vmatpush1.bf16.msra.mxu0 %v15930_v32  ;;  %v7003_v32 = vld [vmem:[#allocation16 + $0x890] sm:$0xff]  ;;  %17119 = vpow2.f32 %v15710_v38 }
 0x44b   :  { %9911 = vmatprep.subr.bf16.mxu0 %v15947_v44  ;;  %v6084_v44 = vadd.f32 %v6022_v58, %v18098_v63  ;;  %v15712_v45 = vmul.f32 -1.442695, %v6083_v60  ;;  %v15997_v48 = vcombine.high %v7003_v32, %v7011_v15  ;;  %v7019_v63 = vld [vmem:[#allocation16 + $0x910] sm:$0xff] }
 0x44c   :  { %9951 = vmatpush1.bf16.msra.mxu1 %v16186_v26  ;;  %v15709_v26 = vmul.f32 -1.442695, %v6080_v6  ;;  %v16013_v62 = vcombine.high %v7019_v63, %v7027_v49  ;;  %v7043_v2 = vld [vmem:[#allocation16 + $0x9d0] sm:$0xff]  ;;  %v16012_v3 = vcombine.low %v7019_v63, %v7027_v49 }
 0x44d   :  { %9952 = vmatprep.subr.bf16.mxu1 %v16203_v36  ;;  %v6086_v36 = vadd.f32 %v6030_v28, %v18101_v0  ;;  %v15740_v0 = vcombine.low %v6747_v42, %v6755_v13  ;;  %v16029_v53 = vcombine.high %v7035_v23, %v7043_v2  ;;  %v6795_v6 = vld [vmem:[#allocation16 + $0x210] sm:$0xff]  ;;  %v16028_v9 = vcombine.low %v7035_v23, %v7043_v2 }
 0x44e   :  { %9912 = vmatpush1.bf16.msra.mxu0 %v15946_v39  ;;  %17121 = vpow2.f32 %v15709_v26  ;;  %v15713_v39 = vmul.f32 -1.442695, %v6084_v44  ;;  %v6803_v58 = vld [vmem:[#allocation16 + $0x250] sm:$0xff] }
 0x44f   :  { %9913 = vmatprep.subr.bf16.mxu0 %v15963_v61  ;;  %17123 = vpow2.f32 %v15711_v30  ;;  %v15715_v52 = vmul.f32 -1.442695, %v6086_v36  ;;  %v15757_v61 = vcombine.high %v6763_v5, %v6771_v56  ;;  %v7051_v28 = vld [vmem:[#allocation16 + $0xa10] sm:$0xff]  ;;  %v15789_v60 = vcombine.high %v6795_v6, %v6803_v58  ;;  %v18153_v36 = vld [vmem:[#allocation13 + $0x8] sm:$0xff] }
 0x450   :  { %9953 = vmatpush1.bf16.msra.mxu1 %v16202_v55  ;;  %v15996_v55 = vcombine.low %v7003_v32, %v7011_v15  ;;  %17125 = vpow2.f32 %v15712_v45  ;;  %v6811_v13 = vld [vmem:[#allocation16 + $0x290] sm:$0xff]  ;;  %v15788_v30 = vcombine.low %v6795_v6, %v6803_v58 }
 0x451   :  { %9954 = vmatprep.subr.bf16.mxu1 %v16219_v1  ;;  %v6787_v1 = vld [vmem:[#allocation16 + $0x1d0] sm:$0xff]  ;;  %17127 = vpow2.f32 %v15714_v24 }
 0x452   :  { %9914 = vmatpush1.bf16.msra.mxu0 %v15962_v27  ;;  %17129 = vpow2.f32 %v15713_v39  ;;  %v15773_v4 = vcombine.high %v6779_v14, %v6787_v1  ;;  %v7059_v27 = vld [vmem:[#allocation16 + $0xa50] sm:$0xff] }
 0x453   :  { %9965 = vmatprep.subr.bf16.mxu0 %v15725_v8  ;;  %17131 = vpow2.f32 %v15715_v52  ;;  %v17118_v7 = vpop.eup %17117  ;;  %v16045_v42 = vcombine.high %v7051_v28, %v7059_v27  ;;  %v6819_v38 = vld [vmem:[#allocation16 + $0x2d0] sm:$0xff]  ;;  %v16044_v45 = vcombine.low %v7051_v28, %v7059_v27  ;;  %v6034_v52 = vrot.slane %v18153_v36, %v18012_v51 }
 0x454   :  { %9955 = vmatpush1.bf16.msra.mxu1 %v16218_v41  ;;  %v15772_v41 = vcombine.low %v6779_v14, %v6787_v1  ;;  %v17120_v8 = vpop.eup %17119  ;;  %v6107_v32 = vadd.f32 1.0, %v17118_v7  ;;  %v18151_v15 = vld [vmem:[#allocation16 + $0xa90] sm:$0xff]  ;;  %v6042_v14 = vrot.slane %v18153_v36, %v18106_v17  ;;  %v15804_v1 = vcombine.low %v6811_v13, %v6819_v38 }
 0x455   :  { %10006 = vmatprep.subr.bf16.mxu1 %v15981_v10  ;;  %9916 = vmatmul.mubr.bf16.vlgmr.msra.gmra.mrb[52].mxu0 %v18083_v40  ;;  %v7075_v26 = vld [vmem:[#allocation16 + $0xad0] sm:$0xff] }
 0x456   :  { %9966 = vmatpush1.bf16.msra.mxu0 %v15724_v47  ;;  %9997 = vmatprep.mubr.bf16.mxu0 %v18063_v31  ;;  %v6109_v47 = vadd.f32 1.0, %v17120_v8  ;;  %v16061_v24 = vcombine.high %v18151_v15, %v7075_v26  ;;  %v18156_v63 = vld [vmem:[#allocation16 + $0x310] sm:$0xff]  ;;  %17133 = vrcp.f32 %v6107_v32  ;;  %v16060_v2 = vcombine.low %v18151_v15, %v7075_v26 }
 0x457   :  { %9957 = vmatmul.mubr.bf16.vlgmr.msra.gmra.mrb[52].mxu1 %v18085_v46  ;;  %9967 = vmatprep.subr.bf16.mxu0 %v15741_v43  ;;  %v6835_v49 = vld [vmem:[#allocation16 + $0x350] sm:$0xff]  ;;  %v6046_v8 = vrot.slane %v18153_v36, %v18109_v25 }
 0x458   :  { %10007 = vmatpush1.bf16.msra.mxu1 %v15980_v50  ;;  %10038 = vmatprep.mubr.bf16.mxu1 %v18066_v54  ;;  %v17122_v10 = vpop.eup %17121  ;;  %17135 = vrcp.f32 %v6109_v47  ;;  %v6843_v58 = vld [vmem:[#allocation16 + $0x390] sm:$0xff] }
 0x459   :  { %10008 = vmatprep.subr.bf16.mxu1 %v15997_v48  ;;  %v17124_v20 = vpop.eup %17123  ;;  %v6108_v43 = vadd.f32 1.0, %v17122_v10  ;;  %v15805_v48 = vcombine.high %v6811_v13, %v6819_v38  ;;  %v6851_v28 = vld [vmem:[#allocation16 + $0x3d0] sm:$0xff] }
 0x45a   :  { %9968 = vmatpush1.bf16.msra.mxu0 %v15740_v0  ;;  %v17126_v44 = vpop.eup %17125  ;;  %v6110_v56 = vadd.f32 1.0, %v17124_v20  ;;  %v7107_v10 = vld [vmem:[#allocation16 + $0xbd0] sm:$0xff]  ;;  %v15837_v47 = vcombine.high %v6843_v58, %v6851_v28 }
 0x45b   :  { %9969 = vmatprep.subr.bf16.mxu0 %v15757_v61  ;;  %v17128_v50 = vpop.eup %17127  ;;  %v6131_v0 = vadd.f32 1.0, %v17126_v44  ;;  %v7091_v61 = vld [vmem:[#allocation16 + $0xb50] sm:$0xff]  ;;  %17137 = vrcp.f32 %v6108_v43 }
 0x45c   :  { %10009 = vmatpush1.bf16.msra.mxu1 %v15996_v55  ;;  %v17130_v5 = vpop.eup %17129  ;;  %v7083_v55 = vld [vmem:[#allocation16 + $0xb10] sm:$0xff]  ;;  %17139 = vrcp.f32 %v6110_v56 }
 0x45d   :  { %10010 = vmatprep.subr.bf16.mxu1 %v16013_v62  ;;  %v17132_v39 = vpop.eup %17131  ;;  %v6133_v62 = vadd.f32 1.0, %v17128_v50  ;;  %v6132_v23 = vadd.f32 1.0, %v17130_v5  ;;  %v16077_v6 = vcombine.high %v7083_v55, %v7091_v61  ;;  %17141 = vrcp.f32 %v6131_v0  ;;  %v7115_v5 = vld [vmem:[#allocation16 + $0xc10] sm:$0xff] }
 0x45e   :  { %9970 = vmatpush1.bf16.msra.mxu0 %v15756_v22  ;;  %v15821_v22 = vcombine.high %v18156_v63, %v6835_v49  ;;  %v16076_v32 = vcombine.low %v7083_v55, %v7091_v61  ;;  %v7123_v56 = vld [vmem:[#allocation16 + $0xc50] sm:$0xff] }
 0x45f   :  { %9971 = vmatprep.subr.bf16.mxu0 %v15773_v4  ;;  %17143 = vrcp.f32 %v6133_v62  ;;  %v16109_v0 = vcombine.high %v7115_v5, %v7123_v56  ;;  %v6883_v55 = vld [vmem:[#allocation16 + $0x4d0] sm:$0xff] }
 0x460   :  { %10011 = vmatpush1.bf16.msra.mxu1 %v16012_v3  ;;  %v6134_v3 = vadd.f32 1.0, %v17132_v39  ;;  %17145 = vrcp.f32 %v6132_v23  ;;  %v7131_v62 = vld [vmem:[#allocation16 + $0xc90] sm:$0xff] }
 0x461   :  { %10012 = vmatprep.subr.bf16.mxu1 %v16029_v53  ;;  %v6038_v53 = vrot.slane %v18153_v36, %v17944_v33 }
 0x462   :  { %9972 = vmatpush1.bf16.msra.mxu0 %v15772_v41  ;;  %17147 = vrcp.f32 %v6134_v3 }
 0x463   :  { %9973 = vmatprep.subr.bf16.mxu0 %v15789_v60  ;;  %v7099_v60 = vld [vmem:[#allocation16 + $0xb90] sm:$0xff] }
 0x464   :  { %10013 = vmatpush1.bf16.msra.mxu1 %v16028_v9  ;;  %v15820_v9 = vcombine.low %v18156_v63, %v6835_v49  ;;  %v16092_v63 = vcombine.low %v7099_v60, %v7107_v10 }
 0x465   :  { %10014 = vmatprep.subr.bf16.mxu1 %v16045_v42 }
 0x466   :  { %9974 = vmatpush1.bf16.msra.mxu0 %v15788_v30 }
 0x467   :  { %9975 = vmatprep.subr.bf16.mxu0 %v15805_v48 }
 0x468   :  { %10015 = vmatpush1.bf16.msra.mxu1 %v16044_v45  ;;  %v5865_v4 = vpop.f32.mrb[40].mxu0  ;;  %v6867_v45 = vld [vmem:[#allocation16 + $0x450] sm:$0xff] }
 0x469   :  { %10016 = vmatprep.subr.bf16.mxu1 %v16061_v24  ;;  %v5866_v27 = vadd.f32 %v5865_v4, %v18007_v12  ;;  %v5867_v41 = vpop.f32.mrb[41].mxu0  ;;  %v17134_v24 = vpop.eup %17133 }
 0x46a   :  { %v5906_v7 = vpop.f32.mrb[40].mxu1  ;;  %v5868_v13 = vadd.f32 %v5867_v41, %v18009_v18  ;;  %v5869_v20 = vpop.f32.mrb[42].mxu0  ;;  %9976 = vmatpush1.bf16.msra.mxu0 %v15804_v1  ;;  %v6859_v18 = vld [vmem:[#allocation16 + $0x410] sm:$0xff] }
 0x46b   :  { %v5907_v42 = vadd.f32 %v5906_v7, %v18043_v19  ;;  %v5908_v38 = vpop.f32.mrb[41].mxu1  ;;  %v6087_v12 = vadd.f32 %v6034_v52, %v5866_v27  ;;  %v5870_v44 = vpop.f32.mrb[43].mxu0  ;;  %9977 = vmatprep.subr.bf16.mxu0 %v15821_v22  ;;  %v16093_v19 = vcombine.high %v7099_v60, %v7107_v10  ;;  %v15853_v49 = vcombine.high %v6859_v18, %v6867_v45  ;;  %v6875_v52 = vld [vmem:[#allocation16 + $0x490] sm:$0xff] }
 0x46c   :  { %v5909_v15 = vadd.f32 %v5908_v38, %v18045_v29  ;;  %v5910_v26 = vpop.f32.mrb[42].mxu1  ;;  %10017 = vmatpush1.bf16.msra.mxu1 %v16060_v2  ;;  %v6088_v50 = vadd.f32 %v6038_v53, %v5868_v13  ;;  %v15836_v29 = vcombine.low %v6843_v58, %v6851_v28  ;;  %v17136_v39 = vpop.eup %17135  ;;  %v15852_v23 = vcombine.low %v6859_v18, %v6867_v45  ;;  %v6899_v58 = vld [vmem:[#allocation16 + $0x550] sm:$0xff] }
 0x46d   :  { %v6089_v30 = vadd.f32 %v6042_v14, %v5907_v42  ;;  %v5911_v43 = vpop.f32.mrb[43].mxu1  ;;  %10018 = vmatprep.subr.bf16.mxu1 %v16077_v6  ;;  %17149 = vtanh.f32 %v6087_v12  ;;  %v17138_v61 = vpop.eup %17137  ;;  %v7139_v14 = vld [vmem:[#allocation16 + $0xcd0] sm:$0xff]  ;;  %v16108_v22 = vcombine.low %v7115_v5, %v7123_v56  ;;  %v15869_v3 = vcombine.high %v6875_v52, %v6883_v55  ;;  %v394_v42 = vld [vmem:[#allocation9 + $0x8] sm:$0xff]  ;;  %v396_v26 = vld [vmem:[#allocation9 + $0x18] sm:$0xff] }
 0x46e   :  { %v6090_v48 = vadd.f32 %v6046_v8, %v5909_v15  ;;  %9978 = vmatpush1.bf16.msra.mxu0 %v15820_v9  ;;  %v17140_v1 = vpop.eup %17139  ;;  %v16125_v53 = vcombine.high %v7131_v62, %v7139_v14  ;;  %v6891_v6 = vld [vmem:[#allocation16 + $0x510] sm:$0xff]  ;;  %v395_v9 = vld [vmem:[#allocation9 + $0x10] sm:$0xff]  ;;  %v15868_v60 = vcombine.low %v6875_v52, %v6883_v55  ;;  %v16124_v13 = vcombine.low %v7131_v62, %v7139_v14 }
 0x46f   :  { %17151 = vtanh.f32 %v6089_v30  ;;  %9979 = vmatprep.subr.bf16.mxu0 %v15837_v47  ;;  %v17142_v2 = vpop.eup %17141  ;;  %v393_v27 = vld [vmem:[#allocation9] sm:$0xff]  ;;  %v15885_v38 = vcombine.high %v6891_v6, %v6899_v58 }
 0x470   :  { %17153 = vtanh.f32 %v6088_v50  ;;  %10019 = vmatpush1.bf16.msra.mxu1 %v16076_v32  ;;  %v17144_v4 = vpop.eup %17143  ;;  %v7147_v7 = vld [vmem:[#allocation16 + $0xd10] sm:$0xff]  ;;  %v6171_v15 = vmul.f32 %v17142_v2, %v393_v27 }
 0x471   :  { %17155 = vtanh.f32 %v6090_v48  ;;  %10020 = vmatprep.subr.bf16.mxu1 %v16093_v19  ;;  %v17146_v28 = vpop.eup %17145  ;;  %v7155_v41 = vld [vmem:[#allocation16 + $0xd50] sm:$0xff]  ;;  %v6173_v50 = vmul.f32 %v17144_v4, %v395_v9  ;;  %v15884_v19 = vcombine.low %v6891_v6, %v6899_v58 }
 0x472   :  { %9980 = vmatpush1.bf16.msra.mxu0 %v15836_v29  ;;  %v17148_v8 = vpop.eup %17147  ;;  %v6907_v20 = vld [vmem:[#allocation16 + $0x590] sm:$0xff]  ;;  %v16141_v47 = vcombine.high %v7147_v7, %v7155_v41  ;;  %v16140_v18 = vcombine.low %v7147_v7, %v7155_v41  ;;  %v6172_v56 = vmul.f32 %v17146_v28, %v394_v42 }
 0x473   :  { %9981 = vmatprep.subr.bf16.mxu0 %v15853_v49  ;;  %v6915_v32 = vld [vmem:[#allocation16 + $0x5d0] sm:$0xff] }
 0x474   :  { %10021 = vmatpush1.bf16.msra.mxu1 %v16092_v63  ;;  %v7163_v45 = vld [vmem:[#allocation16 + $0xd90] sm:$0xff]  ;;  %v15901_v49 = vcombine.high %v6907_v20, %v6915_v32 }
 0x475   :  { %10022 = vmatprep.subr.bf16.mxu1 %v16109_v0  ;;  %v7171_v48 = vld [vmem:[#allocation16 + $0xdd0] sm:$0xff]  ;;  %v6174_v0 = vmul.f32 %v17148_v8, %v396_v26 }
 0x476   :  { %9982 = vmatpush1.bf16.msra.mxu0 %v15852_v23  ;;  %v16157_v55 = vcombine.high %v7163_v45, %v7171_v48  ;;  %v6923_v62 = vld [vmem:[#allocation16 + $0x610] sm:$0xff] }
 0x477   :  { %v17150_v10 = vpop.eup %17149  ;;  %9983 = vmatprep.subr.bf16.mxu0 %v15869_v3  ;;  %v6931_v14 = vld [vmem:[#allocation16 + $0x650] sm:$0xff] }
 0x478   :  { %10023 = vmatpush1.bf16.msra.mxu1 %v16108_v22  ;;  %v6175_v44 = vmul.f32 %v17150_v10, %v17134_v24  ;;  %v7187_v2 = vld [vmem:[#allocation16 + $0xe50] sm:$0xff]  ;;  %v16156_v22 = vcombine.low %v7163_v45, %v7171_v48  ;;  %v15917_v3 = vcombine.high %v6923_v62, %v6931_v14  ;;  %v15916_v27 = vcombine.low %v6923_v62, %v6931_v14  ;;  %v6988_v45 = vld [vmem:[#allocation16 + $0x818] sm:$0xff] }
 0x479   :  { %v17152_v12 = vpop.eup %17151  ;;  %10024 = vmatprep.subr.bf16.mxu1 %v16125_v53  ;;  %v6939_v53 = vld [vmem:[#allocation16 + $0x690] sm:$0xff]  ;;  %v6996_v48 = vld [vmem:[#allocation16 + $0x858] sm:$0xff] }
 0x47a   :  { %v17154_v30 = vpop.eup %17153  ;;  %v6177_v43 = vmul.f32 %v17152_v12, %v17136_v39  ;;  %v18173_v29 = vadd.f32 %v6175_v44, %v6171_v15  ;;  %9984 = vmatpush1.bf16.msra.mxu0 %v15868_v60  ;;  %v6947_v6 = vld [vmem:[#allocation16 + $0x6d0] sm:$0xff]  ;;  %v7012_v62 = vld [vmem:[#allocation16 + $0x8d8] sm:$0xff] }
 0x47b   :  { %v17156_v5 = vpop.eup %17155  ;;  %v6176_v63 = vmul.f32 %v17154_v30, %v17138_v61  ;;  %9985 = vmatprep.subr.bf16.mxu0 %v15885_v38  ;;  %v7179_v61 = vld [vmem:[#allocation16 + $0xe10] sm:$0xff]  ;;  %v15933_v41 = vcombine.high %v6939_v53, %v6947_v6 }
 0x47c   :  { %v18175_v52 = vadd.f32 %v6177_v43, %v6173_v50  ;;  %v6178_v24 = vmul.f32 %v17156_v5, %v17140_v1  ;;  %10025 = vmatpush1.bf16.msra.mxu1 %v16124_v13  ;;  %6195 = vst [vmem:[#allocation25] sm:$0xff] %v18173_v29  ;;  %v15900_v1 = vcombine.low %v6907_v20, %v6915_v32  ;;  %v7195_v58 = vld [vmem:[#allocation16 + $0xe90] sm:$0xff] }
 0x47d   :  { %v18178_v39 = vadd.f32 %v6176_v63, %v6172_v56  ;;  %10026 = vmatprep.subr.bf16.mxu1 %v16141_v47  ;;  %v16173_v4 = vcombine.high %v7179_v61, %v7187_v2  ;;  %v7203_v28 = vld [vmem:[#allocation16 + $0xed0] sm:$0xff]  ;;  %v16172_v7 = vcombine.low %v7179_v61, %v7187_v2  ;;  %v15932_v13 = vcombine.low %v6939_v53, %v6947_v6  ;;  %v7028_v53 = vld [vmem:[#allocation16 + $0x958] sm:$0xff] }
 0x47e   :  { %6197 = vst [vmem:[#allocation25 + $0x10] sm:$0xff] %v18175_v52  ;;  %v18181_v23 = vadd.f32 %v6178_v24, %v6174_v0  ;;  %9986 = vmatpush1.bf16.msra.mxu0 %v15884_v19  ;;  %v16189_v8 = vcombine.high %v7195_v58, %v7203_v28  ;;  %v6955_v9 = vld [vmem:[#allocation16 + $0x710] sm:$0xff]  ;;  %v16188_v38 = vcombine.low %v7195_v58, %v7203_v28  ;;  %v6732_v19 = vld [vmem:[#allocation16 + $0x18] sm:$0xff] }
 0x47f   :  { %6196 = vst [vmem:[#allocation25 + $0x8] sm:$0xff] %v18178_v39  ;;  %9987 = vmatprep.subr.bf16.mxu0 %v15901_v49  ;;  %v6963_v60 = vld [vmem:[#allocation16 + $0x750] sm:$0xff]  ;;  %v15983_v49 = vcombine.high %v6988_v45, %v6996_v48  ;;  %v6748_v0 = vld [vmem:[#allocation16 + $0x98] sm:$0xff]  ;;  %v15982_v61 = vcombine.low %v6988_v45, %v6996_v48 }
 0x480   :  { %6198 = vst [vmem:[#allocation25 + $0x18] sm:$0xff] %v18181_v23  ;;  %10027 = vmatpush1.bf16.msra.mxu1 %v16140_v18  ;;  %v7211_v10 = vld [vmem:[#allocation16 + $0xf10] sm:$0xff]  ;;  %v15949_v20 = vcombine.high %v6955_v9, %v6963_v60  ;;  %v15948_v47 = vcombine.low %v6955_v9, %v6963_v60  ;;  %v6740_v18 = vld [vmem:[#allocation16 + $0x58] sm:$0xff] }
 0x481   :  { %10028 = vmatprep.subr.bf16.mxu1 %v16157_v55  ;;  %v7219_v42 = vld [vmem:[#allocation16 + $0xf50] sm:$0xff]  ;;  %v15727_v63 = vcombine.high %v6732_v19, %v6740_v18  ;;  %v6756_v24 = vld [vmem:[#allocation16 + $0xd8] sm:$0xff]  ;;  %v15726_v14 = vcombine.low %v6732_v19, %v6740_v18 }
 0x482   :  { %9988 = vmatpush1.bf16.msra.mxu0 %v15900_v1  ;;  %v16205_v32 = vcombine.high %v7211_v10, %v7219_v42  ;;  %v6971_v12 = vld [vmem:[#allocation16 + $0x790] sm:$0xff]  ;;  %v16204_v30 = vcombine.low %v7211_v10, %v7219_v42  ;;  %v7004_v55 = vld [vmem:[#allocation16 + $0x898] sm:$0xff]  ;;  %v15743_v2 = vcombine.high %v6748_v0, %v6756_v24  ;;  %v15742_v6 = vcombine.low %v6748_v0, %v6756_v24 }
 0x483   :  { %9989 = vmatprep.subr.bf16.mxu0 %v15917_v3  ;;  %v6979_v15 = vld [vmem:[#allocation16 + $0x7d0] sm:$0xff]  ;;  %v15999_v1 = vcombine.high %v7004_v55, %v7012_v62  ;;  %v6772_v3 = vld [vmem:[#allocation16 + $0x158] sm:$0xff]  ;;  %v15998_v58 = vcombine.low %v7004_v55, %v7012_v62  ;;  %v6050_v55 = vrot.slane %v18153_v36, %v18114_v34 }
 0x484   :  { %10029 = vmatpush1.bf16.msra.mxu1 %v16156_v22  ;;  %v7227_v26 = vld [vmem:[#allocation16 + $0xf90] sm:$0xff]  ;;  %v15965_v50 = vcombine.high %v6971_v12, %v6979_v15  ;;  %v15964_v5 = vcombine.low %v6971_v12, %v6979_v15  ;;  %v6764_v22 = vld [vmem:[#allocation16 + $0x118] sm:$0xff] }
 0x485   :  { %10030 = vmatprep.subr.bf16.mxu1 %v16173_v4  ;;  %v7235_v44 = vld [vmem:[#allocation16 + $0xfd0] sm:$0xff]  ;;  %v7020_v4 = vld [vmem:[#allocation16 + $0x918] sm:$0xff]  ;;  %v15759_v28 = vcombine.high %v6764_v22, %v6772_v3  ;;  %v15758_v60 = vcombine.low %v6764_v22, %v6772_v3 }
 0x486   :  { %9990 = vmatpush1.bf16.msra.mxu0 %v15916_v27  ;;  %v16221_v43 = vcombine.high %v7227_v26, %v7235_v44  ;;  %v16220_v56 = vcombine.low %v7227_v26, %v7235_v44  ;;  %v16015_v27 = vcombine.high %v7020_v4, %v7028_v53  ;;  %v7044_v9 = vld [vmem:[#allocation16 + $0x9d8] sm:$0xff]  ;;  %v16014_v10 = vcombine.low %v7020_v4, %v7028_v53 }
 0x487   :  { %9991 = vmatprep.subr.bf16.mxu0 %v15933_v41  ;;  %v6788_v41 = vld [vmem:[#allocation16 + $0x1d8] sm:$0xff] }
 0x488   :  { %10031 = vmatpush1.bf16.msra.mxu1 %v16172_v7  ;;  %v6780_v7 = vld [vmem:[#allocation16 + $0x198] sm:$0xff] }
 0x489   :  { %10032 = vmatprep.subr.bf16.mxu1 %v16189_v8  ;;  %v7036_v8 = vld [vmem:[#allocation16 + $0x998] sm:$0xff]  ;;  %v15775_v42 = vcombine.high %v6780_v7, %v6788_v41  ;;  %v15774_v15 = vcombine.low %v6780_v7, %v6788_v41 }
 0x48a   :  { %9992 = vmatpush1.bf16.msra.mxu0 %v15932_v13  ;;  %v16031_v13 = vcombine.high %v7036_v8, %v7044_v9  ;;  %v7060_v12 = vld [vmem:[#allocation16 + $0xa58] sm:$0xff]  ;;  %v16030_v26 = vcombine.low %v7036_v8, %v7044_v9 }
 0x48b   :  { %9993 = vmatprep.subr.bf16.mxu0 %v15949_v20  ;;  %v6804_v20 = vld [vmem:[#allocation16 + $0x258] sm:$0xff] }
 0x48c   :  { %10033 = vmatpush1.bf16.msra.mxu1 %v16188_v38  ;;  %v6796_v38 = vld [vmem:[#allocation16 + $0x218] sm:$0xff] }
 0x48d   :  { %10034 = vmatprep.subr.bf16.mxu1 %v16205_v32  ;;  %v7052_v32 = vld [vmem:[#allocation16 + $0xa18] sm:$0xff]  ;;  %v15791_v44 = vcombine.high %v6796_v38, %v6804_v20  ;;  %v15790_v18 = vcombine.low %v6796_v38, %v6804_v20 }
 0x48e   :  { %9994 = vmatpush1.bf16.msra.mxu0 %v15948_v47  ;;  %v16047_v47 = vcombine.high %v7052_v32, %v7060_v12  ;;  %v7076_v19 = vld [vmem:[#allocation16 + $0xad8] sm:$0xff]  ;;  %v16046_v45 = vcombine.low %v7052_v32, %v7060_v12 }
 0x48f   :  { %9995 = vmatprep.subr.bf16.mxu0 %v15965_v50  ;;  %v6820_v50 = vld [vmem:[#allocation16 + $0x2d8] sm:$0xff] }
 0x490   :  { %10035 = vmatpush1.bf16.msra.mxu1 %v16204_v30  ;;  %v6812_v30 = vld [vmem:[#allocation16 + $0x298] sm:$0xff] }
 0x491   :  { %10036 = vmatprep.subr.bf16.mxu1 %v16221_v43  ;;  %v7068_v43 = vld [vmem:[#allocation16 + $0xa98] sm:$0xff]  ;;  %v15807_v48 = vcombine.high %v6812_v30, %v6820_v50  ;;  %v15806_v24 = vcombine.low %v6812_v30, %v6820_v50 }
 0x492   :  { %9996 = vmatpush1.bf16.msra.mxu0 %v15964_v5  ;;  %v16063_v5 = vcombine.high %v7068_v43, %v7076_v19  ;;  %v7092_v0 = vld [vmem:[#allocation16 + $0xb58] sm:$0xff]  ;;  %v16062_v62 = vcombine.low %v7068_v43, %v7076_v19 }
 0x493   :  { %10047 = vmatprep.subr.bf16.mxu0 %v15727_v63  ;;  %v6836_v63 = vld [vmem:[#allocation16 + $0x358] sm:$0xff] }
 0x494   :  { %10037 = vmatpush1.bf16.msra.mxu1 %v16220_v56  ;;  %v6828_v56 = vld [vmem:[#allocation16 + $0x318] sm:$0xff] }
 0x495   :  { %10088 = vmatprep.subr.bf16.mxu1 %v15983_v49  ;;  %9998 = vmatmul.mubr.bf16.vlgmr.msra.gmra.mrb[56].mxu0 %v18083_v40  ;;  %v7084_v49 = vld [vmem:[#allocation16 + $0xb18] sm:$0xff] }
 0x496   :  { %10048 = vmatpush1.bf16.msra.mxu0 %v15726_v14  ;;  %10079 = vmatprep.mubr.bf16.mxu0 %v18063_v31  ;;  %v15823_v14 = vcombine.high %v6828_v56, %v6836_v63  ;;  %v16079_v22 = vcombine.high %v7084_v49, %v7092_v0  ;;  %v6844_v3 = vld [vmem:[#allocation16 + $0x398] sm:$0xff] }
 0x497   :  { %10039 = vmatmul.mubr.bf16.vlgmr.msra.gmra.mrb[56].mxu1 %v18085_v46  ;;  %10049 = vmatprep.subr.bf16.mxu0 %v15743_v2  ;;  %v6058_v2 = vrot.slane %v18153_v36, %v18119_v35  ;;  %v6852_v4 = vld [vmem:[#allocation16 + $0x3d8] sm:$0xff] }
 0x498   :  { %10089 = vmatpush1.bf16.msra.mxu1 %v15982_v61  ;;  %10120 = vmatprep.mubr.bf16.mxu1 %v18066_v54  ;;  %v7108_v7 = vld [vmem:[#allocation16 + $0xbd8] sm:$0xff]  ;;  %v15839_v32 = vcombine.high %v6844_v3, %v6852_v4 }
 0x499   :  { %10090 = vmatprep.subr.bf16.mxu1 %v15999_v1  ;;  %v6054_v1 = vrot.slane %v18153_v36, %v18124_v57  ;;  %v7116_v30 = vld [vmem:[#allocation16 + $0xc18] sm:$0xff] }
 0x49a   :  { %10050 = vmatpush1.bf16.msra.mxu0 %v15742_v6  ;;  %v7124_v50 = vld [vmem:[#allocation16 + $0xc58] sm:$0xff] }
 0x49b   :  { %10051 = vmatprep.subr.bf16.mxu0 %v15759_v28  ;;  %v6062_v28 = vrot.slane %v18153_v36, %v18127_v11 }
 0x49c   :  { %10091 = vmatpush1.bf16.msra.mxu1 %v15998_v58 }
 0x49d   :  { %10092 = vmatprep.subr.bf16.mxu1 %v16015_v27  ;;  %v7100_v27 = vld [vmem:[#allocation16 + $0xb98] sm:$0xff] }
 0x49e   :  { %10052 = vmatpush1.bf16.msra.mxu0 %v15758_v60 }
 0x49f   :  { %10053 = vmatprep.subr.bf16.mxu0 %v15775_v42  ;;  %v16078_v42 = vcombine.low %v7084_v49, %v7092_v0  ;;  %v7132_v49 = vld [vmem:[#allocation16 + $0xc98] sm:$0xff] }
 0x4a0   :  { %10093 = vmatpush1.bf16.msra.mxu1 %v16014_v10  ;;  %v15822_v10 = vcombine.low %v6828_v56, %v6836_v63  ;;  %v6876_v56 = vld [vmem:[#allocation16 + $0x498] sm:$0xff] }
 0x4a1   :  { %10094 = vmatprep.subr.bf16.mxu1 %v16031_v13  ;;  %v6884_v63 = vld [vmem:[#allocation16 + $0x4d8] sm:$0xff] }
 0x4a2   :  { %10054 = vmatpush1.bf16.msra.mxu0 %v15774_v15  ;;  %v7140_v0 = vld [vmem:[#allocation16 + $0xcd8] sm:$0xff] }
 0x4a3   :  { %10055 = vmatprep.subr.bf16.mxu0 %v15791_v44 }
 0x4a4   :  { %10095 = vmatpush1.bf16.msra.mxu1 %v16030_v26  ;;  %v6860_v26 = vld [vmem:[#allocation16 + $0x418] sm:$0xff] }
 0x4a5   :  { %10096 = vmatprep.subr.bf16.mxu1 %v16047_v47 }
 0x4a6   :  { %10056 = vmatpush1.bf16.msra.mxu0 %v15790_v18 }
 0x4a7   :  { %10057 = vmatprep.subr.bf16.mxu0 %v15807_v48 }
 0x4a8   :  { %10097 = vmatpush1.bf16.msra.mxu1 %v16046_v45  ;;  %v5947_v61 = vpop.f32.mrb[44].mxu0  ;;  %v16094_v45 = vcombine.low %v7100_v27, %v7108_v7 }
 0x4a9   :  { %10098 = vmatprep.subr.bf16.mxu1 %v16063_v5  ;;  %v5948_v53 = vadd.f32 %v5947_v61, %v18051_v21  ;;  %v5949_v58 = vpop.f32.mrb[45].mxu0  ;;  %v16111_v5 = vcombine.high %v7116_v30, %v7124_v50  ;;  %v6892_v61 = vld [vmem:[#allocation16 + $0x518] sm:$0xff] }
 0x4aa   :  { %v5988_v6 = vpop.f32.mrb[44].mxu1  ;;  %v5950_v8 = vadd.f32 %v5949_v58, %v18053_v16  ;;  %v5951_v60 = vpop.f32.mrb[46].mxu0  ;;  %10058 = vmatpush1.bf16.msra.mxu0 %v15806_v24  ;;  %v6868_v16 = vld [vmem:[#allocation16 + $0x458] sm:$0xff] }
 0x4ab   :  { %v5989_v41 = vadd.f32 %v5988_v6, %v18059_v37  ;;  %v5990_v9 = vpop.f32.mrb[45].mxu1  ;;  %v6091_v13 = vadd.f32 %v6050_v55, %v5948_v53  ;;  %v5952_v20 = vpop.f32.mrb[47].mxu0  ;;  %10059 = vmatprep.subr.bf16.mxu0 %v15823_v14  ;;  %v16095_v37 = vcombine.high %v7100_v27, %v7108_v7  ;;  %v15855_v48 = vcombine.high %v6860_v26, %v6868_v16  ;;  %v6908_v58 = vld [vmem:[#allocation16 + $0x598] sm:$0xff] }
 0x4ac   :  { %v5991_v38 = vadd.f32 %v5990_v9, %v18061_v59  ;;  %v5992_v21 = vpop.f32.mrb[46].mxu1  ;;  %10099 = vmatpush1.bf16.msra.mxu1 %v16062_v62  ;;  %v6092_v12 = vadd.f32 %v6054_v1, %v5950_v8  ;;  %v15838_v59 = vcombine.low %v6844_v3, %v6852_v4  ;;  %v15854_v24 = vcombine.low %v6860_v26, %v6868_v16  ;;  %v7148_v1 = vld [vmem:[#allocation16 + $0xd18] sm:$0xff] }
 0x4ad   :  { %v6093_v36 = vadd.f32 %v6058_v2, %v5989_v41  ;;  %v5993_v15 = vpop.f32.mrb[47].mxu1  ;;  %10100 = vmatprep.subr.bf16.mxu1 %v16079_v22  ;;  %v15716_v44 = vmul.f32 -1.442695, %v6091_v13  ;;  %v16110_v55 = vcombine.low %v7116_v30, %v7124_v50  ;;  %v15871_v62 = vcombine.high %v6876_v56, %v6884_v63  ;;  %v6900_v2 = vld [vmem:[#allocation16 + $0x558] sm:$0xff] }
 0x4ae   :  { %v6094_v47 = vadd.f32 %v6062_v28, %v5991_v38  ;;  %v15717_v19 = vmul.f32 -1.442695, %v6092_v12  ;;  %10060 = vmatpush1.bf16.msra.mxu0 %v15822_v10  ;;  %v16127_v14 = vcombine.high %v7132_v49, %v7140_v0  ;;  %v7156_v22 = vld [vmem:[#allocation16 + $0xd58] sm:$0xff]  ;;  %v15870_v3 = vcombine.low %v6876_v56, %v6884_v63 }
 0x4af   :  { %v15718_v43 = vmul.f32 -1.442695, %v6093_v36  ;;  %17157 = vpow2.f32 %v15716_v44  ;;  %10061 = vmatprep.subr.bf16.mxu0 %v15839_v32  ;;  %v16126_v4 = vcombine.low %v7132_v49, %v7140_v0  ;;  %v15887_v53 = vcombine.high %v6892_v61, %v6900_v2  ;;  %v6916_v28 = vld [vmem:[#allocation16 + $0x5d8] sm:$0xff] }
 0x4b0   :  { %v15719_v18 = vmul.f32 -1.442695, %v6094_v47  ;;  %10101 = vmatpush1.bf16.msra.mxu1 %v16078_v42  ;;  %v16143_v6 = vcombine.high %v7148_v1, %v7156_v22  ;;  %v7164_v7 = vld [vmem:[#allocation16 + $0xd98] sm:$0xff]  ;;  %v15886_v60 = vcombine.low %v6892_v61, %v6900_v2  ;;  %v15903_v13 = vcombine.high %v6908_v58, %v6916_v28 }
 0x4b1   :  { %17159 = vpow2.f32 %v15718_v43  ;;  %10102 = vmatprep.subr.bf16.mxu1 %v16095_v37  ;;  %v7172_v41 = vld [vmem:[#allocation16 + $0xdd8] sm:$0xff]  ;;  %v15902_v15 = vcombine.low %v6908_v58, %v6916_v28 }
 0x4b2   :  { %17161 = vpow2.f32 %v15717_v19  ;;  %10062 = vmatpush1.bf16.msra.mxu0 %v15838_v59  ;;  %v6924_v20 = vld [vmem:[#allocation16 + $0x618] sm:$0xff] }
 0x4b3   :  { %17163 = vpow2.f32 %v15719_v18  ;;  %10063 = vmatprep.subr.bf16.mxu0 %v15855_v48  ;;  %v6932_v32 = vld [vmem:[#allocation16 + $0x658] sm:$0xff] }
 0x4b4   :  { %10103 = vmatpush1.bf16.msra.mxu1 %v16094_v45  ;;  %17165 = vtanh.f32 %v18173_v29  ;;  %v16142_v29 = vcombine.low %v7148_v1, %v7156_v22  ;;  %v7180_v36 = vld [vmem:[#allocation16 + $0xe18] sm:$0xff]  ;;  %v15919_v37 = vcombine.high %v6924_v20, %v6932_v32  ;;  %v15918_v43 = vcombine.low %v6924_v20, %v6932_v32  ;;  %v6749_v32 = vld [vmem:[#allocation16 + $0xa0] sm:$0xff] }
 0x4b5   :  { %10104 = vmatprep.subr.bf16.mxu1 %v16111_v5  ;;  %17167 = vtanh.f32 %v18175_v52  ;;  %v16159_v52 = vcombine.high %v7164_v7, %v7172_v41  ;;  %v7188_v12 = vld [vmem:[#allocation16 + $0xe58] sm:$0xff] }
 0x4b6   :  { %10064 = vmatpush1.bf16.msra.mxu0 %v15854_v24  ;;  %17169 = vtanh.f32 %v18178_v39  ;;  %v16175_v26 = vcombine.high %v7180_v36, %v7188_v12  ;;  %v6940_v16 = vld [vmem:[#allocation16 + $0x698] sm:$0xff]  ;;  %v16174_v59 = vcombine.low %v7180_v36, %v7188_v12  ;;  %v7005_v36 = vld [vmem:[#allocation16 + $0x8a0] sm:$0xff] }
 0x4b7   :  { %10065 = vmatprep.subr.bf16.mxu0 %v15871_v62  ;;  %17171 = vtanh.f32 %v18181_v23  ;;  %v16158_v23 = vcombine.low %v7164_v7, %v7172_v41  ;;  %v6948_v44 = vld [vmem:[#allocation16 + $0x6d8] sm:$0xff]  ;;  %v7013_v12 = vld [vmem:[#allocation16 + $0x8e0] sm:$0xff] }
 0x4b8   :  { %10105 = vmatpush1.bf16.msra.mxu1 %v16110_v55  ;;  %v7196_v47 = vld [vmem:[#allocation16 + $0xe98] sm:$0xff]  ;;  %v15935_v18 = vcombine.high %v6940_v16, %v6948_v44  ;;  %v15934_v55 = vcombine.low %v6940_v16, %v6948_v44  ;;  %v6765_v16 = vld [vmem:[#allocation16 + $0x120] sm:$0xff] }
 0x4b9   :  { %10106 = vmatprep.subr.bf16.mxu1 %v16127_v14  ;;  %v17158_v27 = vpop.eup %17157  ;;  %v7204_v30 = vld [vmem:[#allocation16 + $0xed8] sm:$0xff]  ;;  %v6773_v44 = vld [vmem:[#allocation16 + $0x160] sm:$0xff] }
 0x4ba   :  { %v6159_v9 = vadd.f32 1.0, %v17158_v27  ;;  %10066 = vmatpush1.bf16.msra.mxu0 %v15870_v3  ;;  %v16191_v48 = vcombine.high %v7196_v47, %v7204_v30  ;;  %v6956_v5 = vld [vmem:[#allocation16 + $0x718] sm:$0xff]  ;;  %v16190_v61 = vcombine.low %v7196_v47, %v7204_v30  ;;  %v7021_v47 = vld [vmem:[#allocation16 + $0x920] sm:$0xff] }
 0x4bb   :  { %v17160_v8 = vpop.eup %17159  ;;  %10067 = vmatprep.subr.bf16.mxu0 %v15887_v53  ;;  %v6964_v56 = vld [vmem:[#allocation16 + $0x758] sm:$0xff]  ;;  %v7029_v30 = vld [vmem:[#allocation16 + $0x960] sm:$0xff] }
 0x4bc   :  { %v17162_v10 = vpop.eup %17161  ;;  %v6161_v42 = vadd.f32 1.0, %v17160_v8  ;;  %10107 = vmatpush1.bf16.msra.mxu1 %v16126_v4  ;;  %17173 = vrcp.f32 %v6159_v9  ;;  %v7212_v49 = vld [vmem:[#allocation16 + $0xf18] sm:$0xff]  ;;  %v15951_v2 = vcombine.high %v6956_v5, %v6964_v56  ;;  %v15950_v41 = vcombine.low %v6956_v5, %v6964_v56  ;;  %v7045_v5 = vld [vmem:[#allocation16 + $0x9e0] sm:$0xff] }
 0x4bd   :  { %v17164_v38 = vpop.eup %17163  ;;  %v6160_v21 = vadd.f32 1.0, %v17162_v10  ;;  %10108 = vmatprep.subr.bf16.mxu1 %v16143_v6  ;;  %v7220_v0 = vld [vmem:[#allocation16 + $0xf58] sm:$0xff]  ;;  %v6733_v10 = vld [vmem:[#allocation16 + $0x20] sm:$0xff]  ;;  %v15760_v56 = vcombine.low %v6765_v16, %v6773_v44 }
 0x4be   :  { %17175 = vrcp.f32 %v6161_v42  ;;  %v6162_v39 = vadd.f32 1.0, %v17164_v38  ;;  %10068 = vmatpush1.bf16.msra.mxu0 %v15886_v60  ;;  %v17166_v50 = vpop.eup %17165  ;;  %v16207_v3 = vcombine.high %v7212_v49, %v7220_v0  ;;  %v6972_v4 = vld [vmem:[#allocation16 + $0x798] sm:$0xff]  ;;  %v16206_v8 = vcombine.low %v7212_v49, %v7220_v0  ;;  %v6741_v42 = vld [vmem:[#allocation16 + $0x60] sm:$0xff] }
 0x4bf   :  { %17177 = vrcp.f32 %v6160_v21  ;;  %10069 = vmatprep.subr.bf16.mxu0 %v15903_v13  ;;  %v17168_v19 = vpop.eup %17167  ;;  %v6980_v53 = vld [vmem:[#allocation16 + $0x7d8] sm:$0xff]  ;;  %v6997_v13 = vld [vmem:[#allocation16 + $0x860] sm:$0xff] }
 0x4c0   :  { %17179 = vrcp.f32 %v6162_v39  ;;  %10109 = vmatpush1.bf16.msra.mxu1 %v16142_v29  ;;  %v17170_v45 = vpop.eup %17169  ;;  %v7228_v28 = vld [vmem:[#allocation16 + $0xf98] sm:$0xff]  ;;  %v15967_v9 = vcombine.high %v6972_v4, %v6980_v53  ;;  %v6989_v29 = vld [vmem:[#allocation16 + $0x820] sm:$0xff]  ;;  %v15966_v38 = vcombine.low %v6972_v4, %v6980_v53 }
 0x4c1   :  { %10110 = vmatprep.subr.bf16.mxu1 %v16159_v52  ;;  %v17172_v63 = vpop.eup %17171  ;;  %v7236_v27 = vld [vmem:[#allocation16 + $0xfd8] sm:$0xff]  ;;  %v15729_v52 = vcombine.high %v6733_v10, %v6741_v42  ;;  %v15985_v20 = vcombine.high %v6989_v29, %v6997_v13  ;;  %v6757_v39 = vld [vmem:[#allocation16 + $0xe0] sm:$0xff] }
 0x4c2   :  { %10070 = vmatpush1.bf16.msra.mxu0 %v15902_v15  ;;  %v16223_v60 = vcombine.high %v7228_v28, %v7236_v27  ;;  %v16222_v21 = vcombine.low %v7228_v28, %v7236_v27  ;;  %v15728_v15 = vcombine.low %v6733_v10, %v6741_v42  ;;  %v6821_v4 = vld [vmem:[#allocation16 + $0x2e0] sm:$0xff] }
 0x4c3   :  { %10071 = vmatprep.subr.bf16.mxu0 %v15919_v37  ;;  %v15745_v37 = vcombine.high %v6749_v32, %v6757_v39  ;;  %v7069_v53 = vld [vmem:[#allocation16 + $0xaa0] sm:$0xff] }
 0x4c4   :  { %10111 = vmatpush1.bf16.msra.mxu1 %v16158_v23  ;;  %v15984_v23 = vcombine.low %v6989_v29, %v6997_v13 }
 0x4c5   :  { %10112 = vmatprep.subr.bf16.mxu1 %v16175_v26  ;;  %v16001_v26 = vcombine.high %v7005_v36, %v7013_v12 }
 0x4c6   :  { %v17174_v24 = vpop.eup %17173  ;;  %10072 = vmatpush1.bf16.msra.mxu0 %v15918_v43  ;;  %v16000_v43 = vcombine.low %v7005_v36, %v7013_v12  ;;  %v7109_v36 = vld [vmem:[#allocation16 + $0xbe0] sm:$0xff] }
 0x4c7   :  { %v6187_v14 = vmul.f32 %v17174_v24, %v17166_v50  ;;  %10073 = vmatprep.subr.bf16.mxu0 %v15935_v18  ;;  %v15744_v50 = vcombine.low %v6749_v32, %v6757_v39  ;;  %v6781_v18 = vld [vmem:[#allocation16 + $0x1a0] sm:$0xff] }
 0x4c8   :  { %v17176_v62 = vpop.eup %17175  ;;  %10113 = vmatpush1.bf16.msra.mxu1 %v16174_v59  ;;  %v16017_v59 = vcombine.high %v7021_v47, %v7029_v30  ;;  %v6797_v24 = vld [vmem:[#allocation16 + $0x220] sm:$0xff] }
 0x4c9   :  { %v17178_v1 = vpop.eup %17177  ;;  %v6189_v22 = vmul.f32 %v17176_v62, %v17168_v19  ;;  %10114 = vmatprep.subr.bf16.mxu1 %v16191_v48  ;;  %6191 = vst [vmem:[#allocation23] sm:$0xff] %v6187_v14  ;;  %v15761_v19 = vcombine.high %v6765_v16, %v6773_v44  ;;  %v7037_v48 = vld [vmem:[#allocation16 + $0x9a0] sm:$0xff] }
 0x4ca   :  { %v17180_v6 = vpop.eup %17179  ;;  %v6188_v58 = vmul.f32 %v17178_v1, %v17170_v45  ;;  %10074 = vmatpush1.bf16.msra.mxu0 %v15934_v55  ;;  %v6789_v45 = vld [vmem:[#allocation16 + $0x1e0] sm:$0xff]  ;;  %v16033_v0 = vcombine.high %v7037_v48, %v7045_v5 }
 0x4cb   :  { %6193 = vst [vmem:[#allocation23 + $0x10] sm:$0xff] %v6189_v22  ;;  %v6190_v7 = vmul.f32 %v17180_v6, %v17172_v63  ;;  %10075 = vmatprep.subr.bf16.mxu0 %v15951_v2  ;;  %v16016_v63 = vcombine.low %v7021_v47, %v7029_v30  ;;  %v15777_v49 = vcombine.high %v6781_v18, %v6789_v45  ;;  %v6805_v55 = vld [vmem:[#allocation16 + $0x260] sm:$0xff] }
 0x4cc   :  { %6192 = vst [vmem:[#allocation23 + $0x8] sm:$0xff] %v6188_v58  ;;  %10115 = vmatpush1.bf16.msra.mxu1 %v16190_v61  ;;  %v7053_v62 = vld [vmem:[#allocation16 + $0xa20] sm:$0xff]  ;;  %v15776_v61 = vcombine.low %v6781_v18, %v6789_v45  ;;  %v16032_v2 = vcombine.low %v7037_v48, %v7045_v5  ;;  %v15793_v1 = vcombine.high %v6797_v24, %v6805_v55 }
 0x4cd   :  { %6194 = vst [vmem:[#allocation23 + $0x18] sm:$0xff] %v6190_v7  ;;  %10116 = vmatprep.subr.bf16.mxu1 %v16207_v3  ;;  %v7061_v14 = vld [vmem:[#allocation16 + $0xa60] sm:$0xff]  ;;  %v15792_v58 = vcombine.low %v6797_v24, %v6805_v55 }
 0x4ce   :  { %10076 = vmatpush1.bf16.msra.mxu0 %v15950_v41  ;;  %v16049_v22 = vcombine.high %v7053_v62, %v7061_v14  ;;  %v6813_v3 = vld [vmem:[#allocation16 + $0x2a0] sm:$0xff]  ;;  %v16048_v28 = vcombine.low %v7053_v62, %v7061_v14 }
 0x4cf   :  { %10077 = vmatprep.subr.bf16.mxu0 %v15967_v9  ;;  %v7077_v6 = vld [vmem:[#allocation16 + $0xae0] sm:$0xff]  ;;  %v15809_v27 = vcombine.high %v6813_v3, %v6821_v4  ;;  %v15808_v10 = vcombine.low %v6813_v3, %v6821_v4 }
 0x4d0   :  { %10117 = vmatpush1.bf16.msra.mxu1 %v16206_v8  ;;  %v16065_v7 = vcombine.high %v7069_v53, %v7077_v6  ;;  %v6829_v41 = vld [vmem:[#allocation16 + $0x320] sm:$0xff]  ;;  %v16064_v42 = vcombine.low %v7069_v53, %v7077_v6 }
 0x4d1   :  { %10118 = vmatprep.subr.bf16.mxu1 %v16223_v60  ;;  %v6837_v8 = vld [vmem:[#allocation16 + $0x360] sm:$0xff] }
 0x4d2   :  { %10078 = vmatpush1.bf16.msra.mxu0 %v15966_v38  ;;  %v7085_v9 = vld [vmem:[#allocation16 + $0xb20] sm:$0xff]  ;;  %v15825_v29 = vcombine.high %v6829_v41, %v6837_v8 }
 0x4d3   :  { %10129 = vmatprep.subr.bf16.mxu0 %v15729_v52  ;;  %v7093_v60 = vld [vmem:[#allocation16 + $0xb60] sm:$0xff] }
 0x4d4   :  { %10119 = vmatpush1.bf16.msra.mxu1 %v16222_v21  ;;  %v16081_v38 = vcombine.high %v7085_v9, %v7093_v60  ;;  %v6845_v21 = vld [vmem:[#allocation16 + $0x3a0] sm:$0xff]  ;;  %v16080_v47 = vcombine.low %v7085_v9, %v7093_v60 }
 0x4d5   :  { %10170 = vmatprep.subr.bf16.mxu1 %v15985_v20  ;;  %10080 = vmatmul.mubr.bf16.vlgmr.msra.gmra.mrb[60].mxu0 %v18083_v40  ;;  %v6853_v52 = vld [vmem:[#allocation16 + $0x3e0] sm:$0xff] }
 0x4d6   :  { %10130 = vmatpush1.bf16.msra.mxu0 %v15728_v15  ;;  %10161 = vmatprep.mubr.bf16.mxu0 %v18063_v31  ;;  %v7101_v39 = vld [vmem:[#allocation16 + $0xba0] sm:$0xff]  ;;  %v15841_v30 = vcombine.high %v6845_v21, %v6853_v52  ;;  %v15840_v48 = vcombine.low %v6845_v21, %v6853_v52 }
 0x4d7   :  { %10121 = vmatmul.mubr.bf16.vlgmr.msra.gmra.mrb[60].mxu1 %v18085_v46  ;;  %10131 = vmatprep.subr.bf16.mxu0 %v15745_v37  ;;  %v15824_v37 = vcombine.low %v6829_v41, %v6837_v8  ;;  %v7117_v18 = vld [vmem:[#allocation16 + $0xc20] sm:$0xff]  ;;  %v16096_v5 = vcombine.low %v7101_v39, %v7109_v36 }
 0x4d8   :  { %10171 = vmatpush1.bf16.msra.mxu1 %v15984_v23  ;;  %10202 = vmatprep.mubr.bf16.mxu1 %v18066_v54  ;;  %v7125_v45 = vld [vmem:[#allocation16 + $0xc60] sm:$0xff] }
 0x4d9   :  { %10172 = vmatprep.subr.bf16.mxu1 %v16001_v26  ;;  %v7133_v24 = vld [vmem:[#allocation16 + $0xca0] sm:$0xff]  ;;  %v16112_v14 = vcombine.low %v7117_v18, %v7125_v45 }
 0x4da   :  { %10132 = vmatpush1.bf16.msra.mxu0 %v15744_v50  ;;  %v7141_v55 = vld [vmem:[#allocation16 + $0xce0] sm:$0xff] }
 0x4db   :  { %10133 = vmatprep.subr.bf16.mxu0 %v15761_v19  ;;  %v6861_v19 = vld [vmem:[#allocation16 + $0x420] sm:$0xff]  ;;  %v16128_v6 = vcombine.low %v7133_v24, %v7141_v55 }
 0x4dc   :  { %10173 = vmatpush1.bf16.msra.mxu1 %v16000_v43  ;;  %v16097_v43 = vcombine.high %v7101_v39, %v7109_v36  ;;  %v7149_v3 = vld [vmem:[#allocation16 + $0xd20] sm:$0xff] }
 0x4dd   :  { %10174 = vmatprep.subr.bf16.mxu1 %v16017_v59  ;;  %v6869_v59 = vld [vmem:[#allocation16 + $0x460] sm:$0xff] }
 0x4de   :  { %10134 = vmatpush1.bf16.msra.mxu0 %v15760_v56  ;;  %v15857_v56 = vcombine.high %v6861_v19, %v6869_v59  ;;  %v15856_v62 = vcombine.low %v6861_v19, %v6869_v59  ;;  %v7157_v4 = vld [vmem:[#allocation16 + $0xd60] sm:$0xff] }
 0x4df   :  { %10135 = vmatprep.subr.bf16.mxu0 %v15777_v49  ;;  %v6877_v49 = vld [vmem:[#allocation16 + $0x4a0] sm:$0xff]  ;;  %v16144_v60 = vcombine.low %v7149_v3, %v7157_v4 }
 0x4e0   :  { %10175 = vmatpush1.bf16.msra.mxu1 %v16016_v63  ;;  %v16113_v63 = vcombine.high %v7117_v18, %v7125_v45  ;;  %v7165_v41 = vld [vmem:[#allocation16 + $0xda0] sm:$0xff] }
 0x4e1   :  { %10176 = vmatprep.subr.bf16.mxu1 %v16033_v0  ;;  %v6885_v0 = vld [vmem:[#allocation16 + $0x4e0] sm:$0xff] }
 0x4e2   :  { %10136 = vmatpush1.bf16.msra.mxu0 %v15776_v61  ;;  %v15873_v61 = vcombine.high %v6877_v49, %v6885_v0  ;;  %v15872_v53 = vcombine.low %v6877_v49, %v6885_v0  ;;  %v7173_v8 = vld [vmem:[#allocation16 + $0xde0] sm:$0xff] }
 0x4e3   :  { %10137 = vmatprep.subr.bf16.mxu0 %v15793_v1  ;;  %v6893_v1 = vld [vmem:[#allocation16 + $0x520] sm:$0xff] }
 0x4e4   :  { %10177 = vmatpush1.bf16.msra.mxu1 %v16032_v2  ;;  %v16129_v2 = vcombine.high %v7133_v24, %v7141_v55  ;;  %v7189_v21 = vld [vmem:[#allocation16 + $0xe60] sm:$0xff] }
 0x4e5   :  { %10178 = vmatprep.subr.bf16.mxu1 %v16049_v22  ;;  %v6901_v22 = vld [vmem:[#allocation16 + $0x560] sm:$0xff] }
 0x4e6   :  { %10138 = vmatpush1.bf16.msra.mxu0 %v15792_v58  ;;  %v15889_v58 = vcombine.high %v6893_v1, %v6901_v22  ;;  %v15888_v9 = vcombine.low %v6893_v1, %v6901_v22  ;;  %v6941_v36 = vld [vmem:[#allocation16 + $0x6a0] sm:$0xff]  ;;  %v6990_v1 = vld [vmem:[#allocation16 + $0x828] sm:$0xff] }
 0x4e7   :  { %10139 = vmatprep.subr.bf16.mxu0 %v15809_v27  ;;  %v6909_v27 = vld [vmem:[#allocation16 + $0x5a0] sm:$0xff]  ;;  %v6998_v22 = vld [vmem:[#allocation16 + $0x868] sm:$0xff] }
 0x4e8   :  { %10179 = vmatpush1.bf16.msra.mxu1 %v16048_v28  ;;  %v9835_v13 = vpop.f32.mrb[48].mxu0  ;;  %v16145_v28 = vcombine.high %v7149_v3, %v7157_v4  ;;  %v7213_v19 = vld [vmem:[#allocation16 + $0xf20] sm:$0xff] }
 0x4e9   :  { %10180 = vmatprep.subr.bf16.mxu1 %v16065_v7  ;;  %v9837_v32 = vpop.f32.mrb[49].mxu0  ;;  %v6917_v7 = vld [vmem:[#allocation16 + $0x5e0] sm:$0xff] }
 0x4ea   :  { %v9876_v20 = vpop.f32.mrb[48].mxu1  ;;  %v9839_v23 = vpop.f32.mrb[50].mxu0  ;;  %10140 = vmatpush1.bf16.msra.mxu0 %v15808_v10  ;;  %v15905_v10 = vcombine.high %v6909_v27, %v6917_v7  ;;  %v15904_v52 = vcombine.low %v6909_v27, %v6917_v7  ;;  %v7221_v59 = vld [vmem:[#allocation16 + $0xf60] sm:$0xff]  ;;  %v7006_v27 = vld [vmem:[#allocation16 + $0x8a8] sm:$0xff] }
 0x4eb   :  { %v18209_v12 = vadd.f32 %v9876_v20, %v9835_v13  ;;  %v9878_v15 = vpop.f32.mrb[49].mxu1  ;;  %v9840_v44 = vpop.f32.mrb[51].mxu0  ;;  %10141 = vmatprep.subr.bf16.mxu0 %v15825_v29  ;;  %v6925_v29 = vld [vmem:[#allocation16 + $0x620] sm:$0xff]  ;;  %v16160_v20 = vcombine.low %v7165_v41, %v7173_v8  ;;  %v16208_v55 = vcombine.low %v7213_v19, %v7221_v59  ;;  %v7014_v7 = vld [vmem:[#allocation16 + $0x8e8] sm:$0xff] }
 0x4ec   :  { %v18211_v26 = vadd.f32 %v9878_v15, %v9837_v32  ;;  %v9880_v16 = vpop.f32.mrb[50].mxu1  ;;  %10181 = vmatpush1.bf16.msra.mxu1 %v16064_v42  ;;  %v16161_v42 = vcombine.high %v7165_v41, %v7173_v8  ;;  %v6933_v13 = vld [vmem:[#allocation16 + $0x660] sm:$0xff]  ;;  %v15986_v8 = vcombine.low %v6990_v1, %v6998_v22 }
 0x4ed   :  { %v9881_v50 = vpop.f32.mrb[51].mxu1  ;;  %10182 = vmatprep.subr.bf16.mxu1 %v16081_v38  ;;  %v7181_v38 = vld [vmem:[#allocation16 + $0xe20] sm:$0xff]  ;;  %v15921_v32 = vcombine.high %v6925_v29, %v6933_v13  ;;  %v15920_v16 = vcombine.low %v6925_v29, %v6933_v13  ;;  %v7022_v29 = vld [vmem:[#allocation16 + $0x928] sm:$0xff] }
 0x4ee   :  { %10142 = vmatpush1.bf16.msra.mxu0 %v15824_v37  ;;  %v16177_v39 = vcombine.high %v7181_v38, %v7189_v21  ;;  %v6949_v15 = vld [vmem:[#allocation16 + $0x6e0] sm:$0xff]  ;;  %v16176_v44 = vcombine.low %v7181_v38, %v7189_v21  ;;  %v7030_v13 = vld [vmem:[#allocation16 + $0x968] sm:$0xff]  ;;  %v16002_v21 = vcombine.low %v7006_v27, %v7014_v7 }
 0x4ef   :  { %10143 = vmatprep.subr.bf16.mxu0 %v15841_v30  ;;  %v7197_v23 = vld [vmem:[#allocation16 + $0xea0] sm:$0xff]  ;;  %v15936_v18 = vcombine.low %v6941_v36, %v6949_v15 }
 0x4f0   :  { %10183 = vmatpush1.bf16.msra.mxu1 %v16080_v47  ;;  %v7205_v37 = vld [vmem:[#allocation16 + $0xee0] sm:$0xff]  ;;  %v15937_v47 = vcombine.high %v6941_v36, %v6949_v15  ;;  %v7038_v36 = vld [vmem:[#allocation16 + $0x9a8] sm:$0xff] }
 0x4f1   :  { %10184 = vmatprep.subr.bf16.mxu1 %v16097_v43  ;;  %v16193_v30 = vcombine.high %v7197_v23, %v7205_v37  ;;  %v6957_v50 = vld [vmem:[#allocation16 + $0x720] sm:$0xff]  ;;  %v16192_v45 = vcombine.low %v7197_v23, %v7205_v37  ;;  %v7046_v15 = vld [vmem:[#allocation16 + $0x9e8] sm:$0xff]  ;;  %v16018_v37 = vcombine.low %v7022_v29, %v7030_v13 }
 0x4f2   :  { %10144 = vmatpush1.bf16.msra.mxu0 %v15840_v48  ;;  %v6965_v43 = vld [vmem:[#allocation16 + $0x760] sm:$0xff] }
 0x4f3   :  { %10145 = vmatprep.subr.bf16.mxu0 %v15857_v56  ;;  %v15953_v48 = vcombine.high %v6957_v50, %v6965_v43  ;;  %v6973_v56 = vld [vmem:[#allocation16 + $0x7a0] sm:$0xff]  ;;  %v15952_v24 = vcombine.low %v6957_v50, %v6965_v43  ;;  %v7054_v50 = vld [vmem:[#allocation16 + $0xa28] sm:$0xff] }
 0x4f4   :  { %10185 = vmatpush1.bf16.msra.mxu1 %v16096_v5  ;;  %v16209_v5 = vcombine.high %v7213_v19, %v7221_v59  ;;  %v7229_v49 = vld [vmem:[#allocation16 + $0xfa0] sm:$0xff]  ;;  %v7062_v43 = vld [vmem:[#allocation16 + $0xa68] sm:$0xff]  ;;  %v16034_v59 = vcombine.low %v7038_v36, %v7046_v15 }
 0x4f5   :  { %10186 = vmatprep.subr.bf16.mxu1 %v16113_v63  ;;  %v6981_v63 = vld [vmem:[#allocation16 + $0x7e0] sm:$0xff] }
 0x4f6   :  { %10146 = vmatpush1.bf16.msra.mxu0 %v15856_v62  ;;  %v7237_v0 = vld [vmem:[#allocation16 + $0xfe0] sm:$0xff]  ;;  %v15969_v62 = vcombine.high %v6973_v56, %v6981_v63  ;;  %v15968_v3 = vcombine.low %v6973_v56, %v6981_v63  ;;  %v7070_v56 = vld [vmem:[#allocation16 + $0xaa8] sm:$0xff] }
 0x4f7   :  { %10147 = vmatprep.subr.bf16.mxu0 %v15873_v61  ;;  %v6734_v61 = vld [vmem:[#allocation16 + $0x28] sm:$0xff]  ;;  %v16224_v4 = vcombine.low %v7229_v49, %v7237_v0 }
 0x4f8   :  { %10187 = vmatpush1.bf16.msra.mxu1 %v16112_v14  ;;  %v16225_v14 = vcombine.high %v7229_v49, %v7237_v0  ;;  %v7078_v63 = vld [vmem:[#allocation16 + $0xae8] sm:$0xff]  ;;  %v16050_v0 = vcombine.low %v7054_v50, %v7062_v43 }
 0x4f9   :  { %10188 = vmatprep.subr.bf16.mxu1 %v16129_v2  ;;  %v6742_v2 = vld [vmem:[#allocation16 + $0x68] sm:$0xff] }
 0x4fa   :  { %10148 = vmatpush1.bf16.msra.mxu0 %v15872_v53  ;;  %v15731_v53 = vcombine.high %v6734_v61, %v6742_v2  ;;  %v15730_v41 = vcombine.low %v6734_v61, %v6742_v2  ;;  %v7086_v61 = vld [vmem:[#allocation16 + $0xb28] sm:$0xff] }
 0x4fb   :  { %10149 = vmatprep.subr.bf16.mxu0 %v15889_v58  ;;  %v6750_v58 = vld [vmem:[#allocation16 + $0xa8] sm:$0xff] }
 0x4fc   :  { %10189 = vmatpush1.bf16.msra.mxu1 %v16128_v6  ;;  %v15987_v6 = vcombine.high %v6990_v1, %v6998_v22  ;;  %v7094_v2 = vld [vmem:[#allocation16 + $0xb68] sm:$0xff]  ;;  %v16066_v22 = vcombine.low %v7070_v56, %v7078_v63 }
 0x4fd   :  { %10190 = vmatprep.subr.bf16.mxu1 %v16145_v28  ;;  %v6758_v28 = vld [vmem:[#allocation16 + $0xe8] sm:$0xff] }
 0x4fe   :  { %10150 = vmatpush1.bf16.msra.mxu0 %v15888_v9  ;;  %v15747_v9 = vcombine.high %v6750_v58, %v6758_v28  ;;  %v15746_v38 = vcombine.low %v6750_v58, %v6758_v28  ;;  %v6854_v58 = vld [vmem:[#allocation16 + $0x3e8] sm:$0xff] }
 0x4ff   :  { %10151 = vmatprep.subr.bf16.mxu0 %v15905_v10  ;;  %v6766_v10 = vld [vmem:[#allocation16 + $0x128] sm:$0xff] }
 0x500   :  { %10191 = vmatpush1.bf16.msra.mxu1 %v16144_v60  ;;  %v16003_v60 = vcombine.high %v7006_v27, %v7014_v7  ;;  %v7102_v7 = vld [vmem:[#allocation16 + $0xba8] sm:$0xff] }
 0x501   :  { %10192 = vmatprep.subr.bf16.mxu1 %v16161_v42  ;;  %v6774_v42 = vld [vmem:[#allocation16 + $0x168] sm:$0xff] }
 0x502   :  { %10152 = vmatpush1.bf16.msra.mxu0 %v15904_v52  ;;  %v15763_v52 = vcombine.high %v6766_v10, %v6774_v42  ;;  %v15762_v23 = vcombine.low %v6766_v10, %v6774_v42 }
 0x503   :  { %10153 = vmatprep.subr.bf16.mxu0 %v15921_v32  ;;  %v6782_v32 = vld [vmem:[#allocation16 + $0x1a8] sm:$0xff] }
 0x504   :  { %10193 = vmatpush1.bf16.msra.mxu1 %v16160_v20  ;;  %v16019_v20 = vcombine.high %v7022_v29, %v7030_v13 }
 0x505   :  { %10194 = vmatprep.subr.bf16.mxu1 %v16177_v39  ;;  %v6790_v39 = vld [vmem:[#allocation16 + $0x1e8] sm:$0xff] }
 0x506   :  { %10154 = vmatpush1.bf16.msra.mxu0 %v15920_v16  ;;  %v15779_v16 = vcombine.high %v6782_v32, %v6790_v39  ;;  %v15778_v19 = vcombine.low %v6782_v32, %v6790_v39  ;;  %v6862_v32 = vld [vmem:[#allocation16 + $0x428] sm:$0xff] }
 0x507   :  { %10155 = vmatprep.subr.bf16.mxu0 %v15937_v47  ;;  %v6798_v47 = vld [vmem:[#allocation16 + $0x228] sm:$0xff] }
 0x508   :  { %10195 = vmatpush1.bf16.msra.mxu1 %v16176_v44  ;;  %v16035_v44 = vcombine.high %v7038_v36, %v7046_v15  ;;  %v6870_v39 = vld [vmem:[#allocation16 + $0x468] sm:$0xff] }
 0x509   :  { %10196 = vmatprep.subr.bf16.mxu1 %v16193_v30  ;;  %v6806_v30 = vld [vmem:[#allocation16 + $0x268] sm:$0xff] }
 0x50a   :  { %10156 = vmatpush1.bf16.msra.mxu0 %v15936_v18  ;;  %v15795_v18 = vcombine.high %v6798_v47, %v6806_v30  ;;  %v15794_v49 = vcombine.low %v6798_v47, %v6806_v30  ;;  %v7118_v36 = vld [vmem:[#allocation16 + $0xc28] sm:$0xff] }
 0x50b   :  { %10157 = vmatprep.subr.bf16.mxu0 %v15953_v48  ;;  %v6814_v48 = vld [vmem:[#allocation16 + $0x2a8] sm:$0xff] }
 0x50c   :  { %10197 = vmatpush1.bf16.msra.mxu1 %v16192_v45  ;;  %v16051_v45 = vcombine.high %v7054_v50, %v7062_v43  ;;  %v7126_v15 = vld [vmem:[#allocation16 + $0xc68] sm:$0xff] }
 0x50d   :  { %10198 = vmatprep.subr.bf16.mxu1 %v16209_v5  ;;  %v6822_v5 = vld [vmem:[#allocation16 + $0x2e8] sm:$0xff] }
 0x50e   :  { %10158 = vmatpush1.bf16.msra.mxu0 %v15952_v24  ;;  %v15811_v24 = vcombine.high %v6814_v48, %v6822_v5  ;;  %v15810_v1 = vcombine.low %v6814_v48, %v6822_v5  ;;  %v6878_v47 = vld [vmem:[#allocation16 + $0x4a8] sm:$0xff] }
 0x50f   :  { %10159 = vmatprep.subr.bf16.mxu0 %v15969_v62  ;;  %v6830_v62 = vld [vmem:[#allocation16 + $0x328] sm:$0xff] }
 0x510   :  { %10199 = vmatpush1.bf16.msra.mxu1 %v16208_v55  ;;  %v16067_v55 = vcombine.high %v7070_v56, %v7078_v63  ;;  %v6886_v30 = vld [vmem:[#allocation16 + $0x4e8] sm:$0xff] }
 0x511   :  { %10200 = vmatprep.subr.bf16.mxu1 %v16225_v14  ;;  %v6838_v14 = vld [vmem:[#allocation16 + $0x368] sm:$0xff] }
 0x512   :  { %10160 = vmatpush1.bf16.msra.mxu0 %v15968_v3  ;;  %v15827_v3 = vcombine.high %v6830_v62, %v6838_v14  ;;  %v15826_v10 = vcombine.low %v6830_v62, %v6838_v14  ;;  %v7134_v50 = vld [vmem:[#allocation16 + $0xca8] sm:$0xff] }
 0x513   :  { %10211 = vmatprep.subr.bf16.mxu0 %v15731_v53  ;;  %v16083_v53 = vcombine.high %v7086_v61, %v7094_v2  ;;  %v7142_v43 = vld [vmem:[#allocation16 + $0xce8] sm:$0xff] }
 0x514   :  { %10201 = vmatpush1.bf16.msra.mxu1 %v16224_v4  ;;  %v6894_v48 = vld [vmem:[#allocation16 + $0x528] sm:$0xff] }
 0x515   :  { %10252 = vmatprep.subr.bf16.mxu1 %v15987_v6  ;;  %10162 = vmatmul.mubr.bf16.vlgmr.msra.gmra.mrb[64].mxu0 %v18083_v40  ;;  %v6846_v6 = vld [vmem:[#allocation16 + $0x3a8] sm:$0xff] }
 0x516   :  { %10212 = vmatpush1.bf16.msra.mxu0 %v15730_v41  ;;  %10243 = vmatprep.mubr.bf16.mxu0 %v18063_v31  ;;  %v7110_v41 = vld [vmem:[#allocation16 + $0xbe8] sm:$0xff] }
 0x517   :  { %10203 = vmatmul.mubr.bf16.vlgmr.msra.gmra.mrb[64].mxu1 %v18085_v46  ;;  %10213 = vmatprep.subr.bf16.mxu0 %v15747_v9  ;;  %v6902_v5 = vld [vmem:[#allocation16 + $0x568] sm:$0xff] }
 0x518   :  { %10253 = vmatpush1.bf16.msra.mxu1 %v15986_v8  ;;  %10284 = vmatprep.mubr.bf16.mxu1 %v18066_v54  ;;  %v7150_v56 = vld [vmem:[#allocation16 + $0xd28] sm:$0xff] }
 0x519   :  { %10254 = vmatprep.subr.bf16.mxu1 %v16003_v60  ;;  %v7158_v63 = vld [vmem:[#allocation16 + $0xd68] sm:$0xff] }
 0x51a   :  { %10214 = vmatpush1.bf16.msra.mxu0 %v15746_v38  ;;  %v16082_v38 = vcombine.low %v7086_v61, %v7094_v2  ;;  %v6910_v62 = vld [vmem:[#allocation16 + $0x5a8] sm:$0xff] }
 0x51b   :  { %10215 = vmatprep.subr.bf16.mxu0 %v15763_v52  ;;  %v6918_v14 = vld [vmem:[#allocation16 + $0x5e8] sm:$0xff] }
 0x51c   :  { %10255 = vmatpush1.bf16.msra.mxu1 %v16002_v21  ;;  %v15843_v21 = vcombine.high %v6846_v6, %v6854_v58  ;;  %v7166_v61 = vld [vmem:[#allocation16 + $0xda8] sm:$0xff] }
 0x51d   :  { %10256 = vmatprep.subr.bf16.mxu1 %v16019_v20  ;;  %v16099_v20 = vcombine.high %v7102_v7, %v7110_v41  ;;  %v7174_v2 = vld [vmem:[#allocation16 + $0xde8] sm:$0xff] }
 0x51e   :  { %10216 = vmatpush1.bf16.msra.mxu0 %v15762_v23  ;;  %v15842_v23 = vcombine.low %v6846_v6, %v6854_v58  ;;  %v6934_v6 = vld [vmem:[#allocation16 + $0x668] sm:$0xff] }
 0x51f   :  { %10217 = vmatprep.subr.bf16.mxu0 %v15779_v16  ;;  %v15859_v16 = vcombine.high %v6862_v32, %v6870_v39  ;;  %v7182_v58 = vld [vmem:[#allocation16 + $0xe28] sm:$0xff] }
 0x520   :  { %10257 = vmatpush1.bf16.msra.mxu1 %v16018_v37  ;;  %v16098_v37 = vcombine.low %v7102_v7, %v7110_v41  ;;  %v16162_v7 = vcombine.low %v7166_v61, %v7174_v2 }
 0x521   :  { %10258 = vmatprep.subr.bf16.mxu1 %v16035_v44  ;;  %v16115_v44 = vcombine.high %v7118_v36, %v7126_v15 }
 0x522   :  { %10218 = vmatpush1.bf16.msra.mxu0 %v15778_v19  ;;  %v15858_v19 = vcombine.low %v6862_v32, %v6870_v39  ;;  %v6958_v32 = vld [vmem:[#allocation16 + $0x728] sm:$0xff] }
 0x523   :  { %10219 = vmatprep.subr.bf16.mxu0 %v15795_v18  ;;  %v15875_v18 = vcombine.high %v6878_v47, %v6886_v30  ;;  %v6966_v39 = vld [vmem:[#allocation16 + $0x768] sm:$0xff] }
 0x524   :  { %10259 = vmatpush1.bf16.msra.mxu1 %v16034_v59  ;;  %v16114_v59 = vcombine.low %v7118_v36, %v7126_v15  ;;  %v7214_v36 = vld [vmem:[#allocation16 + $0xf28] sm:$0xff] }
 0x525   :  { %10260 = vmatprep.subr.bf16.mxu1 %v16051_v45  ;;  %v16131_v45 = vcombine.high %v7134_v50, %v7142_v43  ;;  %v7222_v15 = vld [vmem:[#allocation16 + $0xf68] sm:$0xff] }
 0x526   :  { %10220 = vmatpush1.bf16.msra.mxu0 %v15794_v49  ;;  %v15874_v49 = vcombine.low %v6878_v47, %v6886_v30  ;;  %v6974_v47 = vld [vmem:[#allocation16 + $0x7a8] sm:$0xff] }
 0x527   :  { %10221 = vmatprep.subr.bf16.mxu0 %v15811_v24  ;;  %v15891_v24 = vcombine.high %v6894_v48, %v6902_v5  ;;  %v6982_v30 = vld [vmem:[#allocation16 + $0x7e8] sm:$0xff] }
 0x528   :  { %10261 = vmatpush1.bf16.msra.mxu1 %v16050_v0  ;;  %v9917_v4 = vpop.f32.mrb[52].mxu0  ;;  %v16130_v0 = vcombine.low %v7134_v50, %v7142_v43  ;;  %v7230_v50 = vld [vmem:[#allocation16 + $0xfa8] sm:$0xff] }
 0x529   :  { %10262 = vmatprep.subr.bf16.mxu1 %v16067_v55  ;;  %v9919_v27 = vpop.f32.mrb[53].mxu0  ;;  %v16147_v55 = vcombine.high %v7150_v56, %v7158_v63  ;;  %v7238_v43 = vld [vmem:[#allocation16 + $0xfe8] sm:$0xff] }
 0x52a   :  { %v9958_v28 = vpop.f32.mrb[52].mxu1  ;;  %v9921_v60 = vpop.f32.mrb[54].mxu0  ;;  %10222 = vmatpush1.bf16.msra.mxu0 %v15810_v1  ;;  %v15890_v1 = vcombine.low %v6894_v48, %v6902_v5  ;;  %v6735_v48 = vld [vmem:[#allocation16 + $0x30] sm:$0xff] }
 0x52b   :  { %v18217_v8 = vadd.f32 %v9958_v28, %v9917_v4  ;;  %v9960_v9 = vpop.f32.mrb[53].mxu1  ;;  %v9922_v13 = vpop.f32.mrb[55].mxu0  ;;  %10223 = vmatprep.subr.bf16.mxu0 %v15827_v3  ;;  %v15907_v3 = vcombine.high %v6910_v62, %v6918_v14  ;;  %v16163_v4 = vcombine.high %v7166_v61, %v7174_v2  ;;  %v7190_v28 = vld [vmem:[#allocation16 + $0xe68] sm:$0xff]  ;;  %v6743_v5 = vld [vmem:[#allocation16 + $0x70] sm:$0xff] }
 0x52c   :  { %v18219_v42 = vadd.f32 %v9960_v9, %v9919_v27  ;;  %v9962_v29 = vpop.f32.mrb[54].mxu1  ;;  %10263 = vmatpush1.bf16.msra.mxu1 %v16066_v22  ;;  %v16146_v22 = vcombine.low %v7150_v56, %v7158_v63  ;;  %v15906_v27 = vcombine.low %v6910_v62, %v6918_v14  ;;  %v16179_v9 = vcombine.high %v7182_v58, %v7190_v28  ;;  %v6942_v60 = vld [vmem:[#allocation16 + $0x6a8] sm:$0xff]  ;;  %v6991_v56 = vld [vmem:[#allocation16 + $0x830] sm:$0xff] }
 0x52d   :  { %v9963_v52 = vpop.f32.mrb[55].mxu1  ;;  %10264 = vmatprep.subr.bf16.mxu1 %v16083_v53  ;;  %v6926_v53 = vld [vmem:[#allocation16 + $0x628] sm:$0xff]  ;;  %v6999_v63 = vld [vmem:[#allocation16 + $0x870] sm:$0xff] }
 0x52e   :  { %10224 = vmatpush1.bf16.msra.mxu0 %v15826_v10  ;;  %v15923_v41 = vcombine.high %v6926_v53, %v6934_v6  ;;  %v6950_v10 = vld [vmem:[#allocation16 + $0x6e8] sm:$0xff]  ;;  %v6751_v62 = vld [vmem:[#allocation16 + $0xb0] sm:$0xff] }
 0x52f   :  { %10225 = vmatprep.subr.bf16.mxu0 %v15843_v21  ;;  %v7198_v29 = vld [vmem:[#allocation16 + $0xea8] sm:$0xff]  ;;  %v16178_v21 = vcombine.low %v7182_v58, %v7190_v28  ;;  %v15939_v52 = vcombine.high %v6942_v60, %v6950_v10  ;;  %v6759_v14 = vld [vmem:[#allocation16 + $0xf0] sm:$0xff] }
 0x530   :  { %10265 = vmatpush1.bf16.msra.mxu1 %v16082_v38  ;;  %v7206_v13 = vld [vmem:[#allocation16 + $0xee8] sm:$0xff]  ;;  %v15922_v38 = vcombine.low %v6926_v53, %v6934_v6  ;;  %v7007_v61 = vld [vmem:[#allocation16 + $0x8b0] sm:$0xff] }
 0x531   :  { %10266 = vmatprep.subr.bf16.mxu1 %v16099_v20  ;;  %v16195_v20 = vcombine.high %v7198_v29, %v7206_v13  ;;  %v7015_v2 = vld [vmem:[#allocation16 + $0x8f0] sm:$0xff] }
 0x532   :  { %10226 = vmatpush1.bf16.msra.mxu0 %v15842_v23  ;;  %v15938_v23 = vcombine.low %v6942_v60, %v6950_v10  ;;  %v6767_v53 = vld [vmem:[#allocation16 + $0x130] sm:$0xff] }
 0x533   :  { %10227 = vmatprep.subr.bf16.mxu0 %v15859_v16  ;;  %v15955_v16 = vcombine.high %v6958_v32, %v6966_v39  ;;  %v6775_v6 = vld [vmem:[#allocation16 + $0x170] sm:$0xff] }
 0x534   :  { %10267 = vmatpush1.bf16.msra.mxu1 %v16098_v37  ;;  %v16194_v37 = vcombine.low %v7198_v29, %v7206_v13  ;;  %v7023_v58 = vld [vmem:[#allocation16 + $0x930] sm:$0xff] }
 0x535   :  { %10268 = vmatprep.subr.bf16.mxu1 %v16115_v44  ;;  %v16211_v44 = vcombine.high %v7214_v36, %v7222_v15  ;;  %v7031_v28 = vld [vmem:[#allocation16 + $0x970] sm:$0xff] }
 0x536   :  { %10228 = vmatpush1.bf16.msra.mxu0 %v15858_v19  ;;  %v15954_v19 = vcombine.low %v6958_v32, %v6966_v39  ;;  %v6783_v60 = vld [vmem:[#allocation16 + $0x1b0] sm:$0xff] }
 0x537   :  { %10229 = vmatprep.subr.bf16.mxu0 %v15875_v18  ;;  %v15971_v18 = vcombine.high %v6974_v47, %v6982_v30  ;;  %v6791_v10 = vld [vmem:[#allocation16 + $0x1f0] sm:$0xff] }
 0x538   :  { %10269 = vmatpush1.bf16.msra.mxu1 %v16114_v59  ;;  %v16210_v59 = vcombine.low %v7214_v36, %v7222_v15  ;;  %v7039_v29 = vld [vmem:[#allocation16 + $0x9b0] sm:$0xff] }
 0x539   :  { %10270 = vmatprep.subr.bf16.mxu1 %v16131_v45  ;;  %v16227_v45 = vcombine.high %v7230_v50, %v7238_v43  ;;  %v7047_v13 = vld [vmem:[#allocation16 + $0x9f0] sm:$0xff] }
 0x53a   :  { %10230 = vmatpush1.bf16.msra.mxu0 %v15874_v49  ;;  %v15970_v49 = vcombine.low %v6974_v47, %v6982_v30  ;;  %v6799_v32 = vld [vmem:[#allocation16 + $0x230] sm:$0xff] }
 0x53b   :  { %10231 = vmatprep.subr.bf16.mxu0 %v15891_v24  ;;  %v15733_v24 = vcombine.high %v6735_v48, %v6743_v5  ;;  %v6807_v39 = vld [vmem:[#allocation16 + $0x270] sm:$0xff] }
 0x53c   :  { %10271 = vmatpush1.bf16.msra.mxu1 %v16130_v0  ;;  %v16226_v0 = vcombine.low %v7230_v50, %v7238_v43  ;;  %v7055_v36 = vld [vmem:[#allocation16 + $0xa30] sm:$0xff] }
 0x53d   :  { %10272 = vmatprep.subr.bf16.mxu1 %v16147_v55  ;;  %v15989_v55 = vcombine.high %v6991_v56, %v6999_v63  ;;  %v7063_v15 = vld [vmem:[#allocation16 + $0xa70] sm:$0xff] }
 0x53e   :  { %10232 = vmatpush1.bf16.msra.mxu0 %v15890_v1  ;;  %v15732_v1 = vcombine.low %v6735_v48, %v6743_v5  ;;  %v6815_v47 = vld [vmem:[#allocation16 + $0x2b0] sm:$0xff] }
 0x53f   :  { %10233 = vmatprep.subr.bf16.mxu0 %v15907_v3  ;;  %v15749_v3 = vcombine.high %v6751_v62, %v6759_v14  ;;  %v6823_v30 = vld [vmem:[#allocation16 + $0x2f0] sm:$0xff] }
 0x540   :  { %10273 = vmatpush1.bf16.msra.mxu1 %v16146_v22  ;;  %v15988_v22 = vcombine.low %v6991_v56, %v6999_v63  ;;  %v7071_v50 = vld [vmem:[#allocation16 + $0xab0] sm:$0xff] }
 0x541   :  { %10274 = vmatprep.subr.bf16.mxu1 %v16163_v4  ;;  %v16005_v4 = vcombine.high %v7007_v61, %v7015_v2  ;;  %v7079_v43 = vld [vmem:[#allocation16 + $0xaf0] sm:$0xff] }
 0x542   :  { %10234 = vmatpush1.bf16.msra.mxu0 %v15906_v27  ;;  %v15748_v27 = vcombine.low %v6751_v62, %v6759_v14  ;;  %v6831_v48 = vld [vmem:[#allocation16 + $0x330] sm:$0xff] }
 0x543   :  { %10235 = vmatprep.subr.bf16.mxu0 %v15923_v41  ;;  %v15765_v41 = vcombine.high %v6767_v53, %v6775_v6  ;;  %v6839_v5 = vld [vmem:[#allocation16 + $0x370] sm:$0xff] }
 0x544   :  { %10275 = vmatpush1.bf16.msra.mxu1 %v16162_v7  ;;  %v16004_v7 = vcombine.low %v7007_v61, %v7015_v2  ;;  %v7087_v56 = vld [vmem:[#allocation16 + $0xb30] sm:$0xff] }
 0x545   :  { %10276 = vmatprep.subr.bf16.mxu1 %v16179_v9  ;;  %v16021_v9 = vcombine.high %v7023_v58, %v7031_v28  ;;  %v7095_v63 = vld [vmem:[#allocation16 + $0xb70] sm:$0xff] }
 0x546   :  { %10236 = vmatpush1.bf16.msra.mxu0 %v15922_v38  ;;  %v15764_v38 = vcombine.low %v6767_v53, %v6775_v6  ;;  %v16085_v62 = vcombine.high %v7087_v56, %v7095_v63  ;;  %v6847_v14 = vld [vmem:[#allocation16 + $0x3b0] sm:$0xff] }
 0x547   :  { %10237 = vmatprep.subr.bf16.mxu0 %v15939_v52  ;;  %v15781_v52 = vcombine.high %v6783_v60, %v6791_v10  ;;  %v6855_v61 = vld [vmem:[#allocation16 + $0x3f0] sm:$0xff] }
 0x548   :  { %10277 = vmatpush1.bf16.msra.mxu1 %v16178_v21  ;;  %v16020_v21 = vcombine.low %v7023_v58, %v7031_v28  ;;  %v15828_v58 = vcombine.low %v6831_v48, %v6839_v5 }
 0x549   :  { %10278 = vmatprep.subr.bf16.mxu1 %v16195_v20  ;;  %v16037_v20 = vcombine.high %v7039_v29, %v7047_v13 }
 0x54a   :  { %10238 = vmatpush1.bf16.msra.mxu0 %v15938_v23  ;;  %v15780_v23 = vcombine.low %v6783_v60, %v6791_v10 }
 0x54b   :  { %10239 = vmatprep.subr.bf16.mxu0 %v15955_v16  ;;  %v15797_v16 = vcombine.high %v6799_v32, %v6807_v39 }
 0x54c   :  { %10279 = vmatpush1.bf16.msra.mxu1 %v16194_v37  ;;  %v16036_v37 = vcombine.low %v7039_v29, %v7047_v13  ;;  %v6863_v29 = vld [vmem:[#allocation16 + $0x430] sm:$0xff] }
 0x54d   :  { %10280 = vmatprep.subr.bf16.mxu1 %v16211_v44  ;;  %v16053_v44 = vcombine.high %v7055_v36, %v7063_v15  ;;  %v6871_v13 = vld [vmem:[#allocation16 + $0x470] sm:$0xff] }
 0x54e   :  { %10240 = vmatpush1.bf16.msra.mxu0 %v15954_v19  ;;  %v15796_v19 = vcombine.low %v6799_v32, %v6807_v39  ;;  %v15861_v32 = vcombine.high %v6863_v29, %v6871_v13 }
 0x54f   :  { %10241 = vmatprep.subr.bf16.mxu0 %v15971_v18  ;;  %v15813_v18 = vcombine.high %v6815_v47, %v6823_v30 }
 0x550   :  { %10281 = vmatpush1.bf16.msra.mxu1 %v16210_v59  ;;  %v16052_v59 = vcombine.low %v7055_v36, %v7063_v15  ;;  %v6879_v36 = vld [vmem:[#allocation16 + $0x4b0] sm:$0xff] }
 0x551   :  { %10282 = vmatprep.subr.bf16.mxu1 %v16227_v45  ;;  %v16069_v45 = vcombine.high %v7071_v50, %v7079_v43  ;;  %v6887_v15 = vld [vmem:[#allocation16 + $0x4f0] sm:$0xff] }
 0x552   :  { %10242 = vmatpush1.bf16.msra.mxu0 %v15970_v49  ;;  %v15812_v49 = vcombine.low %v6815_v47, %v6823_v30  ;;  %v15877_v47 = vcombine.high %v6879_v36, %v6887_v15 }
 0x553   :  { %10293 = vmatprep.subr.bf16.mxu0 %v15733_v24  ;;  %v15829_v24 = vcombine.high %v6831_v48, %v6839_v5 }
 0x554   :  { %10283 = vmatpush1.bf16.msra.mxu1 %v16226_v0  ;;  %v16068_v0 = vcombine.low %v7071_v50, %v7079_v43  ;;  %v6895_v50 = vld [vmem:[#allocation16 + $0x530] sm:$0xff] }
 0x555   :  { %10334 = vmatprep.subr.bf16.mxu1 %v15989_v55  ;;  %10244 = vmatmul.mubr.bf16.vlgmr.msra.gmra.mrb[68].mxu0 %v18083_v40  ;;  %v6903_v43 = vld [vmem:[#allocation16 + $0x570] sm:$0xff] }
 0x556   :  { %10294 = vmatpush1.bf16.msra.mxu0 %v15732_v1  ;;  %10325 = vmatprep.mubr.bf16.mxu0 %v18063_v31  ;;  %v15893_v48 = vcombine.high %v6895_v50, %v6903_v43 }
 0x557   :  { %10285 = vmatmul.mubr.bf16.vlgmr.msra.gmra.mrb[68].mxu1 %v18085_v46  ;;  %10295 = vmatprep.subr.bf16.mxu0 %v15749_v3  ;;  %v7111_v3 = vld [vmem:[#allocation16 + $0xbf0] sm:$0xff] }
 0x558   :  { %10335 = vmatpush1.bf16.msra.mxu1 %v15988_v22  ;;  %10366 = vmatprep.mubr.bf16.mxu1 %v18066_v54  ;;  %v7103_v22 = vld [vmem:[#allocation16 + $0xbb0] sm:$0xff] }
 0x559   :  { %10336 = vmatprep.subr.bf16.mxu1 %v16005_v4  ;;  %v16101_v10 = vcombine.high %v7103_v22, %v7111_v3 }
 0x55a   :  { %10296 = vmatpush1.bf16.msra.mxu0 %v15748_v27 }
 0x55b   :  { %10297 = vmatprep.subr.bf16.mxu0 %v15765_v41  ;;  %v16084_v41 = vcombine.low %v7087_v56, %v7095_v63  ;;  %v6911_v56 = vld [vmem:[#allocation16 + $0x5b0] sm:$0xff] }
 0x55c   :  { %10337 = vmatpush1.bf16.msra.mxu1 %v16004_v7  ;;  %v6919_v63 = vld [vmem:[#allocation16 + $0x5f0] sm:$0xff] }
 0x55d   :  { %10338 = vmatprep.subr.bf16.mxu1 %v16021_v9  ;;  %v15845_v9 = vcombine.high %v6847_v14, %v6855_v61 }
 0x55e   :  { %10298 = vmatpush1.bf16.msra.mxu0 %v15764_v38  ;;  %v7119_v38 = vld [vmem:[#allocation16 + $0xc30] sm:$0xff] }
 0x55f   :  { %10299 = vmatprep.subr.bf16.mxu0 %v15781_v52  ;;  %v15844_v52 = vcombine.low %v6847_v14, %v6855_v61  ;;  %v6927_v61 = vld [vmem:[#allocation16 + $0x630] sm:$0xff] }
 0x560   :  { %10339 = vmatpush1.bf16.msra.mxu1 %v16020_v21  ;;  %v7127_v21 = vld [vmem:[#allocation16 + $0xc70] sm:$0xff] }
 0x561   :  { %10340 = vmatprep.subr.bf16.mxu1 %v16037_v20  ;;  %v16100_v20 = vcombine.low %v7103_v22, %v7111_v3  ;;  %v16117_v39 = vcombine.high %v7119_v38, %v7127_v21  ;;  %v7191_v22 = vld [vmem:[#allocation16 + $0xe70] sm:$0xff]  ;;  %v15908_v3 = vcombine.low %v6911_v56, %v6919_v63 }
 0x562   :  { %10300 = vmatpush1.bf16.msra.mxu0 %v15780_v23  ;;  %v7135_v23 = vld [vmem:[#allocation16 + $0xcb0] sm:$0xff] }
 0x563   :  { %10301 = vmatprep.subr.bf16.mxu0 %v15797_v16  ;;  %v15860_v16 = vcombine.low %v6863_v29, %v6871_v13 }
 0x564   :  { %10341 = vmatpush1.bf16.msra.mxu1 %v16036_v37  ;;  %v7143_v37 = vld [vmem:[#allocation16 + $0xcf0] sm:$0xff] }
 0x565   :  { %10342 = vmatprep.subr.bf16.mxu1 %v16053_v44  ;;  %v16116_v44 = vcombine.low %v7119_v38, %v7127_v21  ;;  %v16133_v30 = vcombine.high %v7135_v23, %v7143_v37  ;;  %v6959_v38 = vld [vmem:[#allocation16 + $0x730] sm:$0xff] }
 0x566   :  { %10302 = vmatpush1.bf16.msra.mxu0 %v15796_v19  ;;  %v7151_v19 = vld [vmem:[#allocation16 + $0xd30] sm:$0xff] }
 0x567   :  { %10303 = vmatprep.subr.bf16.mxu0 %v15813_v18  ;;  %v15876_v18 = vcombine.low %v6879_v36, %v6887_v15  ;;  %v6967_v21 = vld [vmem:[#allocation16 + $0x770] sm:$0xff] }
 0x568   :  { %10343 = vmatpush1.bf16.msra.mxu1 %v16052_v59  ;;  %v9999_v55 = vpop.f32.mrb[56].mxu0  ;;  %v7159_v59 = vld [vmem:[#allocation16 + $0xd70] sm:$0xff]  ;;  %v15957_v36 = vcombine.high %v6959_v38, %v6967_v21 }
 0x569   :  { %10344 = vmatprep.subr.bf16.mxu1 %v16069_v45  ;;  %v10001_v1 = vpop.f32.mrb[57].mxu0  ;;  %v16132_v45 = vcombine.low %v7135_v23, %v7143_v37  ;;  %v16149_v5 = vcombine.high %v7151_v19, %v7159_v59  ;;  %v6975_v23 = vld [vmem:[#allocation16 + $0x7b0] sm:$0xff] }
 0x56a   :  { %v10040_v2 = vpop.f32.mrb[56].mxu1  ;;  %v10003_v6 = vpop.f32.mrb[58].mxu0  ;;  %10304 = vmatpush1.bf16.msra.mxu0 %v15812_v49  ;;  %v7167_v49 = vld [vmem:[#allocation16 + $0xdb0] sm:$0xff] }
 0x56b   :  { %v18225_v4 = vadd.f32 %v10040_v2, %v9999_v55  ;;  %v10042_v53 = vpop.f32.mrb[57].mxu1  ;;  %v10004_v7 = vpop.f32.mrb[59].mxu0  ;;  %10305 = vmatprep.subr.bf16.mxu0 %v15829_v24  ;;  %v15892_v24 = vcombine.low %v6895_v50, %v6903_v43  ;;  %v16148_v55 = vcombine.low %v7151_v19, %v7159_v59  ;;  %v6935_v2 = vld [vmem:[#allocation16 + $0x670] sm:$0xff]  ;;  %v6736_v19 = vld [vmem:[#allocation16 + $0x38] sm:$0xff] }
 0x56c   :  { %v18227_v28 = vadd.f32 %v10042_v53, %v10001_v1  ;;  %v10044_v27 = vpop.f32.mrb[58].mxu1  ;;  %10345 = vmatpush1.bf16.msra.mxu1 %v16068_v0  ;;  %v7175_v0 = vld [vmem:[#allocation16 + $0xdf0] sm:$0xff]  ;;  %v15925_v6 = vcombine.high %v6927_v61, %v6935_v2  ;;  %v6744_v59 = vld [vmem:[#allocation16 + $0x78] sm:$0xff] }
 0x56d   :  { %v10045_v60 = vpop.f32.mrb[59].mxu1  ;;  %10346 = vmatprep.subr.bf16.mxu1 %v16085_v62  ;;  %v15909_v62 = vcombine.high %v6911_v56, %v6919_v63  ;;  %v16165_v14 = vcombine.high %v7167_v49, %v7175_v0  ;;  %v7183_v1 = vld [vmem:[#allocation16 + $0xe30] sm:$0xff]  ;;  %v16164_v53 = vcombine.low %v7167_v49, %v7175_v0  ;;  %v15735_v56 = vcombine.high %v6736_v19, %v6744_v59  ;;  %v6752_v49 = vld [vmem:[#allocation16 + $0xb8] sm:$0xff] }
 0x56e   :  { %10306 = vmatpush1.bf16.msra.mxu0 %v15828_v58  ;;  %v16181_v58 = vcombine.high %v7183_v1, %v7191_v22  ;;  %v6943_v27 = vld [vmem:[#allocation16 + $0x6b0] sm:$0xff]  ;;  %v15924_v60 = vcombine.low %v6927_v61, %v6935_v2  ;;  %v6760_v0 = vld [vmem:[#allocation16 + $0xf8] sm:$0xff] }
 0x56f   :  { %10307 = vmatprep.subr.bf16.mxu0 %v15845_v9  ;;  %v6951_v7 = vld [vmem:[#allocation16 + $0x6f0] sm:$0xff]  ;;  %v15751_v61 = vcombine.high %v6752_v49, %v6760_v0 }
 0x570   :  { %10347 = vmatpush1.bf16.msra.mxu1 %v16084_v41  ;;  %v7199_v41 = vld [vmem:[#allocation16 + $0xeb0] sm:$0xff]  ;;  %v15941_v29 = vcombine.high %v6943_v27, %v6951_v7 }
 0x571   :  { %10348 = vmatprep.subr.bf16.mxu1 %v16101_v10  ;;  %v7207_v9 = vld [vmem:[#allocation16 + $0xef0] sm:$0xff]  ;;  %v16180_v10 = vcombine.low %v7183_v1, %v7191_v22  ;;  %v6768_v1 = vld [vmem:[#allocation16 + $0x138] sm:$0xff] }
 0x572   :  { %10308 = vmatpush1.bf16.msra.mxu0 %v15844_v52  ;;  %v16197_v13 = vcombine.high %v7199_v41, %v7207_v9  ;;  %v7215_v52 = vld [vmem:[#allocation16 + $0xf30] sm:$0xff]  ;;  %v6776_v22 = vld [vmem:[#allocation16 + $0x178] sm:$0xff] }
 0x573   :  { %10309 = vmatprep.subr.bf16.mxu0 %v15861_v32  ;;  %v15940_v32 = vcombine.low %v6943_v27, %v6951_v7  ;;  %v6983_v37 = vld [vmem:[#allocation16 + $0x7f0] sm:$0xff]  ;;  %v15767_v27 = vcombine.high %v6768_v1, %v6776_v22 }
 0x574   :  { %10349 = vmatpush1.bf16.msra.mxu1 %v16100_v20  ;;  %v7223_v20 = vld [vmem:[#allocation16 + $0xf70] sm:$0xff]  ;;  %v15973_v50 = vcombine.high %v6975_v23, %v6983_v37 }
 0x575   :  { %10350 = vmatprep.subr.bf16.mxu1 %v16117_v39  ;;  %v16196_v39 = vcombine.low %v7199_v41, %v7207_v9  ;;  %v16213_v15 = vcombine.high %v7215_v52, %v7223_v20  ;;  %v6784_v41 = vld [vmem:[#allocation16 + $0x1b8] sm:$0xff] }
 0x576   :  { %10310 = vmatpush1.bf16.msra.mxu0 %v15860_v16  ;;  %v7231_v16 = vld [vmem:[#allocation16 + $0xfb0] sm:$0xff]  ;;  %v6792_v9 = vld [vmem:[#allocation16 + $0x1f8] sm:$0xff] }
 0x577   :  { %10311 = vmatprep.subr.bf16.mxu0 %v15877_v47  ;;  %v15956_v47 = vcombine.low %v6959_v38, %v6967_v21  ;;  %v15783_v38 = vcombine.high %v6784_v41, %v6792_v9 }
 0x578   :  { %10351 = vmatpush1.bf16.msra.mxu1 %v16116_v44  ;;  %v7239_v44 = vld [vmem:[#allocation16 + $0xff0] sm:$0xff] }
 0x579   :  { %10352 = vmatprep.subr.bf16.mxu1 %v16133_v30  ;;  %v16212_v30 = vcombine.low %v7215_v52, %v7223_v20  ;;  %v16229_v43 = vcombine.high %v7231_v16, %v7239_v44  ;;  %v6800_v52 = vld [vmem:[#allocation16 + $0x238] sm:$0xff] }
 0x57a   :  { %10312 = vmatpush1.bf16.msra.mxu0 %v15876_v18  ;;  %v6992_v18 = vld [vmem:[#allocation16 + $0x838] sm:$0xff] }
 0x57b   :  { %10313 = vmatprep.subr.bf16.mxu0 %v15893_v48  ;;  %v15972_v48 = vcombine.low %v6975_v23, %v6983_v37  ;;  %v6808_v20 = vld [vmem:[#allocation16 + $0x278] sm:$0xff] }
 0x57c   :  { %10353 = vmatpush1.bf16.msra.mxu1 %v16132_v45  ;;  %v7000_v45 = vld [vmem:[#allocation16 + $0x878] sm:$0xff] }
 0x57d   :  { %10354 = vmatprep.subr.bf16.mxu1 %v16149_v5  ;;  %v16228_v5 = vcombine.low %v7231_v16, %v7239_v44  ;;  %v15991_v63 = vcombine.high %v6992_v18, %v7000_v45  ;;  %v6816_v23 = vld [vmem:[#allocation16 + $0x2b8] sm:$0xff] }
 0x57e   :  { %10314 = vmatpush1.bf16.msra.mxu0 %v15892_v24  ;;  %v7008_v24 = vld [vmem:[#allocation16 + $0x8b8] sm:$0xff] }
 0x57f   :  { %10315 = vmatprep.subr.bf16.mxu0 %v15909_v62  ;;  %v15734_v62 = vcombine.low %v6736_v19, %v6744_v59  ;;  %v6824_v37 = vld [vmem:[#allocation16 + $0x2f8] sm:$0xff] }
 0x580   :  { %10355 = vmatpush1.bf16.msra.mxu1 %v16148_v55  ;;  %v7016_v55 = vld [vmem:[#allocation16 + $0x8f8] sm:$0xff] }
 0x581   :  { %10356 = vmatprep.subr.bf16.mxu1 %v16165_v14  ;;  %v15990_v14 = vcombine.low %v6992_v18, %v7000_v45  ;;  %v16007_v2 = vcombine.high %v7008_v24, %v7016_v55  ;;  %v7072_v16 = vld [vmem:[#allocation16 + $0xab8] sm:$0xff] }
 0x582   :  { %10316 = vmatpush1.bf16.msra.mxu0 %v15908_v3  ;;  %v7024_v3 = vld [vmem:[#allocation16 + $0x938] sm:$0xff] }
 0x583   :  { %10317 = vmatprep.subr.bf16.mxu0 %v15925_v6  ;;  %v15750_v6 = vcombine.low %v6752_v49, %v6760_v0  ;;  %v7080_v44 = vld [vmem:[#allocation16 + $0xaf8] sm:$0xff] }
 0x584   :  { %10357 = vmatpush1.bf16.msra.mxu1 %v16164_v53  ;;  %v7032_v53 = vld [vmem:[#allocation16 + $0x978] sm:$0xff] }
 0x585   :  { %10358 = vmatprep.subr.bf16.mxu1 %v16181_v58  ;;  %v16006_v58 = vcombine.low %v7008_v24, %v7016_v55  ;;  %v16023_v7 = vcombine.high %v7024_v3, %v7032_v53  ;;  %v6832_v19 = vld [vmem:[#allocation16 + $0x338] sm:$0xff] }
 0x586   :  { %10318 = vmatpush1.bf16.msra.mxu0 %v15924_v60  ;;  %v7040_v60 = vld [vmem:[#allocation16 + $0x9b8] sm:$0xff] }
 0x587   :  { %10319 = vmatprep.subr.bf16.mxu0 %v15941_v29  ;;  %v15766_v29 = vcombine.low %v6768_v1, %v6776_v22  ;;  %v6840_v59 = vld [vmem:[#allocation16 + $0x378] sm:$0xff] }
 0x588   :  { %10359 = vmatpush1.bf16.msra.mxu1 %v16180_v10  ;;  %v7048_v10 = vld [vmem:[#allocation16 + $0x9f8] sm:$0xff] }
 0x589   :  { %10360 = vmatprep.subr.bf16.mxu1 %v16197_v13  ;;  %v16022_v13 = vcombine.low %v7024_v3, %v7032_v53  ;;  %v16039_v21 = vcombine.high %v7040_v60, %v7048_v10  ;;  %v7088_v18 = vld [vmem:[#allocation16 + $0xb38] sm:$0xff]  ;;  %v15830_v3 = vcombine.low %v6832_v19, %v6840_v59 }
 0x58a   :  { %10320 = vmatpush1.bf16.msra.mxu0 %v15940_v32  ;;  %v7056_v32 = vld [vmem:[#allocation16 + $0xa38] sm:$0xff] }
 0x58b   :  { %10321 = vmatprep.subr.bf16.mxu0 %v15957_v36  ;;  %v15782_v36 = vcombine.low %v6784_v41, %v6792_v9  ;;  %v7096_v45 = vld [vmem:[#allocation16 + $0xb78] sm:$0xff] }
 0x58c   :  { %10361 = vmatpush1.bf16.msra.mxu1 %v16196_v39  ;;  %v7064_v39 = vld [vmem:[#allocation16 + $0xa78] sm:$0xff]  ;;  %v16087_v49 = vcombine.high %v7088_v18, %v7096_v45 }
 0x58d   :  { %10362 = vmatprep.subr.bf16.mxu1 %v16213_v15  ;;  %v15799_v15 = vcombine.high %v6800_v52, %v6808_v20  ;;  %v6848_v0 = vld [vmem:[#allocation16 + $0x3b8] sm:$0xff] }
 0x58e   :  { %10322 = vmatpush1.bf16.msra.mxu0 %v15956_v47  ;;  %v15798_v47 = vcombine.low %v6800_v52, %v6808_v20  ;;  %v6856_v24 = vld [vmem:[#allocation16 + $0x3f8] sm:$0xff] }
 0x58f   :  { %10323 = vmatprep.subr.bf16.mxu0 %v15973_v50  ;;  %v15815_v50 = vcombine.high %v6816_v23, %v6824_v37 }
 0x590   :  { %10363 = vmatpush1.bf16.msra.mxu1 %v16212_v30  ;;  %v16054_v30 = vcombine.low %v7056_v32, %v7064_v39 }
 0x591   :  { %10364 = vmatprep.subr.bf16.mxu1 %v16229_v43  ;;  %v16071_v43 = vcombine.high %v7072_v16, %v7080_v44 }
 0x592   :  { %10324 = vmatpush1.bf16.msra.mxu0 %v15972_v48  ;;  %v15814_v48 = vcombine.low %v6816_v23, %v6824_v37 }
 0x593   :  { %10375 = vmatprep.subr.bf16.mxu0 %v15735_v56  ;;  %v15831_v56 = vcombine.high %v6832_v19, %v6840_v59 }
 0x594   :  { %10365 = vmatpush1.bf16.msra.mxu1 %v16228_v5  ;;  %v16070_v5 = vcombine.low %v7072_v16, %v7080_v44  ;;  %v6896_v16 = vld [vmem:[#allocation16 + $0x538] sm:$0xff] }
 0x595   :  { %10416 = vmatprep.subr.bf16.mxu1 %v15991_v63  ;;  %10326 = vmatmul.mubr.bf16.vlgmr.msra.gmra.mrb[72].mxu0 %v18083_v40  ;;  %v6904_v44 = vld [vmem:[#allocation16 + $0x578] sm:$0xff] }
 0x596   :  { %10376 = vmatpush1.bf16.msra.mxu0 %v15734_v62  ;;  %10407 = vmatprep.mubr.bf16.mxu0 %v18063_v31  ;;  %v16038_v31 = vcombine.low %v7040_v60, %v7048_v10  ;;  %v6864_v60 = vld [vmem:[#allocation16 + $0x438] sm:$0xff]  ;;  %v15895_v19 = vcombine.high %v6896_v16, %v6904_v44 }
 0x597   :  { %10367 = vmatmul.mubr.bf16.vlgmr.msra.gmra.mrb[72].mxu1 %v18085_v46  ;;  %10377 = vmatprep.subr.bf16.mxu0 %v15751_v61  ;;  %v7112_v61 = vld [vmem:[#allocation16 + $0xbf8] sm:$0xff] }
 0x598   :  { %10417 = vmatpush1.bf16.msra.mxu1 %v15990_v14  ;;  %10448 = vmatprep.mubr.bf16.mxu1 %v18066_v54  ;;  %v16055_v54 = vcombine.high %v7056_v32, %v7064_v39  ;;  %v7104_v14 = vld [vmem:[#allocation16 + $0xbb8] sm:$0xff] }
 0x599   :  { %10418 = vmatprep.subr.bf16.mxu1 %v16007_v2  ;;  %v16103_v9 = vcombine.high %v7104_v14, %v7112_v61  ;;  %v6872_v10 = vld [vmem:[#allocation16 + $0x478] sm:$0xff] }
 0x59a   :  { %10378 = vmatpush1.bf16.msra.mxu0 %v15750_v6  ;;  %v15863_v52 = vcombine.high %v6864_v60, %v6872_v10  ;;  %v6880_v32 = vld [vmem:[#allocation16 + $0x4b8] sm:$0xff] }
 0x59b   :  { %10379 = vmatprep.subr.bf16.mxu0 %v15767_v27  ;;  %v16086_v27 = vcombine.low %v7088_v18, %v7096_v45  ;;  %v6888_v39 = vld [vmem:[#allocation16 + $0x4f8] sm:$0xff] }
 0x59c   :  { %10419 = vmatpush1.bf16.msra.mxu1 %v16006_v58  ;;  %v15879_v23 = vcombine.high %v6880_v32, %v6888_v39  ;;  %v6912_v18 = vld [vmem:[#allocation16 + $0x5b8] sm:$0xff] }
 0x59d   :  { %10420 = vmatprep.subr.bf16.mxu1 %v16023_v7  ;;  %v15847_v7 = vcombine.high %v6848_v0, %v6856_v24  ;;  %v6920_v45 = vld [vmem:[#allocation16 + $0x5f8] sm:$0xff] }
 0x59e   :  { %10380 = vmatpush1.bf16.msra.mxu0 %v15766_v29  ;;  %v7120_v29 = vld [vmem:[#allocation16 + $0xc38] sm:$0xff] }
 0x59f   :  { %10381 = vmatprep.subr.bf16.mxu0 %v15783_v38  ;;  %v15846_v38 = vcombine.low %v6848_v0, %v6856_v24  ;;  %v6928_v24 = vld [vmem:[#allocation16 + $0x638] sm:$0xff] }
 0x5a0   :  { %10421 = vmatpush1.bf16.msra.mxu1 %v16022_v13  ;;  %v7128_v13 = vld [vmem:[#allocation16 + $0xc78] sm:$0xff] }
 0x5a1   :  { %10422 = vmatprep.subr.bf16.mxu1 %v16039_v21  ;;  %v16102_v21 = vcombine.low %v7104_v14, %v7112_v61  ;;  %v16119_v20 = vcombine.high %v7120_v29, %v7128_v13  ;;  %v7192_v14 = vld [vmem:[#allocation16 + $0xe78] sm:$0xff]  ;;  %v15910_v61 = vcombine.low %v6912_v18, %v6920_v45 }
 0x5a2   :  { %10382 = vmatpush1.bf16.msra.mxu0 %v15782_v36  ;;  %v7136_v36 = vld [vmem:[#allocation16 + $0xcb8] sm:$0xff] }
 0x5a3   :  { %10383 = vmatprep.subr.bf16.mxu0 %v15799_v15  ;;  %v15862_v15 = vcombine.low %v6864_v60, %v6872_v10 }
 0x5a4   :  { %10423 = vmatpush1.bf16.msra.mxu1 %v16038_v31  ;;  %v7144_v31 = vld [vmem:[#allocation16 + $0xcf8] sm:$0xff] }
 0x5a5   :  { %10424 = vmatprep.subr.bf16.mxu1 %v16055_v54  ;;  %v16118_v54 = vcombine.low %v7120_v29, %v7128_v13  ;;  %v16135_v37 = vcombine.high %v7136_v36, %v7144_v31  ;;  %v6960_v29 = vld [vmem:[#allocation16 + $0x738] sm:$0xff] }
 0x5a6   :  { %10384 = vmatpush1.bf16.msra.mxu0 %v15798_v47  ;;  %v7152_v47 = vld [vmem:[#allocation16 + $0xd38] sm:$0xff] }
 0x5a7   :  { %10385 = vmatprep.subr.bf16.mxu0 %v15815_v50  ;;  %v15878_v50 = vcombine.low %v6880_v32, %v6888_v39  ;;  %v6968_v13 = vld [vmem:[#allocation16 + $0x778] sm:$0xff] }
 0x5a8   :  { %10425 = vmatpush1.bf16.msra.mxu1 %v16054_v30  ;;  %v10081_v63 = vpop.f32.mrb[60].mxu0  ;;  %v7160_v30 = vld [vmem:[#allocation16 + $0xd78] sm:$0xff]  ;;  %v15959_v32 = vcombine.high %v6960_v29, %v6968_v13 }
 0x5a9   :  { %10426 = vmatprep.subr.bf16.mxu1 %v16071_v43  ;;  %v10083_v62 = vpop.f32.mrb[61].mxu0  ;;  %v16134_v43 = vcombine.low %v7136_v36, %v7144_v31  ;;  %v16151_v59 = vcombine.high %v7152_v47, %v7160_v30  ;;  %v6976_v36 = vld [vmem:[#allocation16 + $0x7b8] sm:$0xff] }
 0x5aa   :  { %v10122_v55 = vpop.f32.mrb[60].mxu1  ;;  %v10085_v22 = vpop.f32.mrb[62].mxu0  ;;  %10386 = vmatpush1.bf16.msra.mxu0 %v15814_v48  ;;  %v7168_v48 = vld [vmem:[#allocation16 + $0xdb8] sm:$0xff] }
 0x5ab   :  { %v18233_v2 = vadd.f32 %v10122_v55, %v10081_v63  ;;  %v10124_v1 = vpop.f32.mrb[61].mxu1  ;;  %v10086_v58 = vpop.f32.mrb[63].mxu0  ;;  %10387 = vmatprep.subr.bf16.mxu0 %v15831_v56  ;;  %v15894_v56 = vcombine.low %v6896_v16, %v6904_v44  ;;  %v16150_v63 = vcombine.low %v7152_v47, %v7160_v30  ;;  %v6936_v55 = vld [vmem:[#allocation16 + $0x678] sm:$0xff]  ;;  %v6213_v47 = vld [vmem:[#allocation15] sm:$0xff] }
 0x5ac   :  { %v18235_v53 = vadd.f32 %v10124_v1, %v10083_v62  ;;  %v10126_v6 = vpop.f32.mrb[62].mxu1  ;;  %10427 = vmatpush1.bf16.msra.mxu1 %v16070_v5  ;;  %v7176_v5 = vld [vmem:[#allocation16 + $0xdf8] sm:$0xff]  ;;  %v15927_v22 = vcombine.high %v6928_v24, %v6936_v55  ;;  %v6221_v30 = vld [vmem:[#allocation15 + $0x40] sm:$0xff] }
 0x5ad   :  { %v10127_v41 = vpop.f32.mrb[63].mxu1  ;;  %10428 = vmatprep.subr.bf16.mxu1 %v16087_v49  ;;  %v15911_v49 = vcombine.high %v6912_v18, %v6920_v45  ;;  %v16167_v0 = vcombine.high %v7168_v48, %v7176_v5  ;;  %v7184_v62 = vld [vmem:[#allocation16 + $0xe38] sm:$0xff]  ;;  %v16166_v1 = vcombine.low %v7168_v48, %v7176_v5  ;;  %v16233_v18 = vcombine.high %v6213_v47, %v6221_v30  ;;  %v6229_v48 = vld [vmem:[#allocation15 + $0x80] sm:$0xff] }
 0x5ae   :  { %10388 = vmatpush1.bf16.msra.mxu0 %v15830_v3  ;;  %v16183_v3 = vcombine.high %v7184_v62, %v7192_v14  ;;  %v6944_v6 = vld [vmem:[#allocation16 + $0x6b8] sm:$0xff]  ;;  %v15926_v41 = vcombine.low %v6928_v24, %v6936_v55  ;;  %v6237_v5 = vld [vmem:[#allocation15 + $0xc0] sm:$0xff] }
 0x5af   :  { %10389 = vmatprep.subr.bf16.mxu0 %v15847_v7  ;;  %v6952_v58 = vld [vmem:[#allocation16 + $0x6f8] sm:$0xff]  ;;  %v16249_v24 = vcombine.high %v6229_v48, %v6237_v5  ;;  %v6245_v55 = vld [vmem:[#allocation15 + $0x100] sm:$0xff] }
 0x5b0   :  { %10429 = vmatpush1.bf16.msra.mxu1 %v16086_v27  ;;  %v7200_v27 = vld [vmem:[#allocation16 + $0xeb8] sm:$0xff]  ;;  %v15943_v60 = vcombine.high %v6944_v6, %v6952_v58 }
 0x5b1   :  { %10430 = vmatprep.subr.bf16.mxu1 %v16103_v9  ;;  %v7208_v7 = vld [vmem:[#allocation16 + $0xef8] sm:$0xff]  ;;  %v16182_v9 = vcombine.low %v7184_v62, %v7192_v14  ;;  %v6253_v62 = vld [vmem:[#allocation15 + $0x140] sm:$0xff] }
 0x5b2   :  { %10390 = vmatpush1.bf16.msra.mxu0 %v15846_v38  ;;  %v16199_v10 = vcombine.high %v7200_v27, %v7208_v7  ;;  %v7216_v38 = vld [vmem:[#allocation16 + $0xf38] sm:$0xff] }
 0x5b3   :  { %10391 = vmatprep.subr.bf16.mxu0 %v15863_v52  ;;  %v15942_v52 = vcombine.low %v6944_v6, %v6952_v58  ;;  %v6984_v31 = vld [vmem:[#allocation16 + $0x7f8] sm:$0xff]  ;;  %v17246_v6 = vld [vmem:[#allocation23 + $0x18] sm:$0xff] }
 0x5b4   :  { %10431 = vmatpush1.bf16.msra.mxu1 %v16102_v21  ;;  %v7224_v21 = vld [vmem:[#allocation16 + $0xf78] sm:$0xff]  ;;  %v15975_v16 = vcombine.high %v6976_v36, %v6984_v31  ;;  %v18240_v58 = vpack.c.bf16 %v17246_v6, %v17246_v6 }
 0x5b5   :  { %10432 = vmatprep.subr.bf16.mxu1 %v16119_v20  ;;  %v16198_v20 = vcombine.low %v7200_v27, %v7208_v7  ;;  %v16215_v39 = vcombine.high %v7216_v38, %v7224_v21  ;;  %v17245_v14 = vld [vmem:[#allocation23 + $0x8] sm:$0xff]  ;;  %v16248_v27 = vcombine.low %v6229_v48, %v6237_v5 }
 0x5b6   :  { %10392 = vmatpush1.bf16.msra.mxu0 %v15862_v15  ;;  %v7232_v15 = vld [vmem:[#allocation16 + $0xfb8] sm:$0xff] }
 0x5b7   :  { %10393 = vmatprep.subr.bf16.mxu0 %v15879_v23  ;;  %v15958_v23 = vcombine.low %v6960_v29, %v6968_v13  ;;  %v6525_v29 = vld [vmem:[#allocation15 + $0x9c0] sm:$0xff]  ;;  %v16264_v13 = vcombine.low %v6245_v55, %v6253_v62 }
 0x5b8   :  { %10433 = vmatpush1.bf16.msra.mxu1 %v16118_v54  ;;  %v7240_v54 = vld [vmem:[#allocation16 + $0xff8] sm:$0xff] }
 0x5b9   :  { %10434 = vmatprep.subr.bf16.mxu1 %v16135_v37  ;;  %v16214_v37 = vcombine.low %v7216_v38, %v7224_v21  ;;  %v16231_v44 = vcombine.high %v7232_v15, %v7240_v54 }
 0x5ba   :  { %10394 = vmatpush1.bf16.msra.mxu0 %v15878_v50  ;;  %v6469_v50 = vld [vmem:[#allocation15 + $0x800] sm:$0xff] }
 0x5bb   :  { %10395 = vmatprep.subr.bf16.mxu0 %v15895_v19  ;;  %v15974_v19 = vcombine.low %v6976_v36, %v6984_v31 }
 0x5bc   :  { %10435 = vmatpush1.bf16.msra.mxu1 %v16134_v43  ;;  %v6477_v43 = vld [vmem:[#allocation15 + $0x840] sm:$0xff] }
 0x5bd   :  { %10436 = vmatprep.subr.bf16.mxu1 %v16151_v59  ;;  %v16230_v59 = vcombine.low %v7232_v15, %v7240_v54  ;;  %v16489_v45 = vcombine.high %v6469_v50, %v6477_v43 }
 0x5be   :  { %10396 = vmatpush1.bf16.msra.mxu0 %v15894_v56  ;;  %v16232_v56 = vcombine.low %v6213_v47, %v6221_v30 }
 0x5bf   :  { %10397 = vmatprep.subr.bf16.mxu0 %v15911_v49  ;;  %v6493_v49 = vld [vmem:[#allocation15 + $0x8c0] sm:$0xff] }
 0x5c0   :  { %10437 = vmatpush1.bf16.msra.mxu1 %v16150_v63  ;;  %v6485_v63 = vld [vmem:[#allocation15 + $0x880] sm:$0xff] }
 0x5c1   :  { %10438 = vmatprep.subr.bf16.mxu1 %v16167_v0  ;;  %v16488_v0 = vcombine.low %v6469_v50, %v6477_v43  ;;  %v16504_v7 = vcombine.low %v6485_v63, %v6493_v49 }
 0x5c2   :  { %10398 = vmatpush1.bf16.msra.mxu0 %v15910_v61  ;;  %v18237_v61 = vpack.c.bf16 %v17245_v14, %v17245_v14  ;;  %v6581_v14 = vld [vmem:[#allocation15 + $0xb80] sm:$0xff] }
 0x5c3   :  { %10399 = vmatprep.subr.bf16.mxu0 %v15927_v22  ;;  %v6501_v22 = vld [vmem:[#allocation15 + $0x900] sm:$0xff] }
 0x5c4   :  { %10439 = vmatpush1.bf16.msra.mxu1 %v16166_v1  ;;  %v16505_v1 = vcombine.high %v6485_v63, %v6493_v49 }
 0x5c5   :  { %10440 = vmatprep.subr.bf16.mxu1 %v16183_v3  ;;  %v6509_v3 = vld [vmem:[#allocation15 + $0x940] sm:$0xff] }
 0x5c6   :  { %10400 = vmatpush1.bf16.msra.mxu0 %v15926_v41  ;;  %v16265_v41 = vcombine.high %v6245_v55, %v6253_v62 }
 0x5c7   :  { %10401 = vmatprep.subr.bf16.mxu0 %v15943_v60  ;;  %v6269_v60 = vld [vmem:[#allocation15 + $0x1c0] sm:$0xff] }
 0x5c8   :  { %10441 = vmatpush1.bf16.msra.mxu1 %v16182_v9  ;;  %v16521_v9 = vcombine.high %v6501_v22, %v6509_v3 }
 0x5c9   :  { %10442 = vmatprep.subr.bf16.mxu1 %v16199_v10  ;;  %v6517_v10 = vld [vmem:[#allocation15 + $0x980] sm:$0xff] }
 0x5ca   :  { %10402 = vmatpush1.bf16.msra.mxu0 %v15942_v52  ;;  %v16537_v21 = vcombine.high %v6517_v10, %v6525_v29  ;;  %v6277_v52 = vld [vmem:[#allocation15 + $0x200] sm:$0xff]  ;;  %v16536_v31 = vcombine.low %v6517_v10, %v6525_v29 }
 0x5cb   :  { %10403 = vmatprep.subr.bf16.mxu0 %v15959_v32  ;;  %v6533_v32 = vld [vmem:[#allocation15 + $0xa00] sm:$0xff] }
 0x5cc   :  { %10443 = vmatpush1.bf16.msra.mxu1 %v16198_v20  ;;  %v6285_v20 = vld [vmem:[#allocation15 + $0x240] sm:$0xff] }
 0x5cd   :  { %10444 = vmatprep.subr.bf16.mxu1 %v16215_v39  ;;  %v6541_v39 = vld [vmem:[#allocation15 + $0xa40] sm:$0xff]  ;;  %v16297_v15 = vcombine.high %v6277_v52, %v6285_v20  ;;  %v16296_v47 = vcombine.low %v6277_v52, %v6285_v20 }
 0x5ce   :  { %10404 = vmatpush1.bf16.msra.mxu0 %v15958_v23  ;;  %v16553_v54 = vcombine.high %v6533_v32, %v6541_v39  ;;  %v6293_v23 = vld [vmem:[#allocation15 + $0x280] sm:$0xff]  ;;  %v16552_v30 = vcombine.low %v6533_v32, %v6541_v39 }
 0x5cf   :  { %10405 = vmatprep.subr.bf16.mxu0 %v15975_v16  ;;  %v6549_v16 = vld [vmem:[#allocation15 + $0xa80] sm:$0xff] }
 0x5d0   :  { %10445 = vmatpush1.bf16.msra.mxu1 %v16214_v37  ;;  %v6301_v37 = vld [vmem:[#allocation15 + $0x2c0] sm:$0xff] }
 0x5d1   :  { %10446 = vmatprep.subr.bf16.mxu1 %v16231_v44  ;;  %v6557_v44 = vld [vmem:[#allocation15 + $0xac0] sm:$0xff]  ;;  %v16313_v50 = vcombine.high %v6293_v23, %v6301_v37  ;;  %v16312_v48 = vcombine.low %v6293_v23, %v6301_v37 }
 0x5d2   :  { %10406 = vmatpush1.bf16.msra.mxu0 %v15974_v19  ;;  %v16569_v43 = vcombine.high %v6549_v16, %v6557_v44  ;;  %v6309_v19 = vld [vmem:[#allocation15 + $0x300] sm:$0xff]  ;;  %v16568_v5 = vcombine.low %v6549_v16, %v6557_v44 }
 0x5d3   :  { %13017 = vmatprep.subr.bf16.mxu0 %v16233_v18  ;;  %v6565_v18 = vld [vmem:[#allocation15 + $0xb00] sm:$0xff] }
 0x5d4   :  { %10447 = vmatpush1.bf16.msra.mxu1 %v16230_v59  ;;  %v6317_v59 = vld [vmem:[#allocation15 + $0x340] sm:$0xff] }
 0x5d5   :  { %13058 = vmatprep.subr.bf16.mxu1 %v16489_v45  ;;  %10408 = vmatmul.mubr.bf16.vlgmr.msra.gmra.mrb[76].mxu0 %v18083_v40  ;;  %v6261_v40 = vld [vmem:[#allocation15 + $0x180] sm:$0xff] }
 0x5d6   :  { %13018 = vmatpush1.bf16.msra.mxu0 %v16232_v56  ;;  %13049 = vmatprep.mubr.bf16.mxu0 %v18237_v61  ;;  %v16281_v38 = vcombine.high %v6261_v40, %v6269_v60  ;;  %v16280_v36 = vcombine.low %v6261_v40, %v6269_v60  ;;  %v6573_v45 = vld [vmem:[#allocation15 + $0xb40] sm:$0xff]  ;;  %v16329_v56 = vcombine.high %v6309_v19, %v6317_v59 }
 0x5d7   :  { %10449 = vmatmul.mubr.bf16.vlgmr.msra.gmra.mrb[76].mxu1 %v18085_v46  ;;  %13019 = vmatprep.subr.bf16.mxu0 %v16249_v24  ;;  %v16520_v46 = vcombine.low %v6501_v22, %v6509_v3  ;;  %v16585_v49 = vcombine.high %v6565_v18, %v6573_v45  ;;  %v6333_v24 = vld [vmem:[#allocation15 + $0x3c0] sm:$0xff]  ;;  %v16584_v40 = vcombine.low %v6565_v18, %v6573_v45 }
 0x5d8   :  { %13059 = vmatpush1.bf16.msra.mxu1 %v16488_v0  ;;  %13090 = vmatprep.mubr.bf16.mxu1 %v18240_v58  ;;  %v6325_v0 = vld [vmem:[#allocation15 + $0x380] sm:$0xff] }
 0x5d9   :  { %13060 = vmatprep.subr.bf16.mxu1 %v16505_v1  ;;  %v6589_v1 = vld [vmem:[#allocation15 + $0xbc0] sm:$0xff]  ;;  %v16345_v60 = vcombine.high %v6325_v0, %v6333_v24  ;;  %v16344_v52 = vcombine.low %v6325_v0, %v6333_v24 }
 0x5da   :  { %13020 = vmatpush1.bf16.msra.mxu0 %v16248_v27  ;;  %v16328_v27 = vcombine.low %v6309_v19, %v6317_v59  ;;  %v16601_v29 = vcombine.high %v6581_v14, %v6589_v1  ;;  %v16600_v20 = vcombine.low %v6581_v14, %v6589_v1  ;;  %v6413_v14 = vld [vmem:[#allocation15 + $0x640] sm:$0xff] }
 0x5db   :  { %13021 = vmatprep.subr.bf16.mxu0 %v16265_v41  ;;  %v6661_v1 = vld [vmem:[#allocation15 + $0xe00] sm:$0xff] }
 0x5dc   :  { %13061 = vmatpush1.bf16.msra.mxu1 %v16504_v7 }
 0x5dd   :  { %13062 = vmatprep.subr.bf16.mxu1 %v16521_v9 }
 0x5de   :  { %13022 = vmatpush1.bf16.msra.mxu0 %v16264_v13  ;;  %v6341_v13 = vld [vmem:[#allocation15 + $0x400] sm:$0xff] }
 0x5df   :  { %13023 = vmatprep.subr.bf16.mxu0 %v16281_v38  ;;  %v6597_v38 = vld [vmem:[#allocation15 + $0xc00] sm:$0xff] }
 0x5e0   :  { %13063 = vmatpush1.bf16.msra.mxu1 %v16520_v46  ;;  %v6349_v46 = vld [vmem:[#allocation15 + $0x440] sm:$0xff] }
 0x5e1   :  { %13064 = vmatprep.subr.bf16.mxu1 %v16537_v21  ;;  %v6605_v21 = vld [vmem:[#allocation15 + $0xc40] sm:$0xff]  ;;  %v16361_v32 = vcombine.high %v6341_v13, %v6349_v46  ;;  %v16360_v23 = vcombine.low %v6341_v13, %v6349_v46 }
 0x5e2   :  { %13024 = vmatpush1.bf16.msra.mxu0 %v16280_v36  ;;  %v16617_v39 = vcombine.high %v6597_v38, %v6605_v21  ;;  %v6357_v36 = vld [vmem:[#allocation15 + $0x480] sm:$0xff]  ;;  %v16616_v37 = vcombine.low %v6597_v38, %v6605_v21 }
 0x5e3   :  { %13025 = vmatprep.subr.bf16.mxu0 %v16297_v15  ;;  %v6613_v15 = vld [vmem:[#allocation15 + $0xc80] sm:$0xff] }
 0x5e4   :  { %13065 = vmatpush1.bf16.msra.mxu1 %v16536_v31  ;;  %v6365_v31 = vld [vmem:[#allocation15 + $0x4c0] sm:$0xff] }
 0x5e5   :  { %13066 = vmatprep.subr.bf16.mxu1 %v16553_v54  ;;  %v6621_v54 = vld [vmem:[#allocation15 + $0xcc0] sm:$0xff]  ;;  %v16377_v16 = vcombine.high %v6357_v36, %v6365_v31  ;;  %v16376_v19 = vcombine.low %v6357_v36, %v6365_v31 }
 0x5e6   :  { %13026 = vmatpush1.bf16.msra.mxu0 %v16296_v47  ;;  %v16633_v44 = vcombine.high %v6613_v15, %v6621_v54  ;;  %v6373_v47 = vld [vmem:[#allocation15 + $0x500] sm:$0xff]  ;;  %v16632_v59 = vcombine.low %v6613_v15, %v6621_v54 }
 0x5e7   :  { %13027 = vmatprep.subr.bf16.mxu0 %v16313_v50  ;;  %v6629_v50 = vld [vmem:[#allocation15 + $0xd00] sm:$0xff] }
 0x5e8   :  { %13067 = vmatpush1.bf16.msra.mxu1 %v16552_v30  ;;  %v10163_v63 = vpop.f32.mrb[64].mxu0  ;;  %v6381_v30 = vld [vmem:[#allocation15 + $0x540] sm:$0xff] }
 0x5e9   :  { %13068 = vmatprep.subr.bf16.mxu1 %v16569_v43  ;;  %v10165_v62 = vpop.f32.mrb[65].mxu0  ;;  %v6637_v43 = vld [vmem:[#allocation15 + $0xd40] sm:$0xff]  ;;  %v16393_v18 = vcombine.high %v6373_v47, %v6381_v30 }
 0x5ea   :  { %v10204_v55 = vpop.f32.mrb[64].mxu1  ;;  %v10167_v6 = vpop.f32.mrb[66].mxu0  ;;  %13028 = vmatpush1.bf16.msra.mxu0 %v16312_v48  ;;  %v16649_v45 = vcombine.high %v6629_v50, %v6637_v43  ;;  %v6389_v48 = vld [vmem:[#allocation15 + $0x580] sm:$0xff]  ;;  %v16648_v0 = vcombine.low %v6629_v50, %v6637_v43 }
 0x5eb   :  { %v18245_v22 = vadd.f32 %v10204_v55, %v10163_v63  ;;  %v10206_v3 = vpop.f32.mrb[65].mxu1  ;;  %v10168_v9 = vpop.f32.mrb[67].mxu0  ;;  %13029 = vmatprep.subr.bf16.mxu0 %v16329_v56  ;;  %v6645_v56 = vld [vmem:[#allocation15 + $0xd80] sm:$0xff] }
 0x5ec   :  { %v18247_v7 = vadd.f32 %v10206_v3, %v10165_v62  ;;  %v10208_v41 = vpop.f32.mrb[66].mxu1  ;;  %13069 = vmatpush1.bf16.msra.mxu1 %v16568_v5  ;;  %v6397_v5 = vld [vmem:[#allocation15 + $0x5c0] sm:$0xff] }
 0x5ed   :  { %v10209_v10 = vpop.f32.mrb[67].mxu1  ;;  %13070 = vmatprep.subr.bf16.mxu1 %v16585_v49  ;;  %v6653_v63 = vld [vmem:[#allocation15 + $0xdc0] sm:$0xff]  ;;  %v16392_v49 = vcombine.low %v6373_v47, %v6381_v30  ;;  %v16409_v24 = vcombine.high %v6389_v48, %v6397_v5  ;;  %v16408_v6 = vcombine.low %v6389_v48, %v6397_v5 }
 0x5ee   :  { %13030 = vmatpush1.bf16.msra.mxu0 %v16328_v27  ;;  %v16665_v55 = vcombine.high %v6645_v56, %v6653_v63  ;;  %v6405_v62 = vld [vmem:[#allocation15 + $0x600] sm:$0xff]  ;;  %v16664_v27 = vcombine.low %v6645_v56, %v6653_v63 }
 0x5ef   :  { %13031 = vmatprep.subr.bf16.mxu0 %v16345_v60  ;;  %v6669_v3 = vld [vmem:[#allocation15 + $0xe40] sm:$0xff]  ;;  %v16425_v41 = vcombine.high %v6405_v62, %v6413_v14  ;;  %v16424_v13 = vcombine.low %v6405_v62, %v6413_v14  ;;  %v6494_v62 = vld [vmem:[#allocation15 + $0x8c8] sm:$0xff]  ;;  %v17247_v14 = vld [vmem:[#allocation23] sm:$0xff] }
 0x5f0   :  { %13071 = vmatpush1.bf16.msra.mxu1 %v16584_v40  ;;  %v16681_v9 = vcombine.high %v6661_v1, %v6669_v3  ;;  %v6421_v40 = vld [vmem:[#allocation15 + $0x680] sm:$0xff]  ;;  %v16680_v46 = vcombine.low %v6661_v1, %v6669_v3  ;;  %v18249_v1 = vpack.c.bf16 %v17247_v14, %v17247_v14 }
 0x5f1   :  { %13072 = vmatprep.subr.bf16.mxu1 %v16601_v29  ;;  %v6429_v60 = vld [vmem:[#allocation15 + $0x6c0] sm:$0xff] }
 0x5f2   :  { %13032 = vmatpush1.bf16.msra.mxu0 %v16344_v52  ;;  %v6677_v10 = vld [vmem:[#allocation15 + $0xe80] sm:$0xff]  ;;  %v16441_v38 = vcombine.high %v6421_v40, %v6429_v60  ;;  %v16440_v36 = vcombine.low %v6421_v40, %v6429_v60  ;;  %v6254_v40 = vld [vmem:[#allocation15 + $0x148] sm:$0xff] }
 0x5f3   :  { %13033 = vmatprep.subr.bf16.mxu0 %v16361_v32  ;;  %v6685_v29 = vld [vmem:[#allocation15 + $0xec0] sm:$0xff] }
 0x5f4   :  { %13073 = vmatpush1.bf16.msra.mxu1 %v16600_v20  ;;  %v16697_v21 = vcombine.high %v6677_v10, %v6685_v29  ;;  %v6437_v52 = vld [vmem:[#allocation15 + $0x700] sm:$0xff]  ;;  %v16696_v31 = vcombine.low %v6677_v10, %v6685_v29  ;;  %v6502_v10 = vld [vmem:[#allocation15 + $0x908] sm:$0xff] }
 0x5f5   :  { %13074 = vmatprep.subr.bf16.mxu1 %v16617_v39  ;;  %v6445_v20 = vld [vmem:[#allocation15 + $0x740] sm:$0xff]  ;;  %v6510_v29 = vld [vmem:[#allocation15 + $0x948] sm:$0xff] }
 0x5f6   :  { %13034 = vmatpush1.bf16.msra.mxu0 %v16360_v23  ;;  %v6693_v32 = vld [vmem:[#allocation15 + $0xf00] sm:$0xff]  ;;  %v16457_v15 = vcombine.high %v6437_v52, %v6445_v20  ;;  %v16456_v47 = vcombine.low %v6437_v52, %v6445_v20  ;;  %v6262_v52 = vld [vmem:[#allocation15 + $0x188] sm:$0xff] }
 0x5f7   :  { %13035 = vmatprep.subr.bf16.mxu0 %v16377_v16  ;;  %v6701_v39 = vld [vmem:[#allocation15 + $0xf40] sm:$0xff]  ;;  %v6270_v20 = vld [vmem:[#allocation15 + $0x1c8] sm:$0xff] }
 0x5f8   :  { %13075 = vmatpush1.bf16.msra.mxu1 %v16616_v37  ;;  %v16713_v54 = vcombine.high %v6693_v32, %v6701_v39  ;;  %v6453_v23 = vld [vmem:[#allocation15 + $0x780] sm:$0xff]  ;;  %v16712_v30 = vcombine.low %v6693_v32, %v6701_v39  ;;  %v6518_v32 = vld [vmem:[#allocation15 + $0x988] sm:$0xff] }
 0x5f9   :  { %13076 = vmatprep.subr.bf16.mxu1 %v16633_v44  ;;  %v6461_v37 = vld [vmem:[#allocation15 + $0x7c0] sm:$0xff]  ;;  %v6526_v39 = vld [vmem:[#allocation15 + $0x9c8] sm:$0xff] }
 0x5fa   :  { %13036 = vmatpush1.bf16.msra.mxu0 %v16376_v19  ;;  %v6709_v16 = vld [vmem:[#allocation15 + $0xf80] sm:$0xff]  ;;  %v16473_v50 = vcombine.high %v6453_v23, %v6461_v37  ;;  %v6214_v19 = vld [vmem:[#allocation15 + $0x8] sm:$0xff]  ;;  %v16472_v48 = vcombine.low %v6453_v23, %v6461_v37 }
 0x5fb   :  { %13037 = vmatprep.subr.bf16.mxu0 %v16393_v18  ;;  %v6717_v44 = vld [vmem:[#allocation15 + $0xfc0] sm:$0xff]  ;;  %v6470_v18 = vld [vmem:[#allocation15 + $0x808] sm:$0xff] }
 0x5fc   :  { %13077 = vmatpush1.bf16.msra.mxu1 %v16632_v59  ;;  %v16729_v43 = vcombine.high %v6709_v16, %v6717_v44  ;;  %v6222_v59 = vld [vmem:[#allocation15 + $0x48] sm:$0xff]  ;;  %v16728_v5 = vcombine.low %v6709_v16, %v6717_v44 }
 0x5fd   :  { %13078 = vmatprep.subr.bf16.mxu1 %v16649_v45  ;;  %v6478_v45 = vld [vmem:[#allocation15 + $0x848] sm:$0xff]  ;;  %v16235_v56 = vcombine.high %v6214_v19, %v6222_v59 }
 0x5fe   :  { %13038 = vmatpush1.bf16.msra.mxu0 %v16392_v49  ;;  %v16491_v63 = vcombine.high %v6470_v18, %v6478_v45  ;;  %v6230_v49 = vld [vmem:[#allocation15 + $0x88] sm:$0xff]  ;;  %v16490_v3 = vcombine.low %v6470_v18, %v6478_v45 }
 0x5ff   :  { %13039 = vmatprep.subr.bf16.mxu0 %v16409_v24  ;;  %v16234_v24 = vcombine.low %v6214_v19, %v6222_v59  ;;  %v6278_v23 = vld [vmem:[#allocation15 + $0x208] sm:$0xff] }
 0x600   :  { %13079 = vmatpush1.bf16.msra.mxu1 %v16648_v0  ;;  %v6238_v0 = vld [vmem:[#allocation15 + $0xc8] sm:$0xff] }
 0x601   :  { %13080 = vmatprep.subr.bf16.mxu1 %v16665_v55  ;;  %v6486_v55 = vld [vmem:[#allocation15 + $0x888] sm:$0xff] }
 0x602   :  { %13040 = vmatpush1.bf16.msra.mxu0 %v16408_v6  ;;  %v17248_v6 = vld [vmem:[#allocation23 + $0x10] sm:$0xff]  ;;  %v16507_v60 = vcombine.high %v6486_v55, %v6494_v62 }
 0x603   :  { %13041 = vmatprep.subr.bf16.mxu0 %v16425_v41  ;;  %v16251_v41 = vcombine.high %v6230_v49, %v6238_v0  ;;  %v6286_v37 = vld [vmem:[#allocation15 + $0x248] sm:$0xff] }
 0x604   :  { %13081 = vmatpush1.bf16.msra.mxu1 %v16664_v27  ;;  %v18251_v27 = vpack.c.bf16 %v17248_v6, %v17248_v6  ;;  %v6534_v16 = vld [vmem:[#allocation15 + $0xa08] sm:$0xff] }
 0x605   :  { %13082 = vmatprep.subr.bf16.mxu1 %v16681_v9  ;;  %v6246_v9 = vld [vmem:[#allocation15 + $0x108] sm:$0xff] }
 0x606   :  { %13042 = vmatpush1.bf16.msra.mxu0 %v16424_v13  ;;  %v16250_v13 = vcombine.low %v6230_v49, %v6238_v0  ;;  %v6542_v44 = vld [vmem:[#allocation15 + $0xa48] sm:$0xff] }
 0x607   :  { %13043 = vmatprep.subr.bf16.mxu0 %v16441_v38  ;;  %v16267_v38 = vcombine.high %v6246_v9, %v6254_v40  ;;  %v6294_v19 = vld [vmem:[#allocation15 + $0x288] sm:$0xff] }
 0x608   :  { %13083 = vmatpush1.bf16.msra.mxu1 %v16680_v46  ;;  %v16506_v46 = vcombine.low %v6486_v55, %v6494_v62  ;;  %v6302_v59 = vld [vmem:[#allocation15 + $0x2c8] sm:$0xff] }
 0x609   :  { %13084 = vmatprep.subr.bf16.mxu1 %v16697_v21  ;;  %v16523_v21 = vcombine.high %v6502_v10, %v6510_v29  ;;  %v6550_v18 = vld [vmem:[#allocation15 + $0xa88] sm:$0xff]  ;;  %v16314_v62 = vcombine.low %v6294_v19, %v6302_v59 }
 0x60a   :  { %13044 = vmatpush1.bf16.msra.mxu0 %v16440_v36  ;;  %v16266_v36 = vcombine.low %v6246_v9, %v6254_v40  ;;  %v6558_v45 = vld [vmem:[#allocation15 + $0xac8] sm:$0xff] }
 0x60b   :  { %13045 = vmatprep.subr.bf16.mxu0 %v16457_v15  ;;  %v16283_v15 = vcombine.high %v6262_v52, %v6270_v20  ;;  %v6310_v49 = vld [vmem:[#allocation15 + $0x308] sm:$0xff]  ;;  %v16570_v14 = vcombine.low %v6550_v18, %v6558_v45 }
 0x60c   :  { %13085 = vmatpush1.bf16.msra.mxu1 %v16696_v31  ;;  %v16522_v31 = vcombine.low %v6502_v10, %v6510_v29  ;;  %v6318_v0 = vld [vmem:[#allocation15 + $0x348] sm:$0xff] }
 0x60d   :  { %13086 = vmatprep.subr.bf16.mxu1 %v16713_v54  ;;  %v16539_v54 = vcombine.high %v6518_v32, %v6526_v39  ;;  %v6574_v55 = vld [vmem:[#allocation15 + $0xb48] sm:$0xff] }
 0x60e   :  { %13046 = vmatpush1.bf16.msra.mxu0 %v16456_v47  ;;  %v16282_v47 = vcombine.low %v6262_v52, %v6270_v20  ;;  %v6326_v9 = vld [vmem:[#allocation15 + $0x388] sm:$0xff]  ;;  %v16330_v52 = vcombine.low %v6310_v49, %v6318_v0 }
 0x60f   :  { %13047 = vmatprep.subr.bf16.mxu0 %v16473_v50  ;;  %v16299_v50 = vcombine.high %v6278_v23, %v6286_v37  ;;  %v6334_v40 = vld [vmem:[#allocation15 + $0x3c8] sm:$0xff] }
 0x610   :  { %13087 = vmatpush1.bf16.msra.mxu1 %v16712_v30  ;;  %v16538_v30 = vcombine.low %v6518_v32, %v6526_v39  ;;  %v6582_v29 = vld [vmem:[#allocation15 + $0xb88] sm:$0xff] }
 0x611   :  { %13088 = vmatprep.subr.bf16.mxu1 %v16729_v43  ;;  %v16555_v43 = vcombine.high %v6534_v16, %v6542_v44 }
 0x612   :  { %13048 = vmatpush1.bf16.msra.mxu0 %v16472_v48  ;;  %v16298_v48 = vcombine.low %v6278_v23, %v6286_v37  ;;  %v6342_v23 = vld [vmem:[#allocation15 + $0x408] sm:$0xff] }
 0x613   :  { %13099 = vmatprep.subr.bf16.mxu0 %v16235_v56  ;;  %v16315_v56 = vcombine.high %v6294_v19, %v6302_v59  ;;  %v6350_v37 = vld [vmem:[#allocation15 + $0x448] sm:$0xff] }
 0x614   :  { %13089 = vmatpush1.bf16.msra.mxu1 %v16728_v5  ;;  %v16554_v5 = vcombine.low %v6534_v16, %v6542_v44  ;;  %v6598_v16 = vld [vmem:[#allocation15 + $0xc08] sm:$0xff] }
 0x615   :  { %13140 = vmatprep.subr.bf16.mxu1 %v16491_v63  ;;  %13050 = vmatmul.mubr.bf16.vlgmr.msra.gmra.mrb[80].mxu0 %v18249_v1  ;;  %v16571_v63 = vcombine.high %v6550_v18, %v6558_v45  ;;  %v6606_v44 = vld [vmem:[#allocation15 + $0xc48] sm:$0xff] }
 0x616   :  { %13100 = vmatpush1.bf16.msra.mxu0 %v16234_v24  ;;  %13131 = vmatprep.mubr.bf16.mxu0 %v18237_v61  ;;  %v6566_v24 = vld [vmem:[#allocation15 + $0xb08] sm:$0xff] }
 0x617   :  { %13091 = vmatmul.mubr.bf16.vlgmr.msra.gmra.mrb[80].mxu1 %v18251_v27  ;;  %13101 = vmatprep.subr.bf16.mxu0 %v16251_v41  ;;  %v16587_v41 = vcombine.high %v6566_v24, %v6574_v55  ;;  %v6358_v19 = vld [vmem:[#allocation15 + $0x488] sm:$0xff] }
 0x618   :  { %13141 = vmatpush1.bf16.msra.mxu1 %v16490_v3  ;;  %13172 = vmatprep.mubr.bf16.mxu1 %v18240_v58  ;;  %v16331_v3 = vcombine.high %v6310_v49, %v6318_v0  ;;  %v6366_v59 = vld [vmem:[#allocation15 + $0x4c8] sm:$0xff] }
 0x619   :  { %13142 = vmatprep.subr.bf16.mxu1 %v16507_v60  ;;  %v6614_v18 = vld [vmem:[#allocation15 + $0xc88] sm:$0xff] }
 0x61a   :  { %13102 = vmatpush1.bf16.msra.mxu0 %v16250_v13  ;;  %v6590_v13 = vld [vmem:[#allocation15 + $0xbc8] sm:$0xff] }
 0x61b   :  { %13103 = vmatprep.subr.bf16.mxu0 %v16267_v38  ;;  %v6622_v45 = vld [vmem:[#allocation15 + $0xcc8] sm:$0xff] }
 0x61c   :  { %13143 = vmatpush1.bf16.msra.mxu1 %v16506_v46  ;;  %v6374_v49 = vld [vmem:[#allocation15 + $0x508] sm:$0xff] }
 0x61d   :  { %13144 = vmatprep.subr.bf16.mxu1 %v16523_v21  ;;  %v6382_v0 = vld [vmem:[#allocation15 + $0x548] sm:$0xff] }
 0x61e   :  { %13104 = vmatpush1.bf16.msra.mxu0 %v16266_v36  ;;  %v16586_v36 = vcombine.low %v6566_v24, %v6574_v55  ;;  %v6630_v24 = vld [vmem:[#allocation15 + $0xd08] sm:$0xff] }
 0x61f   :  { %13105 = vmatprep.subr.bf16.mxu0 %v16283_v15  ;;  %v6638_v55 = vld [vmem:[#allocation15 + $0xd48] sm:$0xff] }
 0x620   :  { %13145 = vmatpush1.bf16.msra.mxu1 %v16522_v31  ;;  %v16347_v31 = vcombine.high %v6326_v9, %v6334_v40 }
 0x621   :  { %13146 = vmatprep.subr.bf16.mxu1 %v16539_v54  ;;  %v16603_v54 = vcombine.high %v6582_v29, %v6590_v13 }
 0x622   :  { %13106 = vmatpush1.bf16.msra.mxu0 %v16282_v47  ;;  %v16346_v47 = vcombine.low %v6326_v9, %v6334_v40  ;;  %v6398_v9 = vld [vmem:[#allocation15 + $0x5c8] sm:$0xff] }
 0x623   :  { %13107 = vmatprep.subr.bf16.mxu0 %v16299_v50  ;;  %v16363_v50 = vcombine.high %v6342_v23, %v6350_v37  ;;  %v6646_v40 = vld [vmem:[#allocation15 + $0xd88] sm:$0xff] }
 0x624   :  { %13147 = vmatpush1.bf16.msra.mxu1 %v16538_v30  ;;  %v16602_v30 = vcombine.low %v6582_v29, %v6590_v13  ;;  %v16650_v29 = vcombine.low %v6630_v24, %v6638_v55 }
 0x625   :  { %13148 = vmatprep.subr.bf16.mxu1 %v16555_v43  ;;  %v16619_v43 = vcombine.high %v6598_v16, %v6606_v44 }
 0x626   :  { %13108 = vmatpush1.bf16.msra.mxu0 %v16298_v48  ;;  %v16362_v48 = vcombine.low %v6342_v23, %v6350_v37  ;;  %v6422_v23 = vld [vmem:[#allocation15 + $0x688] sm:$0xff] }
 0x627   :  { %13109 = vmatprep.subr.bf16.mxu0 %v16315_v56  ;;  %v16379_v56 = vcombine.high %v6358_v19, %v6366_v59  ;;  %v6430_v37 = vld [vmem:[#allocation15 + $0x6c8] sm:$0xff] }
 0x628   :  { %13149 = vmatpush1.bf16.msra.mxu1 %v16554_v5  ;;  %v10245_v6 = vpop.f32.mrb[68].mxu0  ;;  %v16618_v5 = vcombine.low %v6598_v16, %v6606_v44  ;;  %v6678_v16 = vld [vmem:[#allocation15 + $0xe88] sm:$0xff] }
 0x629   :  { %13150 = vmatprep.subr.bf16.mxu1 %v16571_v63  ;;  %v10247_v10 = vpop.f32.mrb[69].mxu0  ;;  %v16635_v63 = vcombine.high %v6614_v18, %v6622_v45  ;;  %v6686_v44 = vld [vmem:[#allocation15 + $0xec8] sm:$0xff] }
 0x62a   :  { %v10286_v60 = vpop.f32.mrb[68].mxu1  ;;  %v10249_v21 = vpop.f32.mrb[70].mxu0  ;;  %13110 = vmatpush1.bf16.msra.mxu0 %v16314_v62  ;;  %v16378_v62 = vcombine.low %v6358_v19, %v6366_v59  ;;  %v6438_v19 = vld [vmem:[#allocation15 + $0x708] sm:$0xff] }
 0x62b   :  { %v18257_v46 = vadd.f32 %v10286_v60, %v10245_v6  ;;  %v10288_v38 = vpop.f32.mrb[69].mxu1  ;;  %v10250_v39 = vpop.f32.mrb[71].mxu0  ;;  %13111 = vmatprep.subr.bf16.mxu0 %v16331_v3  ;;  %v16395_v3 = vcombine.high %v6374_v49, %v6382_v0  ;;  %v16651_v6 = vcombine.high %v6630_v24, %v6638_v55  ;;  %v6654_v60 = vld [vmem:[#allocation15 + $0xdc8] sm:$0xff] }
 0x62c   :  { %v18259_v20 = vadd.f32 %v10288_v38, %v10247_v10  ;;  %v10290_v32 = vpop.f32.mrb[70].mxu1  ;;  %13151 = vmatpush1.bf16.msra.mxu1 %v16570_v14  ;;  %v16634_v14 = vcombine.low %v6614_v18, %v6622_v45  ;;  %v16394_v10 = vcombine.low %v6374_v49, %v6382_v0  ;;  %v16667_v38 = vcombine.high %v6646_v40, %v6654_v60  ;;  %v6406_v21 = vld [vmem:[#allocation15 + $0x608] sm:$0xff] }
 0x62d   :  { %v10291_v15 = vpop.f32.mrb[71].mxu1  ;;  %13152 = vmatprep.subr.bf16.mxu1 %v16587_v41  ;;  %v6390_v41 = vld [vmem:[#allocation15 + $0x588] sm:$0xff] }
 0x62e   :  { %13112 = vmatpush1.bf16.msra.mxu0 %v16330_v52  ;;  %v16411_v13 = vcombine.high %v6390_v41, %v6398_v9  ;;  %v6414_v52 = vld [vmem:[#allocation15 + $0x648] sm:$0xff] }
 0x62f   :  { %13113 = vmatprep.subr.bf16.mxu0 %v16347_v31  ;;  %v6662_v32 = vld [vmem:[#allocation15 + $0xe08] sm:$0xff]  ;;  %v16666_v31 = vcombine.low %v6646_v40, %v6654_v60  ;;  %v16427_v15 = vcombine.high %v6406_v21, %v6414_v52  ;;  %v6471_v40 = vld [vmem:[#allocation15 + $0x810] sm:$0xff] }
 0x630   :  { %13153 = vmatpush1.bf16.msra.mxu1 %v16586_v36  ;;  %v6670_v39 = vld [vmem:[#allocation15 + $0xe48] sm:$0xff]  ;;  %v16410_v36 = vcombine.low %v6390_v41, %v6398_v9  ;;  %v6215_v41 = vld [vmem:[#allocation15 + $0x10] sm:$0xff] }
 0x631   :  { %13154 = vmatprep.subr.bf16.mxu1 %v16603_v54  ;;  %v16683_v54 = vcombine.high %v6662_v32, %v6670_v39  ;;  %v6446_v59 = vld [vmem:[#allocation15 + $0x748] sm:$0xff]  ;;  %v6223_v9 = vld [vmem:[#allocation15 + $0x50] sm:$0xff] }
 0x632   :  { %13114 = vmatpush1.bf16.msra.mxu0 %v16346_v47  ;;  %v16426_v47 = vcombine.low %v6406_v21, %v6414_v52  ;;  %v6694_v18 = vld [vmem:[#allocation15 + $0xf08] sm:$0xff]  ;;  %v6479_v60 = vld [vmem:[#allocation15 + $0x850] sm:$0xff] }
 0x633   :  { %13115 = vmatprep.subr.bf16.mxu0 %v16363_v50  ;;  %v16443_v50 = vcombine.high %v6422_v23, %v6430_v37  ;;  %v6702_v45 = vld [vmem:[#allocation15 + $0xf48] sm:$0xff]  ;;  %v6231_v21 = vld [vmem:[#allocation15 + $0x90] sm:$0xff] }
 0x634   :  { %13155 = vmatpush1.bf16.msra.mxu1 %v16602_v30  ;;  %v16682_v30 = vcombine.low %v6662_v32, %v6670_v39  ;;  %v6454_v49 = vld [vmem:[#allocation15 + $0x788] sm:$0xff]  ;;  %v6239_v52 = vld [vmem:[#allocation15 + $0xd0] sm:$0xff]  ;;  %v16236_v32 = vcombine.low %v6215_v41, %v6223_v9 }
 0x635   :  { %13156 = vmatprep.subr.bf16.mxu1 %v16619_v43  ;;  %v16699_v43 = vcombine.high %v6678_v16, %v6686_v44  ;;  %v6462_v0 = vld [vmem:[#allocation15 + $0x7c8] sm:$0xff]  ;;  %v6487_v39 = vld [vmem:[#allocation15 + $0x890] sm:$0xff] }
 0x636   :  { %13116 = vmatpush1.bf16.msra.mxu0 %v16362_v48  ;;  %v16442_v48 = vcombine.low %v6422_v23, %v6430_v37  ;;  %v6710_v24 = vld [vmem:[#allocation15 + $0xf88] sm:$0xff]  ;;  %v6255_v23 = vld [vmem:[#allocation15 + $0x150] sm:$0xff] }
 0x637   :  { %13117 = vmatprep.subr.bf16.mxu0 %v16379_v56  ;;  %v16459_v56 = vcombine.high %v6438_v19, %v6446_v59  ;;  %v6718_v55 = vld [vmem:[#allocation15 + $0xfc8] sm:$0xff] }
 0x638   :  { %13157 = vmatpush1.bf16.msra.mxu1 %v16618_v5  ;;  %v16698_v5 = vcombine.low %v6678_v16, %v6686_v44  ;;  %v6503_v16 = vld [vmem:[#allocation15 + $0x910] sm:$0xff] }
 0x639   :  { %13158 = vmatprep.subr.bf16.mxu1 %v16635_v63  ;;  %v16715_v63 = vcombine.high %v6694_v18, %v6702_v45  ;;  %v6511_v44 = vld [vmem:[#allocation15 + $0x950] sm:$0xff] }
 0x63a   :  { %13118 = vmatpush1.bf16.msra.mxu0 %v16378_v62  ;;  %v16458_v62 = vcombine.low %v6438_v19, %v6446_v59  ;;  %v6263_v19 = vld [vmem:[#allocation15 + $0x190] sm:$0xff] }
 0x63b   :  { %13119 = vmatprep.subr.bf16.mxu0 %v16395_v3  ;;  %v16475_v3 = vcombine.high %v6454_v49, %v6462_v0  ;;  %v6271_v59 = vld [vmem:[#allocation15 + $0x1d0] sm:$0xff] }
 0x63c   :  { %13159 = vmatpush1.bf16.msra.mxu1 %v16634_v14  ;;  %v16714_v14 = vcombine.low %v6694_v18, %v6702_v45  ;;  %v6519_v18 = vld [vmem:[#allocation15 + $0x990] sm:$0xff] }
 0x63d   :  { %13160 = vmatprep.subr.bf16.mxu1 %v16651_v6  ;;  %v16731_v6 = vcombine.high %v6710_v24, %v6718_v55  ;;  %v6527_v45 = vld [vmem:[#allocation15 + $0x9d0] sm:$0xff] }
 0x63e   :  { %13120 = vmatpush1.bf16.msra.mxu0 %v16394_v10  ;;  %v16474_v10 = vcombine.low %v6454_v49, %v6462_v0  ;;  %v6279_v49 = vld [vmem:[#allocation15 + $0x210] sm:$0xff] }
 0x63f   :  { %13121 = vmatprep.subr.bf16.mxu0 %v16411_v13  ;;  %v16237_v13 = vcombine.high %v6215_v41, %v6223_v9  ;;  %v6287_v0 = vld [vmem:[#allocation15 + $0x250] sm:$0xff] }
 0x640   :  { %13161 = vmatpush1.bf16.msra.mxu1 %v16650_v29  ;;  %v16730_v29 = vcombine.low %v6710_v24, %v6718_v55  ;;  %v6535_v24 = vld [vmem:[#allocation15 + $0xa10] sm:$0xff] }
 0x641   :  { %13162 = vmatprep.subr.bf16.mxu1 %v16667_v38  ;;  %v16493_v38 = vcombine.high %v6471_v40, %v6479_v60  ;;  %v6543_v55 = vld [vmem:[#allocation15 + $0xa50] sm:$0xff] }
 0x642   :  { %13122 = vmatpush1.bf16.msra.mxu0 %v16410_v36  ;;  %v6495_v36 = vld [vmem:[#allocation15 + $0x8d0] sm:$0xff] }
 0x643   :  { %13123 = vmatprep.subr.bf16.mxu0 %v16427_v15  ;;  %v16253_v15 = vcombine.high %v6231_v21, %v6239_v52  ;;  %v16509_v37 = vcombine.high %v6487_v39, %v6495_v36  ;;  %v6295_v41 = vld [vmem:[#allocation15 + $0x290] sm:$0xff] }
 0x644   :  { %13163 = vmatpush1.bf16.msra.mxu1 %v16666_v31  ;;  %v16492_v31 = vcombine.low %v6471_v40, %v6479_v60  ;;  %v6303_v9 = vld [vmem:[#allocation15 + $0x2d0] sm:$0xff] }
 0x645   :  { %13164 = vmatprep.subr.bf16.mxu1 %v16683_v54  ;;  %v6247_v54 = vld [vmem:[#allocation15 + $0x110] sm:$0xff] }
 0x646   :  { %13124 = vmatpush1.bf16.msra.mxu0 %v16426_v47  ;;  %v16252_v47 = vcombine.low %v6231_v21, %v6239_v52  ;;  %v6551_v40 = vld [vmem:[#allocation15 + $0xa90] sm:$0xff] }
 0x647   :  { %13125 = vmatprep.subr.bf16.mxu0 %v16443_v50  ;;  %v16269_v50 = vcombine.high %v6247_v54, %v6255_v23  ;;  %v6559_v60 = vld [vmem:[#allocation15 + $0xad0] sm:$0xff] }
 0x648   :  { %13165 = vmatpush1.bf16.msra.mxu1 %v16682_v30  ;;  %v16508_v30 = vcombine.low %v6487_v39, %v6495_v36  ;;  %v6311_v21 = vld [vmem:[#allocation15 + $0x310] sm:$0xff]  ;;  %v16316_v36 = vcombine.low %v6295_v41, %v6303_v9 }
 0x649   :  { %13166 = vmatprep.subr.bf16.mxu1 %v16699_v43  ;;  %v16525_v43 = vcombine.high %v6503_v16, %v6511_v44  ;;  %v6319_v52 = vld [vmem:[#allocation15 + $0x350] sm:$0xff] }
 0x64a   :  { %13126 = vmatpush1.bf16.msra.mxu0 %v16442_v48  ;;  %v16268_v48 = vcombine.low %v6247_v54, %v6255_v23  ;;  %v6575_v39 = vld [vmem:[#allocation15 + $0xb50] sm:$0xff] }
 0x64b   :  { %13127 = vmatprep.subr.bf16.mxu0 %v16459_v56  ;;  %v16285_v56 = vcombine.high %v6263_v19, %v6271_v59 }
 0x64c   :  { %13167 = vmatpush1.bf16.msra.mxu1 %v16698_v5  ;;  %v16524_v5 = vcombine.low %v6503_v16, %v6511_v44  ;;  %v6335_v16 = vld [vmem:[#allocation15 + $0x3d0] sm:$0xff] }
 0x64d   :  { %13168 = vmatprep.subr.bf16.mxu1 %v16715_v63  ;;  %v16541_v63 = vcombine.high %v6519_v18, %v6527_v45 }
 0x64e   :  { %13128 = vmatpush1.bf16.msra.mxu0 %v16458_v62  ;;  %v16284_v62 = vcombine.low %v6263_v19, %v6271_v59 }
 0x64f   :  { %13129 = vmatprep.subr.bf16.mxu0 %v16475_v3  ;;  %v16301_v3 = vcombine.high %v6279_v49, %v6287_v0 }
 0x650   :  { %13169 = vmatpush1.bf16.msra.mxu1 %v16714_v14  ;;  %v16540_v14 = vcombine.low %v6519_v18, %v6527_v45  ;;  %v16332_v18 = vcombine.low %v6311_v21, %v6319_v52 }
 0x651   :  { %13170 = vmatprep.subr.bf16.mxu1 %v16731_v6  ;;  %v16557_v6 = vcombine.high %v6535_v24, %v6543_v55 }
 0x652   :  { %13130 = vmatpush1.bf16.msra.mxu0 %v16474_v10  ;;  %v16300_v10 = vcombine.low %v6279_v49, %v6287_v0 }
 0x653   :  { %13181 = vmatprep.subr.bf16.mxu0 %v16237_v13  ;;  %v16317_v13 = vcombine.high %v6295_v41, %v6303_v9 }
 0x654   :  { %13171 = vmatpush1.bf16.msra.mxu1 %v16730_v29  ;;  %v16556_v29 = vcombine.low %v6535_v24, %v6543_v55  ;;  %v6343_v24 = vld [vmem:[#allocation15 + $0x410] sm:$0xff] }
 0x655   :  { %13222 = vmatprep.subr.bf16.mxu1 %v16493_v38  ;;  %13132 = vmatmul.mubr.bf16.vlgmr.msra.gmra.mrb[84].mxu0 %v18249_v1  ;;  %v16573_v38 = vcombine.high %v6551_v40, %v6559_v60  ;;  %v6351_v55 = vld [vmem:[#allocation15 + $0x450] sm:$0xff] }
 0x656   :  { %13182 = vmatpush1.bf16.msra.mxu0 %v16236_v32  ;;  %13213 = vmatprep.mubr.bf16.mxu0 %v18237_v61  ;;  %v6567_v32 = vld [vmem:[#allocation15 + $0xb10] sm:$0xff]  ;;  %v16365_v41 = vcombine.high %v6343_v24, %v6351_v55 }
 0x657   :  { %13173 = vmatmul.mubr.bf16.vlgmr.msra.gmra.mrb[84].mxu1 %v18251_v27  ;;  %13183 = vmatprep.subr.bf16.mxu0 %v16253_v15  ;;  %v16333_v15 = vcombine.high %v6311_v21, %v6319_v52  ;;  %v16589_v23 = vcombine.high %v6567_v32, %v6575_v39 }
 0x658   :  { %13223 = vmatpush1.bf16.msra.mxu1 %v16492_v31  ;;  %13254 = vmatprep.mubr.bf16.mxu1 %v18240_v58  ;;  %v16572_v31 = vcombine.low %v6551_v40, %v6559_v60  ;;  %v6359_v40 = vld [vmem:[#allocation15 + $0x490] sm:$0xff] }
 0x659   :  { %13224 = vmatprep.subr.bf16.mxu1 %v16509_v37  ;;  %v6327_v37 = vld [vmem:[#allocation15 + $0x390] sm:$0xff] }
 0x65a   :  { %13184 = vmatpush1.bf16.msra.mxu0 %v16252_v47  ;;  %v6367_v60 = vld [vmem:[#allocation15 + $0x4d0] sm:$0xff] }
 0x65b   :  { %13185 = vmatprep.subr.bf16.mxu0 %v16269_v50  ;;  %v6591_v50 = vld [vmem:[#allocation15 + $0xbd0] sm:$0xff]  ;;  %v16381_v21 = vcombine.high %v6359_v40, %v6367_v60 }
 0x65c   :  { %13225 = vmatpush1.bf16.msra.mxu1 %v16508_v30  ;;  %v6583_v30 = vld [vmem:[#allocation15 + $0xb90] sm:$0xff] }
 0x65d   :  { %13226 = vmatprep.subr.bf16.mxu1 %v16525_v43  ;;  %v16605_v0 = vcombine.high %v6583_v30, %v6591_v50 }
 0x65e   :  { %13186 = vmatpush1.bf16.msra.mxu0 %v16268_v48 }
 0x65f   :  { %13187 = vmatprep.subr.bf16.mxu0 %v16285_v56  ;;  %v16588_v56 = vcombine.low %v6567_v32, %v6575_v39  ;;  %v6375_v32 = vld [vmem:[#allocation15 + $0x510] sm:$0xff] }
 0x660   :  { %13227 = vmatpush1.bf16.msra.mxu1 %v16524_v5  ;;  %v6383_v39 = vld [vmem:[#allocation15 + $0x550] sm:$0xff] }
 0x661   :  { %13228 = vmatprep.subr.bf16.mxu1 %v16541_v63  ;;  %v16349_v63 = vcombine.high %v6327_v37, %v6335_v16 }
 0x662   :  { %13188 = vmatpush1.bf16.msra.mxu0 %v16284_v62  ;;  %v6599_v62 = vld [vmem:[#allocation15 + $0xc10] sm:$0xff] }
 0x663   :  { %13189 = vmatprep.subr.bf16.mxu0 %v16301_v3  ;;  %v16348_v3 = vcombine.low %v6327_v37, %v6335_v16  ;;  %v6391_v16 = vld [vmem:[#allocation15 + $0x590] sm:$0xff] }
 0x664   :  { %13229 = vmatpush1.bf16.msra.mxu1 %v16540_v14  ;;  %v6607_v14 = vld [vmem:[#allocation15 + $0xc50] sm:$0xff] }
 0x665   :  { %13230 = vmatprep.subr.bf16.mxu1 %v16557_v6  ;;  %v16604_v6 = vcombine.low %v6583_v30, %v6591_v50  ;;  %v16621_v9 = vcombine.high %v6599_v62, %v6607_v14  ;;  %v6655_v30 = vld [vmem:[#allocation15 + $0xdd0] sm:$0xff]  ;;  %v16396_v50 = vcombine.low %v6375_v32, %v6383_v39 }
 0x666   :  { %13190 = vmatpush1.bf16.msra.mxu0 %v16300_v10  ;;  %v6615_v10 = vld [vmem:[#allocation15 + $0xc90] sm:$0xff] }
 0x667   :  { %13191 = vmatprep.subr.bf16.mxu0 %v16317_v13  ;;  %v16364_v13 = vcombine.low %v6343_v24, %v6351_v55 }
 0x668   :  { %13231 = vmatpush1.bf16.msra.mxu1 %v16556_v29  ;;  %v10327_v54 = vpop.f32.mrb[72].mxu0  ;;  %v6623_v29 = vld [vmem:[#allocation15 + $0xcd0] sm:$0xff] }
 0x669   :  { %13232 = vmatprep.subr.bf16.mxu1 %v16573_v38  ;;  %v10329_v47 = vpop.f32.mrb[73].mxu0  ;;  %v16620_v38 = vcombine.low %v6599_v62, %v6607_v14  ;;  %v16637_v52 = vcombine.high %v6615_v10, %v6623_v29  ;;  %v6423_v62 = vld [vmem:[#allocation15 + $0x690] sm:$0xff] }
 0x66a   :  { %v10368_v44 = vpop.f32.mrb[72].mxu1  ;;  %v10331_v59 = vpop.f32.mrb[74].mxu0  ;;  %13192 = vmatpush1.bf16.msra.mxu0 %v16316_v36  ;;  %v6631_v36 = vld [vmem:[#allocation15 + $0xd10] sm:$0xff] }
 0x66b   :  { %v18265_v43 = vadd.f32 %v10368_v44, %v10327_v54  ;;  %v10370_v19 = vpop.f32.mrb[73].mxu1  ;;  %v10332_v5 = vpop.f32.mrb[75].mxu0  ;;  %13193 = vmatprep.subr.bf16.mxu0 %v16333_v15  ;;  %v16380_v15 = vcombine.low %v6359_v40, %v6367_v60  ;;  %v16636_v54 = vcombine.low %v6615_v10, %v6623_v29  ;;  %v6399_v44 = vld [vmem:[#allocation15 + $0x5d0] sm:$0xff] }
 0x66c   :  { %v18267_v45 = vadd.f32 %v10370_v19, %v10329_v47  ;;  %v10372_v48 = vpop.f32.mrb[74].mxu1  ;;  %13233 = vmatpush1.bf16.msra.mxu1 %v16572_v31  ;;  %v6639_v31 = vld [vmem:[#allocation15 + $0xd50] sm:$0xff]  ;;  %v16413_v59 = vcombine.high %v6391_v16, %v6399_v44 }
 0x66d   :  { %v10373_v49 = vpop.f32.mrb[75].mxu1  ;;  %13234 = vmatprep.subr.bf16.mxu1 %v16589_v23  ;;  %v16397_v23 = vcombine.high %v6375_v32, %v6383_v39  ;;  %v16653_v37 = vcombine.high %v6631_v36, %v6639_v31  ;;  %v6647_v47 = vld [vmem:[#allocation15 + $0xd90] sm:$0xff]  ;;  %v16652_v19 = vcombine.low %v6631_v36, %v6639_v31 }
 0x66e   :  { %13194 = vmatpush1.bf16.msra.mxu0 %v16332_v18  ;;  %v16669_v18 = vcombine.high %v6647_v47, %v6655_v30  ;;  %v6407_v48 = vld [vmem:[#allocation15 + $0x610] sm:$0xff]  ;;  %v16412_v49 = vcombine.low %v6391_v16, %v6399_v44 }
 0x66f   :  { %13195 = vmatprep.subr.bf16.mxu0 %v16349_v63  ;;  %v6415_v5 = vld [vmem:[#allocation15 + $0x650] sm:$0xff] }
 0x670   :  { %13235 = vmatpush1.bf16.msra.mxu1 %v16588_v56  ;;  %v6663_v56 = vld [vmem:[#allocation15 + $0xe10] sm:$0xff]  ;;  %v16429_v24 = vcombine.high %v6407_v48, %v6415_v5 }
 0x671   :  { %13236 = vmatprep.subr.bf16.mxu1 %v16605_v0  ;;  %v6671_v63 = vld [vmem:[#allocation15 + $0xe50] sm:$0xff]  ;;  %v16668_v0 = vcombine.low %v6647_v47, %v6655_v30  ;;  %v6216_v47 = vld [vmem:[#allocation15 + $0x18] sm:$0xff] }
 0x672   :  { %13196 = vmatpush1.bf16.msra.mxu0 %v16348_v3  ;;  %v16685_v55 = vcombine.high %v6663_v56, %v6671_v63  ;;  %v6431_v14 = vld [vmem:[#allocation15 + $0x6d0] sm:$0xff]  ;;  %v6224_v30 = vld [vmem:[#allocation15 + $0x58] sm:$0xff] }
 0x673   :  { %13197 = vmatprep.subr.bf16.mxu0 %v16365_v41  ;;  %v6679_v3 = vld [vmem:[#allocation15 + $0xe90] sm:$0xff]  ;;  %v16428_v41 = vcombine.low %v6407_v48, %v6415_v5  ;;  %v16445_v40 = vcombine.high %v6423_v62, %v6431_v14  ;;  %v16239_v48 = vcombine.high %v6216_v47, %v6224_v30 }
 0x674   :  { %13237 = vmatpush1.bf16.msra.mxu1 %v16604_v6  ;;  %v6687_v6 = vld [vmem:[#allocation15 + $0xed0] sm:$0xff] }
 0x675   :  { %13238 = vmatprep.subr.bf16.mxu1 %v16621_v9  ;;  %v16684_v9 = vcombine.low %v6663_v56, %v6671_v63  ;;  %v16701_v60 = vcombine.high %v6679_v3, %v6687_v6  ;;  %v6439_v10 = vld [vmem:[#allocation15 + $0x710] sm:$0xff]  ;;  %v6232_v56 = vld [vmem:[#allocation15 + $0x98] sm:$0xff] }
 0x676   :  { %13198 = vmatpush1.bf16.msra.mxu0 %v16364_v13  ;;  %v6447_v29 = vld [vmem:[#allocation15 + $0x750] sm:$0xff]  ;;  %v6240_v63 = vld [vmem:[#allocation15 + $0xd8] sm:$0xff] }
 0x677   :  { %13199 = vmatprep.subr.bf16.mxu0 %v16381_v21  ;;  %v6695_v13 = vld [vmem:[#allocation15 + $0xf10] sm:$0xff]  ;;  %v16444_v21 = vcombine.low %v6423_v62, %v6431_v14  ;;  %v16461_v32 = vcombine.high %v6439_v10, %v6447_v29  ;;  %v16255_v62 = vcombine.high %v6232_v56, %v6240_v63  ;;  %v6248_v14 = vld [vmem:[#allocation15 + $0x118] sm:$0xff] }
 0x678   :  { %13239 = vmatpush1.bf16.msra.mxu1 %v16620_v38  ;;  %v6703_v38 = vld [vmem:[#allocation15 + $0xf50] sm:$0xff] }
 0x679   :  { %13240 = vmatprep.subr.bf16.mxu1 %v16637_v52  ;;  %v16700_v52 = vcombine.low %v6679_v3, %v6687_v6  ;;  %v16717_v39 = vcombine.high %v6695_v13, %v6703_v38  ;;  %v6455_v36 = vld [vmem:[#allocation15 + $0x790] sm:$0xff]  ;;  %v6256_v3 = vld [vmem:[#allocation15 + $0x158] sm:$0xff] }
 0x67a   :  { %13200 = vmatpush1.bf16.msra.mxu0 %v16380_v15  ;;  %v6463_v31 = vld [vmem:[#allocation15 + $0x7d0] sm:$0xff] }
 0x67b   :  { %13201 = vmatprep.subr.bf16.mxu0 %v16397_v23  ;;  %v6711_v15 = vld [vmem:[#allocation15 + $0xf90] sm:$0xff]  ;;  %v16460_v23 = vcombine.low %v6439_v10, %v6447_v29  ;;  %v16477_v16 = vcombine.high %v6455_v36, %v6463_v31  ;;  %v16271_v10 = vcombine.high %v6248_v14, %v6256_v3 }
 0x67c   :  { %13241 = vmatpush1.bf16.msra.mxu1 %v16636_v54  ;;  %v6719_v54 = vld [vmem:[#allocation15 + $0xfd0] sm:$0xff] }
 0x67d   :  { %13242 = vmatprep.subr.bf16.mxu1 %v16653_v37  ;;  %v16716_v37 = vcombine.low %v6695_v13, %v6703_v38  ;;  %v16733_v44 = vcombine.high %v6711_v15, %v6719_v54  ;;  %v6264_v13 = vld [vmem:[#allocation15 + $0x198] sm:$0xff] }
 0x67e   :  { %13202 = vmatpush1.bf16.msra.mxu0 %v16396_v50  ;;  %v6472_v50 = vld [vmem:[#allocation15 + $0x818] sm:$0xff] }
 0x67f   :  { %13203 = vmatprep.subr.bf16.mxu0 %v16413_v59  ;;  %v16476_v59 = vcombine.low %v6455_v36, %v6463_v31  ;;  %v6272_v38 = vld [vmem:[#allocation15 + $0x1d8] sm:$0xff] }
 0x680   :  { %13243 = vmatpush1.bf16.msra.mxu1 %v16652_v19  ;;  %v6480_v19 = vld [vmem:[#allocation15 + $0x858] sm:$0xff]  ;;  %v16287_v36 = vcombine.high %v6264_v13, %v6272_v38 }
 0x681   :  { %13244 = vmatprep.subr.bf16.mxu1 %v16669_v18  ;;  %v16732_v18 = vcombine.low %v6711_v15, %v6719_v54  ;;  %v16495_v5 = vcombine.high %v6472_v50, %v6480_v19  ;;  %v6280_v15 = vld [vmem:[#allocation15 + $0x218] sm:$0xff] }
 0x682   :  { %13204 = vmatpush1.bf16.msra.mxu0 %v16412_v49  ;;  %v16238_v49 = vcombine.low %v6216_v47, %v6224_v30  ;;  %v6288_v54 = vld [vmem:[#allocation15 + $0x258] sm:$0xff] }
 0x683   :  { %13205 = vmatprep.subr.bf16.mxu0 %v16429_v24  ;;  %v6496_v24 = vld [vmem:[#allocation15 + $0x8d8] sm:$0xff]  ;;  %v16303_v47 = vcombine.high %v6280_v15, %v6288_v54 }
 0x684   :  { %13245 = vmatpush1.bf16.msra.mxu1 %v16668_v0  ;;  %v6488_v0 = vld [vmem:[#allocation15 + $0x898] sm:$0xff] }
 0x685   :  { %13246 = vmatprep.subr.bf16.mxu1 %v16685_v55  ;;  %v16494_v55 = vcombine.low %v6472_v50, %v6480_v19  ;;  %v16511_v6 = vcombine.high %v6488_v0, %v6496_v24  ;;  %v6296_v50 = vld [vmem:[#allocation15 + $0x298] sm:$0xff] }
 0x686   :  { %13206 = vmatpush1.bf16.msra.mxu0 %v16428_v41  ;;  %v6504_v41 = vld [vmem:[#allocation15 + $0x918] sm:$0xff] }
 0x687   :  { %13207 = vmatprep.subr.bf16.mxu0 %v16445_v40  ;;  %v16254_v40 = vcombine.low %v6232_v56, %v6240_v63  ;;  %v6304_v19 = vld [vmem:[#allocation15 + $0x2d8] sm:$0xff] }
 0x688   :  { %13247 = vmatpush1.bf16.msra.mxu1 %v16684_v9  ;;  %v6512_v9 = vld [vmem:[#allocation15 + $0x958] sm:$0xff]  ;;  %v16319_v56 = vcombine.high %v6296_v50, %v6304_v19 }
 0x689   :  { %13248 = vmatprep.subr.bf16.mxu1 %v16701_v60  ;;  %v16510_v60 = vcombine.low %v6488_v0, %v6496_v24  ;;  %v16527_v29 = vcombine.high %v6504_v41, %v6512_v9  ;;  %v6320_v0 = vld [vmem:[#allocation15 + $0x358] sm:$0xff] }
 0x68a   :  { %13208 = vmatpush1.bf16.msra.mxu0 %v16444_v21  ;;  %v6520_v21 = vld [vmem:[#allocation15 + $0x998] sm:$0xff] }
 0x68b   :  { %13209 = vmatprep.subr.bf16.mxu0 %v16461_v32  ;;  %v16270_v32 = vcombine.low %v6248_v14, %v6256_v3  ;;  %v6568_v24 = vld [vmem:[#allocation15 + $0xb18] sm:$0xff] }
 0x68c   :  { %13249 = vmatpush1.bf16.msra.mxu1 %v16700_v52  ;;  %v6528_v52 = vld [vmem:[#allocation15 + $0x9d8] sm:$0xff] }
 0x68d   :  { %13250 = vmatprep.subr.bf16.mxu1 %v16717_v39  ;;  %v16526_v39 = vcombine.low %v6504_v41, %v6512_v9  ;;  %v16543_v31 = vcombine.high %v6520_v21, %v6528_v52  ;;  %v6328_v9 = vld [vmem:[#allocation15 + $0x398] sm:$0xff] }
 0x68e   :  { %13210 = vmatpush1.bf16.msra.mxu0 %v16460_v23  ;;  %v6536_v23 = vld [vmem:[#allocation15 + $0xa18] sm:$0xff] }
 0x68f   :  { %13211 = vmatprep.subr.bf16.mxu0 %v16477_v16  ;;  %v16286_v16 = vcombine.low %v6264_v13, %v6272_v38  ;;  %v6592_v13 = vld [vmem:[#allocation15 + $0xbd8] sm:$0xff] }
 0x690   :  { %13251 = vmatpush1.bf16.msra.mxu1 %v16716_v37  ;;  %v6544_v37 = vld [vmem:[#allocation15 + $0xa58] sm:$0xff] }
 0x691   :  { %13252 = vmatprep.subr.bf16.mxu1 %v16733_v44  ;;  %v16542_v44 = vcombine.low %v6520_v21, %v6528_v52  ;;  %v16559_v30 = vcombine.high %v6536_v23, %v6544_v37 }
 0x692   :  { %13212 = vmatpush1.bf16.msra.mxu0 %v16476_v59  ;;  %v6552_v59 = vld [vmem:[#allocation15 + $0xa98] sm:$0xff] }
 0x693   :  { %13263 = vmatprep.subr.bf16.mxu0 %v16239_v48  ;;  %v16302_v48 = vcombine.low %v6280_v15, %v6288_v54 }
 0x694   :  { %13253 = vmatpush1.bf16.msra.mxu1 %v16732_v18  ;;  %v6560_v18 = vld [vmem:[#allocation15 + $0xad8] sm:$0xff] }
 0x695   :  { %13304 = vmatprep.subr.bf16.mxu1 %v16495_v5  ;;  %13214 = vmatmul.mubr.bf16.vlgmr.msra.gmra.mrb[88].mxu0 %v18249_v1  ;;  %v16558_v5 = vcombine.low %v6536_v23, %v6544_v37  ;;  %v16575_v63 = vcombine.high %v6552_v59, %v6560_v18  ;;  %v16574_v14 = vcombine.low %v6552_v59, %v6560_v18 }
 0x696   :  { %13264 = vmatpush1.bf16.msra.mxu0 %v16238_v49  ;;  %13295 = vmatprep.mubr.bf16.mxu0 %v18237_v61  ;;  %v6312_v49 = vld [vmem:[#allocation15 + $0x318] sm:$0xff] }
 0x697   :  { %13255 = vmatmul.mubr.bf16.vlgmr.msra.gmra.mrb[88].mxu1 %v18251_v27  ;;  %13265 = vmatprep.subr.bf16.mxu0 %v16255_v62  ;;  %v16318_v62 = vcombine.low %v6296_v50, %v6304_v19  ;;  %v16335_v3 = vcombine.high %v6312_v49, %v6320_v0 }
 0x698   :  { %13305 = vmatpush1.bf16.msra.mxu1 %v16494_v55  ;;  %13336 = vmatprep.mubr.bf16.mxu1 %v18240_v58  ;;  %v6576_v55 = vld [vmem:[#allocation15 + $0xb58] sm:$0xff] }
 0x699   :  { %13306 = vmatprep.subr.bf16.mxu1 %v16511_v6  ;;  %v16591_v41 = vcombine.high %v6568_v24, %v6576_v55  ;;  %v16590_v15 = vcombine.low %v6568_v24, %v6576_v55 }
 0x69a   :  { %13266 = vmatpush1.bf16.msra.mxu0 %v16254_v40  ;;  %v6336_v40 = vld [vmem:[#allocation15 + $0x3d8] sm:$0xff] }
 0x69b   :  { %13267 = vmatprep.subr.bf16.mxu0 %v16271_v10  ;;  %v16351_v54 = vcombine.high %v6328_v9, %v6336_v40  ;;  %v16350_v50 = vcombine.low %v6328_v9, %v6336_v40 }
 0x69c   :  { %13307 = vmatpush1.bf16.msra.mxu1 %v16510_v60 }
 0x69d   :  { %13308 = vmatprep.subr.bf16.mxu1 %v16527_v29  ;;  %v6584_v29 = vld [vmem:[#allocation15 + $0xb98] sm:$0xff] }
 0x69e   :  { %13268 = vmatpush1.bf16.msra.mxu0 %v16270_v32  ;;  %v16334_v32 = vcombine.low %v6312_v49, %v6320_v0  ;;  %v16607_v37 = vcombine.high %v6584_v29, %v6592_v13  ;;  %v16606_v19 = vcombine.low %v6584_v29, %v6592_v13  ;;  %v6400_v29 = vld [vmem:[#allocation15 + $0x5d8] sm:$0xff] }
 0x69f   :  { %13269 = vmatprep.subr.bf16.mxu0 %v16287_v36  ;;  %v6648_v13 = vld [vmem:[#allocation15 + $0xd98] sm:$0xff] }
 0x6a0   :  { %13309 = vmatpush1.bf16.msra.mxu1 %v16526_v39 }
 0x6a1   :  { %13310 = vmatprep.subr.bf16.mxu1 %v16543_v31 }
 0x6a2   :  { %13270 = vmatpush1.bf16.msra.mxu0 %v16286_v16  ;;  %v6344_v16 = vld [vmem:[#allocation15 + $0x418] sm:$0xff] }
 0x6a3   :  { %13271 = vmatprep.subr.bf16.mxu0 %v16303_v47  ;;  %v6600_v47 = vld [vmem:[#allocation15 + $0xc18] sm:$0xff] }
 0x6a4   :  { %13311 = vmatpush1.bf16.msra.mxu1 %v16542_v44  ;;  %v6352_v44 = vld [vmem:[#allocation15 + $0x458] sm:$0xff] }
 0x6a5   :  { %13312 = vmatprep.subr.bf16.mxu1 %v16559_v30  ;;  %v6608_v30 = vld [vmem:[#allocation15 + $0xc58] sm:$0xff]  ;;  %v16367_v59 = vcombine.high %v6344_v16, %v6352_v44  ;;  %v16366_v49 = vcombine.low %v6344_v16, %v6352_v44 }
 0x6a6   :  { %13272 = vmatpush1.bf16.msra.mxu0 %v16302_v48  ;;  %v16623_v18 = vcombine.high %v6600_v47, %v6608_v30  ;;  %v6360_v48 = vld [vmem:[#allocation15 + $0x498] sm:$0xff]  ;;  %v16622_v0 = vcombine.low %v6600_v47, %v6608_v30 }
 0x6a7   :  { %13273 = vmatprep.subr.bf16.mxu0 %v16319_v56  ;;  %v6616_v56 = vld [vmem:[#allocation15 + $0xc98] sm:$0xff] }
 0x6a8   :  { %13313 = vmatpush1.bf16.msra.mxu1 %v16558_v5  ;;  %v10409_v6 = vpop.f32.mrb[76].mxu0  ;;  %v6368_v5 = vld [vmem:[#allocation15 + $0x4d8] sm:$0xff] }
 0x6a9   :  { %13314 = vmatprep.subr.bf16.mxu1 %v16575_v63  ;;  %v10411_v10 = vpop.f32.mrb[77].mxu0  ;;  %v6624_v63 = vld [vmem:[#allocation15 + $0xcd8] sm:$0xff]  ;;  %v16383_v24 = vcombine.high %v6360_v48, %v6368_v5 }
 0x6aa   :  { %v10450_v60 = vpop.f32.mrb[76].mxu1  ;;  %v10413_v52 = vpop.f32.mrb[78].mxu0  ;;  %13274 = vmatpush1.bf16.msra.mxu0 %v16318_v62  ;;  %v16639_v55 = vcombine.high %v6616_v56, %v6624_v63  ;;  %v6376_v62 = vld [vmem:[#allocation15 + $0x518] sm:$0xff]  ;;  %v16638_v9 = vcombine.low %v6616_v56, %v6624_v63 }
 0x6ab   :  { %v18273_v38 = vadd.f32 %v10450_v60, %v10409_v6  ;;  %v10452_v21 = vpop.f32.mrb[77].mxu1  ;;  %v10414_v31 = vpop.f32.mrb[79].mxu0  ;;  %13275 = vmatprep.subr.bf16.mxu0 %v16335_v3  ;;  %v6632_v3 = vld [vmem:[#allocation15 + $0xd18] sm:$0xff] }
 0x6ac   :  { %v18275_v39 = vadd.f32 %v10452_v21, %v10411_v10  ;;  %v10454_v36 = vpop.f32.mrb[78].mxu1  ;;  %13315 = vmatpush1.bf16.msra.mxu1 %v16574_v14  ;;  %v6384_v14 = vld [vmem:[#allocation15 + $0x558] sm:$0xff] }
 0x6ad   :  { %v10455_v23 = vpop.f32.mrb[79].mxu1  ;;  %13316 = vmatprep.subr.bf16.mxu1 %v16591_v41  ;;  %v6640_v6 = vld [vmem:[#allocation15 + $0xd58] sm:$0xff]  ;;  %v16382_v41 = vcombine.low %v6360_v48, %v6368_v5  ;;  %v16399_v40 = vcombine.high %v6376_v62, %v6384_v14  ;;  %v16398_v52 = vcombine.low %v6376_v62, %v6384_v14 }
 0x6ae   :  { %13276 = vmatpush1.bf16.msra.mxu0 %v16334_v32  ;;  %v16655_v60 = vcombine.high %v6632_v3, %v6640_v6  ;;  %v6392_v10 = vld [vmem:[#allocation15 + $0x598] sm:$0xff]  ;;  %v16654_v32 = vcombine.low %v6632_v3, %v6640_v6 }
 0x6af   :  { %13277 = vmatprep.subr.bf16.mxu0 %v16351_v54  ;;  %v6656_v21 = vld [vmem:[#allocation15 + $0xdd8] sm:$0xff]  ;;  %v16415_v36 = vcombine.high %v6392_v10, %v6400_v29  ;;  %v16414_v16 = vcombine.low %v6392_v10, %v6400_v29 }
 0x6b0   :  { %13317 = vmatpush1.bf16.msra.mxu1 %v16590_v15  ;;  %v16671_v31 = vcombine.high %v6648_v13, %v6656_v21  ;;  %v6408_v15 = vld [vmem:[#allocation15 + $0x618] sm:$0xff]  ;;  %v16670_v44 = vcombine.low %v6648_v13, %v6656_v21 }
 0x6b1   :  { %13318 = vmatprep.subr.bf16.mxu1 %v16607_v37  ;;  %v6416_v54 = vld [vmem:[#allocation15 + $0x658] sm:$0xff] }
 0x6b2   :  { %13278 = vmatpush1.bf16.msra.mxu0 %v16350_v50  ;;  %v6664_v23 = vld [vmem:[#allocation15 + $0xe18] sm:$0xff]  ;;  %v16431_v47 = vcombine.high %v6408_v15, %v6416_v54  ;;  %v16430_v48 = vcombine.low %v6408_v15, %v6416_v54 }
 0x6b3   :  { %13279 = vmatprep.subr.bf16.mxu0 %v16367_v59  ;;  %v6672_v37 = vld [vmem:[#allocation15 + $0xe58] sm:$0xff] }
 0x6b4   :  { %13319 = vmatpush1.bf16.msra.mxu1 %v16606_v19  ;;  %v16687_v30 = vcombine.high %v6664_v23, %v6672_v37  ;;  %v6424_v50 = vld [vmem:[#allocation15 + $0x698] sm:$0xff]  ;;  %v16686_v5 = vcombine.low %v6664_v23, %v6672_v37 }
 0x6b5   :  { %13320 = vmatprep.subr.bf16.mxu1 %v16623_v18  ;;  %v6432_v19 = vld [vmem:[#allocation15 + $0x6d8] sm:$0xff] }
 0x6b6   :  { %13280 = vmatpush1.bf16.msra.mxu0 %v16366_v49  ;;  %v6680_v59 = vld [vmem:[#allocation15 + $0xe98] sm:$0xff]  ;;  %v16447_v56 = vcombine.high %v6424_v50, %v6432_v19  ;;  %v16446_v62 = vcombine.low %v6424_v50, %v6432_v19  ;;  %v6497_v50 = vld [vmem:[#allocation15 + $0x8e0] sm:$0xff] }
 0x6b7   :  { %13281 = vmatprep.subr.bf16.mxu0 %v16383_v24  ;;  %v6688_v18 = vld [vmem:[#allocation15 + $0xed8] sm:$0xff] }
 0x6b8   :  { %13321 = vmatpush1.bf16.msra.mxu1 %v16622_v0  ;;  %v16703_v63 = vcombine.high %v6680_v59, %v6688_v18  ;;  %v6440_v49 = vld [vmem:[#allocation15 + $0x718] sm:$0xff]  ;;  %v16702_v14 = vcombine.low %v6680_v59, %v6688_v18  ;;  %v6249_v18 = vld [vmem:[#allocation15 + $0x120] sm:$0xff] }
 0x6b9   :  { %13322 = vmatprep.subr.bf16.mxu1 %v16639_v55  ;;  %v6448_v0 = vld [vmem:[#allocation15 + $0x758] sm:$0xff] }
 0x6ba   :  { %13282 = vmatpush1.bf16.msra.mxu0 %v16382_v41  ;;  %v6696_v24 = vld [vmem:[#allocation15 + $0xf18] sm:$0xff]  ;;  %v16463_v3 = vcombine.high %v6440_v49, %v6448_v0  ;;  %v16462_v10 = vcombine.low %v6440_v49, %v6448_v0 }
 0x6bb   :  { %13283 = vmatprep.subr.bf16.mxu0 %v16399_v40  ;;  %v6704_v55 = vld [vmem:[#allocation15 + $0xf58] sm:$0xff] }
 0x6bc   :  { %13323 = vmatpush1.bf16.msra.mxu1 %v16638_v9  ;;  %v16719_v6 = vcombine.high %v6696_v24, %v6704_v55  ;;  %v6456_v41 = vld [vmem:[#allocation15 + $0x798] sm:$0xff]  ;;  %v16718_v29 = vcombine.low %v6696_v24, %v6704_v55 }
 0x6bd   :  { %13324 = vmatprep.subr.bf16.mxu1 %v16655_v60  ;;  %v6464_v9 = vld [vmem:[#allocation15 + $0x7d8] sm:$0xff] }
 0x6be   :  { %13284 = vmatpush1.bf16.msra.mxu0 %v16398_v52  ;;  %v6712_v40 = vld [vmem:[#allocation15 + $0xf98] sm:$0xff]  ;;  %v16479_v13 = vcombine.high %v6456_v41, %v6464_v9  ;;  %v6217_v52 = vld [vmem:[#allocation15 + $0x20] sm:$0xff]  ;;  %v16478_v15 = vcombine.low %v6456_v41, %v6464_v9 }
 0x6bf   :  { %13285 = vmatprep.subr.bf16.mxu0 %v16415_v36  ;;  %v6720_v60 = vld [vmem:[#allocation15 + $0xfd8] sm:$0xff]  ;;  %v6473_v36 = vld [vmem:[#allocation15 + $0x820] sm:$0xff] }
 0x6c0   :  { %13325 = vmatpush1.bf16.msra.mxu1 %v16654_v32  ;;  %v16735_v21 = vcombine.high %v6712_v40, %v6720_v60  ;;  %v6225_v32 = vld [vmem:[#allocation15 + $0x60] sm:$0xff]  ;;  %v16734_v54 = vcombine.low %v6712_v40, %v6720_v60 }
 0x6c1   :  { %13326 = vmatprep.subr.bf16.mxu1 %v16671_v31  ;;  %v6481_v31 = vld [vmem:[#allocation15 + $0x860] sm:$0xff]  ;;  %v16241_v23 = vcombine.high %v6217_v52, %v6225_v32 }
 0x6c2   :  { %13286 = vmatpush1.bf16.msra.mxu0 %v16414_v16  ;;  %v16497_v37 = vcombine.high %v6473_v36, %v6481_v31  ;;  %v6233_v16 = vld [vmem:[#allocation15 + $0xa0] sm:$0xff]  ;;  %v16496_v19 = vcombine.low %v6473_v36, %v6481_v31 }
 0x6c3   :  { %13287 = vmatprep.subr.bf16.mxu0 %v16431_v47  ;;  %v16240_v47 = vcombine.low %v6217_v52, %v6225_v32 }
 0x6c4   :  { %13327 = vmatpush1.bf16.msra.mxu1 %v16670_v44  ;;  %v6241_v44 = vld [vmem:[#allocation15 + $0xe0] sm:$0xff] }
 0x6c5   :  { %13328 = vmatprep.subr.bf16.mxu1 %v16687_v30  ;;  %v6489_v30 = vld [vmem:[#allocation15 + $0x8a0] sm:$0xff]  ;;  %v16257_v59 = vcombine.high %v6233_v16, %v6241_v44  ;;  %v16256_v49 = vcombine.low %v6233_v16, %v6241_v44 }
 0x6c6   :  { %13288 = vmatpush1.bf16.msra.mxu0 %v16430_v48  ;;  %v6257_v48 = vld [vmem:[#allocation15 + $0x160] sm:$0xff]  ;;  %v16512_v0 = vcombine.low %v6489_v30, %v6497_v50 }
 0x6c7   :  { %13289 = vmatprep.subr.bf16.mxu0 %v16447_v56  ;;  %v6505_v56 = vld [vmem:[#allocation15 + $0x920] sm:$0xff]  ;;  %v16273_v24 = vcombine.high %v6249_v18, %v6257_v48  ;;  %v16272_v41 = vcombine.low %v6249_v18, %v6257_v48 }
 0x6c8   :  { %13329 = vmatpush1.bf16.msra.mxu1 %v16686_v5  ;;  %v16513_v5 = vcombine.high %v6489_v30, %v6497_v50  ;;  %v6313_v50 = vld [vmem:[#allocation15 + $0x320] sm:$0xff] }
 0x6c9   :  { %13330 = vmatprep.subr.bf16.mxu1 %v16703_v63  ;;  %v6513_v63 = vld [vmem:[#allocation15 + $0x960] sm:$0xff] }
 0x6ca   :  { %13290 = vmatpush1.bf16.msra.mxu0 %v16446_v62  ;;  %v16529_v55 = vcombine.high %v6505_v56, %v6513_v63  ;;  %v6265_v62 = vld [vmem:[#allocation15 + $0x1a0] sm:$0xff]  ;;  %v16528_v9 = vcombine.low %v6505_v56, %v6513_v63 }
 0x6cb   :  { %13291 = vmatprep.subr.bf16.mxu0 %v16463_v3  ;;  %v6521_v3 = vld [vmem:[#allocation15 + $0x9a0] sm:$0xff] }
 0x6cc   :  { %13331 = vmatpush1.bf16.msra.mxu1 %v16702_v14  ;;  %v6273_v14 = vld [vmem:[#allocation15 + $0x1e0] sm:$0xff] }
 0x6cd   :  { %13332 = vmatprep.subr.bf16.mxu1 %v16719_v6  ;;  %v6529_v6 = vld [vmem:[#allocation15 + $0x9e0] sm:$0xff]  ;;  %v16289_v40 = vcombine.high %v6265_v62, %v6273_v14  ;;  %v16288_v52 = vcombine.low %v6265_v62, %v6273_v14 }
 0x6ce   :  { %13292 = vmatpush1.bf16.msra.mxu0 %v16462_v10  ;;  %v16545_v60 = vcombine.high %v6521_v3, %v6529_v6  ;;  %v6281_v10 = vld [vmem:[#allocation15 + $0x220] sm:$0xff]  ;;  %v16544_v32 = vcombine.low %v6521_v3, %v6529_v6 }
 0x6cf   :  { %13293 = vmatprep.subr.bf16.mxu0 %v16479_v13  ;;  %v6537_v13 = vld [vmem:[#allocation15 + $0xa20] sm:$0xff] }
 0x6d0   :  { %13333 = vmatpush1.bf16.msra.mxu1 %v16718_v29  ;;  %v6289_v29 = vld [vmem:[#allocation15 + $0x260] sm:$0xff] }
 0x6d1   :  { %13334 = vmatprep.subr.bf16.mxu1 %v16735_v21  ;;  %v6545_v21 = vld [vmem:[#allocation15 + $0xa60] sm:$0xff]  ;;  %v16305_v36 = vcombine.high %v6281_v10, %v6289_v29  ;;  %v16304_v16 = vcombine.low %v6281_v10, %v6289_v29 }
 0x6d2   :  { %13294 = vmatpush1.bf16.msra.mxu0 %v16478_v15  ;;  %v16561_v31 = vcombine.high %v6537_v13, %v6545_v21  ;;  %v6297_v15 = vld [vmem:[#allocation15 + $0x2a0] sm:$0xff]  ;;  %v16560_v44 = vcombine.low %v6537_v13, %v6545_v21 }
 0x6d3   :  { %13345 = vmatprep.subr.bf16.mxu0 %v16241_v23  ;;  %v6553_v23 = vld [vmem:[#allocation15 + $0xaa0] sm:$0xff] }
 0x6d4   :  { %13335 = vmatpush1.bf16.msra.mxu1 %v16734_v54  ;;  %v6305_v54 = vld [vmem:[#allocation15 + $0x2e0] sm:$0xff] }
 0x6d5   :  { %13386 = vmatprep.subr.bf16.mxu1 %v16497_v37  ;;  %13296 = vmatmul.mubr.bf16.vlgmr.msra.gmra.mrb[92].mxu0 %v18249_v1  ;;  %v6561_v37 = vld [vmem:[#allocation15 + $0xae0] sm:$0xff]  ;;  %v16320_v48 = vcombine.low %v6297_v15, %v6305_v54 }
 0x6d6   :  { %13346 = vmatpush1.bf16.msra.mxu0 %v16240_v47  ;;  %13377 = vmatprep.mubr.bf16.mxu0 %v18237_v61  ;;  %v16321_v47 = vcombine.high %v6297_v15, %v6305_v54  ;;  %v16577_v30 = vcombine.high %v6553_v23, %v6561_v37  ;;  %v6577_v18 = vld [vmem:[#allocation15 + $0xb60] sm:$0xff] }
 0x6d7   :  { %13337 = vmatmul.mubr.bf16.vlgmr.msra.gmra.mrb[92].mxu1 %v18251_v27  ;;  %13347 = vmatprep.subr.bf16.mxu0 %v16257_v59  ;;  %v6569_v59 = vld [vmem:[#allocation15 + $0xb20] sm:$0xff] }
 0x6d8   :  { %13387 = vmatpush1.bf16.msra.mxu1 %v16496_v19  ;;  %13418 = vmatprep.mubr.bf16.mxu1 %v18240_v58  ;;  %v6321_v19 = vld [vmem:[#allocation15 + $0x360] sm:$0xff]  ;;  %v16592_v21 = vcombine.low %v6569_v59, %v6577_v18 }
 0x6d9   :  { %13388 = vmatprep.subr.bf16.mxu1 %v16513_v5  ;;  %v16576_v5 = vcombine.low %v6553_v23, %v6561_v37  ;;  %v16337_v56 = vcombine.high %v6313_v50, %v6321_v19  ;;  %v6585_v3 = vld [vmem:[#allocation15 + $0xba0] sm:$0xff] }
 0x6da   :  { %13348 = vmatpush1.bf16.msra.mxu0 %v16256_v49  ;;  %v16593_v49 = vcombine.high %v6569_v59, %v6577_v18  ;;  %v6593_v6 = vld [vmem:[#allocation15 + $0xbe0] sm:$0xff] }
 0x6db   :  { %13349 = vmatprep.subr.bf16.mxu0 %v16273_v24  ;;  %v6337_v24 = vld [vmem:[#allocation15 + $0x3e0] sm:$0xff]  ;;  %v16608_v37 = vcombine.low %v6585_v3, %v6593_v6 }
 0x6dc   :  { %13389 = vmatpush1.bf16.msra.mxu1 %v16512_v0  ;;  %v6329_v0 = vld [vmem:[#allocation15 + $0x3a0] sm:$0xff] }
 0x6dd   :  { %13390 = vmatprep.subr.bf16.mxu1 %v16529_v55  ;;  %v6353_v15 = vld [vmem:[#allocation15 + $0x460] sm:$0xff]  ;;  %v16352_v23 = vcombine.low %v6329_v0, %v6337_v24 }
 0x6de   :  { %13350 = vmatpush1.bf16.msra.mxu0 %v16272_v41  ;;  %v6609_v54 = vld [vmem:[#allocation15 + $0xc60] sm:$0xff] }
 0x6df   :  { %13351 = vmatprep.subr.bf16.mxu0 %v16289_v40 }
 0x6e0   :  { %13391 = vmatpush1.bf16.msra.mxu1 %v16528_v9 }
 0x6e1   :  { %13392 = vmatprep.subr.bf16.mxu1 %v16545_v60  ;;  %v16336_v60 = vcombine.low %v6313_v50, %v6321_v19  ;;  %v6617_v50 = vld [vmem:[#allocation15 + $0xca0] sm:$0xff] }
 0x6e2   :  { %13352 = vmatpush1.bf16.msra.mxu0 %v16288_v52  ;;  %v16353_v52 = vcombine.high %v6329_v0, %v6337_v24  ;;  %v6625_v19 = vld [vmem:[#allocation15 + $0xce0] sm:$0xff] }
 0x6e3   :  { %13353 = vmatprep.subr.bf16.mxu0 %v16305_v36  ;;  %v16609_v36 = vcombine.high %v6585_v3, %v6593_v6  ;;  %v6641_v0 = vld [vmem:[#allocation15 + $0xd60] sm:$0xff] }
 0x6e4   :  { %13393 = vmatpush1.bf16.msra.mxu1 %v16544_v32  ;;  %v6393_v3 = vld [vmem:[#allocation15 + $0x5a0] sm:$0xff] }
 0x6e5   :  { %13394 = vmatprep.subr.bf16.mxu1 %v16561_v31  ;;  %v6345_v31 = vld [vmem:[#allocation15 + $0x420] sm:$0xff] }
 0x6e6   :  { %13354 = vmatpush1.bf16.msra.mxu0 %v16304_v16  ;;  %v16369_v16 = vcombine.high %v6345_v31, %v6353_v15  ;;  %v16368_v59 = vcombine.low %v6345_v31, %v6353_v15  ;;  %v6401_v6 = vld [vmem:[#allocation15 + $0x5e0] sm:$0xff] }
 0x6e7   :  { %13355 = vmatprep.subr.bf16.mxu0 %v16321_v47  ;;  %v6361_v47 = vld [vmem:[#allocation15 + $0x4a0] sm:$0xff]  ;;  %v16416_v31 = vcombine.low %v6393_v3, %v6401_v6 }
 0x6e8   :  { %13395 = vmatpush1.bf16.msra.mxu1 %v16560_v44  ;;  %v13051_v63 = vpop.f32.mrb[80].mxu0 }
 0x6e9   :  { %13396 = vmatprep.subr.bf16.mxu1 %v16577_v30  ;;  %v13052_v55 = vadd.f32 %v13051_v63, %v18209_v12  ;;  %v13053_v14 = vpop.f32.mrb[81].mxu0  ;;  %v6369_v30 = vld [vmem:[#allocation15 + $0x4e0] sm:$0xff] }
 0x6ea   :  { %v13092_v62 = vpop.f32.mrb[80].mxu1  ;;  %v13054_v41 = vadd.f32 %v13053_v14, %v18211_v26  ;;  %v13055_v40 = vpop.f32.mrb[82].mxu0  ;;  %13356 = vmatpush1.bf16.msra.mxu0 %v16320_v48  ;;  %v6601_v26 = vld [vmem:[#allocation15 + $0xc20] sm:$0xff]  ;;  %v16385_v48 = vcombine.high %v6361_v47, %v6369_v30  ;;  %v16384_v24 = vcombine.low %v6361_v47, %v6369_v30 }
 0x6eb   :  { %v13094_v9 = vpop.f32.mrb[81].mxu1  ;;  %v18283_v10 = vadd.f32 %v13092_v62, %v13052_v55  ;;  %v13056_v13 = vpop.f32.mrb[83].mxu0  ;;  %13357 = vmatprep.subr.bf16.mxu0 %v16337_v56  ;;  %v16625_v44 = vcombine.high %v6601_v26, %v6609_v54  ;;  %v16624_v18 = vcombine.low %v6601_v26, %v6609_v54  ;;  %v6377_v56 = vld [vmem:[#allocation15 + $0x520] sm:$0xff]  ;;  %v16640_v55 = vcombine.low %v6617_v50, %v6625_v19 }
 0x6ec   :  { %v13096_v29 = vpop.f32.mrb[82].mxu1  ;;  %13397 = vmatpush1.bf16.msra.mxu1 %v16576_v5  ;;  %v18285_v32 = vadd.f32 %v13094_v9, %v13054_v41  ;;  %v16641_v5 = vcombine.high %v6617_v50, %v6625_v19  ;;  %v6385_v63 = vld [vmem:[#allocation15 + $0x560] sm:$0xff] }
 0x6ed   :  { %v13097_v12 = vpop.f32.mrb[83].mxu1  ;;  %13398 = vmatprep.subr.bf16.mxu1 %v16593_v49  ;;  %v6633_v49 = vld [vmem:[#allocation15 + $0xd20] sm:$0xff]  ;;  %v16401_v62 = vcombine.high %v6377_v56, %v6385_v63  ;;  %v16400_v40 = vcombine.low %v6377_v56, %v6385_v63  ;;  %v16417_v29 = vcombine.high %v6393_v3, %v6401_v6 }
 0x6ee   :  { %13358 = vmatpush1.bf16.msra.mxu0 %v16336_v60  ;;  %v16657_v14 = vcombine.high %v6633_v49, %v6641_v0  ;;  %v6649_v41 = vld [vmem:[#allocation15 + $0xda0] sm:$0xff]  ;;  %v16656_v60 = vcombine.low %v6633_v49, %v6641_v0 }
 0x6ef   :  { %13359 = vmatprep.subr.bf16.mxu0 %v16353_v52  ;;  %v6657_v9 = vld [vmem:[#allocation15 + $0xde0] sm:$0xff] }
 0x6f0   :  { %13399 = vmatpush1.bf16.msra.mxu1 %v16592_v21  ;;  %v16673_v13 = vcombine.high %v6649_v41, %v6657_v9  ;;  %v6409_v21 = vld [vmem:[#allocation15 + $0x620] sm:$0xff]  ;;  %v16672_v15 = vcombine.low %v6649_v41, %v6657_v9 }
 0x6f1   :  { %13400 = vmatprep.subr.bf16.mxu1 %v16609_v36  ;;  %v6417_v52 = vld [vmem:[#allocation15 + $0x660] sm:$0xff] }
 0x6f2   :  { %13360 = vmatpush1.bf16.msra.mxu0 %v16352_v23  ;;  %v6665_v12 = vld [vmem:[#allocation15 + $0xe20] sm:$0xff]  ;;  %v16433_v26 = vcombine.high %v6409_v21, %v6417_v52  ;;  %v16432_v47 = vcombine.low %v6409_v21, %v6417_v52 }
 0x6f3   :  { %13361 = vmatprep.subr.bf16.mxu0 %v16369_v16  ;;  %v6673_v36 = vld [vmem:[#allocation15 + $0xe60] sm:$0xff] }
 0x6f4   :  { %13401 = vmatpush1.bf16.msra.mxu1 %v16608_v37  ;;  %v16689_v54 = vcombine.high %v6665_v12, %v6673_v36  ;;  %v6425_v23 = vld [vmem:[#allocation15 + $0x6a0] sm:$0xff]  ;;  %v16688_v30 = vcombine.low %v6665_v12, %v6673_v36 }
 0x6f5   :  { %13402 = vmatprep.subr.bf16.mxu1 %v16625_v44  ;;  %v6433_v37 = vld [vmem:[#allocation15 + $0x6e0] sm:$0xff] }
 0x6f6   :  { %13362 = vmatpush1.bf16.msra.mxu0 %v16368_v59  ;;  %v6681_v16 = vld [vmem:[#allocation15 + $0xea0] sm:$0xff]  ;;  %v16449_v50 = vcombine.high %v6425_v23, %v6433_v37  ;;  %v16448_v56 = vcombine.low %v6425_v23, %v6433_v37  ;;  %v6498_v23 = vld [vmem:[#allocation15 + $0x8e8] sm:$0xff] }
 0x6f7   :  { %13363 = vmatprep.subr.bf16.mxu0 %v16385_v48  ;;  %v6689_v44 = vld [vmem:[#allocation15 + $0xee0] sm:$0xff] }
 0x6f8   :  { %13403 = vmatpush1.bf16.msra.mxu1 %v16624_v18  ;;  %v16705_v19 = vcombine.high %v6681_v16, %v6689_v44  ;;  %v6441_v59 = vld [vmem:[#allocation15 + $0x720] sm:$0xff]  ;;  %v16704_v63 = vcombine.low %v6681_v16, %v6689_v44  ;;  %v6250_v44 = vld [vmem:[#allocation15 + $0x128] sm:$0xff] }
 0x6f9   :  { %13404 = vmatprep.subr.bf16.mxu1 %v16641_v5  ;;  %v6449_v18 = vld [vmem:[#allocation15 + $0x760] sm:$0xff] }
 0x6fa   :  { %13364 = vmatpush1.bf16.msra.mxu0 %v16384_v24  ;;  %v6697_v48 = vld [vmem:[#allocation15 + $0xf20] sm:$0xff]  ;;  %v16465_v49 = vcombine.high %v6441_v59, %v6449_v18  ;;  %v16464_v3 = vcombine.low %v6441_v59, %v6449_v18 }
 0x6fb   :  { %13365 = vmatprep.subr.bf16.mxu0 %v16401_v62  ;;  %v6705_v5 = vld [vmem:[#allocation15 + $0xf60] sm:$0xff] }
 0x6fc   :  { %13405 = vmatpush1.bf16.msra.mxu1 %v16640_v55  ;;  %v16721_v0 = vcombine.high %v6697_v48, %v6705_v5  ;;  %v6457_v24 = vld [vmem:[#allocation15 + $0x7a0] sm:$0xff]  ;;  %v16720_v6 = vcombine.low %v6697_v48, %v6705_v5 }
 0x6fd   :  { %13406 = vmatprep.subr.bf16.mxu1 %v16657_v14  ;;  %v6465_v55 = vld [vmem:[#allocation15 + $0x7e0] sm:$0xff] }
 0x6fe   :  { %13366 = vmatpush1.bf16.msra.mxu0 %v16400_v40  ;;  %v6713_v62 = vld [vmem:[#allocation15 + $0xfa0] sm:$0xff]  ;;  %v16481_v41 = vcombine.high %v6457_v24, %v6465_v55  ;;  %v6218_v40 = vld [vmem:[#allocation15 + $0x28] sm:$0xff]  ;;  %v16480_v21 = vcombine.low %v6457_v24, %v6465_v55 }
 0x6ff   :  { %13367 = vmatprep.subr.bf16.mxu0 %v16417_v29  ;;  %v6721_v14 = vld [vmem:[#allocation15 + $0xfe0] sm:$0xff]  ;;  %v6474_v29 = vld [vmem:[#allocation15 + $0x828] sm:$0xff] }
 0x700   :  { %13407 = vmatpush1.bf16.msra.mxu1 %v16656_v60  ;;  %v16737_v9 = vcombine.high %v6713_v62, %v6721_v14  ;;  %v6226_v60 = vld [vmem:[#allocation15 + $0x68] sm:$0xff]  ;;  %v16736_v52 = vcombine.low %v6713_v62, %v6721_v14 }
 0x701   :  { %13408 = vmatprep.subr.bf16.mxu1 %v16673_v13  ;;  %v6482_v13 = vld [vmem:[#allocation15 + $0x868] sm:$0xff]  ;;  %v16243_v12 = vcombine.high %v6218_v40, %v6226_v60 }
 0x702   :  { %13368 = vmatpush1.bf16.msra.mxu0 %v16416_v31  ;;  %v16499_v36 = vcombine.high %v6474_v29, %v6482_v13  ;;  %v6234_v31 = vld [vmem:[#allocation15 + $0xa8] sm:$0xff]  ;;  %v16498_v37 = vcombine.low %v6474_v29, %v6482_v13 }
 0x703   :  { %13369 = vmatprep.subr.bf16.mxu0 %v16433_v26  ;;  %v16242_v26 = vcombine.low %v6218_v40, %v6226_v60 }
 0x704   :  { %13409 = vmatpush1.bf16.msra.mxu1 %v16672_v15  ;;  %v6242_v15 = vld [vmem:[#allocation15 + $0xe8] sm:$0xff] }
 0x705   :  { %13410 = vmatprep.subr.bf16.mxu1 %v16689_v54  ;;  %v6490_v54 = vld [vmem:[#allocation15 + $0x8a8] sm:$0xff]  ;;  %v16259_v16 = vcombine.high %v6234_v31, %v6242_v15  ;;  %v16258_v59 = vcombine.low %v6234_v31, %v6242_v15 }
 0x706   :  { %13370 = vmatpush1.bf16.msra.mxu0 %v16432_v47  ;;  %v6258_v47 = vld [vmem:[#allocation15 + $0x168] sm:$0xff]  ;;  %v16514_v18 = vcombine.low %v6490_v54, %v6498_v23 }
 0x707   :  { %13371 = vmatprep.subr.bf16.mxu0 %v16449_v50  ;;  %v6506_v50 = vld [vmem:[#allocation15 + $0x928] sm:$0xff]  ;;  %v16275_v48 = vcombine.high %v6250_v44, %v6258_v47  ;;  %v16274_v24 = vcombine.low %v6250_v44, %v6258_v47 }
 0x708   :  { %13411 = vmatpush1.bf16.msra.mxu1 %v16688_v30  ;;  %v16515_v30 = vcombine.high %v6490_v54, %v6498_v23  ;;  %v6314_v23 = vld [vmem:[#allocation15 + $0x328] sm:$0xff] }
 0x709   :  { %13412 = vmatprep.subr.bf16.mxu1 %v16705_v19  ;;  %v6514_v19 = vld [vmem:[#allocation15 + $0x968] sm:$0xff] }
 0x70a   :  { %13372 = vmatpush1.bf16.msra.mxu0 %v16448_v56  ;;  %v16531_v5 = vcombine.high %v6506_v50, %v6514_v19  ;;  %v6266_v56 = vld [vmem:[#allocation15 + $0x1a8] sm:$0xff]  ;;  %v16530_v55 = vcombine.low %v6506_v50, %v6514_v19 }
 0x70b   :  { %13373 = vmatprep.subr.bf16.mxu0 %v16465_v49  ;;  %v6522_v49 = vld [vmem:[#allocation15 + $0x9a8] sm:$0xff] }
 0x70c   :  { %13413 = vmatpush1.bf16.msra.mxu1 %v16704_v63  ;;  %v6274_v63 = vld [vmem:[#allocation15 + $0x1e8] sm:$0xff] }
 0x70d   :  { %13414 = vmatprep.subr.bf16.mxu1 %v16721_v0  ;;  %v6530_v0 = vld [vmem:[#allocation15 + $0x9e8] sm:$0xff]  ;;  %v16291_v62 = vcombine.high %v6266_v56, %v6274_v63  ;;  %v16290_v40 = vcombine.low %v6266_v56, %v6274_v63 }
 0x70e   :  { %13374 = vmatpush1.bf16.msra.mxu0 %v16464_v3  ;;  %v16547_v14 = vcombine.high %v6522_v49, %v6530_v0  ;;  %v6282_v3 = vld [vmem:[#allocation15 + $0x228] sm:$0xff]  ;;  %v16546_v60 = vcombine.low %v6522_v49, %v6530_v0 }
 0x70f   :  { %13375 = vmatprep.subr.bf16.mxu0 %v16481_v41  ;;  %v6538_v41 = vld [vmem:[#allocation15 + $0xa28] sm:$0xff] }
 0x710   :  { %13415 = vmatpush1.bf16.msra.mxu1 %v16720_v6  ;;  %v6290_v6 = vld [vmem:[#allocation15 + $0x268] sm:$0xff] }
 0x711   :  { %13416 = vmatprep.subr.bf16.mxu1 %v16737_v9  ;;  %v6546_v9 = vld [vmem:[#allocation15 + $0xa68] sm:$0xff]  ;;  %v16307_v29 = vcombine.high %v6282_v3, %v6290_v6  ;;  %v16306_v31 = vcombine.low %v6282_v3, %v6290_v6 }
 0x712   :  { %13376 = vmatpush1.bf16.msra.mxu0 %v16480_v21  ;;  %v16563_v13 = vcombine.high %v6538_v41, %v6546_v9  ;;  %v6298_v21 = vld [vmem:[#allocation15 + $0x2a8] sm:$0xff]  ;;  %v16562_v15 = vcombine.low %v6538_v41, %v6546_v9 }
 0x713   :  { %13427 = vmatprep.subr.bf16.mxu0 %v16243_v12  ;;  %v6554_v12 = vld [vmem:[#allocation15 + $0xaa8] sm:$0xff] }
 0x714   :  { %13417 = vmatpush1.bf16.msra.mxu1 %v16736_v52  ;;  %v6306_v52 = vld [vmem:[#allocation15 + $0x2e8] sm:$0xff] }
 0x715   :  { %13468 = vmatprep.subr.bf16.mxu1 %v16499_v36  ;;  %13378 = vmatmul.mubr.bf16.vlgmr.msra.gmra.mrb[96].mxu0 %v18249_v1  ;;  %v6562_v36 = vld [vmem:[#allocation15 + $0xae8] sm:$0xff]  ;;  %v16322_v47 = vcombine.low %v6298_v21, %v6306_v52 }
 0x716   :  { %13428 = vmatpush1.bf16.msra.mxu0 %v16242_v26  ;;  %13459 = vmatprep.mubr.bf16.mxu0 %v18237_v61  ;;  %v16323_v26 = vcombine.high %v6298_v21, %v6306_v52  ;;  %v16579_v54 = vcombine.high %v6554_v12, %v6562_v36  ;;  %v6578_v44 = vld [vmem:[#allocation15 + $0xb68] sm:$0xff] }
 0x717   :  { %13419 = vmatmul.mubr.bf16.vlgmr.msra.gmra.mrb[96].mxu1 %v18251_v27  ;;  %13429 = vmatprep.subr.bf16.mxu0 %v16259_v16  ;;  %v6570_v16 = vld [vmem:[#allocation15 + $0xb28] sm:$0xff] }
 0x718   :  { %13469 = vmatpush1.bf16.msra.mxu1 %v16498_v37  ;;  %13500 = vmatprep.mubr.bf16.mxu1 %v18240_v58  ;;  %v6322_v37 = vld [vmem:[#allocation15 + $0x368] sm:$0xff]  ;;  %v16594_v9 = vcombine.low %v6570_v16, %v6578_v44 }
 0x719   :  { %13470 = vmatprep.subr.bf16.mxu1 %v16515_v30  ;;  %v16578_v30 = vcombine.low %v6554_v12, %v6562_v36  ;;  %v16339_v50 = vcombine.high %v6314_v23, %v6322_v37  ;;  %v6586_v49 = vld [vmem:[#allocation15 + $0xba8] sm:$0xff] }
 0x71a   :  { %13430 = vmatpush1.bf16.msra.mxu0 %v16258_v59  ;;  %v16595_v59 = vcombine.high %v6570_v16, %v6578_v44  ;;  %v6594_v0 = vld [vmem:[#allocation15 + $0xbe8] sm:$0xff] }
 0x71b   :  { %13431 = vmatprep.subr.bf16.mxu0 %v16275_v48  ;;  %v6338_v48 = vld [vmem:[#allocation15 + $0x3e8] sm:$0xff]  ;;  %v16610_v36 = vcombine.low %v6586_v49, %v6594_v0 }
 0x71c   :  { %13471 = vmatpush1.bf16.msra.mxu1 %v16514_v18  ;;  %v6330_v18 = vld [vmem:[#allocation15 + $0x3a8] sm:$0xff] }
 0x71d   :  { %13472 = vmatprep.subr.bf16.mxu1 %v16531_v5  ;;  %v6354_v21 = vld [vmem:[#allocation15 + $0x468] sm:$0xff]  ;;  %v16354_v12 = vcombine.low %v6330_v18, %v6338_v48 }
 0x71e   :  { %13432 = vmatpush1.bf16.msra.mxu0 %v16274_v24  ;;  %v6610_v52 = vld [vmem:[#allocation15 + $0xc68] sm:$0xff] }
 0x71f   :  { %13433 = vmatprep.subr.bf16.mxu0 %v16291_v62 }
 0x720   :  { %13473 = vmatpush1.bf16.msra.mxu1 %v16530_v55 }
 0x721   :  { %13474 = vmatprep.subr.bf16.mxu1 %v16547_v14  ;;  %v16338_v14 = vcombine.low %v6314_v23, %v6322_v37  ;;  %v6618_v23 = vld [vmem:[#allocation15 + $0xca8] sm:$0xff] }
 0x722   :  { %13434 = vmatpush1.bf16.msra.mxu0 %v16290_v40  ;;  %v16355_v40 = vcombine.high %v6330_v18, %v6338_v48  ;;  %v6626_v37 = vld [vmem:[#allocation15 + $0xce8] sm:$0xff] }
 0x723   :  { %13435 = vmatprep.subr.bf16.mxu0 %v16307_v29  ;;  %v16611_v29 = vcombine.high %v6586_v49, %v6594_v0  ;;  %v6642_v18 = vld [vmem:[#allocation15 + $0xd68] sm:$0xff] }
 0x724   :  { %13475 = vmatpush1.bf16.msra.mxu1 %v16546_v60  ;;  %v6394_v49 = vld [vmem:[#allocation15 + $0x5a8] sm:$0xff] }
 0x725   :  { %13476 = vmatprep.subr.bf16.mxu1 %v16563_v13  ;;  %v6346_v13 = vld [vmem:[#allocation15 + $0x428] sm:$0xff] }
 0x726   :  { %13436 = vmatpush1.bf16.msra.mxu0 %v16306_v31  ;;  %v16371_v31 = vcombine.high %v6346_v13, %v6354_v21  ;;  %v16370_v16 = vcombine.low %v6346_v13, %v6354_v21  ;;  %v6402_v0 = vld [vmem:[#allocation15 + $0x5e8] sm:$0xff] }
 0x727   :  { %13437 = vmatprep.subr.bf16.mxu0 %v16323_v26  ;;  %v6362_v26 = vld [vmem:[#allocation15 + $0x4a8] sm:$0xff]  ;;  %v16418_v13 = vcombine.low %v6394_v49, %v6402_v0 }
 0x728   :  { %13477 = vmatpush1.bf16.msra.mxu1 %v16562_v15  ;;  %v13133_v19 = vpop.f32.mrb[84].mxu0 }
 0x729   :  { %13478 = vmatprep.subr.bf16.mxu1 %v16579_v54  ;;  %v13134_v5 = vadd.f32 %v13133_v19, %v18217_v8  ;;  %v13135_v63 = vpop.f32.mrb[85].mxu0  ;;  %v6370_v54 = vld [vmem:[#allocation15 + $0x4e8] sm:$0xff] }
 0x72a   :  { %v13174_v56 = vpop.f32.mrb[84].mxu1  ;;  %v13136_v24 = vadd.f32 %v13135_v63, %v18219_v42  ;;  %v13137_v62 = vpop.f32.mrb[86].mxu0  ;;  %13438 = vmatpush1.bf16.msra.mxu0 %v16322_v47  ;;  %v6602_v42 = vld [vmem:[#allocation15 + $0xc28] sm:$0xff]  ;;  %v16387_v47 = vcombine.high %v6362_v26, %v6370_v54  ;;  %v16386_v48 = vcombine.low %v6362_v26, %v6370_v54 }
 0x72b   :  { %v13176_v55 = vpop.f32.mrb[85].mxu1  ;;  %v18293_v3 = vadd.f32 %v13174_v56, %v13134_v5  ;;  %v13138_v41 = vpop.f32.mrb[87].mxu0  ;;  %13439 = vmatprep.subr.bf16.mxu0 %v16339_v50  ;;  %v16627_v15 = vcombine.high %v6602_v42, %v6610_v52  ;;  %v16626_v44 = vcombine.low %v6602_v42, %v6610_v52  ;;  %v6378_v50 = vld [vmem:[#allocation15 + $0x528] sm:$0xff]  ;;  %v16642_v5 = vcombine.low %v6618_v23, %v6626_v37 }
 0x72c   :  { %v13178_v6 = vpop.f32.mrb[86].mxu1  ;;  %13479 = vmatpush1.bf16.msra.mxu1 %v16578_v30  ;;  %v18295_v60 = vadd.f32 %v13176_v55, %v13136_v24  ;;  %v16643_v30 = vcombine.high %v6618_v23, %v6626_v37  ;;  %v6386_v19 = vld [vmem:[#allocation15 + $0x568] sm:$0xff] }
 0x72d   :  { %v13179_v8 = vpop.f32.mrb[87].mxu1  ;;  %13480 = vmatprep.subr.bf16.mxu1 %v16595_v59  ;;  %v6634_v59 = vld [vmem:[#allocation15 + $0xd28] sm:$0xff]  ;;  %v16403_v56 = vcombine.high %v6378_v50, %v6386_v19  ;;  %v16402_v62 = vcombine.low %v6378_v50, %v6386_v19  ;;  %v16419_v6 = vcombine.high %v6394_v49, %v6402_v0 }
 0x72e   :  { %13440 = vmatpush1.bf16.msra.mxu0 %v16338_v14  ;;  %v16659_v63 = vcombine.high %v6634_v59, %v6642_v18  ;;  %v6650_v24 = vld [vmem:[#allocation15 + $0xda8] sm:$0xff]  ;;  %v16658_v14 = vcombine.low %v6634_v59, %v6642_v18 }
 0x72f   :  { %13441 = vmatprep.subr.bf16.mxu0 %v16355_v40  ;;  %v6658_v55 = vld [vmem:[#allocation15 + $0xde8] sm:$0xff] }
 0x730   :  { %13481 = vmatpush1.bf16.msra.mxu1 %v16594_v9  ;;  %v16675_v41 = vcombine.high %v6650_v24, %v6658_v55  ;;  %v6410_v9 = vld [vmem:[#allocation15 + $0x628] sm:$0xff]  ;;  %v16674_v21 = vcombine.low %v6650_v24, %v6658_v55 }
 0x731   :  { %13482 = vmatprep.subr.bf16.mxu1 %v16611_v29  ;;  %v6418_v40 = vld [vmem:[#allocation15 + $0x668] sm:$0xff] }
 0x732   :  { %13442 = vmatpush1.bf16.msra.mxu0 %v16354_v12  ;;  %v6666_v8 = vld [vmem:[#allocation15 + $0xe28] sm:$0xff]  ;;  %v16435_v42 = vcombine.high %v6410_v9, %v6418_v40  ;;  %v16434_v26 = vcombine.low %v6410_v9, %v6418_v40 }
 0x733   :  { %13443 = vmatprep.subr.bf16.mxu0 %v16371_v31  ;;  %v6674_v29 = vld [vmem:[#allocation15 + $0xe68] sm:$0xff] }
 0x734   :  { %13483 = vmatpush1.bf16.msra.mxu1 %v16610_v36  ;;  %v16691_v52 = vcombine.high %v6666_v8, %v6674_v29  ;;  %v6426_v12 = vld [vmem:[#allocation15 + $0x6a8] sm:$0xff]  ;;  %v16690_v54 = vcombine.low %v6666_v8, %v6674_v29 }
 0x735   :  { %13484 = vmatprep.subr.bf16.mxu1 %v16627_v15  ;;  %v6434_v36 = vld [vmem:[#allocation15 + $0x6e8] sm:$0xff] }
 0x736   :  { %13444 = vmatpush1.bf16.msra.mxu0 %v16370_v16  ;;  %v6682_v31 = vld [vmem:[#allocation15 + $0xea8] sm:$0xff]  ;;  %v16451_v23 = vcombine.high %v6426_v12, %v6434_v36  ;;  %v16450_v50 = vcombine.low %v6426_v12, %v6434_v36  ;;  %v6499_v12 = vld [vmem:[#allocation15 + $0x8f0] sm:$0xff] }
 0x737   :  { %13445 = vmatprep.subr.bf16.mxu0 %v16387_v47  ;;  %v6690_v15 = vld [vmem:[#allocation15 + $0xee8] sm:$0xff] }
 0x738   :  { %13485 = vmatpush1.bf16.msra.mxu1 %v16626_v44  ;;  %v16707_v37 = vcombine.high %v6682_v31, %v6690_v15  ;;  %v6442_v16 = vld [vmem:[#allocation15 + $0x728] sm:$0xff]  ;;  %v16706_v19 = vcombine.low %v6682_v31, %v6690_v15  ;;  %v6251_v15 = vld [vmem:[#allocation15 + $0x130] sm:$0xff] }
 0x739   :  { %13486 = vmatprep.subr.bf16.mxu1 %v16643_v30  ;;  %v6450_v44 = vld [vmem:[#allocation15 + $0x768] sm:$0xff] }
 0x73a   :  { %13446 = vmatpush1.bf16.msra.mxu0 %v16386_v48  ;;  %v6698_v47 = vld [vmem:[#allocation15 + $0xf28] sm:$0xff]  ;;  %v16467_v59 = vcombine.high %v6442_v16, %v6450_v44  ;;  %v16466_v49 = vcombine.low %v6442_v16, %v6450_v44 }
 0x73b   :  { %13447 = vmatprep.subr.bf16.mxu0 %v16403_v56  ;;  %v6706_v30 = vld [vmem:[#allocation15 + $0xf68] sm:$0xff] }
 0x73c   :  { %13487 = vmatpush1.bf16.msra.mxu1 %v16642_v5  ;;  %v16723_v18 = vcombine.high %v6698_v47, %v6706_v30  ;;  %v6458_v48 = vld [vmem:[#allocation15 + $0x7a8] sm:$0xff]  ;;  %v16722_v0 = vcombine.low %v6698_v47, %v6706_v30 }
 0x73d   :  { %13488 = vmatprep.subr.bf16.mxu1 %v16659_v63  ;;  %v6466_v5 = vld [vmem:[#allocation15 + $0x7e8] sm:$0xff] }
 0x73e   :  { %13448 = vmatpush1.bf16.msra.mxu0 %v16402_v62  ;;  %v6714_v56 = vld [vmem:[#allocation15 + $0xfa8] sm:$0xff]  ;;  %v16483_v24 = vcombine.high %v6458_v48, %v6466_v5  ;;  %v6219_v62 = vld [vmem:[#allocation15 + $0x30] sm:$0xff]  ;;  %v16482_v9 = vcombine.low %v6458_v48, %v6466_v5 }
 0x73f   :  { %13449 = vmatprep.subr.bf16.mxu0 %v16419_v6  ;;  %v6722_v63 = vld [vmem:[#allocation15 + $0xfe8] sm:$0xff]  ;;  %v6475_v6 = vld [vmem:[#allocation15 + $0x830] sm:$0xff] }
 0x740   :  { %13489 = vmatpush1.bf16.msra.mxu1 %v16658_v14  ;;  %v16739_v55 = vcombine.high %v6714_v56, %v6722_v63  ;;  %v6227_v14 = vld [vmem:[#allocation15 + $0x70] sm:$0xff]  ;;  %v16738_v40 = vcombine.low %v6714_v56, %v6722_v63 }
 0x741   :  { %13490 = vmatprep.subr.bf16.mxu1 %v16675_v41  ;;  %v6483_v41 = vld [vmem:[#allocation15 + $0x870] sm:$0xff]  ;;  %v16245_v8 = vcombine.high %v6219_v62, %v6227_v14 }
 0x742   :  { %13450 = vmatpush1.bf16.msra.mxu0 %v16418_v13  ;;  %v16501_v29 = vcombine.high %v6475_v6, %v6483_v41  ;;  %v6235_v13 = vld [vmem:[#allocation15 + $0xb0] sm:$0xff]  ;;  %v16500_v36 = vcombine.low %v6475_v6, %v6483_v41 }
 0x743   :  { %13451 = vmatprep.subr.bf16.mxu0 %v16435_v42  ;;  %v16244_v42 = vcombine.low %v6219_v62, %v6227_v14 }
 0x744   :  { %13491 = vmatpush1.bf16.msra.mxu1 %v16674_v21  ;;  %v6243_v21 = vld [vmem:[#allocation15 + $0xf0] sm:$0xff] }
 0x745   :  { %13492 = vmatprep.subr.bf16.mxu1 %v16691_v52  ;;  %v6491_v52 = vld [vmem:[#allocation15 + $0x8b0] sm:$0xff]  ;;  %v16261_v31 = vcombine.high %v6235_v13, %v6243_v21  ;;  %v16260_v16 = vcombine.low %v6235_v13, %v6243_v21 }
 0x746   :  { %13452 = vmatpush1.bf16.msra.mxu0 %v16434_v26  ;;  %v6259_v26 = vld [vmem:[#allocation15 + $0x170] sm:$0xff]  ;;  %v16516_v44 = vcombine.low %v6491_v52, %v6499_v12 }
 0x747   :  { %13453 = vmatprep.subr.bf16.mxu0 %v16451_v23  ;;  %v6507_v23 = vld [vmem:[#allocation15 + $0x930] sm:$0xff]  ;;  %v16277_v47 = vcombine.high %v6251_v15, %v6259_v26  ;;  %v16276_v48 = vcombine.low %v6251_v15, %v6259_v26 }
 0x748   :  { %13493 = vmatpush1.bf16.msra.mxu1 %v16690_v54  ;;  %v16517_v54 = vcombine.high %v6491_v52, %v6499_v12  ;;  %v6315_v12 = vld [vmem:[#allocation15 + $0x330] sm:$0xff] }
 0x749   :  { %13494 = vmatprep.subr.bf16.mxu1 %v16707_v37  ;;  %v6515_v37 = vld [vmem:[#allocation15 + $0x970] sm:$0xff] }
 0x74a   :  { %13454 = vmatpush1.bf16.msra.mxu0 %v16450_v50  ;;  %v16533_v30 = vcombine.high %v6507_v23, %v6515_v37  ;;  %v6267_v50 = vld [vmem:[#allocation15 + $0x1b0] sm:$0xff]  ;;  %v16532_v5 = vcombine.low %v6507_v23, %v6515_v37 }
 0x74b   :  { %13455 = vmatprep.subr.bf16.mxu0 %v16467_v59  ;;  %v6523_v59 = vld [vmem:[#allocation15 + $0x9b0] sm:$0xff] }
 0x74c   :  { %13495 = vmatpush1.bf16.msra.mxu1 %v16706_v19  ;;  %v6275_v19 = vld [vmem:[#allocation15 + $0x1f0] sm:$0xff] }
 0x74d   :  { %13496 = vmatprep.subr.bf16.mxu1 %v16723_v18  ;;  %v6531_v18 = vld [vmem:[#allocation15 + $0x9f0] sm:$0xff]  ;;  %v16293_v56 = vcombine.high %v6267_v50, %v6275_v19  ;;  %v16292_v62 = vcombine.low %v6267_v50, %v6275_v19 }
 0x74e   :  { %13456 = vmatpush1.bf16.msra.mxu0 %v16466_v49  ;;  %v16549_v63 = vcombine.high %v6523_v59, %v6531_v18  ;;  %v6283_v49 = vld [vmem:[#allocation15 + $0x230] sm:$0xff]  ;;  %v16548_v14 = vcombine.low %v6523_v59, %v6531_v18 }
 0x74f   :  { %13457 = vmatprep.subr.bf16.mxu0 %v16483_v24  ;;  %v6539_v24 = vld [vmem:[#allocation15 + $0xa30] sm:$0xff] }
 0x750   :  { %13497 = vmatpush1.bf16.msra.mxu1 %v16722_v0  ;;  %v6291_v0 = vld [vmem:[#allocation15 + $0x270] sm:$0xff] }
 0x751   :  { %13498 = vmatprep.subr.bf16.mxu1 %v16739_v55  ;;  %v6547_v55 = vld [vmem:[#allocation15 + $0xa70] sm:$0xff]  ;;  %v16309_v6 = vcombine.high %v6283_v49, %v6291_v0  ;;  %v16308_v13 = vcombine.low %v6283_v49, %v6291_v0 }
 0x752   :  { %13458 = vmatpush1.bf16.msra.mxu0 %v16482_v9  ;;  %v16565_v41 = vcombine.high %v6539_v24, %v6547_v55  ;;  %v6299_v9 = vld [vmem:[#allocation15 + $0x2b0] sm:$0xff]  ;;  %v16564_v21 = vcombine.low %v6539_v24, %v6547_v55 }
 0x753   :  { %13509 = vmatprep.subr.bf16.mxu0 %v16245_v8  ;;  %v6555_v8 = vld [vmem:[#allocation15 + $0xab0] sm:$0xff] }
 0x754   :  { %13499 = vmatpush1.bf16.msra.mxu1 %v16738_v40  ;;  %v6307_v40 = vld [vmem:[#allocation15 + $0x2f0] sm:$0xff] }
 0x755   :  { %13550 = vmatprep.subr.bf16.mxu1 %v16501_v29  ;;  %13460 = vmatmul.mubr.bf16.vlgmr.msra.gmra.mrb[100].mxu0 %v18249_v1  ;;  %v6563_v29 = vld [vmem:[#allocation15 + $0xaf0] sm:$0xff]  ;;  %v16324_v26 = vcombine.low %v6299_v9, %v6307_v40 }
 0x756   :  { %13510 = vmatpush1.bf16.msra.mxu0 %v16244_v42  ;;  %13541 = vmatprep.mubr.bf16.mxu0 %v18237_v61  ;;  %v16325_v42 = vcombine.high %v6299_v9, %v6307_v40  ;;  %v16581_v52 = vcombine.high %v6555_v8, %v6563_v29  ;;  %v6579_v15 = vld [vmem:[#allocation15 + $0xb70] sm:$0xff] }
 0x757   :  { %13501 = vmatmul.mubr.bf16.vlgmr.msra.gmra.mrb[100].mxu1 %v18251_v27  ;;  %13511 = vmatprep.subr.bf16.mxu0 %v16261_v31  ;;  %v6571_v31 = vld [vmem:[#allocation15 + $0xb30] sm:$0xff] }
 0x758   :  { %13551 = vmatpush1.bf16.msra.mxu1 %v16500_v36  ;;  %13582 = vmatprep.mubr.bf16.mxu1 %v18240_v58  ;;  %v6323_v36 = vld [vmem:[#allocation15 + $0x370] sm:$0xff]  ;;  %v16596_v55 = vcombine.low %v6571_v31, %v6579_v15 }
 0x759   :  { %13552 = vmatprep.subr.bf16.mxu1 %v16517_v54  ;;  %v16580_v54 = vcombine.low %v6555_v8, %v6563_v29  ;;  %v16341_v23 = vcombine.high %v6315_v12, %v6323_v36  ;;  %v6587_v59 = vld [vmem:[#allocation15 + $0xbb0] sm:$0xff] }
 0x75a   :  { %13512 = vmatpush1.bf16.msra.mxu0 %v16260_v16  ;;  %v16597_v16 = vcombine.high %v6571_v31, %v6579_v15  ;;  %v6595_v18 = vld [vmem:[#allocation15 + $0xbf0] sm:$0xff] }
 0x75b   :  { %13513 = vmatprep.subr.bf16.mxu0 %v16277_v47  ;;  %v6339_v47 = vld [vmem:[#allocation15 + $0x3f0] sm:$0xff]  ;;  %v16612_v29 = vcombine.low %v6587_v59, %v6595_v18 }
 0x75c   :  { %13553 = vmatpush1.bf16.msra.mxu1 %v16516_v44  ;;  %v6331_v44 = vld [vmem:[#allocation15 + $0x3b0] sm:$0xff] }
 0x75d   :  { %13554 = vmatprep.subr.bf16.mxu1 %v16533_v30  ;;  %v6355_v9 = vld [vmem:[#allocation15 + $0x470] sm:$0xff]  ;;  %v16356_v8 = vcombine.low %v6331_v44, %v6339_v47 }
 0x75e   :  { %13514 = vmatpush1.bf16.msra.mxu0 %v16276_v48  ;;  %v6611_v40 = vld [vmem:[#allocation15 + $0xc70] sm:$0xff] }
 0x75f   :  { %13515 = vmatprep.subr.bf16.mxu0 %v16293_v56 }
 0x760   :  { %13555 = vmatpush1.bf16.msra.mxu1 %v16532_v5 }
 0x761   :  { %13556 = vmatprep.subr.bf16.mxu1 %v16549_v63  ;;  %v16340_v63 = vcombine.low %v6315_v12, %v6323_v36  ;;  %v6619_v12 = vld [vmem:[#allocation15 + $0xcb0] sm:$0xff] }
 0x762   :  { %13516 = vmatpush1.bf16.msra.mxu0 %v16292_v62  ;;  %v16357_v62 = vcombine.high %v6331_v44, %v6339_v47  ;;  %v6627_v36 = vld [vmem:[#allocation15 + $0xcf0] sm:$0xff] }
 0x763   :  { %13517 = vmatprep.subr.bf16.mxu0 %v16309_v6  ;;  %v16613_v6 = vcombine.high %v6587_v59, %v6595_v18  ;;  %v6643_v44 = vld [vmem:[#allocation15 + $0xd70] sm:$0xff] }
 0x764   :  { %13557 = vmatpush1.bf16.msra.mxu1 %v16548_v14  ;;  %v6395_v59 = vld [vmem:[#allocation15 + $0x5b0] sm:$0xff] }
 0x765   :  { %13558 = vmatprep.subr.bf16.mxu1 %v16565_v41  ;;  %v6347_v41 = vld [vmem:[#allocation15 + $0x430] sm:$0xff] }
 0x766   :  { %13518 = vmatpush1.bf16.msra.mxu0 %v16308_v13  ;;  %v16373_v13 = vcombine.high %v6347_v41, %v6355_v9  ;;  %v16372_v31 = vcombine.low %v6347_v41, %v6355_v9  ;;  %v6403_v18 = vld [vmem:[#allocation15 + $0x5f0] sm:$0xff] }
 0x767   :  { %13519 = vmatprep.subr.bf16.mxu0 %v16325_v42  ;;  %v6363_v42 = vld [vmem:[#allocation15 + $0x4b0] sm:$0xff]  ;;  %v16420_v41 = vcombine.low %v6395_v59, %v6403_v18 }
 0x768   :  { %13559 = vmatpush1.bf16.msra.mxu1 %v16564_v21  ;;  %v13215_v37 = vpop.f32.mrb[88].mxu0 }
 0x769   :  { %13560 = vmatprep.subr.bf16.mxu1 %v16581_v52  ;;  %v13216_v30 = vadd.f32 %v13215_v37, %v18225_v4  ;;  %v13217_v19 = vpop.f32.mrb[89].mxu0  ;;  %v6371_v52 = vld [vmem:[#allocation15 + $0x4f0] sm:$0xff] }
 0x76a   :  { %v13256_v50 = vpop.f32.mrb[88].mxu1  ;;  %v13218_v48 = vadd.f32 %v13217_v19, %v18227_v28  ;;  %v13219_v56 = vpop.f32.mrb[90].mxu0  ;;  %13520 = vmatpush1.bf16.msra.mxu0 %v16324_v26  ;;  %v6603_v28 = vld [vmem:[#allocation15 + $0xc30] sm:$0xff]  ;;  %v16389_v26 = vcombine.high %v6363_v42, %v6371_v52  ;;  %v16388_v47 = vcombine.low %v6363_v42, %v6371_v52 }
 0x76b   :  { %v13258_v5 = vpop.f32.mrb[89].mxu1  ;;  %v18303_v49 = vadd.f32 %v13256_v50, %v13216_v30  ;;  %v13220_v24 = vpop.f32.mrb[91].mxu0  ;;  %13521 = vmatprep.subr.bf16.mxu0 %v16341_v23  ;;  %v16629_v21 = vcombine.high %v6603_v28, %v6611_v40  ;;  %v16628_v15 = vcombine.low %v6603_v28, %v6611_v40  ;;  %v6379_v23 = vld [vmem:[#allocation15 + $0x530] sm:$0xff]  ;;  %v16644_v30 = vcombine.low %v6619_v12, %v6627_v36 }
 0x76c   :  { %v13260_v0 = vpop.f32.mrb[90].mxu1  ;;  %13561 = vmatpush1.bf16.msra.mxu1 %v16580_v54  ;;  %v18305_v14 = vadd.f32 %v13258_v5, %v13218_v48  ;;  %v16645_v54 = vcombine.high %v6619_v12, %v6627_v36  ;;  %v6387_v37 = vld [vmem:[#allocation15 + $0x570] sm:$0xff] }
 0x76d   :  { %v13261_v4 = vpop.f32.mrb[91].mxu1  ;;  %13562 = vmatprep.subr.bf16.mxu1 %v16597_v16  ;;  %v6635_v16 = vld [vmem:[#allocation15 + $0xd30] sm:$0xff]  ;;  %v16405_v50 = vcombine.high %v6379_v23, %v6387_v37  ;;  %v16404_v56 = vcombine.low %v6379_v23, %v6387_v37  ;;  %v16421_v0 = vcombine.high %v6395_v59, %v6403_v18 }
 0x76e   :  { %13522 = vmatpush1.bf16.msra.mxu0 %v16340_v63  ;;  %v16661_v19 = vcombine.high %v6635_v16, %v6643_v44  ;;  %v6651_v48 = vld [vmem:[#allocation15 + $0xdb0] sm:$0xff]  ;;  %v16660_v63 = vcombine.low %v6635_v16, %v6643_v44 }
 0x76f   :  { %13523 = vmatprep.subr.bf16.mxu0 %v16357_v62  ;;  %v6659_v5 = vld [vmem:[#allocation15 + $0xdf0] sm:$0xff] }
 0x770   :  { %13563 = vmatpush1.bf16.msra.mxu1 %v16596_v55  ;;  %v16677_v24 = vcombine.high %v6651_v48, %v6659_v5  ;;  %v6411_v55 = vld [vmem:[#allocation15 + $0x630] sm:$0xff]  ;;  %v16676_v9 = vcombine.low %v6651_v48, %v6659_v5 }
 0x771   :  { %13564 = vmatprep.subr.bf16.mxu1 %v16613_v6  ;;  %v6419_v62 = vld [vmem:[#allocation15 + $0x670] sm:$0xff] }
 0x772   :  { %13524 = vmatpush1.bf16.msra.mxu0 %v16356_v8  ;;  %v6667_v4 = vld [vmem:[#allocation15 + $0xe30] sm:$0xff]  ;;  %v16437_v28 = vcombine.high %v6411_v55, %v6419_v62  ;;  %v16436_v42 = vcombine.low %v6411_v55, %v6419_v62 }
 0x773   :  { %13525 = vmatprep.subr.bf16.mxu0 %v16373_v13  ;;  %v6675_v6 = vld [vmem:[#allocation15 + $0xe70] sm:$0xff] }
 0x774   :  { %13565 = vmatpush1.bf16.msra.mxu1 %v16612_v29  ;;  %v16693_v40 = vcombine.high %v6667_v4, %v6675_v6  ;;  %v6427_v8 = vld [vmem:[#allocation15 + $0x6b0] sm:$0xff]  ;;  %v16692_v52 = vcombine.low %v6667_v4, %v6675_v6 }
 0x775   :  { %13566 = vmatprep.subr.bf16.mxu1 %v16629_v21  ;;  %v6435_v29 = vld [vmem:[#allocation15 + $0x6f0] sm:$0xff] }
 0x776   :  { %13526 = vmatpush1.bf16.msra.mxu0 %v16372_v31  ;;  %v6683_v13 = vld [vmem:[#allocation15 + $0xeb0] sm:$0xff]  ;;  %v16453_v12 = vcombine.high %v6427_v8, %v6435_v29  ;;  %v16452_v23 = vcombine.low %v6427_v8, %v6435_v29  ;;  %v6500_v8 = vld [vmem:[#allocation15 + $0x8f8] sm:$0xff] }
 0x777   :  { %13527 = vmatprep.subr.bf16.mxu0 %v16389_v26  ;;  %v6691_v21 = vld [vmem:[#allocation15 + $0xef0] sm:$0xff] }
 0x778   :  { %13567 = vmatpush1.bf16.msra.mxu1 %v16628_v15  ;;  %v16709_v36 = vcombine.high %v6683_v13, %v6691_v21  ;;  %v6443_v31 = vld [vmem:[#allocation15 + $0x730] sm:$0xff]  ;;  %v16708_v37 = vcombine.low %v6683_v13, %v6691_v21  ;;  %v6252_v21 = vld [vmem:[#allocation15 + $0x138] sm:$0xff] }
 0x779   :  { %13568 = vmatprep.subr.bf16.mxu1 %v16645_v54  ;;  %v6451_v15 = vld [vmem:[#allocation15 + $0x770] sm:$0xff] }
 0x77a   :  { %13528 = vmatpush1.bf16.msra.mxu0 %v16388_v47  ;;  %v6699_v26 = vld [vmem:[#allocation15 + $0xf30] sm:$0xff]  ;;  %v16469_v16 = vcombine.high %v6443_v31, %v6451_v15  ;;  %v16468_v59 = vcombine.low %v6443_v31, %v6451_v15 }
 0x77b   :  { %13529 = vmatprep.subr.bf16.mxu0 %v16405_v50  ;;  %v6707_v54 = vld [vmem:[#allocation15 + $0xf70] sm:$0xff] }
 0x77c   :  { %13569 = vmatpush1.bf16.msra.mxu1 %v16644_v30  ;;  %v16725_v44 = vcombine.high %v6699_v26, %v6707_v54  ;;  %v6459_v47 = vld [vmem:[#allocation15 + $0x7b0] sm:$0xff]  ;;  %v16724_v18 = vcombine.low %v6699_v26, %v6707_v54 }
 0x77d   :  { %13570 = vmatprep.subr.bf16.mxu1 %v16661_v19  ;;  %v6467_v30 = vld [vmem:[#allocation15 + $0x7f0] sm:$0xff] }
 0x77e   :  { %13530 = vmatpush1.bf16.msra.mxu0 %v16404_v56  ;;  %v6715_v50 = vld [vmem:[#allocation15 + $0xfb0] sm:$0xff]  ;;  %v16485_v48 = vcombine.high %v6459_v47, %v6467_v30  ;;  %v6220_v56 = vld [vmem:[#allocation15 + $0x38] sm:$0xff]  ;;  %v16484_v55 = vcombine.low %v6459_v47, %v6467_v30 }
 0x77f   :  { %13531 = vmatprep.subr.bf16.mxu0 %v16421_v0  ;;  %v6723_v19 = vld [vmem:[#allocation15 + $0xff0] sm:$0xff]  ;;  %v6476_v0 = vld [vmem:[#allocation15 + $0x838] sm:$0xff] }
 0x780   :  { %13571 = vmatpush1.bf16.msra.mxu1 %v16660_v63  ;;  %v16741_v5 = vcombine.high %v6715_v50, %v6723_v19  ;;  %v6228_v63 = vld [vmem:[#allocation15 + $0x78] sm:$0xff]  ;;  %v16740_v62 = vcombine.low %v6715_v50, %v6723_v19 }
 0x781   :  { %13572 = vmatprep.subr.bf16.mxu1 %v16677_v24  ;;  %v6484_v24 = vld [vmem:[#allocation15 + $0x878] sm:$0xff]  ;;  %v16247_v4 = vcombine.high %v6220_v56, %v6228_v63 }
 0x782   :  { %13532 = vmatpush1.bf16.msra.mxu0 %v16420_v41  ;;  %v16503_v6 = vcombine.high %v6476_v0, %v6484_v24  ;;  %v6236_v41 = vld [vmem:[#allocation15 + $0xb8] sm:$0xff]  ;;  %v16502_v29 = vcombine.low %v6476_v0, %v6484_v24 }
 0x783   :  { %13533 = vmatprep.subr.bf16.mxu0 %v16437_v28  ;;  %v16246_v28 = vcombine.low %v6220_v56, %v6228_v63  ;;  %v6284_v19 = vld [vmem:[#allocation15 + $0x238] sm:$0xff] }
 0x784   :  { %13573 = vmatpush1.bf16.msra.mxu1 %v16676_v9  ;;  %v6244_v9 = vld [vmem:[#allocation15 + $0xf8] sm:$0xff] }
 0x785   :  { %13574 = vmatprep.subr.bf16.mxu1 %v16693_v40  ;;  %v6492_v40 = vld [vmem:[#allocation15 + $0x8b8] sm:$0xff]  ;;  %v16263_v13 = vcombine.high %v6236_v41, %v6244_v9  ;;  %v16262_v31 = vcombine.low %v6236_v41, %v6244_v9 }
 0x786   :  { %13534 = vmatpush1.bf16.msra.mxu0 %v16436_v42  ;;  %v6260_v42 = vld [vmem:[#allocation15 + $0x178] sm:$0xff]  ;;  %v16518_v15 = vcombine.low %v6492_v40, %v6500_v8 }
 0x787   :  { %13535 = vmatprep.subr.bf16.mxu0 %v16453_v12  ;;  %v6508_v12 = vld [vmem:[#allocation15 + $0x938] sm:$0xff]  ;;  %v16279_v26 = vcombine.high %v6252_v21, %v6260_v42  ;;  %v16278_v47 = vcombine.low %v6252_v21, %v6260_v42 }
 0x788   :  { %13575 = vmatpush1.bf16.msra.mxu1 %v16692_v52  ;;  %v16519_v52 = vcombine.high %v6492_v40, %v6500_v8  ;;  %v6300_v0 = vld [vmem:[#allocation15 + $0x2b8] sm:$0xff] }
 0x789   :  { %13576 = vmatprep.subr.bf16.mxu1 %v16709_v36  ;;  %v6516_v36 = vld [vmem:[#allocation15 + $0x978] sm:$0xff] }
 0x78a   :  { %13536 = vmatpush1.bf16.msra.mxu0 %v16452_v23  ;;  %v16535_v54 = vcombine.high %v6508_v12, %v6516_v36  ;;  %v6268_v23 = vld [vmem:[#allocation15 + $0x1b8] sm:$0xff]  ;;  %v16534_v30 = vcombine.low %v6508_v12, %v6516_v36 }
 0x78b   :  { %13537 = vmatprep.subr.bf16.mxu0 %v16469_v16  ;;  %v6524_v16 = vld [vmem:[#allocation15 + $0x9b8] sm:$0xff] }
 0x78c   :  { %13577 = vmatpush1.bf16.msra.mxu1 %v16708_v37  ;;  %v6276_v37 = vld [vmem:[#allocation15 + $0x1f8] sm:$0xff] }
 0x78d   :  { %13578 = vmatprep.subr.bf16.mxu1 %v16725_v44  ;;  %v6532_v44 = vld [vmem:[#allocation15 + $0x9f8] sm:$0xff]  ;;  %v16295_v50 = vcombine.high %v6268_v23, %v6276_v37 }
 0x78e   :  { %13538 = vmatpush1.bf16.msra.mxu0 %v16468_v59  ;;  %v6292_v59 = vld [vmem:[#allocation15 + $0x278] sm:$0xff] }
 0x78f   :  { %13539 = vmatprep.subr.bf16.mxu0 %v16485_v48  ;;  %v6548_v48 = vld [vmem:[#allocation15 + $0xa78] sm:$0xff]  ;;  %v16311_v56 = vcombine.high %v6284_v19, %v6292_v59 }
 0x790   :  { %13579 = vmatpush1.bf16.msra.mxu1 %v16724_v18  ;;  %v6540_v18 = vld [vmem:[#allocation15 + $0xa38] sm:$0xff] }
 0x791   :  { %13580 = vmatprep.subr.bf16.mxu1 %v16741_v5  ;;  %v16550_v5 = vcombine.low %v6524_v16, %v6532_v44  ;;  %v16567_v63 = vcombine.high %v6540_v18, %v6548_v48  ;;  %v6308_v24 = vld [vmem:[#allocation15 + $0x2f8] sm:$0xff] }
 0x792   :  { %13540 = vmatpush1.bf16.msra.mxu0 %v16484_v55  ;;  %v6556_v55 = vld [vmem:[#allocation15 + $0xab8] sm:$0xff]  ;;  %v16327_v41 = vcombine.high %v6300_v0, %v6308_v24 }
 0x793   :  { %13591 = vmatprep.subr.bf16.mxu0 %v16247_v4  ;;  %v16310_v4 = vcombine.low %v6284_v19, %v6292_v59  ;;  %v6324_v40 = vld [vmem:[#allocation15 + $0x378] sm:$0xff] }
 0x794   :  { %13581 = vmatpush1.bf16.msra.mxu1 %v16740_v62  ;;  %v6564_v62 = vld [vmem:[#allocation15 + $0xaf8] sm:$0xff] }
 0x795   :  { %13632 = vmatprep.subr.bf16.mxu1 %v16503_v6  ;;  %13542 = vmatmul.mubr.bf16.vlgmr.msra.gmra.mrb[104].mxu0 %v18249_v1  ;;  %v16566_v6 = vcombine.low %v6540_v18, %v6548_v48  ;;  %v16583_v9 = vcombine.high %v6556_v55, %v6564_v62  ;;  %v6572_v8 = vld [vmem:[#allocation15 + $0xb38] sm:$0xff]  ;;  %v16582_v21 = vcombine.low %v6556_v55, %v6564_v62 }
 0x796   :  { %13592 = vmatpush1.bf16.msra.mxu0 %v16246_v28  ;;  %13623 = vmatprep.mubr.bf16.mxu0 %v18237_v61  ;;  %v16551_v61 = vcombine.high %v6524_v16, %v6532_v44  ;;  %v6316_v28 = vld [vmem:[#allocation15 + $0x338] sm:$0xff] }
 0x797   :  { %13583 = vmatmul.mubr.bf16.vlgmr.msra.gmra.mrb[104].mxu1 %v18251_v27  ;;  %13593 = vmatprep.subr.bf16.mxu0 %v16263_v13  ;;  %v16326_v13 = vcombine.low %v6300_v0, %v6308_v24  ;;  %v16343_v42 = vcombine.high %v6316_v28, %v6324_v40  ;;  %v6332_v36 = vld [vmem:[#allocation15 + $0x3b8] sm:$0xff] }
 0x798   :  { %13633 = vmatpush1.bf16.msra.mxu1 %v16502_v29  ;;  %13664 = vmatprep.mubr.bf16.mxu1 %v18240_v58  ;;  %v16294_v58 = vcombine.low %v6268_v23, %v6276_v37  ;;  %v6580_v29 = vld [vmem:[#allocation15 + $0xb78] sm:$0xff] }
 0x799   :  { %13634 = vmatprep.subr.bf16.mxu1 %v16519_v52  ;;  %v16599_v12 = vcombine.high %v6572_v8, %v6580_v29  ;;  %v6588_v23 = vld [vmem:[#allocation15 + $0xbb8] sm:$0xff]  ;;  %v16598_v59 = vcombine.low %v6572_v8, %v6580_v29 }
 0x79a   :  { %13594 = vmatpush1.bf16.msra.mxu0 %v16262_v31  ;;  %v6340_v31 = vld [vmem:[#allocation15 + $0x3f8] sm:$0xff] }
 0x79b   :  { %13595 = vmatprep.subr.bf16.mxu0 %v16279_v26  ;;  %v6596_v37 = vld [vmem:[#allocation15 + $0xbf8] sm:$0xff]  ;;  %v16359_v18 = vcombine.high %v6332_v36, %v6340_v31  ;;  %v16358_v0 = vcombine.low %v6332_v36, %v6340_v31 }
 0x79c   :  { %13635 = vmatpush1.bf16.msra.mxu1 %v16518_v15  ;;  %v16614_v24 = vcombine.low %v6588_v23, %v6596_v37 }
 0x79d   :  { %13636 = vmatprep.subr.bf16.mxu1 %v16535_v54 }
 0x79e   :  { %13596 = vmatpush1.bf16.msra.mxu0 %v16278_v47 }
 0x79f   :  { %13597 = vmatprep.subr.bf16.mxu0 %v16295_v50 }
 0x7a0   :  { %13637 = vmatpush1.bf16.msra.mxu1 %v16534_v30  ;;  %v16342_v30 = vcombine.low %v6316_v28, %v6324_v40 }
 0x7a1   :  { %13638 = vmatprep.subr.bf16.mxu1 %v16551_v61 }
 0x7a2   :  { %13598 = vmatpush1.bf16.msra.mxu0 %v16294_v58  ;;  %v16615_v58 = vcombine.high %v6588_v23, %v6596_v37  ;;  %v6652_v23 = vld [vmem:[#allocation15 + $0xdb8] sm:$0xff] }
 0x7a3   :  { %13599 = vmatprep.subr.bf16.mxu0 %v16311_v56  ;;  %v6356_v56 = vld [vmem:[#allocation15 + $0x478] sm:$0xff] }
 0x7a4   :  { %13639 = vmatpush1.bf16.msra.mxu1 %v16550_v5  ;;  %v6348_v5 = vld [vmem:[#allocation15 + $0x438] sm:$0xff] }
 0x7a5   :  { %13640 = vmatprep.subr.bf16.mxu1 %v16567_v63  ;;  %v6612_v63 = vld [vmem:[#allocation15 + $0xc78] sm:$0xff]  ;;  %v16375_v55 = vcombine.high %v6348_v5, %v6356_v56  ;;  %v16374_v28 = vcombine.low %v6348_v5, %v6356_v56 }
 0x7a6   :  { %13600 = vmatpush1.bf16.msra.mxu0 %v16310_v4  ;;  %v6364_v4 = vld [vmem:[#allocation15 + $0x4b8] sm:$0xff] }
 0x7a7   :  { %13601 = vmatprep.subr.bf16.mxu0 %v16327_v41  ;;  %v6620_v41 = vld [vmem:[#allocation15 + $0xcb8] sm:$0xff] }
 0x7a8   :  { %13641 = vmatpush1.bf16.msra.mxu1 %v16566_v6  ;;  %v13297_v52 = vpop.f32.mrb[92].mxu0  ;;  %v6372_v6 = vld [vmem:[#allocation15 + $0x4f8] sm:$0xff] }
 0x7a9   :  { %13642 = vmatprep.subr.bf16.mxu1 %v16583_v9  ;;  %v13298_v15 = vadd.f32 %v13297_v52, %v18233_v2  ;;  %v13299_v54 = vpop.f32.mrb[93].mxu0  ;;  %v6628_v9 = vld [vmem:[#allocation15 + $0xcf8] sm:$0xff]  ;;  %v16391_v8 = vcombine.high %v6364_v4, %v6372_v6 }
 0x7aa   :  { %v13338_v26 = vpop.f32.mrb[92].mxu1  ;;  %v13300_v16 = vadd.f32 %v13299_v54, %v18235_v53  ;;  %v13301_v47 = vpop.f32.mrb[94].mxu0  ;;  %13602 = vmatpush1.bf16.msra.mxu0 %v16326_v13  ;;  %v6604_v53 = vld [vmem:[#allocation15 + $0xc38] sm:$0xff]  ;;  %v16647_v29 = vcombine.high %v6620_v41, %v6628_v9  ;;  %v16646_v36 = vcombine.low %v6620_v41, %v6628_v9 }
 0x7ab   :  { %v13340_v44 = vpop.f32.mrb[93].mxu1  ;;  %v18313_v50 = vadd.f32 %v13338_v26, %v13298_v15  ;;  %v13302_v19 = vpop.f32.mrb[95].mxu0  ;;  %13603 = vmatprep.subr.bf16.mxu0 %v16343_v42  ;;  %v16631_v62 = vcombine.high %v6604_v53, %v6612_v63  ;;  %v16630_v40 = vcombine.low %v6604_v53, %v6612_v63  ;;  %v6380_v13 = vld [vmem:[#allocation15 + $0x538] sm:$0xff] }
 0x7ac   :  { %v13342_v61 = vpop.f32.mrb[94].mxu1  ;;  %13643 = vmatpush1.bf16.msra.mxu1 %v16582_v21  ;;  %v18315_v48 = vadd.f32 %v13340_v44, %v13300_v16  ;;  %v6388_v21 = vld [vmem:[#allocation15 + $0x578] sm:$0xff] }
 0x7ad   :  { %v13343_v2 = vpop.f32.mrb[95].mxu1  ;;  %13644 = vmatprep.subr.bf16.mxu1 %v16599_v12  ;;  %v6636_v42 = vld [vmem:[#allocation15 + $0xd38] sm:$0xff]  ;;  %v16390_v12 = vcombine.low %v6364_v4, %v6372_v6  ;;  %v16407_v31 = vcombine.high %v6380_v13, %v6388_v21  ;;  %v16406_v16 = vcombine.low %v6380_v13, %v6388_v21 }
 0x7ae   :  { %13604 = vmatpush1.bf16.msra.mxu0 %v16342_v30  ;;  %v6644_v52 = vld [vmem:[#allocation15 + $0xd78] sm:$0xff] }
 0x7af   :  { %13605 = vmatprep.subr.bf16.mxu0 %v16359_v18  ;;  %v16663_v15 = vcombine.high %v6636_v42, %v6644_v52  ;;  %v6396_v26 = vld [vmem:[#allocation15 + $0x5b8] sm:$0xff]  ;;  %v16662_v44 = vcombine.low %v6636_v42, %v6644_v52 }
 0x7b0   :  { %13645 = vmatpush1.bf16.msra.mxu1 %v16598_v59  ;;  %v6404_v54 = vld [vmem:[#allocation15 + $0x5f8] sm:$0xff] }
 0x7b1   :  { %13646 = vmatprep.subr.bf16.mxu1 %v16615_v58  ;;  %v6660_v37 = vld [vmem:[#allocation15 + $0xdf8] sm:$0xff]  ;;  %v16423_v47 = vcombine.high %v6396_v26, %v6404_v54  ;;  %v16422_v2 = vcombine.low %v6396_v26, %v6404_v54 }
 0x7b2   :  { %13606 = vmatpush1.bf16.msra.mxu0 %v16358_v0  ;;  %v16679_v30 = vcombine.high %v6652_v23, %v6660_v37  ;;  %v6412_v61 = vld [vmem:[#allocation15 + $0x638] sm:$0xff]  ;;  %v16678_v58 = vcombine.low %v6652_v23, %v6660_v37 }
 0x7b3   :  { %13607 = vmatprep.subr.bf16.mxu0 %v16375_v55  ;;  %v6420_v19 = vld [vmem:[#allocation15 + $0x678] sm:$0xff] }
 0x7b4   :  { %13647 = vmatpush1.bf16.msra.mxu1 %v16614_v24  ;;  %v6668_v59 = vld [vmem:[#allocation15 + $0xe38] sm:$0xff]  ;;  %v16439_v5 = vcombine.high %v6412_v61, %v6420_v19  ;;  %v16438_v55 = vcombine.low %v6412_v61, %v6420_v19 }
 0x7b5   :  { %13648 = vmatprep.subr.bf16.mxu1 %v16631_v62  ;;  %v6676_v18 = vld [vmem:[#allocation15 + $0xe78] sm:$0xff] }
 0x7b6   :  { %13608 = vmatpush1.bf16.msra.mxu0 %v16374_v28  ;;  %v16695_v56 = vcombine.high %v6668_v59, %v6676_v18  ;;  %v6428_v53 = vld [vmem:[#allocation15 + $0x6b8] sm:$0xff]  ;;  %v16694_v62 = vcombine.low %v6668_v59, %v6676_v18 }
 0x7b7   :  { %13609 = vmatprep.subr.bf16.mxu0 %v16391_v8  ;;  %v6436_v63 = vld [vmem:[#allocation15 + $0x6f8] sm:$0xff] }
 0x7b8   :  { %13649 = vmatpush1.bf16.msra.mxu1 %v16630_v40  ;;  %v6684_v0 = vld [vmem:[#allocation15 + $0xeb8] sm:$0xff]  ;;  %v16455_v4 = vcombine.high %v6428_v53, %v6436_v63  ;;  %v16454_v8 = vcombine.low %v6428_v53, %v6436_v63 }
 0x7b9   :  { %13650 = vmatprep.subr.bf16.mxu1 %v16647_v29  ;;  %v6692_v24 = vld [vmem:[#allocation15 + $0xef8] sm:$0xff] }
 0x7ba   :  { %13610 = vmatpush1.bf16.msra.mxu0 %v16390_v12  ;;  %v16711_v6 = vcombine.high %v6684_v0, %v6692_v24  ;;  %v6444_v41 = vld [vmem:[#allocation15 + $0x738] sm:$0xff]  ;;  %v16710_v29 = vcombine.low %v6684_v0, %v6692_v24 }
 0x7bb   :  { %13611 = vmatprep.subr.bf16.mxu0 %v16407_v31  ;;  %v6452_v9 = vld [vmem:[#allocation15 + $0x778] sm:$0xff] }
 0x7bc   :  { %13651 = vmatpush1.bf16.msra.mxu1 %v16646_v36  ;;  %v6700_v28 = vld [vmem:[#allocation15 + $0xf38] sm:$0xff]  ;;  %v16471_v13 = vcombine.high %v6444_v41, %v6452_v9  ;;  %v16470_v31 = vcombine.low %v6444_v41, %v6452_v9  ;;  %v16937_v41 = vld [vmem:[#allocation19 + $0x40] ss:$16 sps:$4 sm:$0xff]  }
 0x7bd   :  { %13652 = vmatprep.subr.bf16.mxu1 %v16663_v15  ;;  %v6708_v40 = vld [vmem:[#allocation15 + $0xf78] sm:$0xff]  ;;  %v18317_v15 = vld [vmem:[#allocation18] sm:$0xff] }
 0x7be   :  { %13612 = vmatpush1.bf16.msra.mxu0 %v16406_v16  ;;  %v16727_v21 = vcombine.high %v6700_v28, %v6708_v40  ;;  %v6460_v42 = vld [vmem:[#allocation15 + $0x7b8] sm:$0xff]  ;;  %v16726_v26 = vcombine.low %v6700_v28, %v6708_v40  ;;  %v13680_v37 = vrot.slane %v18317_v15, %v18012_v51  ;;  %v13696_v61 = vrot.slane %v18317_v15, %v18114_v34  ;;  %v16943_v9 = vld [vmem:[#allocation19 + $0x60] ss:$16 sps:$4 sm:$0xff]   ;;  %v16951_v40 = vld [vmem:[#allocation19 + $0x84] ss:$16 sps:$4 sm:$0xff]  }
 0x7bf   :  { %13613 = vmatprep.subr.bf16.mxu0 %v16423_v47  ;;  %v6468_v52 = vld [vmem:[#allocation15 + $0x7f8] sm:$0xff]  ;;  %v13700_v59 = vrot.slane %v18317_v15, %v18124_v57 }
 0x7c0   :  { %13653 = vmatpush1.bf16.msra.mxu1 %v16662_v44  ;;  %v6716_v12 = vld [vmem:[#allocation15 + $0xfb8] sm:$0xff]  ;;  %v16487_v54 = vcombine.high %v6460_v42, %v6468_v52  ;;  %v16486_v16 = vcombine.low %v6460_v42, %v6468_v52  ;;  %v13684_v44 = vrot.slane %v18317_v15, %v17944_v33  ;;  %v13757_v18 = vadd.f32 %v13680_v37, %v18283_v10  ;;  %v16931_v10 = vld [vmem:[#allocation19 + $0x20] ss:$16 sps:$4 sm:$0xff]  }
 0x7c1   :  { %13654 = vmatprep.subr.bf16.mxu1 %v16679_v30  ;;  %v6724_v36 = vld [vmem:[#allocation15 + $0xff8] sm:$0xff]  ;;  %v16927_v30 = vld [vmem:[#allocation19 + $0x4] ss:$16 sps:$4 sm:$0xff]   ;;  %v13761_v53 = vadd.f32 %v13696_v61, %v18303_v49  ;;  %v13762_v0 = vadd.f32 %v13700_v59, %v18305_v14 }
 0x7c2   :  { %13614 = vmatpush1.bf16.msra.mxu0 %v16422_v2  ;;  %v16743_v23 = vcombine.high %v6716_v12, %v6724_v36  ;;  %v16742_v47 = vcombine.low %v6716_v12, %v6724_v36  ;;  %v16930_v19 = vld [vmem:[#allocation19 + $0xc] ss:$16 sps:$4 sm:$0xff]   ;;  %v16925_v2 = vld [vmem:[#allocation19] ss:$16 sps:$4 sm:$0xff]   ;;  %v16744_v24 = vmul.f32 -1.442695, %v13757_v18 }
 0x7c3   :  { %13615 = vmatprep.subr.bf16.mxu0 %v16439_v5  ;;  %v16928_v5 = vld [vmem:[#allocation19 + $0x8] ss:$16 sps:$4 sm:$0xff]   ;;  %v16936_v63 = vld [vmem:[#allocation19 + $0x2c] ss:$16 sps:$4 sm:$0xff]   ;;  %v16749_v49 = vmul.f32 -1.442695, %v13762_v0 }
 0x7c4   :  { %13655 = vmatpush1.bf16.msra.mxu1 %v16678_v58  ;;  %v13758_v58 = vadd.f32 %v13684_v44, %v18285_v32  ;;  %v16934_v32 = vld [vmem:[#allocation19 + $0x28] ss:$16 sps:$4 sm:$0xff]   ;;  %17181 = vpow2.f32 %v16744_v24  ;;  %v16945_v14 = vld [vmem:[#allocation19 + $0x64] ss:$16 sps:$4 sm:$0xff]   ;;  %v16960_v52 = vld [vmem:[#allocation19 + $0xac] ss:$16 sps:$4 sm:$0xff]  }
 0x7c5   :  { %13656 = vmatprep.subr.bf16.mxu1 %v16695_v56  ;;  %v16933_v56 = vld [vmem:[#allocation19 + $0x24] ss:$16 sps:$4 sm:$0xff]   ;;  %v16946_v28 = vld [vmem:[#allocation19 + $0x68] ss:$16 sps:$4 sm:$0xff]   ;;  %v16961_v0 = vld [vmem:[#allocation19 + $0xc0] ss:$16 sps:$4 sm:$0xff]  }
 0x7c6   :  { %13616 = vmatpush1.bf16.msra.mxu0 %v16438_v55  ;;  %v16745_v55 = vmul.f32 -1.442695, %v13758_v58  ;;  %v16958_v37 = vld [vmem:[#allocation19 + $0xa8] ss:$16 sps:$4 sm:$0xff]  }
 0x7c7   :  { %13617 = vmatprep.subr.bf16.mxu0 %v16455_v4  ;;  %v16748_v4 = vmul.f32 -1.442695, %v13761_v53 }
 0x7c8   :  { %13657 = vmatpush1.bf16.msra.mxu1 %v16694_v62  ;;  %v16939_v62 = vld [vmem:[#allocation19 + $0x44] ss:$16 sps:$4 sm:$0xff]   ;;  %17183 = vpow2.f32 %v16745_v55 }
 0x7c9   :  { %13658 = vmatprep.subr.bf16.mxu1 %v16711_v6  ;;  %v16942_v6 = vld [vmem:[#allocation19 + $0x4c] ss:$16 sps:$4 sm:$0xff]   ;;  %17185 = vpow2.f32 %v16748_v4 }
 0x7ca   :  { %13618 = vmatpush1.bf16.msra.mxu0 %v16454_v8  ;;  %17187 = vpow2.f32 %v16749_v49  ;;  %v16954_v8 = vld [vmem:[#allocation19 + $0x8c] ss:$16 sps:$4 sm:$0xff]  }
 0x7cb   :  { %13619 = vmatprep.subr.bf16.mxu0 %v16471_v13  ;;  %v16952_v13 = vld [vmem:[#allocation19 + $0x88] ss:$16 sps:$4 sm:$0xff]  }
 0x7cc   :  { %13659 = vmatpush1.bf16.msra.mxu1 %v16710_v29  ;;  %v16949_v29 = vld [vmem:[#allocation19 + $0x80] ss:$16 sps:$4 sm:$0xff]  }
 0x7cd   :  { %13660 = vmatprep.subr.bf16.mxu1 %v16727_v21  ;;  %v16957_v21 = vld [vmem:[#allocation19 + $0xa4] ss:$16 sps:$4 sm:$0xff]  }
 0x7ce   :  { %13620 = vmatpush1.bf16.msra.mxu0 %v16470_v31  ;;  %v17182_v42 = vpop.eup %17181  ;;  %v18333_v31 = vld [vmem:[#allocation18 + $0x8] sm:$0xff] }
 0x7cf   :  { %13621 = vmatprep.subr.bf16.mxu0 %v16487_v54  ;;  %v13712_v18 = vrot.slane %v18333_v31, %v18012_v51  ;;  %v13716_v53 = vrot.slane %v18333_v31, %v17944_v33 }
 0x7d0   :  { %13661 = vmatpush1.bf16.msra.mxu1 %v16726_v26  ;;  %v16955_v26 = vld [vmem:[#allocation19 + $0xa0] ss:$16 sps:$4 sm:$0xff]  }
 0x7d1   :  { %13662 = vmatprep.subr.bf16.mxu1 %v16743_v23  ;;  %v13785_v23 = vadd.f32 1.0, %v17182_v42 }
 0x7d2   :  { %13622 = vmatpush1.bf16.msra.mxu0 %v16486_v16  ;;  %v17184_v12 = vpop.eup %17183  ;;  %v16963_v16 = vld [vmem:[#allocation19 + $0xc4] ss:$16 sps:$4 sm:$0xff]  }
 0x7d3   :  { %14673 = vmatprep.subr.bf16.mxu0 %v16927_v30  ;;  %v17186_v36 = vpop.eup %17185  ;;  %v13786_v44 = vadd.f32 1.0, %v17184_v12  ;;  %v16966_v30 = vld [vmem:[#allocation19 + $0xcc] ss:$16 sps:$4 sm:$0xff]   ;;  %17189 = vrcp.f32 %v13785_v23  ;;  %v16982_v12 = vld [vmem:[#allocation19 + $0x128] ss:$16 sps:$4 sm:$0xff]  }
 0x7d4   :  { %13663 = vmatpush1.bf16.msra.mxu1 %v16742_v47  ;;  %v17188_v54 = vpop.eup %17187  ;;  %v13809_v61 = vadd.f32 1.0, %v17186_v36  ;;  %v16987_v36 = vld [vmem:[#allocation19 + $0x144] ss:$16 sps:$4 sm:$0xff]   ;;  %v16990_v23 = vld [vmem:[#allocation19 + $0x14c] ss:$16 sps:$4 sm:$0xff]  }
 0x7d5   :  { %14755 = vmatprep.subr.bf16.mxu1 %v16930_v19  ;;  %13624 = vmatmul.mubr.bf16.vlgmr.msra.gmra.mrb[108].mxu0 %v18249_v1  ;;  %v16940_v1 = vld [vmem:[#allocation19 + $0x48] ss:$16 sps:$4 sm:$0xff]   ;;  %v13810_v58 = vadd.f32 1.0, %v17188_v54  ;;  %17191 = vrcp.f32 %v13786_v44 }
 0x7d6   :  { %14674 = vmatpush1.bf16.msra.mxu0 %v16925_v2  ;;  %17193 = vrcp.f32 %v13809_v61  ;;  %v6206_v54 = vld [vmem:[#allocation9 + $0x28] sm:$0xff] }
 0x7d7   :  { %13665 = vmatmul.mubr.bf16.vlgmr.msra.gmra.mrb[108].mxu1 %v18251_v27  ;;  %14675 = vmatprep.subr.bf16.mxu0 %v16933_v56  ;;  %v16948_v27 = vld [vmem:[#allocation19 + $0x6c] ss:$16 sps:$4 sm:$0xff]   ;;  %17195 = vrcp.f32 %v13810_v58 }
 0x7d8   :  { %14756 = vmatpush1.bf16.msra.mxu1 %v16928_v5  ;;  %v16996_v58 = vld [vmem:[#allocation19 + $0x16c] ss:$16 sps:$4 sm:$0xff]  }
 0x7d9   :  { %14757 = vmatprep.subr.bf16.mxu1 %v16936_v63 }
 0x7da   :  { %14676 = vmatpush1.bf16.msra.mxu0 %v16931_v10 }
 0x7db   :  { %14677 = vmatprep.subr.bf16.mxu0 %v16939_v62 }
 0x7dc   :  { %14758 = vmatpush1.bf16.msra.mxu1 %v16934_v32  ;;  %v16969_v32 = vld [vmem:[#allocation19 + $0xe4] ss:$16 sps:$4 sm:$0xff]  }
 0x7dd   :  { %14759 = vmatprep.subr.bf16.mxu1 %v16942_v6 }
 0x7de   :  { %14678 = vmatpush1.bf16.msra.mxu0 %v16937_v41  ;;  %v16967_v41 = vld [vmem:[#allocation19 + $0xe0] ss:$16 sps:$4 sm:$0xff]  }
 0x7df   :  { %14679 = vmatprep.subr.bf16.mxu0 %v16945_v14  ;;  %v16975_v14 = vld [vmem:[#allocation19 + $0x104] ss:$16 sps:$4 sm:$0xff]  }
 0x7e0   :  { %14760 = vmatpush1.bf16.msra.mxu1 %v16940_v1  ;;  %v16970_v1 = vld [vmem:[#allocation19 + $0xe8] ss:$16 sps:$4 sm:$0xff]  }
 0x7e1   :  { %14761 = vmatprep.subr.bf16.mxu1 %v16948_v27  ;;  %v16978_v27 = vld [vmem:[#allocation19 + $0x10c] ss:$16 sps:$4 sm:$0xff]  }
 0x7e2   :  { %14680 = vmatpush1.bf16.msra.mxu0 %v16943_v9  ;;  %v16973_v9 = vld [vmem:[#allocation19 + $0x100] ss:$16 sps:$4 sm:$0xff]  }
 0x7e3   :  { %14681 = vmatprep.subr.bf16.mxu0 %v16951_v40  ;;  %v16981_v40 = vld [vmem:[#allocation19 + $0x124] ss:$16 sps:$4 sm:$0xff]  }
 0x7e4   :  { %14762 = vmatpush1.bf16.msra.mxu1 %v16946_v28  ;;  %v16976_v28 = vld [vmem:[#allocation19 + $0x108] ss:$16 sps:$4 sm:$0xff]  }
 0x7e5   :  { %14763 = vmatprep.subr.bf16.mxu1 %v16954_v8  ;;  %v16984_v8 = vld [vmem:[#allocation19 + $0x12c] ss:$16 sps:$4 sm:$0xff]  }
 0x7e6   :  { %14682 = vmatpush1.bf16.msra.mxu0 %v16949_v29  ;;  %v17190_v29 = vpop.eup %17189 }
 0x7e7   :  { %14683 = vmatprep.subr.bf16.mxu0 %v16957_v21  ;;  %v16979_v21 = vld [vmem:[#allocation19 + $0x120] ss:$16 sps:$4 sm:$0xff]  }
 0x7e8   :  { %14764 = vmatpush1.bf16.msra.mxu1 %v16952_v13  ;;  %v13379_v47 = vpop.f32.mrb[96].mxu0  ;;  %v17192_v13 = vpop.eup %17191 }
 0x7e9   :  { %14765 = vmatprep.subr.bf16.mxu1 %v16960_v52  ;;  %v13380_v19 = vadd.f32 %v13379_v47, %v18245_v22  ;;  %v13381_v2 = vpop.f32.mrb[97].mxu0  ;;  %v16964_v22 = vld [vmem:[#allocation19 + $0xc8] ss:$16 sps:$4 sm:$0xff]   ;;  %v17194_v42 = vpop.eup %17193  ;;  %v6205_v52 = vld [vmem:[#allocation9 + $0x20] sm:$0xff] }
 0x7ea   :  { %v13420_v59 = vpop.f32.mrb[96].mxu1  ;;  %v13382_v5 = vadd.f32 %v13381_v2, %v18247_v7  ;;  %v13383_v63 = vpop.f32.mrb[98].mxu0  ;;  %14684 = vmatpush1.bf16.msra.mxu0 %v16955_v26  ;;  %v16972_v7 = vld [vmem:[#allocation19 + $0xec] ss:$16 sps:$4 sm:$0xff]   ;;  %v13849_v44 = vmul.f32 %v17194_v42, %v6205_v52 }
 0x7eb   :  { %v13422_v56 = vpop.f32.mrb[97].mxu1  ;;  %v13421_v24 = vadd.f32 %v13420_v59, %v13380_v19  ;;  %v13384_v55 = vpop.f32.mrb[99].mxu0  ;;  %14685 = vmatprep.subr.bf16.mxu0 %v16963_v16  ;;  %v16988_v59 = vld [vmem:[#allocation19 + $0x148] ss:$16 sps:$4 sm:$0xff]   ;;  %v16999_v63 = vld [vmem:[#allocation19 + $0x184] ss:$16 sps:$4 sm:$0xff]  }
 0x7ec   :  { %v13424_v10 = vpop.f32.mrb[98].mxu1  ;;  %14766 = vmatpush1.bf16.msra.mxu1 %v16958_v37  ;;  %v13423_v62 = vadd.f32 %v13422_v56, %v13382_v5  ;;  %v17196_v26 = vpop.eup %17195  ;;  %v16991_v56 = vld [vmem:[#allocation19 + $0x160] ss:$16 sps:$4 sm:$0xff]   ;;  %v17005_v55 = vld [vmem:[#allocation19 + $0x1a4] ss:$16 sps:$4 sm:$0xff]  }
 0x7ed   :  { %v13425_v4 = vpop.f32.mrb[99].mxu1  ;;  %14767 = vmatprep.subr.bf16.mxu1 %v16966_v30  ;;  %v13765_v6 = vadd.f32 %v13712_v18, %v13421_v24  ;;  %v16985_v30 = vld [vmem:[#allocation19 + $0x140] ss:$16 sps:$4 sm:$0xff]   ;;  %v13850_v61 = vmul.f32 %v17196_v26, %v6206_v54  ;;  %v16993_v18 = vld [vmem:[#allocation19 + $0x164] ss:$16 sps:$4 sm:$0xff]  }
 0x7ee   :  { %v13766_v49 = vadd.f32 %v13716_v53, %v13423_v62  ;;  %14686 = vmatpush1.bf16.msra.mxu0 %v16961_v0  ;;  %v16994_v53 = vld [vmem:[#allocation19 + $0x168] ss:$16 sps:$4 sm:$0xff]   ;;  %v17002_v0 = vld [vmem:[#allocation19 + $0x18c] ss:$16 sps:$4 sm:$0xff]   ;;  %v16997_v24 = vld [vmem:[#allocation19 + $0x180] ss:$16 sps:$4 sm:$0xff]  }
 0x7ef   :  { %17197 = vtanh.f32 %v13765_v6  ;;  %14687 = vmatprep.subr.bf16.mxu0 %v16969_v32  ;;  %v17000_v10 = vld [vmem:[#allocation19 + $0x188] ss:$16 sps:$4 sm:$0xff]   ;;  %v17003_v32 = vld [vmem:[#allocation19 + $0x1a0] ss:$16 sps:$4 sm:$0xff]   ;;  %v17011_v4 = vld [vmem:[#allocation19 + $0x1c4] ss:$16 sps:$4 sm:$0xff]  }
 0x7f0   :  { %14768 = vmatpush1.bf16.msra.mxu1 %v16964_v22  ;;  %17199 = vtanh.f32 %v13766_v49  ;;  %v17008_v22 = vld [vmem:[#allocation19 + $0x1ac] ss:$16 sps:$4 sm:$0xff]   ;;  %v17006_v62 = vld [vmem:[#allocation19 + $0x1a8] ss:$16 sps:$4 sm:$0xff]   ;;  %v17009_v6 = vld [vmem:[#allocation19 + $0x1c0] ss:$16 sps:$4 sm:$0xff]  }
 0x7f1   :  { %14769 = vmatprep.subr.bf16.mxu1 %v16972_v7  ;;  %v17014_v7 = vld [vmem:[#allocation19 + $0x1cc] ss:$16 sps:$4 sm:$0xff]   ;;  %v17012_v49 = vld [vmem:[#allocation19 + $0x1c8] ss:$16 sps:$4 sm:$0xff]  }
 0x7f2   :  { %14688 = vmatpush1.bf16.msra.mxu0 %v16967_v41  ;;  %v17017_v41 = vld [vmem:[#allocation19 + $0x1e4] ss:$16 sps:$4 sm:$0xff]  }
 0x7f3   :  { %14689 = vmatprep.subr.bf16.mxu0 %v16975_v14  ;;  %v13688_v14 = vrot.slane %v18317_v15, %v18106_v17 }
 0x7f4   :  { %14770 = vmatpush1.bf16.msra.mxu1 %v16970_v1  ;;  %v17020_v1 = vld [vmem:[#allocation19 + $0x1ec] ss:$16 sps:$4 sm:$0xff]  }
 0x7f5   :  { %14771 = vmatprep.subr.bf16.mxu1 %v16978_v27  ;;  %v17015_v27 = vld [vmem:[#allocation19 + $0x1e0] ss:$16 sps:$4 sm:$0xff]  }
 0x7f6   :  { %14690 = vmatpush1.bf16.msra.mxu0 %v16973_v9  ;;  %v13692_v9 = vrot.slane %v18317_v15, %v18109_v25 }
 0x7f7   :  { %14691 = vmatprep.subr.bf16.mxu0 %v16981_v40  ;;  %v17023_v40 = vld [vmem:[#allocation19 + $0x204] ss:$16 sps:$4 sm:$0xff]  }
 0x7f8   :  { %14772 = vmatpush1.bf16.msra.mxu1 %v16976_v28  ;;  %v17018_v28 = vld [vmem:[#allocation19 + $0x1e8] ss:$16 sps:$4 sm:$0xff]   ;;  %v13760_v42 = vadd.f32 %v13692_v9, %v18295_v60 }
 0x7f9   :  { %14773 = vmatprep.subr.bf16.mxu1 %v16984_v8  ;;  %v17198_v37 = vpop.eup %17197  ;;  %v13704_v8 = vrot.slane %v18317_v15, %v18119_v35 }
 0x7fa   :  { %v17200_v16 = vpop.eup %17199  ;;  %v13853_v47 = vmul.f32 %v17198_v37, %v17190_v29  ;;  %14692 = vmatpush1.bf16.msra.mxu0 %v16979_v21  ;;  %v17026_v29 = vld [vmem:[#allocation19 + $0x20c] ss:$16 sps:$4 sm:$0xff]   ;;  %v13759_v21 = vadd.f32 %v13688_v14, %v18293_v3  ;;  %v16747_v26 = vmul.f32 -1.442695, %v13760_v42 }
 0x7fb   :  { %v13854_v19 = vmul.f32 %v17200_v16, %v17192_v13  ;;  %14693 = vmatprep.subr.bf16.mxu0 %v16987_v36  ;;  %v13708_v13 = vrot.slane %v18317_v15, %v18127_v11  ;;  %v13763_v52 = vadd.f32 %v13704_v8, %v18313_v50 }
 0x7fc   :  { %14774 = vmatpush1.bf16.msra.mxu1 %v16982_v12  ;;  %v18341_v2 = vadd.f32 %v13853_v47, %v13849_v44  ;;  %v16746_v36 = vmul.f32 -1.442695, %v13759_v21  ;;  %v13728_v21 = vrot.slane %v18333_v31, %v18114_v34 }
 0x7fd   :  { %14775 = vmatprep.subr.bf16.mxu1 %v16990_v23  ;;  %v18343_v5 = vadd.f32 %v13854_v19, %v13850_v61  ;;  %v13764_v12 = vadd.f32 %v13708_v13, %v18315_v48  ;;  %v16750_v54 = vmul.f32 -1.442695, %v13763_v52  ;;  %v13720_v48 = vrot.slane %v18333_v31, %v18106_v17 }
 0x7fe   :  { %13875 = vst [vmem:[#allocation25 + $0x20] sm:$0xff] %v18341_v2  ;;  %14694 = vmatpush1.bf16.msra.mxu0 %v16985_v30  ;;  %17201 = vpow2.f32 %v16746_v36  ;;  %v13732_v36 = vrot.slane %v18333_v31, %v18124_v57 }
 0x7ff   :  { %13876 = vst [vmem:[#allocation25 + $0x28] sm:$0xff] %v18343_v5  ;;  %14695 = vmatprep.subr.bf16.mxu0 %v16993_v18  ;;  %v16751_v23 = vmul.f32 -1.442695, %v13764_v12  ;;  %17203 = vpow2.f32 %v16747_v26 }
 0x800   :  { %14776 = vmatpush1.bf16.msra.mxu1 %v16988_v59  ;;  %17205 = vpow2.f32 %v16750_v54 }
 0x801   :  { %14777 = vmatprep.subr.bf16.mxu1 %v16996_v58  ;;  %17207 = vpow2.f32 %v16751_v23 }
 0x802   :  { %14696 = vmatpush1.bf16.msra.mxu0 %v16991_v56  ;;  %v13724_v56 = vrot.slane %v18333_v31, %v18109_v25 }
 0x803   :  { %14697 = vmatprep.subr.bf16.mxu0 %v16999_v63 }
 0x804   :  { %14778 = vmatpush1.bf16.msra.mxu1 %v16994_v53 }
 0x805   :  { %14779 = vmatprep.subr.bf16.mxu1 %v17002_v0 }
 0x806   :  { %14698 = vmatpush1.bf16.msra.mxu0 %v16997_v24 }
 0x807   :  { %14699 = vmatprep.subr.bf16.mxu0 %v17005_v55 }
 0x808   :  { %14780 = vmatpush1.bf16.msra.mxu1 %v17000_v10  ;;  %v17202_v15 = vpop.eup %17201 }
 0x809   :  { %14781 = vmatprep.subr.bf16.mxu1 %v17008_v22  ;;  %v17204_v3 = vpop.eup %17203  ;;  %v13787_v60 = vadd.f32 1.0, %v17202_v15 }
 0x80a   :  { %14700 = vmatpush1.bf16.msra.mxu0 %v17003_v32  ;;  %v17206_v37 = vpop.eup %17205  ;;  %v13788_v44 = vadd.f32 1.0, %v17204_v3 }
 0x80b   :  { %14701 = vmatprep.subr.bf16.mxu0 %v17011_v4  ;;  %v17208_v16 = vpop.eup %17207  ;;  %v13811_v30 = vadd.f32 1.0, %v17206_v37  ;;  %17209 = vrcp.f32 %v13787_v60  ;;  %v6207_v4 = vld [vmem:[#allocation9 + $0x30] sm:$0xff] }
 0x80c   :  { %14782 = vmatpush1.bf16.msra.mxu1 %v17006_v62  ;;  %v13812_v59 = vadd.f32 1.0, %v17208_v16  ;;  %17211 = vrcp.f32 %v13788_v44 }
 0x80d   :  { %14783 = vmatprep.subr.bf16.mxu1 %v17014_v7  ;;  %17213 = vrcp.f32 %v13811_v30 }
 0x80e   :  { %14702 = vmatpush1.bf16.msra.mxu0 %v17009_v6  ;;  %17215 = vrcp.f32 %v13812_v59  ;;  %v6208_v6 = vld [vmem:[#allocation9 + $0x38] sm:$0xff] }
 0x80f   :  { %14703 = vmatprep.subr.bf16.mxu0 %v17017_v41 }
 0x810   :  { %14784 = vmatpush1.bf16.msra.mxu1 %v17012_v49 }
 0x811   :  { %14785 = vmatprep.subr.bf16.mxu1 %v17020_v1 }
 0x812   :  { %14704 = vmatpush1.bf16.msra.mxu0 %v17015_v27 }
 0x813   :  { %14714 = vmatprep.subr.bf16.mxu0 %v17023_v40 }
 0x814   :  { %14786 = vmatpush1.bf16.msra.mxu1 %v17018_v28 }
 0x815   :  { %14796 = vmatprep.subr.bf16.mxu1 %v17026_v29  ;;  %v17210_v32 = vpop.eup %17209 }
 0x828   :  { %v13461_v47 = vpop.f32.mrb[100].mxu0 }
 0x829   :  { %v13462_v50 = vadd.f32 %v13461_v47, %v18257_v46  ;;  %v13463_v19 = vpop.f32.mrb[101].mxu0 }
 0x82a   :  { %v13502_v61 = vpop.f32.mrb[100].mxu1  ;;  %v13464_v18 = vadd.f32 %v13463_v19, %v18259_v20  ;;  %v13465_v53 = vpop.f32.mrb[102].mxu0 }
 0x82b   :  { %v13504_v58 = vpop.f32.mrb[101].mxu1  ;;  %v13503_v63 = vadd.f32 %v13502_v61, %v13462_v50  ;;  %v13466_v24 = vpop.f32.mrb[103].mxu0 }
 0x82c   :  { %v13506_v0 = vpop.f32.mrb[102].mxu1  ;;  %v13505_v10 = vadd.f32 %v13504_v58, %v13464_v18  ;;  %v17212_v20 = vpop.eup %17211  ;;  %v17021_v58 = vld [vmem:[#allocation19 + $0x200] ss:$16 sps:$4 sm:$0xff]   ;;  %v17035_v24 = vld [vmem:[#allocation19 + $0x244] ss:$16 sps:$4 sm:$0xff]  }
 0x82d   :  { %v13507_v46 = vpop.f32.mrb[103].mxu1  ;;  %v13767_v55 = vadd.f32 %v13720_v48, %v13503_v63  ;;  %v17214_v62 = vpop.eup %17213  ;;  %v17029_v63 = vld [vmem:[#allocation19 + $0x224] ss:$16 sps:$4 sm:$0xff]   ;;  %v17030_v0 = vld [vmem:[#allocation19 + $0x228] ss:$16 sps:$4 sm:$0xff]  }
 0x82e   :  { %v13768_v22 = vadd.f32 %v13724_v56, %v13505_v10  ;;  %v17216_v7 = vpop.eup %17215  ;;  %v13851_v1 = vmul.f32 %v17214_v62, %v6207_v4  ;;  %v17024_v56 = vld [vmem:[#allocation19 + $0x208] ss:$16 sps:$4 sm:$0xff]   ;;  %v17038_v10 = vld [vmem:[#allocation19 + $0x24c] ss:$16 sps:$4 sm:$0xff]   ;;  %v17033_v46 = vld [vmem:[#allocation19 + $0x240] ss:$16 sps:$4 sm:$0xff]  }
 0x82f   :  { %17217 = vtanh.f32 %v13767_v55  ;;  %v13852_v27 = vmul.f32 %v17216_v7, %v6208_v6  ;;  %v17036_v55 = vld [vmem:[#allocation19 + $0x248] ss:$16 sps:$4 sm:$0xff]   ;;  %v17047_v4 = vld [vmem:[#allocation19 + $0x284] ss:$16 sps:$4 sm:$0xff]   ;;  %v17050_v7 = vld [vmem:[#allocation19 + $0x28c] ss:$16 sps:$4 sm:$0xff]  }
 0x830   :  { %17219 = vtanh.f32 %v13768_v22  ;;  %v17041_v22 = vld [vmem:[#allocation19 + $0x264] ss:$16 sps:$4 sm:$0xff]   ;;  %v17042_v62 = vld [vmem:[#allocation19 + $0x268] ss:$16 sps:$4 sm:$0xff]   ;;  %v17045_v6 = vld [vmem:[#allocation19 + $0x280] ss:$16 sps:$4 sm:$0xff]  }
 0x839   :  { %v17218_v49 = vpop.eup %17217 }
 0x83a   :  { %v17220_v41 = vpop.eup %17219  ;;  %v13855_v14 = vmul.f32 %v17218_v49, %v17210_v32  ;;  %v17044_v32 = vld [vmem:[#allocation19 + $0x26c] ss:$16 sps:$4 sm:$0xff]   ;;  %v17048_v49 = vld [vmem:[#allocation19 + $0x288] ss:$16 sps:$4 sm:$0xff]  }
 0x83b   :  { %v13856_v9 = vmul.f32 %v17220_v41, %v17212_v20  ;;  %v17039_v20 = vld [vmem:[#allocation19 + $0x260] ss:$16 sps:$4 sm:$0xff]   ;;  %v17053_v41 = vld [vmem:[#allocation19 + $0x2a4] ss:$16 sps:$4 sm:$0xff]  }
 0x83c   :  { %v18365_v28 = vadd.f32 %v13855_v14, %v13851_v1  ;;  %v17056_v1 = vld [vmem:[#allocation19 + $0x2ac] ss:$16 sps:$4 sm:$0xff]   ;;  %v17051_v14 = vld [vmem:[#allocation19 + $0x2a0] ss:$16 sps:$4 sm:$0xff]  }
 0x83d   :  { %v18367_v40 = vadd.f32 %v13856_v9, %v13852_v27  ;;  %v17054_v27 = vld [vmem:[#allocation19 + $0x2a8] ss:$16 sps:$4 sm:$0xff]   ;;  %v17059_v9 = vld [vmem:[#allocation19 + $0x2c4] ss:$16 sps:$4 sm:$0xff]  }
 0x83e   :  { %13877 = vst [vmem:[#allocation25 + $0x30] sm:$0xff] %v18365_v28 }
 0x83f   :  { %13878 = vst [vmem:[#allocation25 + $0x38] sm:$0xff] %v18367_v40 }
 0x868   :  { %v13543_v8 = vpop.f32.mrb[104].mxu0 }
 0x869   :  { %v13544_v29 = vadd.f32 %v13543_v8, %v18265_v43  ;;  %v13545_v42 = vpop.f32.mrb[105].mxu0  ;;  %v17062_v8 = vld [vmem:[#allocation19 + $0x2cc] ss:$16 sps:$4 sm:$0xff]  }
 0x86a   :  { %v13584_v13 = vpop.f32.mrb[104].mxu1  ;;  %v13546_v52 = vadd.f32 %v13545_v42, %v18267_v45  ;;  %v13547_v26 = vpop.f32.mrb[106].mxu0  ;;  %v17068_v42 = vld [vmem:[#allocation19 + $0x2ec] ss:$16 sps:$4 sm:$0xff]  }
 0x86b   :  { %v13586_v12 = vpop.f32.mrb[105].mxu1  ;;  %v13585_v54 = vadd.f32 %v13584_v13, %v13544_v29  ;;  %v13548_v15 = vpop.f32.mrb[107].mxu0  ;;  %v17057_v29 = vld [vmem:[#allocation19 + $0x2c0] ss:$16 sps:$4 sm:$0xff]   ;;  %v17060_v13 = vld [vmem:[#allocation19 + $0x2c8] ss:$16 sps:$4 sm:$0xff]  }
 0x86c   :  { %v13588_v23 = vpop.f32.mrb[106].mxu1  ;;  %v13587_v3 = vadd.f32 %v13586_v12, %v13546_v52  ;;  %v17063_v12 = vld [vmem:[#allocation19 + $0x2e0] ss:$16 sps:$4 sm:$0xff]  }
 0x86d   :  { %v13589_v37 = vpop.f32.mrb[107].mxu1  ;;  %v13769_v16 = vadd.f32 %v13728_v21, %v13585_v54  ;;  %v17065_v21 = vld [vmem:[#allocation19 + $0x2e4] ss:$16 sps:$4 sm:$0xff]   ;;  %v13736_v23 = vrot.slane %v18333_v31, %v18119_v35  ;;  %v17069_v35 = vld [vmem:[#allocation19 + $0x300] ss:$16 sps:$4 sm:$0xff]  }
 0x86e   :  { %v13770_v60 = vadd.f32 %v13732_v36, %v13587_v3  ;;  %v17066_v36 = vld [vmem:[#allocation19 + $0x2e8] ss:$16 sps:$4 sm:$0xff]   ;;  %v17071_v3 = vld [vmem:[#allocation19 + $0x304] ss:$16 sps:$4 sm:$0xff]   ;;  %v17074_v37 = vld [vmem:[#allocation19 + $0x30c] ss:$16 sps:$4 sm:$0xff]  }
 0x86f   :  { %v16752_v43 = vmul.f32 -1.442695, %v13769_v16 }
 0x870   :  { %v16753_v44 = vmul.f32 -1.442695, %v13770_v60 }
 0x871   :  { %17221 = vpow2.f32 %v16752_v43  ;;  %v13740_v43 = vrot.slane %v18333_v31, %v18127_v11  ;;  %v17075_v11 = vld [vmem:[#allocation19 + $0x320] ss:$16 sps:$4 sm:$0xff]   ;;  %v17078_v31 = vld [vmem:[#allocation19 + $0x328] ss:$16 sps:$4 sm:$0xff]  }
 0x872   :  { %17223 = vpow2.f32 %v16753_v44 }
 0x873   :  { %17225 = vtanh.f32 %v18341_v2  ;;  %v17032_v2 = vld [vmem:[#allocation19 + $0x22c] ss:$16 sps:$4 sm:$0xff]  }
 0x874   :  { %17227 = vtanh.f32 %v18343_v5  ;;  %v17027_v5 = vld [vmem:[#allocation19 + $0x220] ss:$16 sps:$4 sm:$0xff]  }
 0x87b   :  { %v17222_v34 = vpop.eup %17221 }
 0x87c   :  { %v17224_v47 = vpop.eup %17223  ;;  %v13837_v45 = vadd.f32 1.0, %v17222_v34 }
 0x87d   :  { %v13838_v30 = vadd.f32 1.0, %v17224_v47  ;;  %v17226_v57 = vpop.eup %17225 }
 0x87e   :  { %17229 = vrcp.f32 %v13837_v45  ;;  %v17228_v50 = vpop.eup %17227 }
 0x87f   :  { %17231 = vrcp.f32 %v13838_v30 }
 0x888   :  { %v17230_v61 = vpop.eup %17229 }
 0x889   :  { %v17232_v48 = vpop.eup %17231  ;;  %v13865_v19 = vmul.f32 %v17230_v61, %v17226_v57  ;;  %v17072_v57 = vld [vmem:[#allocation19 + $0x308] ss:$16 sps:$4 sm:$0xff]   ;;  %v17077_v61 = vld [vmem:[#allocation19 + $0x324] ss:$16 sps:$4 sm:$0xff]  }
 0x88a   :  { %v13866_v59 = vmul.f32 %v17232_v48, %v17228_v50  ;;  %v17080_v48 = vld [vmem:[#allocation19 + $0x32c] ss:$16 sps:$4 sm:$0xff]  }
 0x88b   :  { %13870 = vst [vmem:[#allocation23 + $0x20] sm:$0xff] %v13865_v19  ;;  %v13879_v53 = vpack.c.bf16 %v13865_v19, %v13865_v19 }
 0x88c   :  { %13871 = vst [vmem:[#allocation23 + $0x28] sm:$0xff] %v13866_v59  ;;  %v13880_v18 = vpack.c.bf16 %v13866_v59, %v13866_v59 }
 0x88e   :  { %14705 = vmatprep.mubr.bf16.mxu0 %v13880_v18  ;;  %14787 = vmatprep.mubr.bf16.mxu1 %v13880_v18  ;;  %v17083_v18 = vld [vmem:[#allocation19 + $0x344] ss:$16 sps:$4 sm:$0xff]  }
 0x88f   :  { %14706 = vmatmul.mubr.bf16.vlgmr.msra.gmra.mrb[112].mxu0 %v13879_v53  ;;  %14788 = vmatmul.mubr.bf16.vlgmr.msra.gmra.mrb[112].mxu1 %v13879_v53  ;;  %v17084_v53 = vld [vmem:[#allocation19 + $0x348] ss:$16 sps:$4 sm:$0xff]  }
 0x890   :  { %14715 = vmatpush1.bf16.msra.mxu0 %v17021_v58  ;;  %14797 = vmatpush1.bf16.msra.mxu1 %v17024_v56  ;;  %v17086_v58 = vld [vmem:[#allocation19 + $0x34c] ss:$16 sps:$4 sm:$0xff]   ;;  %v17081_v56 = vld [vmem:[#allocation19 + $0x340] ss:$16 sps:$4 sm:$0xff]  }
 0x891   :  { %14716 = vmatprep.subr.bf16.mxu0 %v17029_v63  ;;  %14798 = vmatprep.subr.bf16.mxu1 %v17032_v2  ;;  %v17089_v63 = vld [vmem:[#allocation19 + $0x364] ss:$16 sps:$4 sm:$0xff]   ;;  %v17092_v2 = vld [vmem:[#allocation19 + $0x36c] ss:$16 sps:$4 sm:$0xff]  }
 0x894   :  { %14717 = vmatpush1.bf16.msra.mxu0 %v17027_v5  ;;  %14799 = vmatpush1.bf16.msra.mxu1 %v17030_v0  ;;  %v17087_v5 = vld [vmem:[#allocation19 + $0x360] ss:$16 sps:$4 sm:$0xff]   ;;  %v17090_v0 = vld [vmem:[#allocation19 + $0x368] ss:$16 sps:$4 sm:$0xff]  }
 0x895   :  { %14718 = vmatprep.subr.bf16.mxu0 %v17035_v24  ;;  %14800 = vmatprep.subr.bf16.mxu1 %v17038_v10  ;;  %v17095_v24 = vld [vmem:[#allocation19 + $0x384] ss:$16 sps:$4 sm:$0xff]   ;;  %v17098_v10 = vld [vmem:[#allocation19 + $0x38c] ss:$16 sps:$4 sm:$0xff]  }
 0x898   :  { %14719 = vmatpush1.bf16.msra.mxu0 %v17033_v46  ;;  %14801 = vmatpush1.bf16.msra.mxu1 %v17036_v55 }
 0x899   :  { %14720 = vmatprep.subr.bf16.mxu0 %v17041_v22  ;;  %14802 = vmatprep.subr.bf16.mxu1 %v17044_v32  ;;  %v17093_v32 = vld [vmem:[#allocation19 + $0x380] ss:$16 sps:$4 sm:$0xff]  }
 0x89c   :  { %14721 = vmatpush1.bf16.msra.mxu0 %v17039_v20  ;;  %14803 = vmatpush1.bf16.msra.mxu1 %v17042_v62  ;;  %v17096_v20 = vld [vmem:[#allocation19 + $0x388] ss:$16 sps:$4 sm:$0xff]  }
 0x89d   :  { %14722 = vmatprep.subr.bf16.mxu0 %v17047_v4  ;;  %14804 = vmatprep.subr.bf16.mxu1 %v17050_v7  ;;  %v17101_v4 = vld [vmem:[#allocation19 + $0x3a4] ss:$16 sps:$4 sm:$0xff]   ;;  %v17104_v7 = vld [vmem:[#allocation19 + $0x3ac] ss:$16 sps:$4 sm:$0xff]  }
 0x8a0   :  { %14723 = vmatpush1.bf16.msra.mxu0 %v17045_v6  ;;  %14805 = vmatpush1.bf16.msra.mxu1 %v17048_v49  ;;  %v17099_v6 = vld [vmem:[#allocation19 + $0x3a0] ss:$16 sps:$4 sm:$0xff]   ;;  %v17102_v49 = vld [vmem:[#allocation19 + $0x3a8] ss:$16 sps:$4 sm:$0xff]  }
 0x8a1   :  { %14724 = vmatprep.subr.bf16.mxu0 %v17053_v41  ;;  %14806 = vmatprep.subr.bf16.mxu1 %v17056_v1  ;;  %v17110_v41 = vld [vmem:[#allocation19 + $0x3cc] ss:$16 sps:$4 sm:$0xff]   ;;  %v17105_v1 = vld [vmem:[#allocation19 + $0x3c0] ss:$16 sps:$4 sm:$0xff]  }
 0x8a4   :  { %14725 = vmatpush1.bf16.msra.mxu0 %v17051_v14  ;;  %14807 = vmatpush1.bf16.msra.mxu1 %v17054_v27  ;;  %v17108_v14 = vld [vmem:[#allocation19 + $0x3c8] ss:$16 sps:$4 sm:$0xff]   ;;  %v17113_v27 = vld [vmem:[#allocation19 + $0x3e4] ss:$16 sps:$4 sm:$0xff]  }
 0x8a5   :  { %14726 = vmatprep.subr.bf16.mxu0 %v17059_v9  ;;  %14808 = vmatprep.subr.bf16.mxu1 %v17062_v8  ;;  %v17116_v9 = vld [vmem:[#allocation19 + $0x3ec] ss:$16 sps:$4 sm:$0xff]  }
 0x8a8   :  { %v13625_v52 = vpop.f32.mrb[108].mxu0  ;;  %14727 = vmatpush1.bf16.msra.mxu0 %v17057_v29  ;;  %14809 = vmatpush1.bf16.msra.mxu1 %v17060_v13  ;;  %v17111_v13 = vld [vmem:[#allocation19 + $0x3e0] ss:$16 sps:$4 sm:$0xff]  }
 0x8a9   :  { %v13626_v26 = vadd.f32 %v13625_v52, %v18273_v38  ;;  %v13627_v15 = vpop.f32.mrb[109].mxu0  ;;  %14728 = vmatprep.subr.bf16.mxu0 %v17065_v21  ;;  %14810 = vmatprep.subr.bf16.mxu1 %v17068_v42  ;;  %v17114_v21 = vld [vmem:[#allocation19 + $0x3e8] ss:$16 sps:$4 sm:$0xff]  }
 0x8aa   :  { %v13666_v54 = vpop.f32.mrb[108].mxu1  ;;  %v13628_v16 = vadd.f32 %v13627_v15, %v18275_v39  ;;  %v13629_v44 = vpop.f32.mrb[110].mxu0 }
 0x8ab   :  { %v13668_v60 = vpop.f32.mrb[109].mxu1  ;;  %v13667_v34 = vadd.f32 %v13666_v54, %v13626_v26  ;;  %v13630_v45 = vpop.f32.mrb[111].mxu0 }
 0x8ac   :  { %v13670_v47 = vpop.f32.mrb[110].mxu1  ;;  %v13669_v38 = vadd.f32 %v13668_v60, %v13628_v16  ;;  %14729 = vmatpush1.bf16.msra.mxu0 %v17063_v12  ;;  %14811 = vmatpush1.bf16.msra.mxu1 %v17066_v36 }
 0x8ad   :  { %v13671_v30 = vpop.f32.mrb[111].mxu1  ;;  %v13771_v50 = vadd.f32 %v13736_v23, %v13667_v34  ;;  %14730 = vmatprep.subr.bf16.mxu0 %v17071_v3  ;;  %14812 = vmatprep.subr.bf16.mxu1 %v17074_v37 }
 0x8ae   :  { %v13772_v39 = vadd.f32 %v13740_v43, %v13669_v38 }
 0x8af   :  { %v16754_v19 = vmul.f32 -1.442695, %v13771_v50 }
 0x8b0   :  { %v16755_v59 = vmul.f32 -1.442695, %v13772_v39  ;;  %14731 = vmatpush1.bf16.msra.mxu0 %v17069_v35  ;;  %14813 = vmatpush1.bf16.msra.mxu1 %v17072_v57 }
 0x8b1   :  { %17233 = vpow2.f32 %v16754_v19  ;;  %14732 = vmatprep.subr.bf16.mxu0 %v17077_v61  ;;  %14814 = vmatprep.subr.bf16.mxu1 %v17080_v48 }
 0x8b2   :  { %17235 = vpow2.f32 %v16755_v59 }
 0x8b3   :  { %17237 = vtanh.f32 %v18365_v28  ;;  %v17107_v28 = vld [vmem:[#allocation19 + $0x3c4] ss:$16 sps:$4 sm:$0xff]  }
 0x8b4   :  { %14733 = vmatpush1.bf16.msra.mxu0 %v17075_v11  ;;  %14815 = vmatpush1.bf16.msra.mxu1 %v17078_v31  ;;  %17239 = vtanh.f32 %v18367_v40 }
 0x8b5   :  { %14734 = vmatprep.subr.bf16.mxu0 %v17083_v18  ;;  %14816 = vmatprep.subr.bf16.mxu1 %v17086_v58 }
 0x8b8   :  { %14735 = vmatpush1.bf16.msra.mxu0 %v17081_v56  ;;  %14817 = vmatpush1.bf16.msra.mxu1 %v17084_v53 }
 0x8b9   :  { %14736 = vmatprep.subr.bf16.mxu0 %v17089_v63  ;;  %14818 = vmatprep.subr.bf16.mxu1 %v17092_v2 }
 0x8bb   :  { %v17234_v46 = vpop.eup %17233 }
 0x8bc   :  { %v17236_v55 = vpop.eup %17235  ;;  %v13839_v22 = vadd.f32 1.0, %v17234_v46  ;;  %14737 = vmatpush1.bf16.msra.mxu0 %v17087_v5  ;;  %14819 = vmatpush1.bf16.msra.mxu1 %v17090_v0 }
 0x8bd   :  { %v13840_v62 = vadd.f32 1.0, %v17236_v55  ;;  %14738 = vmatprep.subr.bf16.mxu0 %v17095_v24  ;;  %14820 = vmatprep.subr.bf16.mxu1 %v17098_v10  ;;  %v17238_v8 = vpop.eup %17237 }
 0x8be   :  { %17241 = vrcp.f32 %v13839_v22  ;;  %v17240_v40 = vpop.eup %17239 }
 0x8bf   :  { %17243 = vrcp.f32 %v13840_v62 }
 0x8c0   :  { %14739 = vmatpush1.bf16.msra.mxu0 %v17093_v32  ;;  %14821 = vmatpush1.bf16.msra.mxu1 %v17096_v20 }
 0x8c1   :  { %14740 = vmatprep.subr.bf16.mxu0 %v17101_v4  ;;  %14822 = vmatprep.subr.bf16.mxu1 %v17104_v7 }
 0x8c4   :  { %14741 = vmatpush1.bf16.msra.mxu0 %v17099_v6  ;;  %14823 = vmatpush1.bf16.msra.mxu1 %v17102_v49 }
 0x8c5   :  { %14742 = vmatprep.subr.bf16.mxu0 %v17107_v28  ;;  %14824 = vmatprep.subr.bf16.mxu1 %v17110_v41 }
 0x8c8   :  { %v17242_v29 = vpop.eup %17241  ;;  %14743 = vmatpush1.bf16.msra.mxu0 %v17105_v1  ;;  %14825 = vmatpush1.bf16.msra.mxu1 %v17108_v14 }
 0x8c9   :  { %v17244_v42 = vpop.eup %17243  ;;  %14744 = vmatprep.subr.bf16.mxu0 %v17113_v27  ;;  %14826 = vmatprep.subr.bf16.mxu1 %v17116_v9  ;;  %v13867_v52 = vmul.f32 %v17242_v29, %v17238_v8 }
 0x8ca   :  { %v13868_v12 = vmul.f32 %v17244_v42, %v17240_v40 }
 0x8cb   :  { %13872 = vst [vmem:[#allocation23 + $0x30] sm:$0xff] %v13867_v52  ;;  %v13881_v26 = vpack.c.bf16 %v13867_v52, %v13867_v52 }
 0x8cc   :  { %14745 = vmatpush1.bf16.msra.mxu0 %v17111_v13  ;;  %14827 = vmatpush1.bf16.msra.mxu1 %v17114_v21  ;;  %13873 = vst [vmem:[#allocation23 + $0x38] sm:$0xff] %v13868_v12  ;;  %v13882_v36 = vpack.c.bf16 %v13868_v12, %v13868_v12 }
 0x8ce   :  { %14746 = vmatprep.mubr.bf16.mxu0 %v13882_v36  ;;  %14828 = vmatprep.mubr.bf16.mxu1 %v13882_v36 }
 0x8cf   :  { %14747 = vmatmul.mubr.bf16.vlgmr.msra.gmra.mrb[112].mxu0 %v13881_v26  ;;  %14829 = vmatmul.mubr.bf16.vlgmr.msra.gmra.mrb[112].mxu1 %v13881_v26 }
 0x8d0   :  { %17512 = shalt.err (!%p17509_p11)
}
 0x8d1   :  { %s17513_s5 = scalar_lea.hbm %s18446_s13, 1024 }
 0x8d2   :  { %p17514_p12 = scmp.ne.s32.totalorder %s18446_s13, %s17513_s5  ;;  %p17517_p13 = scmp.lt.u32.totalorder %s17513_s5, %s18446_s13 }
 0x8d4   :  { %p17519_p0 = pnand %p17517_p13, %p17514_p12 }
 0x8d6   :  { %17522 = shalt.err (!%p17519_p0)
}
 0x8d7   :  { %14862 = dma.vmem_to_hbm [thread:$0]  %s14857_s20, 1024, %s18446_s13, [#allocation24], %s18450_s28, %s18450_s28, %s17587_s24  }
 0x8d8   :  { %s17604_s23 = smov [#allocation25]  }
 0x8d9   :  { %s14868_s3 = sshll.u32 %s17604_s23, 4  ;;  %s14869_s3 = int_to_ptr.vmem [resolvable:$true] %s14868_s3 }
 0x8da   :  { %s17523_s26 = scalar_lea.vmem %s14869_s3, 1024  ;;  %p17528_p2 = scmp.lt.s32.totalorder %s14869_s3, %s14869_s3 }
 0x8db   :  { %p17524_p1 = scmp.ne.s32.totalorder %s14869_s3, %s17523_s26  ;;  %p17529_p3 = scmp.lt.s32.totalorder %s17523_s26, %s17523_s26 }
 0x8dd   :  { %p17530_p4 = por %p17529_p3, %p17528_p2 }
 0x8df   :  { %p17531_p5 = pnand %p17530_p4, %p17524_p1 }
 0x8e1   :  { %17534 = shalt.err (!%p17531_p5)
}
 0x8e2   :  { %s17535_s2 = scalar_lea.hbm %s18447_s14, 1024 }
 0x8e3   :  { %p17536_p6 = scmp.ne.s32.totalorder %s18447_s14, %s17535_s2  ;;  %p17539_p7 = scmp.lt.u32.totalorder %s17535_s2, %s18447_s14 }
 0x8e5   :  { %p17541_p8 = pnand %p17539_p7, %p17536_p6 }
 0x8e7   :  { %17544 = shalt.err (!%p17541_p8)
}
 0x8e8   :  { %14874 = dma.vmem_to_hbm [thread:$0]  %s14869_s3, 1024, %s18447_s14, [#allocation24], %s18450_s28, %s18450_s28, %s17587_s24   ;;  %v14011_v54 = vld [vmem:[#allocation21] sm:$0xf] }
 0x8e9   :  { %v14016_v23 = vrot.slane %v14011_v54, %v18012_v51  ;;  %v14024_v15 = vrot.slane %v14011_v54, %v18106_v17  ;;  %v14020_v3 = vrot.slane %v14011_v54, %v17944_v33  ;;  %v14028_v37 = vrot.slane %v14011_v54, %v18109_v25  ;;  %s17605_s1 = smov [#allocation22]  }
 0x8ea   :  { %s14847_s15 = sshll.u32 %s17605_s1, 4  ;;  %s14848_s15 = int_to_ptr.vmem [resolvable:$true] %s14847_s15 }
 0x8eb   :  { %s17545_s14 = scalar_lea.vmem %s14848_s15, 512  ;;  %p17550_p10 = scmp.lt.s32.totalorder %s14848_s15, %s14848_s15 }
 0x8ec   :  { %p17546_p9 = scmp.ne.s32.totalorder %s14848_s15, %s17545_s14  ;;  %p17551_p11 = scmp.lt.s32.totalorder %s17545_s14, %s17545_s14 }
 0x8ee   :  { %p17552_p12 = por %p17551_p11, %p17550_p10 }
 0x8f0   :  { %p17553_p13 = pnand %p17552_p12, %p17546_p9 }
 0x9a2   :  { %v14748_v16 = vpop.f32.mrb[112].mxu0  ;;  %v14830_v60 = vpop.f32.mrb[112].mxu1 }
 0x9a3   :  { %v16892_v43 = vadd.f32 %v14748_v16, %v14016_v23  ;;  %v16894_v44 = vadd.f32 %v14830_v60, %v14024_v15  ;;  %v14750_v34 = vpop.f32.mrb[113].mxu0  ;;  %v14832_v47 = vpop.f32.mrb[113].mxu1 }
 0x9a4   :  { %v16893_v45 = vadd.f32 %v14750_v34, %v14020_v3  ;;  %v16895_v38 = vadd.f32 %v14832_v47, %v14028_v37  ;;  %v14752_v30 = vpop.f32.mrb[114].mxu0  ;;  %v14834_v35 = vpop.f32.mrb[114].mxu1 }
 0x9a5   :  { %14837 = vst [vmem:[#allocation22] sm:$0xff] %v16892_v43  ;;  %14839 = vst [vmem:[#allocation22 + $0x10] sm:$0xff] %v16894_v44  ;;  %v14753_v51 = vpop.f32.mrb[115].mxu0  ;;  %v14835_v17 = vpop.f32.mrb[115].mxu1 }
 0x9a6   :  { %14838 = vst [vmem:[#allocation22 + $0x8] sm:$0xff] %v16893_v45  ;;  %14840 = vst [vmem:[#allocation22 + $0x18] sm:$0xff] %v16895_v38 }
 0x9a7   :  { %17556 = shalt.err (!%p17553_p13)
}
 0x9a8   :  { %s17557_s18 = scalar_lea.hbm %s18445_s12, 512 }
 0x9a9   :  { %p17558_p0 = scmp.ne.s32.totalorder %s18445_s12, %s17557_s18  ;;  %p17561_p1 = scmp.lt.u32.totalorder %s17557_s18, %s18445_s12 }
 0x9ab   :  { %p17563_p2 = pnand %p17561_p1, %p17558_p0 }
 0x9ad   :  { %17566 = shalt.err (!%p17563_p2)
}
 0x9ae   :  { %14850 = dma.vmem_to_hbm [thread:$0]  %s14848_s15, 512, %s18445_s12, [#allocation4]  }
 0x9af   :  { %17581 = dma.done.wait [#allocation4], 512  }
 0x9b0   :  { %17582 = vsyncadd [#allocation4], 4294966784 }
 0x9b1   :  { %17583 = dma.done.wait [#allocation24], 2048  }
 0x9b2   :  { %17584 = vsyncadd [#allocation24], 4294965248 }
 0x9b3   :  { %14884 = vsyncpa [#allocation3], 1 }
 0x9b4   :  { %14885 = vsyncpa [#allocation8], 1 }
 0x9b5   :  { %14886 = vsyncpa [#allocation11], 1 }
 0x9b6   :  { %14887 = vsyncpa [#allocation14], 1 }
 0x9b7   :  { %14888 = vsyncpa [#allocation17], 1 }
 0x9b8   :  { %14889 = vsyncpa [#allocation20], 1 }
 0x9b9   :  { %14890 = vsyncpa [#allocation4], 1 }
 0x9ba   :  { %14891 = vsyncpa [#allocation24], 1 }
 0x9bb   :  { %14892 = vsyncpa [#allocation5], 1 }

</bundles_post_ra>
